<compile_context>
chip_gen: v7x
topology: tpu7x:2x2x1
jax: 0.10.0
libtpu: 0.0.40
codegen_flags: <defaults>
</compile_context>

<pallas_src>
import jax
import jax.numpy as jnp
from jax.experimental import pallas as pl
from jax.experimental.pallas import tpu as pltpu


TK = 256            # K tile for streaming the layer-1 weight over the grid
LANE = 128
SUBLANE_BF16 = 16   # bf16 packs 16 rows per vreg


def _round_up(x, m):
    return (x + m - 1) // m * m


# ---------------------------------------------------------------------------
# Fused 5-layer MLP kernel: grid over layer-1 K tiles.
# ---------------------------------------------------------------------------
def _fused_mlp_kernel(x_ref,
                      w1_ref, b1_ref, w2_ref, b2_ref, w3_ref, b3_ref,
                      w4_ref, b4_ref, w5_ref, b5_ref,
                      o_ref, acc_ref):
    # x_ref: (Bp, TK) bf16 tile; w1_ref: (TK, 2048) bf16 tile (streamed)
    # w2..w5: full (K, N) bf16, resident; b_i: (1, N) f32; o: (Bp, Np) f32
    # acc_ref: (Bp, 2048) f32 VMEM scratch (layer-1 accumulator)
    k = pl.program_id(0)

    @pl.when(k == 0)
    def _init():
        acc_ref[...] = jnp.zeros_like(acc_ref)

    # Layer-1 partial product for this K tile; f32 accumulate on the MXU.
    acc_ref[...] += jnp.dot(x_ref[...], w1_ref[...],
                            preferred_element_type=jnp.float32)

    @pl.when(k == pl.num_programs(0) - 1)
    def _tail():
        # Layer 1 epilogue: bias + ReLU, back to bf16 for the next MXU pass.
        h = jnp.maximum(acc_ref[...] + b1_ref[...], 0.0).astype(jnp.bfloat16)
        # Layers 2..4: linear + bias + ReLU.
        for w_ref, b_ref in ((w2_ref, b2_ref), (w3_ref, b3_ref),
                             (w4_ref, b4_ref)):
            y = jnp.dot(h, w_ref[...], preferred_element_type=jnp.float32)
            h = jnp.maximum(y + b_ref[...], 0.0).astype(jnp.bfloat16)
        # Layer 5: linear + bias, no ReLU; lane-dense (128-padded) store.
        y = jnp.dot(h, w5_ref[...], preferred_element_type=jnp.float32)
        o_ref[...] = (y + b5_ref[...]).astype(o_ref.dtype)


def fused_mlp_pallas(x_bf16, prepped_params):
    """x_bf16: (Bp, Kp) bf16, Kp % TK == 0.
    prepped_params: list of (w_bf16 (K, N), b_f32 (1, N))."""
    Bp, Kp = x_bf16.shape
    assert Kp % TK == 0
    n_k = Kp // TK
    w1, b1 = prepped_params[0]
    N1 = w1.shape[1]
    Np_out = prepped_params[-1][0].shape[1]

    flat_args = [x_bf16]
    for w, b in prepped_params:
        flat_args += [w, b]

    # Advisory cost estimate: the kernel is weight-DMA bound at small batch.
    flops = 0
    bytes_accessed = x_bf16.size * x_bf16.dtype.itemsize + Bp * Np_out * 4
    for w, b in prepped_params:
        flops += 2 * Bp * w.shape[0] * w.shape[1]
        bytes_accessed += w.size * w.dtype.itemsize + b.size * b.dtype.itemsize

    # x and w1 are streamed over the K grid; everything else has a constant
    # block index, so Pallas fetches it once (prologue) and keeps it resident.
    in_specs = [
        pl.BlockSpec((Bp, TK), lambda k: (0, k)),    # x: K tiles
        pl.BlockSpec((TK, N1), lambda k: (k, 0)),    # w1: streamed K tiles
        pl.BlockSpec(b1.shape, lambda k: (0, 0)),    # b1: resident
    ]
    for w, b in prepped_params[1:]:
        in_specs.append(pl.BlockSpec(w.shape, lambda k: (0, 0)))  # resident
        in_specs.append(pl.BlockSpec(b.shape, lambda k: (0, 0)))  # resident

    return pl.pallas_call(
        _fused_mlp_kernel,
        out_shape=jax.ShapeDtypeStruct((Bp, Np_out), jnp.float32),
        grid_spec=pltpu.PrefetchScalarGridSpec(
            num_scalar_prefetch=0,
            grid=(n_k,),
            in_specs=in_specs,
            out_specs=pl.BlockSpec((Bp, Np_out), lambda k: (0, 0)),
            scratch_shapes=[pltpu.VMEM((Bp, N1), jnp.float32)],
        ),
        compiler_params=pltpu.CompilerParams(
            dimension_semantics=("arbitrary",),        # K axis is a reduction
            vmem_limit_bytes=48 * 1024 * 1024,         # headroom (fits v7x too)
        ),
        cost_estimate=pl.CostEstimate(
            flops=flops, transcendentals=0, bytes_accessed=bytes_accessed),
    )(*flat_args)
    # TODO(synk): for large batch, add a leading "parallel" batch grid axis so
    # v7x megacore shards row blocks; at B<=16 a per-core split of one fused
    # point would need inter-layer cross-core barriers.
    # TODO(synk): int8 (v5e/v6e) / fp8 (v7x) weight quantization with
    # per-output-channel scales would halve weight DMA in this DMA-bound
    # regime; skipped here to keep parity with the bf16 reference tolerances.


# ---------------------------------------------------------------------------
# Parameters
# ---------------------------------------------------------------------------
def init_params(key, image_W, image_H, classes, dtype=jnp.float32):
    """Deterministic synthetic f32 parameters (same shapes as the PyTorch module)."""
    dims = [image_W * image_H * 3, 2048, 1024, 512, 256, classes]
    params = []
    for i in range(5):
        k_in, k_out = dims[i], dims[i + 1]
        key, kw, kb = jax.random.split(key, 3)
        bound = 1.0 / jnp.sqrt(k_in)
        # stored as (K, N) == transpose of torch's (out, in)
        w = jax.random.uniform(kw, (k_in, k_out), dtype, -bound, bound)
        b = jax.random.uniform(kb, (k_out,), dtype, -bound, bound)
        params.append((w, b))
    return params


def prepare_params(params):
    """One-time prep: cast weights to bf16 (halves HBM traffic; f32 accumulate
    kept in-kernel), pad layer-1 K to a multiple of TK (for the K grid) and the
    last layer's N to a multiple of 128 lanes, biases -> (1, N) f32."""
    prepped = []
    n = len(params)
    for i, (w, b) in enumerate(params):
        K, N = w.shape
        Kp = _round_up(K, TK) if i == 0 else K
        Np = _round_up(N, LANE) if i == n - 1 else N
        w_p = jnp.zeros((Kp, Np), jnp.float32).at[:K, :N].set(w).astype(jnp.bfloat16)
        b_p = jnp.zeros((1, Np), jnp.float32).at[0, :N].set(b)
        prepped.append((w_p, b_p))
    return prepped


# ---------------------------------------------------------------------------
# Forward
# ---------------------------------------------------------------------------
@jax.jit
def _forward_core(x_nchw, prepped_params):
    B = x_nchw.shape[0]
    # flatten exactly like torch .view(-1, nelement/B)
    x = x_nchw.reshape(B, -1).astype(jnp.float32)
    K = x.shape[1]
    Kp = prepped_params[0][0].shape[0]
    Bp = max(SUBLANE_BF16, _round_up(B, SUBLANE_BF16))   # 16-row bf16 sublane pack
    x = jnp.pad(x, ((0, Bp - B), (0, Kp - K))).astype(jnp.bfloat16)
    return fused_mlp_pallas(x, prepped_params)           # (Bp, Np_out) f32


def big_fully_c_forward(x_nchw, prepped_params, classes):
    B = x_nchw.shape[0]
    return _forward_core(x_nchw, prepped_params)[:B, :classes]


def big_fully_c_reference(x_nchw, prepped_params, classes):
    """Reference using the same bf16 cast chain (validates the kernel itself)."""
    B = x_nchw.shape[0]
    h = x_nchw.reshape(B, -1).astype(jnp.float32)
    n = len(prepped_params)
    for i, (w, b) in enumerate(prepped_params):
        Kp = w.shape[0]
        if Kp > h.shape[1]:
            h = jnp.pad(h, ((0, 0), (0, Kp - h.shape[1])))
        h = jnp.dot(h.astype(jnp.bfloat16), w,
                    preferred_element_type=jnp.float32) + b
        if i < n - 1:
            h = jnp.maximum(h, 0.0)
    return h[:, :classes]


if __name__ == "__main__":
    image_W, image_H, classes = 16, 16, 10
    B = 2

    key = jax.random.PRNGKey(0)
    key, kx = jax.random.split(key)
    x = jax.random.normal(kx, (B, 3, image_H, image_W), jnp.float32)  # NCHW
    params = init_params(key, image_W, image_H, classes)
    prepped = prepare_params(params)

    y = big_fully_c_forward(x, prepped, classes)
    y = jax.block_until_ready(y)

    y_ref = big_fully_c_reference(x, prepped, classes)
    assert y.shape == (B, classes)
    assert jnp.allclose(y, y_ref, atol=2e-3, rtol=2e-3)

    print("KERNEL_OK")
</pallas_src>

<mosaic_0001>
module attributes {stable_mosaic.version = 11 : i64} {
  func.func @_fused_mlp_kernel(%arg0: i32, %arg1: memref<16x256xbf16, #tpu.memory_space<vmem>>, %arg2: memref<256x2048xbf16, #tpu.memory_space<vmem>>, %arg3: memref<1x2048xf32, #tpu.memory_space<vmem>>, %arg4: memref<2048x1024xbf16, #tpu.memory_space<vmem>>, %arg5: memref<1x1024xf32, #tpu.memory_space<vmem>>, %arg6: memref<1024x512xbf16, #tpu.memory_space<vmem>>, %arg7: memref<1x512xf32, #tpu.memory_space<vmem>>, %arg8: memref<512x256xbf16, #tpu.memory_space<vmem>>, %arg9: memref<1x256xf32, #tpu.memory_space<vmem>>, %arg10: memref<256x128xbf16, #tpu.memory_space<vmem>>, %arg11: memref<1x128xf32, #tpu.memory_space<vmem>>, %arg12: memref<16x128xf32, #tpu.memory_space<vmem>>, %arg13: memref<16x2048xf32, #tpu.memory_space<vmem>>) attributes {dimension_semantics = [#tpu.dimension_semantics<arbitrary>], iteration_bounds = array<i64: 3>, scalar_prefetch = 0 : i64, scratch_operands = 1 : i64, tpu.core_type = #tpu.core_type<tc>, window_params = [{transform_indices = @transform_0, window_bounds = array<i64: 16, 256>}, {transform_indices = @transform_1, window_bounds = array<i64: 256, 2048>}, {pipeline_mode = #tpu.pipeline_mode<synchronous>, transform_indices = @transform_2, window_bounds = array<i64: 1, 2048>}, {pipeline_mode = #tpu.pipeline_mode<synchronous>, transform_indices = @transform_3, window_bounds = array<i64: 2048, 1024>}, {pipeline_mode = #tpu.pipeline_mode<synchronous>, transform_indices = @transform_4, window_bounds = array<i64: 1, 1024>}, {pipeline_mode = #tpu.pipeline_mode<synchronous>, transform_indices = @transform_5, window_bounds = array<i64: 1024, 512>}, {pipeline_mode = #tpu.pipeline_mode<synchronous>, transform_indices = @transform_6, window_bounds = array<i64: 1, 512>}, {pipeline_mode = #tpu.pipeline_mode<synchronous>, transform_indices = @transform_7, window_bounds = array<i64: 512, 256>}, {pipeline_mode = #tpu.pipeline_mode<synchronous>, transform_indices = @transform_8, window_bounds = array<i64: 1, 256>}, {pipeline_mode = #tpu.pipeline_mode<synchronous>, transform_indices = @transform_9, window_bounds = array<i64: 256, 128>}, {pipeline_mode = #tpu.pipeline_mode<synchronous>, transform_indices = @transform_10, window_bounds = array<i64: 1, 128>}, {pipeline_mode = #tpu.pipeline_mode<synchronous>, transform_indices = @transform_11, window_bounds = array<i64: 16, 128>}]} {
    %c0_i32 = arith.constant 0 : i32
    %0 = arith.cmpi eq, %arg0, %c0_i32 : i32
    %1 = arith.extui %0 : i1 to i32
    %c0_i32_0 = arith.constant 0 : i32
    %2 = arith.cmpi ne, %1, %c0_i32_0 : i32
    scf.if %2 {
      %cst_9 = arith.constant 0.000000e+00 : f32
      %12 = vector.broadcast %cst_9 : f32 to vector<16x2048xf32>
      %c0_10 = arith.constant 0 : index
      %c0_11 = arith.constant 0 : index
      %13 = vector.load %arg13[%c0_10, %c0_11] : memref<16x2048xf32, #tpu.memory_space<vmem>>, vector<16x2048xf32>
      tpu.vector_store %arg13[%c0_10, %c0_11], %12 {strides = array<i32>} : memref<16x2048xf32, #tpu.memory_space<vmem>>, vector<16x2048xf32>,
    } else {
    }
    %c0 = arith.constant 0 : index
    %c0_1 = arith.constant 0 : index
    %3 = vector.load %arg13[%c0, %c0_1] : memref<16x2048xf32, #tpu.memory_space<vmem>>, vector<16x2048xf32>
    %c0_2 = arith.constant 0 : index
    %c0_3 = arith.constant 0 : index
    %4 = vector.load %arg1[%c0_2, %c0_3] : memref<16x256xbf16, #tpu.memory_space<vmem>>, vector<16x256xbf16>
    %c0_4 = arith.constant 0 : index
    %c0_5 = arith.constant 0 : index
    %5 = vector.load %arg2[%c0_4, %c0_5] : memref<256x2048xbf16, #tpu.memory_space<vmem>>, vector<256x2048xbf16>
    %cst = arith.constant dense<0.000000e+00> : vector<16x2048xf32>
    %6 = tpu.matmul %4, %5, %cst {dimension_numbers = #tpu.dot_dimension_numbers<[1], [0], [0], [1], [0, 0, 1, 1], [], []>} : vector<16x256xbf16>, vector<256x2048xbf16>, vector<16x2048xf32> -> vector<16x2048xf32>
    %7 = arith.addf %3, %6 : vector<16x2048xf32>
    %c0_6 = arith.constant 0 : index
    %c0_7 = arith.constant 0 : index
    %8 = vector.load %arg13[%c0_6, %c0_7] : memref<16x2048xf32, #tpu.memory_space<vmem>>, vector<16x2048xf32>
    tpu.vector_store %arg13[%c0_6, %c0_7], %7 {strides = array<i32>} : memref<16x2048xf32, #tpu.memory_space<vmem>>, vector<16x2048xf32>,
    %c2_i32 = arith.constant 2 : i32
    %9 = arith.cmpi eq, %arg0, %c2_i32 : i32
    %10 = arith.extui %9 : i1 to i32
    %c0_i32_8 = arith.constant 0 : i32
    %11 = arith.cmpi ne, %10, %c0_i32_8 : i32
    scf.if %11 {
      %c0_9 = arith.constant 0 : index
      %c0_10 = arith.constant 0 : index
      %12 = vector.load %arg13[%c0_9, %c0_10] : memref<16x2048xf32, #tpu.memory_space<vmem>>, vector<16x2048xf32>
      %c0_11 = arith.constant 0 : index
      %c0_12 = arith.constant 0 : index
      %13 = vector.load %arg3[%c0_11, %c0_12] : memref<1x2048xf32, #tpu.memory_space<vmem>>, vector<1x2048xf32>
      %14 = vector.broadcast %13 : vector<1x2048xf32> to vector<16x2048xf32>
      %15 = arith.addf %12, %14 : vector<16x2048xf32>
      %cst_13 = arith.constant 0.000000e+00 : f32
      %16 = vector.broadcast %cst_13 : f32 to vector<16x2048xf32>
      %17 = arith.maximumf %15, %16 : vector<16x2048xf32>
      %18 = arith.truncf %17 : vector<16x2048xf32> to vector<16x2048xbf16>
      %c0_14 = arith.constant 0 : index
      %c0_15 = arith.constant 0 : index
      %19 = vector.load %arg4[%c0_14, %c0_15] : memref<2048x1024xbf16, #tpu.memory_space<vmem>>, vector<2048x1024xbf16>
      %cst_16 = arith.constant dense<0.000000e+00> : vector<16x1024xf32>
      %20 = tpu.matmul %18, %19, %cst_16 {dimension_numbers = #tpu.dot_dimension_numbers<[1], [0], [0], [1], [0, 0, 1, 1], [], []>} : vector<16x2048xbf16>, vector<2048x1024xbf16>, vector<16x1024xf32> -> vector<16x1024xf32>
      %c0_17 = arith.constant 0 : index
      %c0_18 = arith.constant 0 : index
      %21 = vector.load %arg5[%c0_17, %c0_18] : memref<1x1024xf32, #tpu.memory_space<vmem>>, vector<1x1024xf32>
      %22 = vector.broadcast %21 : vector<1x1024xf32> to vector<16x1024xf32>
      %23 = arith.addf %20, %22 : vector<16x1024xf32>
      %cst_19 = arith.constant 0.000000e+00 : f32
      %24 = vector.broadcast %cst_19 : f32 to vector<16x1024xf32>
      %25 = arith.maximumf %23, %24 : vector<16x1024xf32>
      %26 = arith.truncf %25 : vector<16x1024xf32> to vector<16x1024xbf16>
      %c0_20 = arith.constant 0 : index
      %c0_21 = arith.constant 0 : index
      %27 = vector.load %arg6[%c0_20, %c0_21] : memref<1024x512xbf16, #tpu.memory_space<vmem>>, vector<1024x512xbf16>
      %cst_22 = arith.constant dense<0.000000e+00> : vector<16x512xf32>
      %28 = tpu.matmul %26, %27, %cst_22 {dimension_numbers = #tpu.dot_dimension_numbers<[1], [0], [0], [1], [0, 0, 1, 1], [], []>} : vector<16x1024xbf16>, vector<1024x512xbf16>, vector<16x512xf32> -> vector<16x512xf32>
      %c0_23 = arith.constant 0 : index
      %c0_24 = arith.constant 0 : index
      %29 = vector.load %arg7[%c0_23, %c0_24] : memref<1x512xf32, #tpu.memory_space<vmem>>, vector<1x512xf32>
      %30 = vector.broadcast %29 : vector<1x512xf32> to vector<16x512xf32>
      %31 = arith.addf %28, %30 : vector<16x512xf32>
      %cst_25 = arith.constant 0.000000e+00 : f32
      %32 = vector.broadcast %cst_25 : f32 to vector<16x512xf32>
      %33 = arith.maximumf %31, %32 : vector<16x512xf32>
      %34 = arith.truncf %33 : vector<16x512xf32> to vector<16x512xbf16>
      %c0_26 = arith.constant 0 : index
      %c0_27 = arith.constant 0 : index
      %35 = vector.load %arg8[%c0_26, %c0_27] : memref<512x256xbf16, #tpu.memory_space<vmem>>, vector<512x256xbf16>
      %cst_28 = arith.constant dense<0.000000e+00> : vector<16x256xf32>
      %36 = tpu.matmul %34, %35, %cst_28 {dimension_numbers = #tpu.dot_dimension_numbers<[1], [0], [0], [1], [0, 0, 1, 1], [], []>} : vector<16x512xbf16>, vector<512x256xbf16>, vector<16x256xf32> -> vector<16x256xf32>
      %c0_29 = arith.constant 0 : index
      %c0_30 = arith.constant 0 : index
      %37 = vector.load %arg9[%c0_29, %c0_30] : memref<1x256xf32, #tpu.memory_space<vmem>>, vector<1x256xf32>
      %38 = vector.broadcast %37 : vector<1x256xf32> to vector<16x256xf32>
      %39 = arith.addf %36, %38 : vector<16x256xf32>
      %cst_31 = arith.constant 0.000000e+00 : f32
      %40 = vector.broadcast %cst_31 : f32 to vector<16x256xf32>
      %41 = arith.maximumf %39, %40 : vector<16x256xf32>
      %42 = arith.truncf %41 : vector<16x256xf32> to vector<16x256xbf16>
      %c0_32 = arith.constant 0 : index
      %c0_33 = arith.constant 0 : index
      %43 = vector.load %arg10[%c0_32, %c0_33] : memref<256x128xbf16, #tpu.memory_space<vmem>>, vector<256x128xbf16>
      %cst_34 = arith.constant dense<0.000000e+00> : vector<16x128xf32>
      %44 = tpu.matmul %42, %43, %cst_34 {dimension_numbers = #tpu.dot_dimension_numbers<[1], [0], [0], [1], [0, 0, 1, 1], [], []>} : vector<16x256xbf16>, vector<256x128xbf16>, vector<16x128xf32> -> vector<16x128xf32>
      %c0_35 = arith.constant 0 : index
      %c0_36 = arith.constant 0 : index
      %45 = vector.load %arg11[%c0_35, %c0_36] : memref<1x128xf32, #tpu.memory_space<vmem>>, vector<1x128xf32>
      %46 = vector.broadcast %45 : vector<1x128xf32> to vector<16x128xf32>
      %47 = arith.addf %44, %46 : vector<16x128xf32>
      %c0_37 = arith.constant 0 : index
      %c0_38 = arith.constant 0 : index
      %48 = vector.load %arg12[%c0_37, %c0_38] : memref<16x128xf32, #tpu.memory_space<vmem>>, vector<16x128xf32>
      tpu.vector_store %arg12[%c0_37, %c0_38], %47 {strides = array<i32>} : memref<16x128xf32, #tpu.memory_space<vmem>>, vector<16x128xf32>,
    } else {
    }
    return
  }
  func.func @transform_0(%arg0: i32) -> (i32, i32) {
    %c0_i32 = arith.constant 0 : i32
    %c0_i32_0 = arith.constant 0 : i32
    return %c0_i32, %arg0 : i32, i32
  }
  func.func @transform_1(%arg0: i32) -> (i32, i32) {
    %c0_i32 = arith.constant 0 : i32
    %c0_i32_0 = arith.constant 0 : i32
    return %arg0, %c0_i32 : i32, i32
  }
  func.func @transform_2(%arg0: i32) -> (i32, i32) {
    %c0_i32 = arith.constant 0 : i32
    %c0_i32_0 = arith.constant 0 : i32
    %c0_i32_1 = arith.constant 0 : i32
    return %c0_i32, %c0_i32_0 : i32, i32
  }
  func.func @transform_3(%arg0: i32) -> (i32, i32) {
    %c0_i32 = arith.constant 0 : i32
    %c0_i32_0 = arith.constant 0 : i32
    %c0_i32_1 = arith.constant 0 : i32
    return %c0_i32, %c0_i32_0 : i32, i32
  }
  func.func @transform_4(%arg0: i32) -> (i32, i32) {
    %c0_i32 = arith.constant 0 : i32
    %c0_i32_0 = arith.constant 0 : i32
    %c0_i32_1 = arith.constant 0 : i32
    return %c0_i32, %c0_i32_0 : i32, i32
  }
  func.func @transform_5(%arg0: i32) -> (i32, i32) {
    %c0_i32 = arith.constant 0 : i32
    %c0_i32_0 = arith.constant 0 : i32
    %c0_i32_1 = arith.constant 0 : i32
    return %c0_i32, %c0_i32_0 : i32, i32
  }
  func.func @transform_6(%arg0: i32) -> (i32, i32) {
    %c0_i32 = arith.constant 0 : i32
    %c0_i32_0 = arith.constant 0 : i32
    %c0_i32_1 = arith.constant 0 : i32
    return %c0_i32, %c0_i32_0 : i32, i32
  }
  func.func @transform_7(%arg0: i32) -> (i32, i32) {
    %c0_i32 = arith.constant 0 : i32
    %c0_i32_0 = arith.constant 0 : i32
    %c0_i32_1 = arith.constant 0 : i32
    return %c0_i32, %c0_i32_0 : i32, i32
  }
  func.func @transform_8(%arg0: i32) -> (i32, i32) {
    %c0_i32 = arith.constant 0 : i32
    %c0_i32_0 = arith.constant 0 : i32
    %c0_i32_1 = arith.constant 0 : i32
    return %c0_i32, %c0_i32_0 : i32, i32
  }
  func.func @transform_9(%arg0: i32) -> (i32, i32) {
    %c0_i32 = arith.constant 0 : i32
    %c0_i32_0 = arith.constant 0 : i32
    %c0_i32_1 = arith.constant 0 : i32
    return %c0_i32, %c0_i32_0 : i32, i32
  }
  func.func @transform_10(%arg0: i32) -> (i32, i32) {
    %c0_i32 = arith.constant 0 : i32
    %c0_i32_0 = arith.constant 0 : i32
    %c0_i32_1 = arith.constant 0 : i32
    return %c0_i32, %c0_i32_0 : i32, i32
  }
  func.func @transform_11(%arg0: i32) -> (i32, i32) {
    %c0_i32 = arith.constant 0 : i32
    %c0_i32_0 = arith.constant 0 : i32
    %c0_i32_1 = arith.constant 0 : i32
    return %c0_i32, %c0_i32_0 : i32, i32
  }
}

</mosaic_0001>

<bundles_post_ra>
// kernel: _forward_core.1
= control target key start
LH: loop header
LB: loop body
LE: loop exit
PB: predicated region body
PF: predicated region fallthrough
CT: control target
= control target key end

     0   :  { %s16932_s0 = inlined_call_operand.vmem [shape: bf16[16,768], index: 0, kind: input, shape index: {}]   ;;  %s16933_s1 = inlined_call_operand.hbm [shape: bf16[768,2048], index: 1, kind: input, shape index: {}]   ;;  %s16934_s2 = inlined_call_operand.hbm [shape: f32[1,2048], index: 2, kind: input, shape index: {}]   ;;  %s16935_s3 = inlined_call_operand.hbm [shape: bf16[2048,1024], index: 3, kind: input, shape index: {}]   ;;  %s16936_s4 = inlined_call_operand.hbm [shape: f32[1,1024], index: 4, kind: input, shape index: {}]   ;;  %s16937_s5 = inlined_call_operand.hbm [shape: bf16[1024,512], index: 5, kind: input, shape index: {}]   ;;  %s16938_s6 = inlined_call_operand.hbm [shape: f32[1,512], index: 6, kind: input, shape index: {}]   ;;  %s16939_s7 = inlined_call_operand.hbm [shape: bf16[512,256], index: 7, kind: input, shape index: {}]   ;;  %s16940_s8 = inlined_call_operand.hbm [shape: f32[1,256], index: 8, kind: input, shape index: {}]   ;;  %s16941_s9 = inlined_call_operand.hbm [shape: bf16[256,128], index: 9, kind: input, shape index: {}]   ;;  %s16942_s10 = inlined_call_operand.hbm [shape: f32[1,128], index: 10, kind: input, shape index: {}]   ;;  %s16943_s11 = inlined_call_operand.hbm [shape: f32[16,128], index: 11, kind: output, shape index: {}]  }
   0x1   :  { %16954 = sst [smem:[#allocation32_spill]] %s16934_s2 }
   0x2   :  { %16955 = sst [smem:[#allocation33_spill]] %s16936_s4 }
   0x3   :  { %16956 = sst [smem:[#allocation34_spill]] %s16943_s11 }
   0x4   :  { %16 = vsyncpa [#allocation5], 0 }
   0x5   :  { %18 = vsyncpa [#allocation5 + $0x1], 0 }
   0x6   :  { %19 = vsyncpa [#allocation8], 0 }
   0x7   :  { %20 = vsyncpa [#allocation11], 0 }
   0x8   :  { %21 = vsyncpa [#allocation14], 0 }
   0x9   :  { %22 = vsyncpa [#allocation17], 0 }
   0xa   :  { %23 = vsyncpa [#allocation20], 0 }
   0xb   :  { %24 = vsyncpa [#allocation6], 0  ;;  %s16078_s17 = smov 0   ;;  %s16080_s18 = smov 0  }
   0xc   :  { %s16082_s19 = smov 0   ;;  %s16084_s20 = smov 0  }
   0xd LB: > { %s16097_s21 = sadd.s32 4294967295, %s15992_s20   ;;  %s16100_s22 = sadd.s32 1, %s15992_s20   ;;  %s15992_s20 = sphi %s16084_s20, %s16986_s20   ;;  %s15988_s19 = sphi %s16082_s19, %s16990_s19   ;;  %s15984_s18 = sphi %s16080_s18, %s16989_s18   ;;  %s15980_s17 = sphi %s16078_s17, %s16988_s17  }
   0xe   : > { %16957 = sst [smem:[#allocation29_spill]] %s16097_s21  ;;  %s34_s23 = ssub.s32 %s15992_s20, %s16100_s22 }
   0xf   : > { %16958 = sst [smem:[#allocation30_spill]] %s16100_s22  ;;  %s37_s24 = sadd.s32 1, %s15988_s19 }
  0x10   : > { %p35_p0 = scmp.eq.s32.totalorder %s34_s23, 0  ;;  %p44_p1 = scmp.ne.s32.totalorder %s15988_s19, %s15984_s18 }
  0x11   : > { %p45_p2 = scmp.eq.s32.totalorder %s15992_s20, 0  ;;  %p76_p3 = scmp.ne.s32.totalorder %s15984_s18, %s15980_s17 }
  0x12   : > { %s16110_s25 = scalar_select %p35_p0, %s15988_s19, %s37_s24  }
  0x13   : > { %p16112_p4 = por %p45_p2, %p44_p1  ;;  %p16946_p5 = scmp.eq.s32.totalorder %s16097_s21, 0 }
  0x14   : > { %16959 = sst [smem:[#allocation31_spill]] %s16110_s25  ;;  %p13131_p6 = scmp.ge.s32.totalorder %s15992_s20, 1 }
  0x15   : > { %s16960_s26 = scalar_select %p16112_p4, 1, 0 }
  0x16   : > { %p297_p7 = scmp.lt.s32.totalorder %s15992_s20, 4  ;;  %p16121_p8 = por %p16946_p5, %p76_p3 }
  0x17   : > { %s15994_s29 = smov [#allocation7]   ;;  %s15995_s12 = smov [#allocation10]  }
  0x18   : > { %s16961_s27 = scalar_select %p16121_p8, 1, 0 }
  0x19   : > { %p16126_p10 = pnand %p13131_p6, %p297_p7  ;;  %s310_s30 = sshll.u32 %s15994_s29, 4  ;;  %s311_s30 = int_to_ptr.vmem [resolvable:$true] %s310_s30 }
  0x1a   : > { %s334_s13 = sshll.u32 %s15995_s12, 4  ;;  %s15996_s15 = smov [#allocation13]   ;;  %s16138_s13 = int_to_ptr.vmem [resolvable:$true] %s334_s13 }
  0x1b   : > { %s16962_s28 = scalar_select %p16126_p10, 1, 0 }
  0x1c   : > { %p15021_p11 = pneg %p16126_p10  ;;  %s358_s16 = sshll.u32 %s15996_s15, 4  ;;  %s16140_s16 = int_to_ptr.vmem [resolvable:$true] %s358_s16 }
  0x1d   : > { %s16964_s2 = sld [smem:[#allocation32_spill]] }
  0x1e   : > { %p16134_p12 = pnand %p15021_p11, %p16946_p5 }
  0x20   : > { %p16150_p0 = pneg %p16134_p12 }
  0x23   : > { %s15628_s24 = scalar_lea.hbm %s16964_s2, 256 }
  0x24   : > { %p15629_p13 = scmp.ne.s32.totalorder %s16964_s2, %s15628_s24  ;;  %p15635_p3 = scmp.lt.u32.totalorder %s15628_s24, %s16964_s2 }
  0x26   : > { %p15631_p1 = pnand %p16150_p0, %p15629_p13 }
  0x28   : > { %p15632_p2 = pneg %p15631_p1 }
  0x2a   : > { %p15637_p6 = pnand %p15635_p3, %p15632_p2 }
  0x2c   : > { %15640 = shalt.err (!%p15637_p6)
}
  0x2d   : > { %s15641_s17 = scalar_lea.vmem %s311_s30, 256  ;;  %p15649_p5 = scmp.lt.s32.totalorder %s311_s30, %s311_s30 }
  0x2e   : > { %p15642_p7 = scmp.ne.s32.totalorder %s311_s30, %s15641_s17  ;;  %p15650_p8 = scmp.lt.s32.totalorder %s15641_s17, %s15641_s17 }
  0x30   : > { %p15644_p11 = pnand %p15642_p7, %p16150_p0  ;;  %p15651_p10 = por %p15650_p8, %p15649_p5 }
  0x32   : > { %p15645_p9 = pneg %p15644_p11 }
  0x34   : > { %p15652_p4 = pnand %p15651_p10, %p15645_p9 }
  0x36   : > { %15655 = shalt.err (!%p15652_p4)
}
  0x37   : > { %15024 = dma.hbm_to_vmem [thread:$0]  (!%p16134_p12), %s16964_s2, 256, %s311_s30, [#allocation8]  }
  0x38   : > { %s16966_s4 = sld [smem:[#allocation33_spill]] }
  0x3e   : > { %s15656_s29 = scalar_lea.hbm %s16966_s4, 128 }
  0x3f   : > { %p15657_p13 = scmp.ne.s32.totalorder %s16966_s4, %s15656_s29  ;;  %p15663_p4 = scmp.lt.u32.totalorder %s15656_s29, %s16966_s4 }
  0x41   : > { %p15659_p1 = pnand %p15657_p13, %p16150_p0 }
  0x43   : > { %p15660_p5 = pneg %p15659_p1 }
  0x45   : > { %p15665_p8 = pnand %p15663_p4, %p15660_p5 }
  0x47   : > { %15668 = shalt.err (!%p15665_p8)
}
  0x48   : > { %s15669_s30 = scalar_lea.vmem %s16138_s13, 128  ;;  %p15677_p3 = scmp.lt.s32.totalorder %s16138_s13, %s16138_s13 }
  0x49   : > { %p15670_p9 = scmp.ne.s32.totalorder %s16138_s13, %s15669_s30  ;;  %p15678_p6 = scmp.lt.s32.totalorder %s15669_s30, %s15669_s30 }
  0x4b   : > { %p15672_p10 = pnand %p15670_p9, %p16150_p0  ;;  %p15679_p7 = por %p15678_p6, %p15677_p3 }
  0x4d   : > { %p15673_p2 = pneg %p15672_p10 }
  0x4f   : > { %p15680_p11 = pnand %p15679_p7, %p15673_p2 }
  0x51   : > { %15683 = shalt.err (!%p15680_p11)
}
  0x52   : > { %15030 = dma.hbm_to_vmem [thread:$0]  (!%p16134_p12), %s16966_s4, 128, %s16138_s13, [#allocation11]  }
  0x53   : > { %s15684_s22 = scalar_lea.hbm %s16938_s6, 64 }
  0x54   : > { %p15685_p13 = scmp.ne.s32.totalorder %s16938_s6, %s15684_s22  ;;  %p15691_p4 = scmp.lt.u32.totalorder %s15684_s22, %s16938_s6 }
  0x56   : > { %p15687_p1 = pnand %p15685_p13, %p16150_p0 }
  0x58   : > { %p15688_p5 = pneg %p15687_p1 }
  0x5a   : > { %p15693_p8 = pnand %p15691_p4, %p15688_p5 }
  0x5c   : > { %15696 = shalt.err (!%p15693_p8)
}
  0x5d   : > { %s15697_s13 = scalar_lea.vmem %s16140_s16, 64  ;;  %p15705_p3 = scmp.lt.s32.totalorder %s16140_s16, %s16140_s16 }
  0x5e   : > { %p15698_p9 = scmp.ne.s32.totalorder %s16140_s16, %s15697_s13  ;;  %p15706_p6 = scmp.lt.s32.totalorder %s15697_s13, %s15697_s13 }
  0x60   : > { %p15700_p10 = pnand %p15698_p9, %p16150_p0  ;;  %p15707_p7 = por %p15706_p6, %p15705_p3 }
  0x62   : > { %p15701_p2 = pneg %p15700_p10 }
  0x64   : > { %p15708_p11 = pnand %p15707_p7, %p15701_p2 }
  0x66   : > { %15711 = shalt.err (!%p15708_p11)
}
  0x67   : > { %15036 = dma.hbm_to_vmem [thread:$0]  (!%p16134_p12), %s16938_s6, 64, %s16140_s16, [#allocation14]  }
  0x68   : > { %s15997_s21 = smov [#allocation16]   ;;  %s15998_s23 = smov [#allocation9]  }
  0x69   : > { %s382_s25 = sshll.u32 %s15997_s21, 4  ;;  %s320_s22 = sshll.u32 %s15998_s23, 4  ;;  %s383_s25 = int_to_ptr.vmem [resolvable:$true] %s382_s25  ;;  %s321_s22 = int_to_ptr.vmem [resolvable:$true] %s320_s22 }
  0x6a   : > { %s15712_s15 = scalar_lea.hbm %s16940_s8, 32 }
  0x6b   : > { %p15713_p13 = scmp.ne.s32.totalorder %s16940_s8, %s15712_s15  ;;  %p15719_p4 = scmp.lt.u32.totalorder %s15712_s15, %s16940_s8 }
  0x6d   : > { %p15715_p1 = pnand %p15713_p13, %p16150_p0 }
  0x6f   : > { %p15716_p5 = pneg %p15715_p1 }
  0x71   : > { %p15721_p8 = pnand %p15719_p4, %p15716_p5 }
  0x73   : > { %15724 = shalt.err (!%p15721_p8)
}
  0x74   : > { %s15725_s16 = scalar_lea.vmem %s383_s25, 32  ;;  %p15733_p3 = scmp.lt.s32.totalorder %s383_s25, %s383_s25 }
  0x75   : > { %p15726_p9 = scmp.ne.s32.totalorder %s383_s25, %s15725_s16  ;;  %p15734_p6 = scmp.lt.s32.totalorder %s15725_s16, %s15725_s16 }
  0x77   : > { %p15728_p10 = pnand %p15726_p9, %p16150_p0  ;;  %p15735_p7 = por %p15734_p6, %p15733_p3 }
  0x79   : > { %p15729_p2 = pneg %p15728_p10 }
  0x7b   : > { %p15736_p11 = pnand %p15735_p7, %p15729_p2 }
  0x7d   : > { %15739 = shalt.err (!%p15736_p11)
}
  0x7e   : > { %15042 = dma.hbm_to_vmem [thread:$0]  (!%p16134_p12), %s16940_s8, 32, %s383_s25, [#allocation17]  }
  0x7f   : > { %s15740_s24 = scalar_lea.hbm %s16935_s3, 131072 }
  0x80   : > { %p15741_p13 = scmp.ne.s32.totalorder %s16935_s3, %s15740_s24  ;;  %p15747_p4 = scmp.lt.u32.totalorder %s15740_s24, %s16935_s3 }
  0x82   : > { %p15743_p1 = pnand %p15741_p13, %p16150_p0 }
  0x84   : > { %p15744_p5 = pneg %p15743_p1 }
  0x86   : > { %p15749_p8 = pnand %p15747_p4, %p15744_p5 }
  0x88   : > { %15752 = shalt.err (!%p15749_p8)
}
  0x89   : > { %s15753_s30 = scalar_lea.vmem %s321_s22, 131072  ;;  %p15761_p3 = scmp.lt.s32.totalorder %s321_s22, %s321_s22 }
  0x8a   : > { %p15754_p9 = scmp.ne.s32.totalorder %s321_s22, %s15753_s30  ;;  %p15762_p6 = scmp.lt.s32.totalorder %s15753_s30, %s15753_s30 }
  0x8c   : > { %p15756_p10 = pnand %p15754_p9, %p16150_p0  ;;  %p15763_p7 = por %p15762_p6, %p15761_p3 }
  0x8e   : > { %p15757_p2 = pneg %p15756_p10 }
  0x90   : > { %p15764_p11 = pnand %p15763_p7, %p15757_p2 }
  0x92   : > { %15767 = shalt.err (!%p15764_p11)
}
  0x93   : > { %s15999_s25 = smov 512   ;;  %s16000_s16 = smov 32  }
  0x94   : > { %15027 = dma.hbm_to_vmem [thread:$0]  (!%p16134_p12), %s16935_s3, 131072, %s321_s22, [#allocation8], %s15999_s25, %s15999_s25, %s16000_s16  }
  0x95   : > { %s16001_s2 = smov [#allocation12]   ;;  %s15768_s15 = scalar_lea.hbm %s16937_s5, 32768 }
  0x96   : > { %s344_s23 = sshll.u32 %s16001_s2, 4  ;;  %p15769_p13 = scmp.ne.s32.totalorder %s16937_s5, %s15768_s15  ;;  %s345_s23 = int_to_ptr.vmem [resolvable:$true] %s344_s23 }
  0x97   : > { %p15775_p4 = scmp.lt.u32.totalorder %s15768_s15, %s16937_s5 }
  0x98   : > { %p15771_p1 = pnand %p15769_p13, %p16150_p0 }
  0x9a   : > { %p15772_p5 = pneg %p15771_p1 }
  0x9c   : > { %p15777_p8 = pnand %p15775_p4, %p15772_p5 }
  0x9e   : > { %15780 = shalt.err (!%p15777_p8)
}
  0x9f   : > { %s15781_s22 = scalar_lea.vmem %s345_s23, 32768  ;;  %p15789_p3 = scmp.lt.s32.totalorder %s345_s23, %s345_s23 }
  0xa0   : > { %p15782_p9 = scmp.ne.s32.totalorder %s345_s23, %s15781_s22  ;;  %p15790_p6 = scmp.lt.s32.totalorder %s15781_s22, %s15781_s22 }
  0xa2   : > { %p15784_p10 = pnand %p15782_p9, %p16150_p0  ;;  %p15791_p7 = por %p15790_p6, %p15789_p3 }
  0xa4   : > { %p15785_p2 = pneg %p15784_p10 }
  0xa6   : > { %p15792_p11 = pnand %p15791_p7, %p15785_p2 }
  0xa8   : > { %15795 = shalt.err (!%p15792_p11)
}
  0xa9   : > { %s16002_s25 = smov 256   ;;  %s16003_s16 = smov 16  }
  0xaa   : > { %15033 = dma.hbm_to_vmem [thread:$0]  (!%p16134_p12), %s16937_s5, 32768, %s345_s23, [#allocation11], %s16002_s25, %s16002_s25, %s16003_s16  }
  0xab   : > { %s16004_s21 = smov [#allocation15]   ;;  %s15796_s15 = scalar_lea.hbm %s16939_s7, 8192 }
  0xac   : > { %s368_s2 = sshll.u32 %s16004_s21, 4  ;;  %p15797_p13 = scmp.ne.s32.totalorder %s16939_s7, %s15796_s15  ;;  %s369_s2 = int_to_ptr.vmem [resolvable:$true] %s368_s2 }
  0xad   : > { %p15803_p4 = scmp.lt.u32.totalorder %s15796_s15, %s16939_s7 }
  0xae   : > { %p15799_p1 = pnand %p15797_p13, %p16150_p0 }
  0xb0   : > { %p15800_p5 = pneg %p15799_p1 }
  0xb2   : > { %p15805_p8 = pnand %p15803_p4, %p15800_p5 }
  0xb4   : > { %15808 = shalt.err (!%p15805_p8)
}
  0xb5   : > { %s15809_s23 = scalar_lea.vmem %s369_s2, 8192  ;;  %p15817_p3 = scmp.lt.s32.totalorder %s369_s2, %s369_s2 }
  0xb6   : > { %p15810_p9 = scmp.ne.s32.totalorder %s369_s2, %s15809_s23  ;;  %p15818_p6 = scmp.lt.s32.totalorder %s15809_s23, %s15809_s23 }
  0xb8   : > { %p15812_p10 = pnand %p15810_p9, %p16150_p0  ;;  %p15819_p7 = por %p15818_p6, %p15817_p3 }
  0xba   : > { %p15813_p2 = pneg %p15812_p10 }
  0xbc   : > { %p15820_p11 = pnand %p15819_p7, %p15813_p2 }
  0xbe   : > { %15823 = shalt.err (!%p15820_p11)
}
  0xbf   : > { %s16005_s25 = smov 128   ;;  %s16006_s16 = smov 8  }
  0xc0   : > { %15039 = dma.hbm_to_vmem [thread:$0]  (!%p16134_p12), %s16939_s7, 8192, %s369_s2, [#allocation14], %s16005_s25, %s16005_s25, %s16006_s16  }
  0xc1   : > { %s16007_s21 = smov [#allocation18]   ;;  %s15824_s17 = scalar_lea.hbm %s16941_s9, 2048 }
  0xc2   : > { %s392_s24 = sshll.u32 %s16007_s21, 4  ;;  %p15825_p13 = scmp.ne.s32.totalorder %s16941_s9, %s15824_s17  ;;  %s393_s24 = int_to_ptr.vmem [resolvable:$true] %s392_s24 }
  0xc3   : > { %p15831_p4 = scmp.lt.u32.totalorder %s15824_s17, %s16941_s9 }
  0xc4   : > { %p15827_p1 = pnand %p15825_p13, %p16150_p0 }
  0xc6   : > { %p15828_p5 = pneg %p15827_p1 }
  0xc8   : > { %p15833_p8 = pnand %p15831_p4, %p15828_p5 }
  0xca   : > { %15836 = shalt.err (!%p15833_p8)
}
  0xcb   : > { %s15837_s2 = scalar_lea.vmem %s393_s24, 2048  ;;  %p15845_p3 = scmp.lt.s32.totalorder %s393_s24, %s393_s24 }
  0xcc   : > { %p15838_p9 = scmp.ne.s32.totalorder %s393_s24, %s15837_s2  ;;  %p15846_p6 = scmp.lt.s32.totalorder %s15837_s2, %s15837_s2 }
  0xce   : > { %p15840_p10 = pnand %p15838_p9, %p16150_p0  ;;  %p15847_p7 = por %p15846_p6, %p15845_p3 }
  0xd0   : > { %p15841_p2 = pneg %p15840_p10 }
  0xd2   : > { %p15848_p11 = pnand %p15847_p7, %p15841_p2 }
  0xd4   : > { %15851 = shalt.err (!%p15848_p11)
}
  0xd5   : > { %s16008_s25 = smov 64   ;;  %s16009_s16 = smov 4  }
  0xd6   : > { %15045 = dma.hbm_to_vmem [thread:$0]  (!%p16134_p12), %s16941_s9, 2048, %s393_s24, [#allocation17], %s16008_s25, %s16008_s25, %s16009_s16  }
  0xd7   : > { %s16010_s21 = smov [#allocation19]   ;;  %s15852_s13 = scalar_lea.hbm %s16942_s10, 16 }
  0xd8   : > { %s406_s29 = sshll.u32 %s16010_s21, 4  ;;  %p15853_p13 = scmp.ne.s32.totalorder %s16942_s10, %s15852_s13  ;;  %s407_s29 = int_to_ptr.vmem [resolvable:$true] %s406_s29 }
  0xd9   : > { %p15859_p4 = scmp.lt.u32.totalorder %s15852_s13, %s16942_s10 }
  0xda   : > { %p15855_p1 = pnand %p15853_p13, %p16150_p0 }
  0xdc   : > { %p15856_p5 = pneg %p15855_p1 }
  0xde   : > { %p15861_p8 = pnand %p15859_p4, %p15856_p5 }
  0xe0   : > { %15864 = shalt.err (!%p15861_p8)
}
  0xe1   : > { %s15865_s24 = scalar_lea.vmem %s407_s29, 16  ;;  %s15872_s25 = scalar_lea.vmem %s407_s29, 32 }
  0xe2   : > { %p15866_p9 = scmp.ne.s32.totalorder %s407_s29, %s15865_s24  ;;  %p15873_p3 = scmp.lt.s32.totalorder %s407_s29, %s407_s29 }
  0xe3   : > { %p15874_p6 = scmp.lt.s32.totalorder %s15872_s25, %s15865_s24 }
  0xe4   : > { %p15868_p10 = pnand %p15866_p9, %p16150_p0 }
  0xe5   : > { %p15875_p7 = por %p15874_p6, %p15873_p3 }
  0xe6   : > { %p15869_p2 = pneg %p15868_p10 }
  0xe8   : > { %p15876_p11 = pnand %p15875_p7, %p15869_p2 }
  0xea   : > { %15879 = shalt.err (!%p15876_p11)
}
  0xeb   : > { %15048 = dma.hbm_to_vmem [thread:$0]  (!%p16134_p12), %s16942_s10, 16, %s407_s29, [#allocation20]  }
  0xec   : > { %p13141_p13 = scmp.ge.s32.totalorder %s15992_s20, 3 }
  0xed   : > { %p16967_p1 = scmp.ne.s32.totalorder (!%p13141_p13), %s16960_s26, 0 }
  0xee   : > { %413 = sbr.rel (%p13141_p13) target bundleno = 279 (0x117), region = 52 }
  0xf5   : > { %416 = sbr.rel (!%p16967_p1) target bundleno = 252 (0xfc), region = 56  ;;  %s418_s12 = sand.u32 (%p16967_p1), 1, %s15988_s19  }
  0xf6   : > { %s14786_s11 = sshll.u32 (%p16967_p1), %s15992_s20, 3  ;;  %s13142_s21 = sshll.u32 (%p16967_p1), %s418_s12, 4 }
  0xf7   : > { %s423_s13 = scalar_lea.vmem (%p16967_p1), %s16932_s0, %s14786_s11  ;;  %s420_s14 = scalar_lea.vmem (%p16967_p1), [#allocation3], %s13142_s21 }
  0xf8   : > { %v453_v0 = vld [vmem:[%s423_s13] sm:$0xff] (%p16967_p1)  ;;  %v455_v1 = vld [vmem:[%s423_s13 + $0x18] sm:$0xff] (%p16967_p1) }
  0xf9   : > { %454 = vst [vmem:[%s420_s14] sm:$0xff] (%p16967_p1), %v453_v0  ;;  %456 = vst [vmem:[%s420_s14 + $0x8] sm:$0xff] (%p16967_p1), %v455_v1 }
  0xfc PF: > { %s463_s29 = sand.u32 1, %s15988_s19   ;;  %s14788_s30 = sshll.u32 %s15992_s20, 15 }
  0xfd   : > { %s13145_s22 = sshll.u32 %s463_s29, 11  ;;  %s16333_s24 = scalar_lea.hbm %s16933_s1, %s14788_s30 }
  0xfe   : > { %s467_s25 = scalar_lea.vmem [#allocation4], %s13145_s22  ;;  %s16337_s4 = scalar_lea.sflag [#allocation5], %s463_s29 }
  0xff   : > { %s475_s16 = sshll.u32 %s467_s25, 4  ;;  %s15880_s12 = scalar_lea.hbm %s16333_s24, 32768  ;;  %s16335_s16 = int_to_ptr.vmem [resolvable:$true] %s475_s16 }
 0x100   : > { %p15881_p12 = scmp.ne.s32.totalorder %s16333_s24, %s15880_s12  ;;  %p16968_p0 = scmp.ne.s32.totalorder %s16960_s26, 0 }
 0x101   : > { %s15884_s21 = scalar_lea.hbm %s16933_s1, 98304  ;;  %p15885_p8 = scmp.lt.u32.totalorder %s16333_s24, %s16933_s1 }
 0x102   : > { %p15882_p5 = pnand %p15881_p12, %p16968_p0  ;;  %p15886_p9 = scmp.lt.u32.totalorder %s15884_s21, %s15880_s12 }
 0x103   : > { %p15888_p2 = scmp.lt.u32.totalorder %s15880_s12, %s16333_s24 }
 0x104   : > { %p15883_p4 = pneg %p15882_p5  ;;  %p15887_p10 = por %p15886_p9, %p15885_p8 }
 0x106   : > { %p15889_p3 = por %p15888_p2, %p15887_p10 }
 0x108   : > { %p15890_p6 = pnand %p15889_p3, %p15883_p4 }
 0x10a   : > { %15893 = shalt.err (!%p15890_p6)
}
 0x10b   : > { %s15894_s13 = scalar_lea.vmem %s16335_s16, 32768  ;;  %s16011_s14 = smov [#allocation4]  }
 0x10c   : > { %p15895_p7 = scmp.ne.s32.totalorder %s16335_s16, %s15894_s13  ;;  %s15898_s29 = sshll.u32 %s16011_s14, 4  ;;  %s15899_s29 = int_to_ptr.vmem [resolvable:$false] %s15898_s29 }
 0x10d   : > { %s15900_s30 = scalar_lea.vmem %s15899_s29, 65536  ;;  %p15901_p1 = scmp.lt.s32.totalorder %s16335_s16, %s15899_s29 }
 0x10e   : > { %p15896_p11 = pnand %p15895_p7, %p16968_p0  ;;  %p15902_p12 = scmp.lt.s32.totalorder %s15900_s30, %s15894_s13 }
 0x110   : > { %p15897_p13 = pneg %p15896_p11  ;;  %p15903_p5 = por %p15902_p12, %p15901_p1 }
 0x112   : > { %p15904_p8 = pnand %p15903_p5, %p15897_p13 }
 0x114   : > { %15907 = shalt.err (!%p15904_p8)
}
 0x115   : > { %s16012_s22 = smov 1024   ;;  %s16013_s23 = smov 64  }
 0x116   : > { %14997 = dma.hbm_to_vmem [thread:$0]  (%p16968_p0), %s16333_s24, 32768, %s16335_s16, %s16337_s4, %s16012_s22, %s16012_s22, %s16013_s23  }
 0x117 PF: > { %p16969_p4 = scmp.ne.s32.totalorder %s16962_s28, 0 }
 0x118   : > { %s490_s2 = sand.u32 (!%p16969_p4), 1, %s15984_s18   ;;  %p16970_p9 = scmp.ne.s32.totalorder (!%p16969_p4), %s16961_s27, 0 }
 0x119   : > { %487 = sbr.rel (%p16969_p4) target bundleno = 2860 (0xb2c), region = 98  ;;  %s13150_s25 = sshll.u32 (!%p16969_p4), %s490_s2, 4 }
 0x11a   : > { %s13151_s12 = sshll.u32 (!%p16969_p4), %s490_s2, 11  ;;  %s16364_s20 = scalar_lea.vmem (!%p16969_p4), [#allocation3], %s13150_s25 }
 0x11b   : > { %s497_s11 = scalar_lea.sflag (!%p16969_p4), [#allocation5], %s490_s2  ;;  %s16366_s21 = scalar_lea.vmem (!%p16969_p4), [#allocation4], %s13151_s12 }
 0x120   : > { %15951 = dma.done.wait (%p16970_p9), %s497_s11, 32768  }
 0x121   : > { %15953 = vsyncadd (%p16970_p9), %s497_s11, 4294934528  ;;  %s16971_s26 = sld [smem:[#allocation29_spill]] }
 0x127   : > { %p16972_p0 = scmp.eq.s32.totalorder %s16971_s26, 0 }
 0x129   : > { %15955 = dma.done.wait (%p16972_p0), [#allocation8], 131328   ;;  %p16973_p10 = pmov %p16972_p0 }
 0x12a   : > { %p16974_p2 = pmov %p16972_p0 }
 0x12b   : > { %15957 = vsyncadd (%p16973_p10), [#allocation8], 4294835968 }
 0x12c   : > { %15959 = dma.done.wait (%p16974_p2), [#allocation11], 32896   ;;  %p16975_p3 = pmov %p16972_p0 }
 0x12d   : > { %p16976_p6 = pmov %p16972_p0 }
 0x12e   : > { %15961 = vsyncadd (%p16975_p3), [#allocation11], 4294934400 }
 0x12f   : > { %15963 = dma.done.wait (%p16976_p6), [#allocation14], 8256   ;;  %p16977_p7 = pmov %p16972_p0 }
 0x130   : > { %p16978_p11 = pmov %p16972_p0 }
 0x131   : > { %15965 = vsyncadd (%p16977_p7), [#allocation14], 4294959040 }
 0x132   : > { %15967 = dma.done.wait (%p16978_p11), [#allocation17], 2080   ;;  %p16979_p13 = pmov %p16972_p0 }
 0x133   : > { %p16980_p1 = pmov %p16972_p0 }
 0x134   : > { %15969 = vsyncadd (%p16979_p13), [#allocation17], 4294965216 }
 0x135   : > { %15971 = dma.done.wait (%p16980_p1), [#allocation20], 16   ;;  %p16981_p12 = pmov %p16972_p0 }
 0x136   : > { %p16982_p5 = scmp.ne.s32.totalorder %s16971_s26, 0 }
 0x137   : > { %15973 = vsyncadd (%p16981_p12), [#allocation20], 4294967280  ;;  %v16014_v2 = vmov (!%p16982_p5), 0.0  }
 0x138   : > { %580 = sbr.rel (%p16982_p5) target bundleno = 328 (0x148), region = 146  ;;  %581 = vst [vmem:[#allocation2] sm:$0xff] (!%p16982_p5), %v16014_v2  ;;  %582 = vst [vmem:[#allocation2 + $0x8] sm:$0xff] (!%p16982_p5), %v16014_v2 }
 0x139   : > { %583 = vst [vmem:[#allocation2 + $0x10] sm:$0xff] (!%p16982_p5), %v16014_v2  ;;  %584 = vst [vmem:[#allocation2 + $0x18] sm:$0xff] (!%p16982_p5), %v16014_v2 }
 0x13a   : > { %585 = vst [vmem:[#allocation2 + $0x20] sm:$0xff] (!%p16982_p5), %v16014_v2  ;;  %586 = vst [vmem:[#allocation2 + $0x28] sm:$0xff] (!%p16982_p5), %v16014_v2 }
 0x13b   : > { %587 = vst [vmem:[#allocation2 + $0x30] sm:$0xff] (!%p16982_p5), %v16014_v2  ;;  %588 = vst [vmem:[#allocation2 + $0x38] sm:$0xff] (!%p16982_p5), %v16014_v2 }
 0x13c   : > { %589 = vst [vmem:[#allocation2 + $0x40] sm:$0xff] (!%p16982_p5), %v16014_v2  ;;  %590 = vst [vmem:[#allocation2 + $0x48] sm:$0xff] (!%p16982_p5), %v16014_v2 }
 0x13d   : > { %591 = vst [vmem:[#allocation2 + $0x50] sm:$0xff] (!%p16982_p5), %v16014_v2  ;;  %592 = vst [vmem:[#allocation2 + $0x58] sm:$0xff] (!%p16982_p5), %v16014_v2 }
 0x13e   : > { %593 = vst [vmem:[#allocation2 + $0x60] sm:$0xff] (!%p16982_p5), %v16014_v2  ;;  %594 = vst [vmem:[#allocation2 + $0x68] sm:$0xff] (!%p16982_p5), %v16014_v2 }
 0x13f   : > { %595 = vst [vmem:[#allocation2 + $0x70] sm:$0xff] %v16014_v2  ;;  %596 = vst [vmem:[#allocation2 + $0x78] sm:$0xff] %v16014_v2 }
 0x140   : > { %597 = vst [vmem:[#allocation2 + $0x80] sm:$0xff] %v16014_v2  ;;  %598 = vst [vmem:[#allocation2 + $0x88] sm:$0xff] %v16014_v2 }
 0x141   : > { %599 = vst [vmem:[#allocation2 + $0x90] sm:$0xff] %v16014_v2  ;;  %600 = vst [vmem:[#allocation2 + $0x98] sm:$0xff] %v16014_v2 }
 0x142   : > { %601 = vst [vmem:[#allocation2 + $0xa0] sm:$0xff] %v16014_v2  ;;  %602 = vst [vmem:[#allocation2 + $0xa8] sm:$0xff] %v16014_v2 }
 0x143   : > { %603 = vst [vmem:[#allocation2 + $0xb0] sm:$0xff] %v16014_v2  ;;  %604 = vst [vmem:[#allocation2 + $0xb8] sm:$0xff] %v16014_v2 }
 0x144   : > { %605 = vst [vmem:[#allocation2 + $0xc0] sm:$0xff] %v16014_v2  ;;  %606 = vst [vmem:[#allocation2 + $0xc8] sm:$0xff] %v16014_v2 }
 0x145   : > { %607 = vst [vmem:[#allocation2 + $0xd0] sm:$0xff] %v16014_v2  ;;  %608 = vst [vmem:[#allocation2 + $0xd8] sm:$0xff] %v16014_v2 }
 0x146   : > { %609 = vst [vmem:[#allocation2 + $0xe0] sm:$0xff] %v16014_v2  ;;  %610 = vst [vmem:[#allocation2 + $0xe8] sm:$0xff] %v16014_v2 }
 0x147   : > { %611 = vst [vmem:[#allocation2 + $0xf0] sm:$0xff] %v16014_v2  ;;  %612 = vst [vmem:[#allocation2 + $0xf8] sm:$0xff] %v16014_v2 }
 0x148 PF: > { %v647_v3 = vld [vmem:[%s16366_s21] sm:$0xff]  ;;  %v648_v5 = vld [vmem:[%s16366_s21 + $0x8] sm:$0xff]  ;;  %s16983_s27 = sld [smem:[#allocation29_spill]] }
 0x149   : > { %v655_v4 = vld [vmem:[%s16366_s21 + $0x40] sm:$0xff]  ;;  %v656_v7 = vld [vmem:[%s16366_s21 + $0x48] sm:$0xff] }
 0x14a   : > { %v13165_v6 = vcombine.high %v647_v3, %v655_v4  ;;  %v13164_v8 = vcombine.low %v647_v3, %v655_v4  ;;  %v663_v9 = vld [vmem:[%s16366_s21 + $0x80] sm:$0xff]  ;;  %v13167_v11 = vcombine.high %v648_v5, %v656_v7  ;;  %v13166_v12 = vcombine.low %v648_v5, %v656_v7  ;;  %v664_v14 = vld [vmem:[%s16366_s21 + $0x88] sm:$0xff] }
 0x14b   : > { %v671_v10 = vld [vmem:[%s16366_s21 + $0xc0] sm:$0xff]  ;;  %v672_v15 = vld [vmem:[%s16366_s21 + $0xc8] sm:$0xff] }
 0x14c   : > { %v13181_v13 = vcombine.high %v663_v9, %v671_v10  ;;  %v679_v16 = vld [vmem:[%s16366_s21 + $0x100] sm:$0xff]  ;;  %2193 = vmatprep.subr.bf16.mxu0 %v13165_v6  ;;  %v13183_v17 = vcombine.high %v664_v14, %v672_v15  ;;  %v680_v19 = vld [vmem:[%s16366_s21 + $0x108] sm:$0xff]  ;;  %2236 = vmatprep.subr.bf16.mxu1 %v13167_v11  ;;  %v13180_v21 = vcombine.low %v663_v9, %v671_v10 }
 0x14d   : > { %v687_v18 = vld [vmem:[%s16366_s21 + $0x140] sm:$0xff]  ;;  %v688_v20 = vld [vmem:[%s16366_s21 + $0x148] sm:$0xff]  ;;  %2194 = vmatpush1.bf16.msra.mxu0 %v13164_v8  ;;  %2237 = vmatpush1.bf16.msra.mxu1 %v13166_v12  ;;  %v13182_v22 = vcombine.low %v664_v14, %v672_v15 }
 0x14e   : > { %2195 = vmatprep.subr.bf16.mxu0 %v13181_v13  ;;  %v13197_v23 = vcombine.high %v679_v16, %v687_v18  ;;  %2238 = vmatprep.subr.bf16.mxu1 %v13183_v17  ;;  %v13199_v24 = vcombine.high %v680_v19, %v688_v20  ;;  %v695_v25 = vld [vmem:[%s16366_s21 + $0x180] sm:$0xff]  ;;  %v696_v27 = vld [vmem:[%s16366_s21 + $0x188] sm:$0xff]  ;;  %v13196_v29 = vcombine.low %v679_v16, %v687_v18  ;;  %p13420_p8 = scmp.ne.s32.totalorder %s16983_s27, 2 }
 0x14f   : > { %v703_v26 = vld [vmem:[%s16366_s21 + $0x1c0] sm:$0xff]  ;;  %v704_v28 = vld [vmem:[%s16366_s21 + $0x1c8] sm:$0xff]  ;;  %v13198_v30 = vcombine.low %v680_v19, %v688_v20 }
 0x150   : > { %v13213_v31 = vcombine.high %v695_v25, %v703_v26  ;;  %v13215_v32 = vcombine.high %v696_v27, %v704_v28  ;;  %v711_v33 = vld [vmem:[%s16366_s21 + $0x200] sm:$0xff]  ;;  %v712_v35 = vld [vmem:[%s16366_s21 + $0x208] sm:$0xff]  ;;  %v13212_v37 = vcombine.low %v695_v25, %v703_v26  ;;  %v13214_v38 = vcombine.low %v696_v27, %v704_v28 }
 0x151   : > { %2196 = vmatpush1.bf16.msra.mxu0 %v13180_v21  ;;  %2239 = vmatpush1.bf16.msra.mxu1 %v13182_v22  ;;  %v719_v34 = vld [vmem:[%s16366_s21 + $0x240] sm:$0xff]  ;;  %v720_v36 = vld [vmem:[%s16366_s21 + $0x248] sm:$0xff] }
 0x152   : > { %2197 = vmatprep.subr.bf16.mxu0 %v13197_v23  ;;  %2240 = vmatprep.subr.bf16.mxu1 %v13199_v24  ;;  %v13229_v39 = vcombine.high %v711_v33, %v719_v34  ;;  %v13231_v40 = vcombine.high %v712_v35, %v720_v36  ;;  %v727_v41 = vld [vmem:[%s16366_s21 + $0x280] sm:$0xff]  ;;  %v728_v43 = vld [vmem:[%s16366_s21 + $0x288] sm:$0xff]  ;;  %v13228_v45 = vcombine.low %v711_v33, %v719_v34 }
 0x153   : > { %v735_v42 = vld [vmem:[%s16366_s21 + $0x2c0] sm:$0xff]  ;;  %v736_v44 = vld [vmem:[%s16366_s21 + $0x2c8] sm:$0xff]  ;;  %v13230_v46 = vcombine.low %v712_v35, %v720_v36 }
 0x154   : > { %v13245_v47 = vcombine.high %v727_v41, %v735_v42  ;;  %v13247_v48 = vcombine.high %v728_v43, %v736_v44  ;;  %v743_v49 = vld [vmem:[%s16366_s21 + $0x300] sm:$0xff]  ;;  %v744_v51 = vld [vmem:[%s16366_s21 + $0x308] sm:$0xff]  ;;  %v13244_v53 = vcombine.low %v727_v41, %v735_v42  ;;  %v13246_v54 = vcombine.low %v728_v43, %v736_v44 }
 0x155   : > { %2198 = vmatpush1.bf16.msra.mxu0 %v13196_v29  ;;  %2241 = vmatpush1.bf16.msra.mxu1 %v13198_v30  ;;  %v751_v50 = vld [vmem:[%s16366_s21 + $0x340] sm:$0xff]  ;;  %v752_v52 = vld [vmem:[%s16366_s21 + $0x348] sm:$0xff] }
 0x156   : > { %2199 = vmatprep.subr.bf16.mxu0 %v13213_v31  ;;  %2242 = vmatprep.subr.bf16.mxu1 %v13215_v32  ;;  %v13261_v55 = vcombine.high %v743_v49, %v751_v50  ;;  %v13263_v56 = vcombine.high %v744_v51, %v752_v52  ;;  %v759_v57 = vld [vmem:[%s16366_s21 + $0x380] sm:$0xff]  ;;  %v760_v60 = vld [vmem:[%s16366_s21 + $0x388] sm:$0xff]  ;;  %v13260_v62 = vcombine.low %v743_v49, %v751_v50 }
 0x157   : > { %v767_v58 = vld [vmem:[%s16366_s21 + $0x3c0] sm:$0xff]  ;;  %v768_v61 = vld [vmem:[%s16366_s21 + $0x3c8] sm:$0xff]  ;;  %v13262_v63 = vcombine.low %v744_v51, %v752_v52 }
 0x158   : > { %v16425_v59 = vld [vmem:[%s16364_s20 + $0x4] ss:$8 sps:$4 sm:$0xff]   ;;  %v13277_v0 = vcombine.high %v759_v57, %v767_v58  ;;  %v13279_v1 = vcombine.high %v760_v60, %v768_v61  ;;  %v13276_v6 = vcombine.low %v759_v57, %v767_v58  ;;  %v13278_v7 = vcombine.low %v760_v60, %v768_v61 }
 0x159   : > { %2200 = vmatpush1.bf16.msra.mxu0 %v13212_v37  ;;  %2243 = vmatpush1.bf16.msra.mxu1 %v13214_v38  ;;  %v775_v2 = vld [vmem:[%s16366_s21 + $0x400] sm:$0xff]  ;;  %v776_v4 = vld [vmem:[%s16366_s21 + $0x408] sm:$0xff] }
 0x15a   : > { %2201 = vmatprep.subr.bf16.mxu0 %v13229_v39  ;;  %2244 = vmatprep.subr.bf16.mxu1 %v13231_v40  ;;  %v783_v3 = vld [vmem:[%s16366_s21 + $0x440] sm:$0xff]  ;;  %v784_v5 = vld [vmem:[%s16366_s21 + $0x448] sm:$0xff] }
 0x15b   : > { %2225 = vmatprep.mubr.bf16.mxu0 %v16425_v59  ;;  %2268 = vmatprep.mubr.bf16.mxu1 %v16425_v59  ;;  %v13293_v8 = vcombine.high %v775_v2, %v783_v3  ;;  %v13295_v9 = vcombine.high %v776_v4, %v784_v5  ;;  %v791_v10 = vld [vmem:[%s16366_s21 + $0x480] sm:$0xff]  ;;  %v792_v12 = vld [vmem:[%s16366_s21 + $0x488] sm:$0xff]  ;;  %v13292_v14 = vcombine.low %v775_v2, %v783_v3  ;;  %v649_v3 = vld [vmem:[%s16366_s21 + $0x10] sm:$0xff] }
 0x15c   : > { %v799_v11 = vld [vmem:[%s16366_s21 + $0x4c0] sm:$0xff]  ;;  %v800_v13 = vld [vmem:[%s16366_s21 + $0x4c8] sm:$0xff]  ;;  %v13294_v15 = vcombine.low %v776_v4, %v784_v5  ;;  %v657_v4 = vld [vmem:[%s16366_s21 + $0x50] sm:$0xff] }
 0x15d   : > { %2202 = vmatpush1.bf16.msra.mxu0 %v13228_v45  ;;  %2245 = vmatpush1.bf16.msra.mxu1 %v13230_v46  ;;  %v13309_v16 = vcombine.high %v791_v10, %v799_v11  ;;  %v13311_v17 = vcombine.high %v792_v12, %v800_v13  ;;  %v807_v18 = vld [vmem:[%s16366_s21 + $0x500] sm:$0xff]  ;;  %v808_v20 = vld [vmem:[%s16366_s21 + $0x508] sm:$0xff]  ;;  %v13308_v22 = vcombine.low %v791_v10, %v799_v11  ;;  %v650_v5 = vld [vmem:[%s16366_s21 + $0x18] sm:$0xff] }
 0x15e   : > { %2203 = vmatprep.subr.bf16.mxu0 %v13245_v47  ;;  %2246 = vmatprep.subr.bf16.mxu1 %v13247_v48  ;;  %v815_v19 = vld [vmem:[%s16366_s21 + $0x540] sm:$0xff]  ;;  %v816_v21 = vld [vmem:[%s16366_s21 + $0x548] sm:$0xff]  ;;  %v13310_v23 = vcombine.low %v792_v12, %v800_v13  ;;  %v665_v11 = vld [vmem:[%s16366_s21 + $0x90] sm:$0xff] }
 0x15f   : > { %v13325_v24 = vcombine.high %v807_v18, %v815_v19  ;;  %v13327_v25 = vcombine.high %v808_v20, %v816_v21  ;;  %v823_v26 = vld [vmem:[%s16366_s21 + $0x580] sm:$0xff]  ;;  %v824_v28 = vld [vmem:[%s16366_s21 + $0x588] sm:$0xff]  ;;  %v13324_v30 = vcombine.low %v807_v18, %v815_v19  ;;  %v13326_v31 = vcombine.low %v808_v20, %v816_v21  ;;  %v673_v12 = vld [vmem:[%s16366_s21 + $0xd0] sm:$0xff] }
 0x160   : > { %v831_v27 = vld [vmem:[%s16366_s21 + $0x5c0] sm:$0xff]  ;;  %v832_v29 = vld [vmem:[%s16366_s21 + $0x5c8] sm:$0xff]  ;;  %v13185_v18 = vcombine.high %v665_v11, %v673_v12  ;;  %v681_v20 = vld [vmem:[%s16366_s21 + $0x110] sm:$0xff] }
 0x161   : > { %2204 = vmatpush1.bf16.msra.mxu0 %v13244_v53  ;;  %2247 = vmatpush1.bf16.msra.mxu1 %v13246_v54  ;;  %v13341_v32 = vcombine.high %v823_v26, %v831_v27  ;;  %v13343_v33 = vcombine.high %v824_v28, %v832_v29  ;;  %v839_v34 = vld [vmem:[%s16366_s21 + $0x600] sm:$0xff]  ;;  %v840_v36 = vld [vmem:[%s16366_s21 + $0x608] sm:$0xff]  ;;  %v13340_v38 = vcombine.low %v823_v26, %v831_v27  ;;  %v689_v21 = vld [vmem:[%s16366_s21 + $0x150] sm:$0xff] }
 0x162   : > { %2205 = vmatprep.subr.bf16.mxu0 %v13261_v55  ;;  %2248 = vmatprep.subr.bf16.mxu1 %v13263_v56  ;;  %v847_v35 = vld [vmem:[%s16366_s21 + $0x640] sm:$0xff]  ;;  %v848_v37 = vld [vmem:[%s16366_s21 + $0x648] sm:$0xff]  ;;  %v13342_v39 = vcombine.low %v824_v28, %v832_v29  ;;  %v13201_v26 = vcombine.high %v681_v20, %v689_v21  ;;  %v697_v28 = vld [vmem:[%s16366_s21 + $0x190] sm:$0xff] }
 0x163   : > { %v13357_v40 = vcombine.high %v839_v34, %v847_v35  ;;  %v13359_v41 = vcombine.high %v840_v36, %v848_v37  ;;  %v855_v42 = vld [vmem:[%s16366_s21 + $0x680] sm:$0xff]  ;;  %v856_v44 = vld [vmem:[%s16366_s21 + $0x688] sm:$0xff]  ;;  %v13356_v46 = vcombine.low %v839_v34, %v847_v35  ;;  %v13358_v47 = vcombine.low %v840_v36, %v848_v37  ;;  %v705_v29 = vld [vmem:[%s16366_s21 + $0x1d0] sm:$0xff] }
 0x164   : > { %v863_v43 = vld [vmem:[%s16366_s21 + $0x6c0] sm:$0xff]  ;;  %v864_v45 = vld [vmem:[%s16366_s21 + $0x6c8] sm:$0xff]  ;;  %v13217_v34 = vcombine.high %v697_v28, %v705_v29  ;;  %v713_v36 = vld [vmem:[%s16366_s21 + $0x210] sm:$0xff] }
 0x165   : > { %2206 = vmatpush1.bf16.msra.mxu0 %v13260_v62  ;;  %2249 = vmatpush1.bf16.msra.mxu1 %v13262_v63  ;;  %v13373_v48 = vcombine.high %v855_v42, %v863_v43  ;;  %v13375_v49 = vcombine.high %v856_v44, %v864_v45  ;;  %v871_v50 = vld [vmem:[%s16366_s21 + $0x700] sm:$0xff]  ;;  %v872_v52 = vld [vmem:[%s16366_s21 + $0x708] sm:$0xff]  ;;  %v13372_v54 = vcombine.low %v855_v42, %v863_v43  ;;  %v721_v37 = vld [vmem:[%s16366_s21 + $0x250] sm:$0xff] }
 0x166   : > { %2207 = vmatprep.subr.bf16.mxu0 %v13277_v0  ;;  %2250 = vmatprep.subr.bf16.mxu1 %v13279_v1  ;;  %v879_v51 = vld [vmem:[%s16366_s21 + $0x740] sm:$0xff]  ;;  %v880_v53 = vld [vmem:[%s16366_s21 + $0x748] sm:$0xff]  ;;  %v13374_v55 = vcombine.low %v856_v44, %v864_v45  ;;  %v13233_v42 = vcombine.high %v713_v36, %v721_v37  ;;  %v729_v44 = vld [vmem:[%s16366_s21 + $0x290] sm:$0xff] }
 0x167   : > { %v13389_v56 = vcombine.high %v871_v50, %v879_v51  ;;  %v13391_v57 = vcombine.high %v872_v52, %v880_v53  ;;  %v887_v58 = vld [vmem:[%s16366_s21 + $0x780] sm:$0xff]  ;;  %v888_v61 = vld [vmem:[%s16366_s21 + $0x788] sm:$0xff]  ;;  %v13388_v63 = vcombine.low %v871_v50, %v879_v51  ;;  %v13390_v0 = vcombine.low %v872_v52, %v880_v53  ;;  %v737_v45 = vld [vmem:[%s16366_s21 + $0x2d0] sm:$0xff] }
 0x168   : > { %v895_v60 = vld [vmem:[%s16366_s21 + $0x7c0] sm:$0xff]  ;;  %v896_v62 = vld [vmem:[%s16366_s21 + $0x7c8] sm:$0xff]  ;;  %v13249_v50 = vcombine.high %v729_v44, %v737_v45  ;;  %v745_v52 = vld [vmem:[%s16366_s21 + $0x310] sm:$0xff] }
 0x169   : > { %2208 = vmatpush1.bf16.msra.mxu0 %v13276_v6  ;;  %2251 = vmatpush1.bf16.msra.mxu1 %v13278_v7  ;;  %v13405_v1 = vcombine.high %v887_v58, %v895_v60  ;;  %v13407_v2 = vcombine.high %v888_v61, %v896_v62  ;;  %v658_v6 = vld [vmem:[%s16366_s21 + $0x58] sm:$0xff]  ;;  %v13404_v7 = vcombine.low %v887_v58, %v895_v60  ;;  %v753_v53 = vld [vmem:[%s16366_s21 + $0x350] sm:$0xff] }
 0x16a   : > { %2209 = vmatprep.subr.bf16.mxu0 %v13293_v8  ;;  %2252 = vmatprep.subr.bf16.mxu1 %v13295_v9  ;;  %v13406_v8 = vcombine.low %v888_v61, %v896_v62  ;;  %v13169_v9 = vcombine.high %v649_v3, %v657_v4  ;;  %v13171_v10 = vcombine.high %v650_v5, %v658_v6  ;;  %v16470_v13 = vld [vmem:[%s16364_s20] ss:$8 sps:$4 sm:$0xff]  }
 0x16b   : > { %v13265_v58 = vcombine.high %v745_v52, %v753_v53  ;;  %v761_v61 = vld [vmem:[%s16366_s21 + $0x390] sm:$0xff] }
 0x16c   : > { %v769_v62 = vld [vmem:[%s16366_s21 + $0x3d0] sm:$0xff] }
 0x16d   : > { %2210 = vmatpush1.bf16.msra.mxu0 %v13292_v14  ;;  %2253 = vmatpush1.bf16.msra.mxu1 %v13294_v15  ;;  %v666_v14 = vld [vmem:[%s16366_s21 + $0x98] sm:$0xff] }
 0x16e   : > { %2211 = vmatprep.subr.bf16.mxu0 %v13309_v16  ;;  %2254 = vmatprep.subr.bf16.mxu1 %v13311_v17  ;;  %v674_v15 = vld [vmem:[%s16366_s21 + $0xd8] sm:$0xff]  ;;  %v13168_v16 = vcombine.low %v649_v3, %v657_v4  ;;  %v13170_v17 = vcombine.low %v650_v5, %v658_v6  ;;  %v13281_v3 = vcombine.high %v761_v61, %v769_v62  ;;  %v777_v5 = vld [vmem:[%s16366_s21 + $0x410] sm:$0xff] }
 0x16f   : > { %v13187_v19 = vcombine.high %v666_v14, %v674_v15  ;;  %v785_v6 = vld [vmem:[%s16366_s21 + $0x450] sm:$0xff] }
 0x171   : > { %2212 = vmatpush1.bf16.msra.mxu0 %v13308_v22  ;;  %2255 = vmatpush1.bf16.msra.mxu1 %v13310_v23  ;;  %v682_v22 = vld [vmem:[%s16366_s21 + $0x118] sm:$0xff] }
 0x172   : > { %2213 = vmatprep.subr.bf16.mxu0 %v13325_v24  ;;  %2256 = vmatprep.subr.bf16.mxu1 %v13327_v25  ;;  %v690_v23 = vld [vmem:[%s16366_s21 + $0x158] sm:$0xff]  ;;  %v13184_v24 = vcombine.low %v665_v11, %v673_v12  ;;  %v13186_v25 = vcombine.low %v666_v14, %v674_v15  ;;  %v13297_v11 = vcombine.high %v777_v5, %v785_v6  ;;  %v793_v14 = vld [vmem:[%s16366_s21 + $0x490] sm:$0xff] }
 0x173   : > { %v13203_v27 = vcombine.high %v682_v22, %v690_v23  ;;  %v801_v15 = vld [vmem:[%s16366_s21 + $0x4d0] sm:$0xff] }
 0x175   : > { %2214 = vmatpush1.bf16.msra.mxu0 %v13324_v30  ;;  %2257 = vmatpush1.bf16.msra.mxu1 %v13326_v31  ;;  %v698_v30 = vld [vmem:[%s16366_s21 + $0x198] sm:$0xff] }
 0x176   : > { %2215 = vmatprep.subr.bf16.mxu0 %v13341_v32  ;;  %2258 = vmatprep.subr.bf16.mxu1 %v13343_v33  ;;  %v706_v31 = vld [vmem:[%s16366_s21 + $0x1d8] sm:$0xff]  ;;  %v13200_v32 = vcombine.low %v681_v20, %v689_v21  ;;  %v13202_v33 = vcombine.low %v682_v22, %v690_v23  ;;  %v13313_v20 = vcombine.high %v793_v14, %v801_v15  ;;  %v809_v22 = vld [vmem:[%s16366_s21 + $0x510] sm:$0xff] }
 0x177   : > { %v13219_v35 = vcombine.high %v698_v30, %v706_v31  ;;  %v817_v23 = vld [vmem:[%s16366_s21 + $0x550] sm:$0xff] }
 0x179   : > { %2216 = vmatpush1.bf16.msra.mxu0 %v13340_v38  ;;  %2259 = vmatpush1.bf16.msra.mxu1 %v13342_v39  ;;  %v714_v38 = vld [vmem:[%s16366_s21 + $0x218] sm:$0xff] }
 0x17a   : > { %2217 = vmatprep.subr.bf16.mxu0 %v13357_v40  ;;  %2260 = vmatprep.subr.bf16.mxu1 %v13359_v41  ;;  %v722_v39 = vld [vmem:[%s16366_s21 + $0x258] sm:$0xff]  ;;  %v13216_v40 = vcombine.low %v697_v28, %v705_v29  ;;  %v13218_v41 = vcombine.low %v698_v30, %v706_v31  ;;  %v13329_v28 = vcombine.high %v809_v22, %v817_v23  ;;  %v825_v30 = vld [vmem:[%s16366_s21 + $0x590] sm:$0xff] }
 0x17b   : > { %v13235_v43 = vcombine.high %v714_v38, %v722_v39  ;;  %v833_v31 = vld [vmem:[%s16366_s21 + $0x5d0] sm:$0xff] }
 0x17d   : > { %2218 = vmatpush1.bf16.msra.mxu0 %v13356_v46  ;;  %2261 = vmatpush1.bf16.msra.mxu1 %v13358_v47  ;;  %v730_v46 = vld [vmem:[%s16366_s21 + $0x298] sm:$0xff] }
 0x17e   : > { %2219 = vmatprep.subr.bf16.mxu0 %v13373_v48  ;;  %2262 = vmatprep.subr.bf16.mxu1 %v13375_v49  ;;  %v738_v47 = vld [vmem:[%s16366_s21 + $0x2d8] sm:$0xff]  ;;  %v13232_v48 = vcombine.low %v713_v36, %v721_v37  ;;  %v13234_v49 = vcombine.low %v714_v38, %v722_v39  ;;  %v13345_v36 = vcombine.high %v825_v30, %v833_v31  ;;  %v841_v38 = vld [vmem:[%s16366_s21 + $0x610] sm:$0xff] }
 0x17f   : > { %v13251_v51 = vcombine.high %v730_v46, %v738_v47  ;;  %v849_v39 = vld [vmem:[%s16366_s21 + $0x650] sm:$0xff] }
 0x181   : > { %2220 = vmatpush1.bf16.msra.mxu0 %v13372_v54  ;;  %2263 = vmatpush1.bf16.msra.mxu1 %v13374_v55  ;;  %v746_v54 = vld [vmem:[%s16366_s21 + $0x318] sm:$0xff] }
 0x182   : > { %2221 = vmatprep.subr.bf16.mxu0 %v13389_v56  ;;  %2264 = vmatprep.subr.bf16.mxu1 %v13391_v57  ;;  %v754_v55 = vld [vmem:[%s16366_s21 + $0x358] sm:$0xff]  ;;  %v13248_v56 = vcombine.low %v729_v44, %v737_v45  ;;  %v13250_v57 = vcombine.low %v730_v46, %v738_v47  ;;  %v13361_v44 = vcombine.high %v841_v38, %v849_v39  ;;  %v857_v46 = vld [vmem:[%s16366_s21 + $0x690] sm:$0xff] }
 0x183   : > { %v13267_v60 = vcombine.high %v746_v54, %v754_v55  ;;  %v865_v47 = vld [vmem:[%s16366_s21 + $0x6d0] sm:$0xff] }
 0x185   : > { %2222 = vmatpush1.bf16.msra.mxu0 %v13388_v63  ;;  %2265 = vmatpush1.bf16.msra.mxu1 %v13390_v0  ;;  %v762_v63 = vld [vmem:[%s16366_s21 + $0x398] sm:$0xff] }
 0x186   : > { %2223 = vmatprep.subr.bf16.mxu0 %v13405_v1  ;;  %2266 = vmatprep.subr.bf16.mxu1 %v13407_v2  ;;  %v770_v0 = vld [vmem:[%s16366_s21 + $0x3d8] sm:$0xff]  ;;  %v13264_v1 = vcombine.low %v745_v52, %v753_v53  ;;  %v13266_v2 = vcombine.low %v746_v54, %v754_v55  ;;  %v13377_v52 = vcombine.high %v857_v46, %v865_v47  ;;  %v873_v54 = vld [vmem:[%s16366_s21 + $0x710] sm:$0xff] }
 0x187   : > { %v13283_v4 = vcombine.high %v762_v63, %v770_v0  ;;  %v881_v55 = vld [vmem:[%s16366_s21 + $0x750] sm:$0xff] }
 0x189   : > { %2224 = vmatpush1.bf16.msra.mxu0 %v13404_v7  ;;  %2267 = vmatpush1.bf16.msra.mxu1 %v13406_v8  ;;  %v778_v7 = vld [vmem:[%s16366_s21 + $0x418] sm:$0xff] }
 0x18a   : > { %2279 = vmatprep.subr.bf16.mxu0 %v13169_v9  ;;  %2322 = vmatprep.subr.bf16.mxu1 %v13171_v10  ;;  %v786_v8 = vld [vmem:[%s16366_s21 + $0x458] sm:$0xff]  ;;  %v13280_v9 = vcombine.low %v761_v61, %v769_v62  ;;  %v13282_v10 = vcombine.low %v762_v63, %v770_v0  ;;  %v13393_v61 = vcombine.high %v873_v54, %v881_v55  ;;  %v889_v63 = vld [vmem:[%s16366_s21 + $0x790] sm:$0xff] }
 0x18b   : > { %v13299_v12 = vcombine.high %v778_v7, %v786_v8  ;;  %v897_v0 = vld [vmem:[%s16366_s21 + $0x7d0] sm:$0xff] }
 0x18c   : > { %2226 = vmatmul.mubr.bf16.vlgmr.msra.gmra.mrb[0].mxu0 %v16470_v13  ;;  %2269 = vmatmul.mubr.bf16.vlgmr.msra.gmra.mrb[0].mxu1 %v16470_v13 }
 0x18d   : > { %2280 = vmatpush1.bf16.msra.mxu0 %v13168_v16  ;;  %2323 = vmatpush1.bf16.msra.mxu1 %v13170_v17  ;;  %v794_v16 = vld [vmem:[%s16366_s21 + $0x498] sm:$0xff] }
 0x18e   : > { %2281 = vmatprep.subr.bf16.mxu0 %v13185_v18  ;;  %2324 = vmatprep.subr.bf16.mxu1 %v13187_v19  ;;  %v802_v17 = vld [vmem:[%s16366_s21 + $0x4d8] sm:$0xff]  ;;  %v13296_v18 = vcombine.low %v777_v5, %v785_v6  ;;  %v13298_v19 = vcombine.low %v778_v7, %v786_v8  ;;  %v13409_v5 = vcombine.high %v889_v63, %v897_v0  ;;  %v651_v7 = vld [vmem:[%s16366_s21 + $0x20] sm:$0xff] }
 0x18f   : > { %2311 = vmatprep.mubr.bf16.mxu0 %v16425_v59  ;;  %2354 = vmatprep.mubr.bf16.mxu1 %v16425_v59  ;;  %v13315_v21 = vcombine.high %v794_v16, %v802_v17  ;;  %v659_v8 = vld [vmem:[%s16366_s21 + $0x60] sm:$0xff] }
 0x191   : > { %2282 = vmatpush1.bf16.msra.mxu0 %v13184_v24  ;;  %2325 = vmatpush1.bf16.msra.mxu1 %v13186_v25  ;;  %v810_v24 = vld [vmem:[%s16366_s21 + $0x518] sm:$0xff] }
 0x192   : > { %2283 = vmatprep.subr.bf16.mxu0 %v13201_v26  ;;  %2326 = vmatprep.subr.bf16.mxu1 %v13203_v27  ;;  %v818_v25 = vld [vmem:[%s16366_s21 + $0x558] sm:$0xff]  ;;  %v13312_v26 = vcombine.low %v793_v14, %v801_v15  ;;  %v13314_v27 = vcombine.low %v794_v16, %v802_v17  ;;  %v13173_v14 = vcombine.high %v651_v7, %v659_v8  ;;  %v667_v16 = vld [vmem:[%s16366_s21 + $0xa0] sm:$0xff] }
 0x193   : > { %v13331_v29 = vcombine.high %v810_v24, %v818_v25  ;;  %v675_v17 = vld [vmem:[%s16366_s21 + $0xe0] sm:$0xff] }
 0x195   : > { %2284 = vmatpush1.bf16.msra.mxu0 %v13200_v32  ;;  %2327 = vmatpush1.bf16.msra.mxu1 %v13202_v33  ;;  %v826_v32 = vld [vmem:[%s16366_s21 + $0x598] sm:$0xff] }
 0x196   : > { %2285 = vmatprep.subr.bf16.mxu0 %v13217_v34  ;;  %2328 = vmatprep.subr.bf16.mxu1 %v13219_v35  ;;  %v834_v33 = vld [vmem:[%s16366_s21 + $0x5d8] sm:$0xff]  ;;  %v13328_v34 = vcombine.low %v809_v22, %v817_v23  ;;  %v13330_v35 = vcombine.low %v810_v24, %v818_v25  ;;  %v13189_v22 = vcombine.high %v667_v16, %v675_v17  ;;  %v683_v24 = vld [vmem:[%s16366_s21 + $0x120] sm:$0xff] }
 0x197   : > { %v13347_v37 = vcombine.high %v826_v32, %v834_v33  ;;  %v691_v25 = vld [vmem:[%s16366_s21 + $0x160] sm:$0xff] }
 0x199   : > { %2286 = vmatpush1.bf16.msra.mxu0 %v13216_v40  ;;  %2329 = vmatpush1.bf16.msra.mxu1 %v13218_v41  ;;  %v842_v40 = vld [vmem:[%s16366_s21 + $0x618] sm:$0xff] }
 0x19a   : > { %2287 = vmatprep.subr.bf16.mxu0 %v13233_v42  ;;  %2330 = vmatprep.subr.bf16.mxu1 %v13235_v43  ;;  %v850_v41 = vld [vmem:[%s16366_s21 + $0x658] sm:$0xff]  ;;  %v13344_v42 = vcombine.low %v825_v30, %v833_v31  ;;  %v13346_v43 = vcombine.low %v826_v32, %v834_v33  ;;  %v13205_v30 = vcombine.high %v683_v24, %v691_v25  ;;  %v699_v32 = vld [vmem:[%s16366_s21 + $0x1a0] sm:$0xff] }
 0x19b   : > { %v13363_v45 = vcombine.high %v842_v40, %v850_v41  ;;  %v707_v33 = vld [vmem:[%s16366_s21 + $0x1e0] sm:$0xff] }
 0x19d   : > { %2288 = vmatpush1.bf16.msra.mxu0 %v13232_v48  ;;  %2331 = vmatpush1.bf16.msra.mxu1 %v13234_v49  ;;  %v858_v48 = vld [vmem:[%s16366_s21 + $0x698] sm:$0xff] }
 0x19e   : > { %2289 = vmatprep.subr.bf16.mxu0 %v13249_v50  ;;  %2332 = vmatprep.subr.bf16.mxu1 %v13251_v51  ;;  %v866_v49 = vld [vmem:[%s16366_s21 + $0x6d8] sm:$0xff]  ;;  %v13360_v50 = vcombine.low %v841_v38, %v849_v39  ;;  %v13362_v51 = vcombine.low %v842_v40, %v850_v41  ;;  %v13221_v38 = vcombine.high %v699_v32, %v707_v33  ;;  %v715_v40 = vld [vmem:[%s16366_s21 + $0x220] sm:$0xff] }
 0x19f   : > { %v13379_v53 = vcombine.high %v858_v48, %v866_v49  ;;  %v723_v41 = vld [vmem:[%s16366_s21 + $0x260] sm:$0xff] }
 0x1a1   : > { %2290 = vmatpush1.bf16.msra.mxu0 %v13248_v56  ;;  %2333 = vmatpush1.bf16.msra.mxu1 %v13250_v57  ;;  %v874_v56 = vld [vmem:[%s16366_s21 + $0x718] sm:$0xff] }
 0x1a2   : > { %2291 = vmatprep.subr.bf16.mxu0 %v13265_v58  ;;  %2334 = vmatprep.subr.bf16.mxu1 %v13267_v60  ;;  %v882_v57 = vld [vmem:[%s16366_s21 + $0x758] sm:$0xff]  ;;  %v13376_v58 = vcombine.low %v857_v46, %v865_v47  ;;  %v13378_v60 = vcombine.low %v858_v48, %v866_v49  ;;  %v731_v47 = vld [vmem:[%s16366_s21 + $0x2a0] sm:$0xff]  ;;  %v732_v49 = vld [vmem:[%s16366_s21 + $0x2a8] sm:$0xff] }
 0x1a3   : > { %v13395_v62 = vcombine.high %v874_v56, %v882_v57  ;;  %v739_v48 = vld [vmem:[%s16366_s21 + $0x2e0] sm:$0xff] }
 0x1a5   : > { %2292 = vmatpush1.bf16.msra.mxu0 %v13264_v1  ;;  %2335 = vmatpush1.bf16.msra.mxu1 %v13266_v2  ;;  %v890_v1 = vld [vmem:[%s16366_s21 + $0x798] sm:$0xff] }
 0x1a6   : > { %2293 = vmatprep.subr.bf16.mxu0 %v13281_v3  ;;  %2336 = vmatprep.subr.bf16.mxu1 %v13283_v4  ;;  %v898_v2 = vld [vmem:[%s16366_s21 + $0x7d8] sm:$0xff]  ;;  %v13392_v3 = vcombine.low %v873_v54, %v881_v55  ;;  %v13394_v4 = vcombine.low %v874_v56, %v882_v57  ;;  %v747_v55 = vld [vmem:[%s16366_s21 + $0x320] sm:$0xff]  ;;  %v748_v57 = vld [vmem:[%s16366_s21 + $0x328] sm:$0xff] }
 0x1a7   : > { %v13411_v6 = vcombine.high %v890_v1, %v898_v2  ;;  %v755_v56 = vld [vmem:[%s16366_s21 + $0x360] sm:$0xff] }
 0x1a9   : > { %2294 = vmatpush1.bf16.msra.mxu0 %v13280_v9  ;;  %2337 = vmatpush1.bf16.msra.mxu1 %v13282_v10  ;;  %v652_v9 = vld [vmem:[%s16366_s21 + $0x28] sm:$0xff] }
 0x1aa   : > { %2295 = vmatprep.subr.bf16.mxu0 %v13297_v11  ;;  %2338 = vmatprep.subr.bf16.mxu1 %v13299_v12  ;;  %v660_v10 = vld [vmem:[%s16366_s21 + $0x68] sm:$0xff]  ;;  %v13408_v11 = vcombine.low %v889_v63, %v897_v0  ;;  %v13410_v12 = vcombine.low %v890_v1, %v898_v2  ;;  %v763_v0 = vld [vmem:[%s16366_s21 + $0x3a0] sm:$0xff] }
 0x1ab   : > { %v13175_v15 = vcombine.high %v652_v9, %v660_v10  ;;  %v771_v1 = vld [vmem:[%s16366_s21 + $0x3e0] sm:$0xff]  ;;  %v764_v2 = vld [vmem:[%s16366_s21 + $0x3a8] sm:$0xff] }
 0x1ad   : > { %2296 = vmatpush1.bf16.msra.mxu0 %v13296_v18  ;;  %2339 = vmatpush1.bf16.msra.mxu1 %v13298_v19  ;;  %v668_v18 = vld [vmem:[%s16366_s21 + $0xa8] sm:$0xff] }
 0x1ae   : > { %2297 = vmatprep.subr.bf16.mxu0 %v13313_v20  ;;  %2340 = vmatprep.subr.bf16.mxu1 %v13315_v21  ;;  %v676_v19 = vld [vmem:[%s16366_s21 + $0xe8] sm:$0xff]  ;;  %v13172_v20 = vcombine.low %v651_v7, %v659_v8  ;;  %v13174_v21 = vcombine.low %v652_v9, %v660_v10  ;;  %v779_v8 = vld [vmem:[%s16366_s21 + $0x420] sm:$0xff] }
 0x1af   : > { %v13191_v23 = vcombine.high %v668_v18, %v676_v19  ;;  %v787_v9 = vld [vmem:[%s16366_s21 + $0x460] sm:$0xff]  ;;  %v780_v10 = vld [vmem:[%s16366_s21 + $0x428] sm:$0xff] }
 0x1b1   : > { %2298 = vmatpush1.bf16.msra.mxu0 %v13312_v26  ;;  %2341 = vmatpush1.bf16.msra.mxu1 %v13314_v27  ;;  %v684_v26 = vld [vmem:[%s16366_s21 + $0x128] sm:$0xff] }
 0x1b2   : > { %2299 = vmatprep.subr.bf16.mxu0 %v13329_v28  ;;  %2342 = vmatprep.subr.bf16.mxu1 %v13331_v29  ;;  %v692_v27 = vld [vmem:[%s16366_s21 + $0x168] sm:$0xff]  ;;  %v13188_v28 = vcombine.low %v667_v16, %v675_v17  ;;  %v13190_v29 = vcombine.low %v668_v18, %v676_v19  ;;  %v795_v17 = vld [vmem:[%s16366_s21 + $0x4a0] sm:$0xff] }
 0x1b3   : > { %v13207_v31 = vcombine.high %v684_v26, %v692_v27  ;;  %v803_v18 = vld [vmem:[%s16366_s21 + $0x4e0] sm:$0xff]  ;;  %v796_v19 = vld [vmem:[%s16366_s21 + $0x4a8] sm:$0xff] }
 0x1b5   : > { %2300 = vmatpush1.bf16.msra.mxu0 %v13328_v34  ;;  %2343 = vmatpush1.bf16.msra.mxu1 %v13330_v35  ;;  %v700_v34 = vld [vmem:[%s16366_s21 + $0x1a8] sm:$0xff] }
 0x1b6   : > { %2301 = vmatprep.subr.bf16.mxu0 %v13345_v36  ;;  %2344 = vmatprep.subr.bf16.mxu1 %v13347_v37  ;;  %v708_v35 = vld [vmem:[%s16366_s21 + $0x1e8] sm:$0xff]  ;;  %v13204_v36 = vcombine.low %v683_v24, %v691_v25  ;;  %v13206_v37 = vcombine.low %v684_v26, %v692_v27  ;;  %v811_v25 = vld [vmem:[%s16366_s21 + $0x520] sm:$0xff] }
 0x1b7   : > { %v13223_v39 = vcombine.high %v700_v34, %v708_v35  ;;  %v819_v26 = vld [vmem:[%s16366_s21 + $0x560] sm:$0xff]  ;;  %v812_v27 = vld [vmem:[%s16366_s21 + $0x528] sm:$0xff] }
 0x1b9   : > { %2302 = vmatpush1.bf16.msra.mxu0 %v13344_v42  ;;  %2345 = vmatpush1.bf16.msra.mxu1 %v13346_v43  ;;  %v716_v42 = vld [vmem:[%s16366_s21 + $0x228] sm:$0xff] }
 0x1ba   : > { %2303 = vmatprep.subr.bf16.mxu0 %v13361_v44  ;;  %2346 = vmatprep.subr.bf16.mxu1 %v13363_v45  ;;  %v724_v43 = vld [vmem:[%s16366_s21 + $0x268] sm:$0xff]  ;;  %v13220_v44 = vcombine.low %v699_v32, %v707_v33  ;;  %v13237_v45 = vcombine.high %v715_v40, %v723_v41  ;;  %v827_v33 = vld [vmem:[%s16366_s21 + $0x5a0] sm:$0xff] }
 0x1bb   : > { %v13239_v46 = vcombine.high %v716_v42, %v724_v43 }
 0x1bd   : > { %2304 = vmatpush1.bf16.msra.mxu0 %v13360_v50  ;;  %2347 = vmatpush1.bf16.msra.mxu1 %v13362_v51  ;;  %v740_v50 = vld [vmem:[%s16366_s21 + $0x2e8] sm:$0xff]  ;;  %v13236_v51 = vcombine.low %v715_v40, %v723_v41  ;;  %v843_v41 = vld [vmem:[%s16366_s21 + $0x620] sm:$0xff] }
 0x1be   : > { %2305 = vmatprep.subr.bf16.mxu0 %v13377_v52  ;;  %2348 = vmatprep.subr.bf16.mxu1 %v13379_v53  ;;  %v13238_v52 = vcombine.low %v716_v42, %v724_v43  ;;  %v13253_v53 = vcombine.high %v731_v47, %v739_v48  ;;  %v13255_v54 = vcombine.high %v732_v49, %v740_v50  ;;  %v851_v42 = vld [vmem:[%s16366_s21 + $0x660] sm:$0xff]  ;;  %v844_v43 = vld [vmem:[%s16366_s21 + $0x628] sm:$0xff] }
 0x1c1   : > { %2306 = vmatpush1.bf16.msra.mxu0 %v13376_v58  ;;  %2349 = vmatpush1.bf16.msra.mxu1 %v13378_v60  ;;  %v756_v58 = vld [vmem:[%s16366_s21 + $0x368] sm:$0xff]  ;;  %v13252_v60 = vcombine.low %v731_v47, %v739_v48  ;;  %v859_v48 = vld [vmem:[%s16366_s21 + $0x6a0] sm:$0xff] }
 0x1c2   : > { %2307 = vmatprep.subr.bf16.mxu0 %v13393_v61  ;;  %2350 = vmatprep.subr.bf16.mxu1 %v13395_v62  ;;  %v13254_v61 = vcombine.low %v732_v49, %v740_v50  ;;  %v13269_v62 = vcombine.high %v747_v55, %v755_v56  ;;  %v13271_v63 = vcombine.high %v748_v57, %v756_v58  ;;  %v867_v49 = vld [vmem:[%s16366_s21 + $0x6e0] sm:$0xff]  ;;  %v860_v50 = vld [vmem:[%s16366_s21 + $0x6a8] sm:$0xff] }
 0x1c5   : > { %2308 = vmatpush1.bf16.msra.mxu0 %v13392_v3  ;;  %2351 = vmatpush1.bf16.msra.mxu1 %v13394_v4  ;;  %v772_v3 = vld [vmem:[%s16366_s21 + $0x3e8] sm:$0xff]  ;;  %v13268_v4 = vcombine.low %v747_v55, %v755_v56  ;;  %v875_v56 = vld [vmem:[%s16366_s21 + $0x720] sm:$0xff] }
 0x1c6   : > { %2309 = vmatprep.subr.bf16.mxu0 %v13409_v5  ;;  %2352 = vmatprep.subr.bf16.mxu1 %v13411_v6  ;;  %v13270_v5 = vcombine.low %v748_v57, %v756_v58  ;;  %v13285_v6 = vcombine.high %v763_v0, %v771_v1  ;;  %v13287_v7 = vcombine.high %v764_v2, %v772_v3  ;;  %v883_v57 = vld [vmem:[%s16366_s21 + $0x760] sm:$0xff]  ;;  %v876_v58 = vld [vmem:[%s16366_s21 + $0x728] sm:$0xff] }
 0x1c9   : > { %2310 = vmatpush1.bf16.msra.mxu0 %v13408_v11  ;;  %2353 = vmatpush1.bf16.msra.mxu1 %v13410_v12  ;;  %v788_v11 = vld [vmem:[%s16366_s21 + $0x468] sm:$0xff]  ;;  %v13284_v12 = vcombine.low %v763_v0, %v771_v1  ;;  %v891_v1 = vld [vmem:[%s16366_s21 + $0x7a0] sm:$0xff] }
 0x1ca   : > { %2365 = vmatprep.subr.bf16.mxu0 %v13173_v14  ;;  %2408 = vmatprep.subr.bf16.mxu1 %v13175_v15  ;;  %v13286_v14 = vcombine.low %v764_v2, %v772_v3  ;;  %v13301_v15 = vcombine.high %v779_v8, %v787_v9  ;;  %v13303_v16 = vcombine.high %v780_v10, %v788_v11  ;;  %v899_v2 = vld [vmem:[%s16366_s21 + $0x7e0] sm:$0xff]  ;;  %v892_v3 = vld [vmem:[%s16366_s21 + $0x7a8] sm:$0xff] }
 0x1cc   : > { %2312 = vmatmul.mubr.bf16.vlgmr.msra.gmra.mrb[4].mxu0 %v16470_v13  ;;  %2355 = vmatmul.mubr.bf16.vlgmr.msra.gmra.mrb[4].mxu1 %v16470_v13 }
 0x1cd   : > { %2366 = vmatpush1.bf16.msra.mxu0 %v13172_v20  ;;  %2409 = vmatpush1.bf16.msra.mxu1 %v13174_v21  ;;  %v804_v20 = vld [vmem:[%s16366_s21 + $0x4e8] sm:$0xff]  ;;  %v13300_v21 = vcombine.low %v779_v8, %v787_v9  ;;  %v653_v9 = vld [vmem:[%s16366_s21 + $0x30] sm:$0xff] }
 0x1ce   : > { %2367 = vmatprep.subr.bf16.mxu0 %v13189_v22  ;;  %2410 = vmatprep.subr.bf16.mxu1 %v13191_v23  ;;  %v13302_v22 = vcombine.low %v780_v10, %v788_v11  ;;  %v13317_v23 = vcombine.high %v795_v17, %v803_v18  ;;  %v13319_v24 = vcombine.high %v796_v19, %v804_v20  ;;  %v661_v10 = vld [vmem:[%s16366_s21 + $0x70] sm:$0xff]  ;;  %v654_v11 = vld [vmem:[%s16366_s21 + $0x38] sm:$0xff] }
 0x1cf   : > { %2397 = vmatprep.mubr.bf16.mxu0 %v16425_v59  ;;  %2440 = vmatprep.mubr.bf16.mxu1 %v16425_v59  ;;  %v13222_v59 = vcombine.low %v700_v34, %v708_v35  ;;  %v835_v34 = vld [vmem:[%s16366_s21 + $0x5e0] sm:$0xff]  ;;  %v828_v35 = vld [vmem:[%s16366_s21 + $0x5a8] sm:$0xff] }
 0x1d1   : > { %2368 = vmatpush1.bf16.msra.mxu0 %v13188_v28  ;;  %2411 = vmatpush1.bf16.msra.mxu1 %v13190_v29  ;;  %v820_v28 = vld [vmem:[%s16366_s21 + $0x568] sm:$0xff]  ;;  %v13316_v29 = vcombine.low %v795_v17, %v803_v18  ;;  %v669_v18 = vld [vmem:[%s16366_s21 + $0xb0] sm:$0xff] }
 0x1d2   : > { %2369 = vmatprep.subr.bf16.mxu0 %v13205_v30  ;;  %2412 = vmatprep.subr.bf16.mxu1 %v13207_v31  ;;  %v13318_v30 = vcombine.low %v796_v19, %v804_v20  ;;  %v13333_v31 = vcombine.high %v811_v25, %v819_v26  ;;  %v13335_v32 = vcombine.high %v812_v27, %v820_v28  ;;  %v677_v19 = vld [vmem:[%s16366_s21 + $0xf0] sm:$0xff]  ;;  %v670_v20 = vld [vmem:[%s16366_s21 + $0xb8] sm:$0xff] }
 0x1d5   : > { %2370 = vmatpush1.bf16.msra.mxu0 %v13204_v36  ;;  %2413 = vmatpush1.bf16.msra.mxu1 %v13206_v37  ;;  %v836_v36 = vld [vmem:[%s16366_s21 + $0x5e8] sm:$0xff]  ;;  %v13332_v37 = vcombine.low %v811_v25, %v819_v26  ;;  %v685_v26 = vld [vmem:[%s16366_s21 + $0x130] sm:$0xff] }
 0x1d6   : > { %2371 = vmatprep.subr.bf16.mxu0 %v13221_v38  ;;  %2414 = vmatprep.subr.bf16.mxu1 %v13223_v39  ;;  %v13334_v38 = vcombine.low %v812_v27, %v820_v28  ;;  %v13349_v39 = vcombine.high %v827_v33, %v835_v34  ;;  %v13351_v40 = vcombine.high %v828_v35, %v836_v36  ;;  %v693_v27 = vld [vmem:[%s16366_s21 + $0x170] sm:$0xff]  ;;  %v686_v28 = vld [vmem:[%s16366_s21 + $0x138] sm:$0xff] }
 0x1d9   : > { %2372 = vmatpush1.bf16.msra.mxu0 %v13220_v44  ;;  %2415 = vmatpush1.bf16.msra.mxu1 %v13222_v59  ;;  %v852_v44 = vld [vmem:[%s16366_s21 + $0x668] sm:$0xff]  ;;  %v13348_v59 = vcombine.low %v827_v33, %v835_v34  ;;  %v701_v34 = vld [vmem:[%s16366_s21 + $0x1b0] sm:$0xff] }
 0x1da   : > { %2373 = vmatprep.subr.bf16.mxu0 %v13237_v45  ;;  %2416 = vmatprep.subr.bf16.mxu1 %v13239_v46  ;;  %v13350_v45 = vcombine.low %v828_v35, %v836_v36  ;;  %v13365_v46 = vcombine.high %v843_v41, %v851_v42  ;;  %v13367_v47 = vcombine.high %v844_v43, %v852_v44  ;;  %v709_v35 = vld [vmem:[%s16366_s21 + $0x1f0] sm:$0xff] }
 0x1db   : > { %v15127_v36 = vld [vmem:[%s16364_s20 + $0x4] ss:$8 sps:$4 sm:$0xff]  }
 0x1dd   : > { %2374 = vmatpush1.bf16.msra.mxu0 %v13236_v51  ;;  %2417 = vmatpush1.bf16.msra.mxu1 %v13238_v52  ;;  %v868_v51 = vld [vmem:[%s16366_s21 + $0x6e8] sm:$0xff]  ;;  %v13364_v52 = vcombine.low %v843_v41, %v851_v42  ;;  %v717_v42 = vld [vmem:[%s16366_s21 + $0x230] sm:$0xff] }
 0x1de   : > { %2375 = vmatprep.subr.bf16.mxu0 %v13253_v53  ;;  %2418 = vmatprep.subr.bf16.mxu1 %v13255_v54  ;;  %v13366_v53 = vcombine.low %v844_v43, %v852_v44  ;;  %v13381_v54 = vcombine.high %v859_v48, %v867_v49  ;;  %v13383_v55 = vcombine.high %v860_v50, %v868_v51  ;;  %v725_v43 = vld [vmem:[%s16366_s21 + $0x270] sm:$0xff]  ;;  %v718_v44 = vld [vmem:[%s16366_s21 + $0x238] sm:$0xff] }
 0x1e1   : > { %2376 = vmatpush1.bf16.msra.mxu0 %v13252_v60  ;;  %2419 = vmatpush1.bf16.msra.mxu1 %v13254_v61  ;;  %v884_v60 = vld [vmem:[%s16366_s21 + $0x768] sm:$0xff]  ;;  %v13380_v61 = vcombine.low %v859_v48, %v867_v49  ;;  %v733_v49 = vld [vmem:[%s16366_s21 + $0x2b0] sm:$0xff] }
 0x1e2   : > { %2377 = vmatprep.subr.bf16.mxu0 %v13269_v62  ;;  %2420 = vmatprep.subr.bf16.mxu1 %v13271_v63  ;;  %v13382_v62 = vcombine.low %v860_v50, %v868_v51  ;;  %v13397_v63 = vcombine.high %v875_v56, %v883_v57  ;;  %v13399_v0 = vcombine.high %v876_v58, %v884_v60  ;;  %v741_v50 = vld [vmem:[%s16366_s21 + $0x2f0] sm:$0xff]  ;;  %v734_v51 = vld [vmem:[%s16366_s21 + $0x2b8] sm:$0xff] }
 0x1e5   : > { %2378 = vmatpush1.bf16.msra.mxu0 %v13268_v4  ;;  %2421 = vmatpush1.bf16.msra.mxu1 %v13270_v5  ;;  %v900_v4 = vld [vmem:[%s16366_s21 + $0x7e8] sm:$0xff]  ;;  %v13396_v5 = vcombine.low %v875_v56, %v883_v57  ;;  %v749_v57 = vld [vmem:[%s16366_s21 + $0x330] sm:$0xff] }
 0x1e6   : > { %2379 = vmatprep.subr.bf16.mxu0 %v13285_v6  ;;  %2422 = vmatprep.subr.bf16.mxu1 %v13287_v7  ;;  %v13398_v6 = vcombine.low %v876_v58, %v884_v60  ;;  %v13413_v7 = vcombine.high %v891_v1, %v899_v2  ;;  %v13415_v8 = vcombine.high %v892_v3, %v900_v4  ;;  %v757_v58 = vld [vmem:[%s16366_s21 + $0x370] sm:$0xff]  ;;  %v750_v60 = vld [vmem:[%s16366_s21 + $0x338] sm:$0xff] }
 0x1e9   : > { %2380 = vmatpush1.bf16.msra.mxu0 %v13284_v12  ;;  %2423 = vmatpush1.bf16.msra.mxu1 %v13286_v14  ;;  %v662_v12 = vld [vmem:[%s16366_s21 + $0x78] sm:$0xff]  ;;  %v13412_v14 = vcombine.low %v891_v1, %v899_v2  ;;  %v765_v2 = vld [vmem:[%s16366_s21 + $0x3b0] sm:$0xff] }
 0x1ea   : > { %2381 = vmatprep.subr.bf16.mxu0 %v13301_v15  ;;  %2424 = vmatprep.subr.bf16.mxu1 %v13303_v16  ;;  %v13414_v15 = vcombine.low %v892_v3, %v900_v4  ;;  %v13177_v16 = vcombine.high %v653_v9, %v661_v10  ;;  %v13179_v17 = vcombine.high %v654_v11, %v662_v12  ;;  %v773_v3 = vld [vmem:[%s16366_s21 + $0x3f0] sm:$0xff]  ;;  %v766_v4 = vld [vmem:[%s16366_s21 + $0x3b8] sm:$0xff] }
 0x1ed   : > { %2382 = vmatpush1.bf16.msra.mxu0 %v13300_v21  ;;  %2425 = vmatpush1.bf16.msra.mxu1 %v13302_v22  ;;  %v678_v21 = vld [vmem:[%s16366_s21 + $0xf8] sm:$0xff]  ;;  %v13176_v22 = vcombine.low %v653_v9, %v661_v10  ;;  %v781_v10 = vld [vmem:[%s16366_s21 + $0x430] sm:$0xff] }
 0x1ee   : > { %2383 = vmatprep.subr.bf16.mxu0 %v13317_v23  ;;  %2426 = vmatprep.subr.bf16.mxu1 %v13319_v24  ;;  %v13178_v23 = vcombine.low %v654_v11, %v662_v12  ;;  %v13193_v24 = vcombine.high %v669_v18, %v677_v19  ;;  %v13195_v25 = vcombine.high %v670_v20, %v678_v21  ;;  %v789_v11 = vld [vmem:[%s16366_s21 + $0x470] sm:$0xff]  ;;  %v782_v12 = vld [vmem:[%s16366_s21 + $0x438] sm:$0xff] }
 0x1f1   : > { %2384 = vmatpush1.bf16.msra.mxu0 %v13316_v29  ;;  %2427 = vmatpush1.bf16.msra.mxu1 %v13318_v30  ;;  %v694_v29 = vld [vmem:[%s16366_s21 + $0x178] sm:$0xff]  ;;  %v13192_v30 = vcombine.low %v669_v18, %v677_v19  ;;  %v797_v19 = vld [vmem:[%s16366_s21 + $0x4b0] sm:$0xff] }
 0x1f2   : > { %2385 = vmatprep.subr.bf16.mxu0 %v13333_v31  ;;  %2428 = vmatprep.subr.bf16.mxu1 %v13335_v32  ;;  %v13194_v31 = vcombine.low %v670_v20, %v678_v21  ;;  %v13209_v32 = vcombine.high %v685_v26, %v693_v27  ;;  %v13211_v33 = vcombine.high %v686_v28, %v694_v29  ;;  %v805_v20 = vld [vmem:[%s16366_s21 + $0x4f0] sm:$0xff]  ;;  %v798_v21 = vld [vmem:[%s16366_s21 + $0x4b8] sm:$0xff] }
 0x1f5   : > { %2386 = vmatpush1.bf16.msra.mxu0 %v13332_v37  ;;  %2429 = vmatpush1.bf16.msra.mxu1 %v13334_v38  ;;  %v702_v37 = vld [vmem:[%s16366_s21 + $0x1b8] sm:$0xff] }
 0x1f6   : > { %2387 = vmatprep.subr.bf16.mxu0 %v13349_v39  ;;  %2430 = vmatprep.subr.bf16.mxu1 %v13351_v40  ;;  %v710_v38 = vld [vmem:[%s16366_s21 + $0x1f8] sm:$0xff]  ;;  %v13210_v39 = vcombine.low %v686_v28, %v694_v29  ;;  %v13225_v40 = vcombine.high %v701_v34, %v709_v35  ;;  %v821_v28 = vld [vmem:[%s16366_s21 + $0x570] sm:$0xff] }
 0x1f7   : > { %v13227_v41 = vcombine.high %v702_v37, %v710_v38  ;;  %v814_v29 = vld [vmem:[%s16366_s21 + $0x538] sm:$0xff] }
 0x1f9   : > { %2388 = vmatpush1.bf16.msra.mxu0 %v13348_v59  ;;  %2431 = vmatpush1.bf16.msra.mxu1 %v13350_v45  ;;  %v726_v59 = vld [vmem:[%s16366_s21 + $0x278] sm:$0xff]  ;;  %v13224_v45 = vcombine.low %v701_v34, %v709_v35  ;;  %v829_v35 = vld [vmem:[%s16366_s21 + $0x5b0] sm:$0xff] }
 0x1fa   : > { %2389 = vmatprep.subr.bf16.mxu0 %v13365_v46  ;;  %2432 = vmatprep.subr.bf16.mxu1 %v13367_v47  ;;  %v13226_v46 = vcombine.low %v702_v37, %v710_v38  ;;  %v13241_v47 = vcombine.high %v717_v42, %v725_v43  ;;  %v13243_v48 = vcombine.high %v718_v44, %v726_v59  ;;  %v830_v37 = vld [vmem:[%s16366_s21 + $0x5b8] sm:$0xff] }
 0x1fb   : > { %v838_v38 = vld [vmem:[%s16366_s21 + $0x5f8] sm:$0xff] }
 0x1fd   : > { %2390 = vmatpush1.bf16.msra.mxu0 %v13364_v52  ;;  %2433 = vmatpush1.bf16.msra.mxu1 %v13366_v53  ;;  %v742_v52 = vld [vmem:[%s16366_s21 + $0x2f8] sm:$0xff]  ;;  %v13240_v53 = vcombine.low %v717_v42, %v725_v43  ;;  %v845_v42 = vld [vmem:[%s16366_s21 + $0x630] sm:$0xff] }
 0x1fe   : > { %2391 = vmatprep.subr.bf16.mxu0 %v13381_v54  ;;  %2434 = vmatprep.subr.bf16.mxu1 %v13383_v55  ;;  %v13242_v54 = vcombine.low %v718_v44, %v726_v59  ;;  %v13257_v55 = vcombine.high %v733_v49, %v741_v50  ;;  %v13259_v56 = vcombine.high %v734_v51, %v742_v52  ;;  %v853_v43 = vld [vmem:[%s16366_s21 + $0x670] sm:$0xff]  ;;  %v846_v44 = vld [vmem:[%s16366_s21 + $0x638] sm:$0xff] }
 0x1ff   : > { %v854_v59 = vld [vmem:[%s16366_s21 + $0x678] sm:$0xff] }
 0x201   : > { %2392 = vmatpush1.bf16.msra.mxu0 %v13380_v61  ;;  %2435 = vmatpush1.bf16.msra.mxu1 %v13382_v62  ;;  %v758_v61 = vld [vmem:[%s16366_s21 + $0x378] sm:$0xff]  ;;  %v13256_v62 = vcombine.low %v733_v49, %v741_v50  ;;  %v861_v49 = vld [vmem:[%s16366_s21 + $0x6b0] sm:$0xff] }
 0x202   : > { %2393 = vmatprep.subr.bf16.mxu0 %v13397_v63  ;;  %2436 = vmatprep.subr.bf16.mxu1 %v13399_v0  ;;  %v13258_v63 = vcombine.low %v734_v51, %v742_v52  ;;  %v13273_v0 = vcombine.high %v749_v57, %v757_v58  ;;  %v13275_v1 = vcombine.high %v750_v60, %v758_v61  ;;  %v869_v50 = vld [vmem:[%s16366_s21 + $0x6f0] sm:$0xff]  ;;  %v862_v51 = vld [vmem:[%s16366_s21 + $0x6b8] sm:$0xff] }
 0x203   : > { %v870_v52 = vld [vmem:[%s16366_s21 + $0x6f8] sm:$0xff] }
 0x205   : > { %2394 = vmatpush1.bf16.msra.mxu0 %v13396_v5  ;;  %2437 = vmatpush1.bf16.msra.mxu1 %v13398_v6  ;;  %v774_v5 = vld [vmem:[%s16366_s21 + $0x3f8] sm:$0xff]  ;;  %v13272_v6 = vcombine.low %v749_v57, %v757_v58  ;;  %v877_v57 = vld [vmem:[%s16366_s21 + $0x730] sm:$0xff] }
 0x206   : > { %2395 = vmatprep.subr.bf16.mxu0 %v13413_v7  ;;  %2438 = vmatprep.subr.bf16.mxu1 %v13415_v8  ;;  %v13274_v7 = vcombine.low %v750_v60, %v758_v61  ;;  %v13289_v8 = vcombine.high %v765_v2, %v773_v3  ;;  %v13291_v9 = vcombine.high %v766_v4, %v774_v5  ;;  %v885_v58 = vld [vmem:[%s16366_s21 + $0x770] sm:$0xff]  ;;  %v878_v60 = vld [vmem:[%s16366_s21 + $0x738] sm:$0xff] }
 0x207   : > { %v886_v61 = vld [vmem:[%s16366_s21 + $0x778] sm:$0xff] }
 0x209   : > { %2396 = vmatpush1.bf16.msra.mxu0 %v13412_v14  ;;  %2439 = vmatpush1.bf16.msra.mxu1 %v13414_v15  ;;  %v790_v14 = vld [vmem:[%s16366_s21 + $0x478] sm:$0xff]  ;;  %v13288_v15 = vcombine.low %v765_v2, %v773_v3  ;;  %v893_v2 = vld [vmem:[%s16366_s21 + $0x7b0] sm:$0xff] }
 0x20a   : > { %2451 = vmatprep.subr.bf16.mxu0 %v13177_v16  ;;  %2494 = vmatprep.subr.bf16.mxu1 %v13179_v17  ;;  %v13290_v16 = vcombine.low %v766_v4, %v774_v5  ;;  %v13305_v17 = vcombine.high %v781_v10, %v789_v11  ;;  %v13307_v18 = vcombine.high %v782_v12, %v790_v14  ;;  %v901_v3 = vld [vmem:[%s16366_s21 + $0x7f0] sm:$0xff]  ;;  %v894_v4 = vld [vmem:[%s16366_s21 + $0x7b8] sm:$0xff] }
 0x20b   : > { %v902_v5 = vld [vmem:[%s16366_s21 + $0x7f8] sm:$0xff] }
 0x20c   : > { %2398 = vmatmul.mubr.bf16.vlgmr.msra.gmra.mrb[8].mxu0 %v16470_v13  ;;  %2441 = vmatmul.mubr.bf16.vlgmr.msra.gmra.mrb[8].mxu1 %v16470_v13  ;;  %v13208_v13 = vcombine.low %v685_v26, %v693_v27  ;;  %v813_v27 = vld [vmem:[%s16366_s21 + $0x530] sm:$0xff] }
 0x20d   : > { %2452 = vmatpush1.bf16.msra.mxu0 %v13176_v22  ;;  %2495 = vmatpush1.bf16.msra.mxu1 %v13178_v23  ;;  %v806_v22 = vld [vmem:[%s16366_s21 + $0x4f8] sm:$0xff]  ;;  %v13304_v23 = vcombine.low %v781_v10, %v789_v11  ;;  %v13416_v10 = vcombine.low %v893_v2, %v901_v3  ;;  %v13418_v11 = vcombine.low %v894_v4, %v902_v5 }
 0x20e   : > { %2453 = vmatprep.subr.bf16.mxu0 %v13193_v24  ;;  %2496 = vmatprep.subr.bf16.mxu1 %v13195_v25  ;;  %v13306_v24 = vcombine.low %v782_v12, %v790_v14  ;;  %v13321_v25 = vcombine.high %v797_v19, %v805_v20  ;;  %v13323_v26 = vcombine.high %v798_v21, %v806_v22  ;;  %v15128_v12 = vld [vmem:[%s16364_s20] ss:$8 sps:$4 sm:$0xff]  }
 0x20f   : > { %2483 = vmatprep.mubr.bf16.mxu0 %v15127_v36  ;;  %2526 = vmatprep.mubr.bf16.mxu1 %v15127_v36  ;;  %v837_v36 = vld [vmem:[%s16366_s21 + $0x5f0] sm:$0xff]  ;;  %v613_v14 = vld [vmem:[#allocation2] sm:$0xff] }
 0x211   : > { %2454 = vmatpush1.bf16.msra.mxu0 %v13192_v30  ;;  %2497 = vmatpush1.bf16.msra.mxu1 %v13194_v31  ;;  %v822_v30 = vld [vmem:[%s16366_s21 + $0x578] sm:$0xff]  ;;  %v13320_v31 = vcombine.low %v797_v19, %v805_v20  ;;  %v629_v19 = vld [vmem:[#allocation2 + $0x80] sm:$0xff] }
 0x212   : > { %2455 = vmatprep.subr.bf16.mxu0 %v13209_v32  ;;  %2498 = vmatprep.subr.bf16.mxu1 %v13211_v33  ;;  %v13322_v32 = vcombine.low %v798_v21, %v806_v22  ;;  %v13337_v33 = vcombine.high %v813_v27, %v821_v28  ;;  %v13339_v34 = vcombine.high %v814_v29, %v822_v30 }
 0x215   : > { %2456 = vmatpush1.bf16.msra.mxu0 %v13208_v13  ;;  %2499 = vmatpush1.bf16.msra.mxu1 %v13210_v39  ;;  %v13336_v13 = vcombine.low %v813_v27, %v821_v28  ;;  %v13338_v39 = vcombine.low %v814_v29, %v822_v30  ;;  %v632_v29 = vld [vmem:[#allocation2 + $0x98] sm:$0xff] }
 0x216   : > { %2457 = vmatprep.subr.bf16.mxu0 %v13225_v40  ;;  %2500 = vmatprep.subr.bf16.mxu1 %v13227_v41  ;;  %v13353_v40 = vcombine.high %v829_v35, %v837_v36  ;;  %v13355_v41 = vcombine.high %v830_v37, %v838_v38 }
 0x219   : > { %2458 = vmatpush1.bf16.msra.mxu0 %v13224_v45  ;;  %2501 = vmatpush1.bf16.msra.mxu1 %v13226_v46  ;;  %v13352_v45 = vcombine.low %v829_v35, %v837_v36  ;;  %v13354_v46 = vcombine.low %v830_v37, %v838_v38  ;;  %v617_v38 = vld [vmem:[#allocation2 + $0x20] sm:$0xff] }
 0x21a   : > { %2459 = vmatprep.subr.bf16.mxu0 %v13241_v47  ;;  %2502 = vmatprep.subr.bf16.mxu1 %v13243_v48  ;;  %v13369_v47 = vcombine.high %v845_v42, %v853_v43  ;;  %v13371_v48 = vcombine.high %v846_v44, %v854_v59 }
 0x21d   : > { %2460 = vmatpush1.bf16.msra.mxu0 %v13240_v53  ;;  %2503 = vmatpush1.bf16.msra.mxu1 %v13242_v54  ;;  %v13368_v53 = vcombine.low %v845_v42, %v853_v43  ;;  %v13370_v54 = vcombine.low %v846_v44, %v854_v59  ;;  %v633_v42 = vld [vmem:[#allocation2 + $0xa0] sm:$0xff] }
 0x21e   : > { %2461 = vmatprep.subr.bf16.mxu0 %v13257_v55  ;;  %2504 = vmatprep.subr.bf16.mxu1 %v13259_v56  ;;  %v13385_v55 = vcombine.high %v861_v49, %v869_v50  ;;  %v13387_v56 = vcombine.high %v862_v51, %v870_v52 }
 0x221   : > { %2462 = vmatpush1.bf16.msra.mxu0 %v13256_v62  ;;  %2505 = vmatpush1.bf16.msra.mxu1 %v13258_v63  ;;  %v13384_v62 = vcombine.low %v861_v49, %v869_v50  ;;  %v13386_v63 = vcombine.low %v862_v51, %v870_v52  ;;  %v636_v51 = vld [vmem:[#allocation2 + $0xb8] sm:$0xff] }
 0x222   : > { %2463 = vmatprep.subr.bf16.mxu0 %v13273_v0  ;;  %2506 = vmatprep.subr.bf16.mxu1 %v13275_v1  ;;  %v13401_v0 = vcombine.high %v877_v57, %v885_v58  ;;  %v13403_v1 = vcombine.high %v878_v60, %v886_v61 }
 0x225   : > { %2464 = vmatpush1.bf16.msra.mxu0 %v13272_v6  ;;  %2507 = vmatpush1.bf16.msra.mxu1 %v13274_v7  ;;  %v13400_v6 = vcombine.low %v877_v57, %v885_v58  ;;  %v13402_v7 = vcombine.low %v878_v60, %v886_v61  ;;  %v621_v61 = vld [vmem:[#allocation2 + $0x40] sm:$0xff] }
 0x226   : > { %2465 = vmatprep.subr.bf16.mxu0 %v13289_v8  ;;  %2508 = vmatprep.subr.bf16.mxu1 %v13291_v9  ;;  %v13417_v8 = vcombine.high %v893_v2, %v901_v3  ;;  %v13419_v9 = vcombine.high %v894_v4, %v902_v5  ;;  %v637_v2 = vld [vmem:[#allocation2 + $0xc0] sm:$0xff] }
 0x229   : > { %2466 = vmatpush1.bf16.msra.mxu0 %v13288_v15  ;;  %2509 = vmatpush1.bf16.msra.mxu1 %v13290_v16  ;;  %v615_v15 = vld [vmem:[#allocation2 + $0x10] sm:$0xff]  ;;  %v614_v16 = vld [vmem:[#allocation2 + $0x8] sm:$0xff] }
 0x22a   : > { %2467 = vmatprep.subr.bf16.mxu0 %v13305_v17  ;;  %2510 = vmatprep.subr.bf16.mxu1 %v13307_v18  ;;  %v616_v18 = vld [vmem:[#allocation2 + $0x18] sm:$0xff] }
 0x22d   : > { %2468 = vmatpush1.bf16.msra.mxu0 %v13304_v23  ;;  %2511 = vmatpush1.bf16.msra.mxu1 %v13306_v24  ;;  %v631_v23 = vld [vmem:[#allocation2 + $0x90] sm:$0xff]  ;;  %v630_v24 = vld [vmem:[#allocation2 + $0x88] sm:$0xff] }
 0x22e   : > { %2469 = vmatprep.subr.bf16.mxu0 %v13321_v25  ;;  %2512 = vmatprep.subr.bf16.mxu1 %v13323_v26 }
 0x231   : > { %2470 = vmatpush1.bf16.msra.mxu0 %v13320_v31  ;;  %2513 = vmatpush1.bf16.msra.mxu1 %v13322_v32 }
 0x232   : > { %2471 = vmatprep.subr.bf16.mxu0 %v13337_v33  ;;  %2514 = vmatprep.subr.bf16.mxu1 %v13339_v34 }
 0x235   : > { %2472 = vmatpush1.bf16.msra.mxu0 %v13336_v13  ;;  %2515 = vmatpush1.bf16.msra.mxu1 %v13338_v39  ;;  %v619_v13 = vld [vmem:[#allocation2 + $0x30] sm:$0xff]  ;;  %v618_v39 = vld [vmem:[#allocation2 + $0x28] sm:$0xff] }
 0x236   : > { %2473 = vmatprep.subr.bf16.mxu0 %v13353_v40  ;;  %2516 = vmatprep.subr.bf16.mxu1 %v13355_v41  ;;  %v620_v41 = vld [vmem:[#allocation2 + $0x38] sm:$0xff] }
 0x239   : > { %2474 = vmatpush1.bf16.msra.mxu0 %v13352_v45  ;;  %2517 = vmatpush1.bf16.msra.mxu1 %v13354_v46  ;;  %v635_v45 = vld [vmem:[#allocation2 + $0xb0] sm:$0xff]  ;;  %v634_v46 = vld [vmem:[#allocation2 + $0xa8] sm:$0xff] }
 0x23a   : > { %2475 = vmatprep.subr.bf16.mxu0 %v13369_v47  ;;  %2518 = vmatprep.subr.bf16.mxu1 %v13371_v48 }
 0x23d   : > { %2476 = vmatpush1.bf16.msra.mxu0 %v13368_v53  ;;  %2519 = vmatpush1.bf16.msra.mxu1 %v13370_v54 }
 0x23e   : > { %2477 = vmatprep.subr.bf16.mxu0 %v13385_v55  ;;  %2520 = vmatprep.subr.bf16.mxu1 %v13387_v56 }
 0x241   : > { %2478 = vmatpush1.bf16.msra.mxu0 %v13384_v62  ;;  %2521 = vmatpush1.bf16.msra.mxu1 %v13386_v63  ;;  %v623_v62 = vld [vmem:[#allocation2 + $0x50] sm:$0xff]  ;;  %v622_v63 = vld [vmem:[#allocation2 + $0x48] sm:$0xff] }
 0x242   : > { %2479 = vmatprep.subr.bf16.mxu0 %v13401_v0  ;;  %2522 = vmatprep.subr.bf16.mxu1 %v13403_v1  ;;  %v624_v1 = vld [vmem:[#allocation2 + $0x58] sm:$0xff] }
 0x245   : > { %2480 = vmatpush1.bf16.msra.mxu0 %v13400_v6  ;;  %2523 = vmatpush1.bf16.msra.mxu1 %v13402_v7  ;;  %v639_v6 = vld [vmem:[#allocation2 + $0xd0] sm:$0xff]  ;;  %v638_v7 = vld [vmem:[#allocation2 + $0xc8] sm:$0xff] }
 0x246   : > { %2481 = vmatprep.subr.bf16.mxu0 %v13417_v8  ;;  %2524 = vmatprep.subr.bf16.mxu1 %v13419_v9 }
 0x249   : > { %2482 = vmatpush1.bf16.msra.mxu0 %v13416_v10  ;;  %2525 = vmatpush1.bf16.msra.mxu1 %v13418_v11 }
 0x24c   : > { %2484 = vmatmul.mubr.bf16.vlgmr.msra.gmra.mrb[12].mxu0 %v15128_v12  ;;  %2527 = vmatmul.mubr.bf16.vlgmr.msra.gmra.mrb[12].mxu1 %v15128_v12  ;;  %v640_v12 = vld [vmem:[#allocation2 + $0xd8] sm:$0xff] }
 0x25f   : > { %v2227_v17 = vpop.f32.mrb[0].mxu0  ;;  %v2270_v21 = vpop.f32.mrb[0].mxu1 }
 0x260   : > { %v2537_v20 = vadd.f32 %v2227_v17, %v613_v14  ;;  %v2229_v22 = vpop.f32.mrb[1].mxu0  ;;  %v2539_v25 = vadd.f32 %v2270_v21, %v615_v15  ;;  %v2272_v27 = vpop.f32.mrb[1].mxu1 }
 0x261   : > { %v2538_v26 = vadd.f32 %v2229_v22, %v614_v16  ;;  %v2231_v28 = vpop.f32.mrb[2].mxu0  ;;  %v2540_v30 = vadd.f32 %v2272_v27, %v616_v18  ;;  %v2274_v32 = vpop.f32.mrb[2].mxu1  ;;  %v625_v22 = vld [vmem:[#allocation2 + $0x60] sm:$0xff] }
 0x262   : > { %2569 = vst [vmem:[#allocation2] sm:$0xff] %v2537_v20  ;;  %v2553_v31 = vadd.f32 %v2231_v28, %v629_v19  ;;  %v2233_v33 = vpop.f32.mrb[3].mxu0  ;;  %2571 = vst [vmem:[#allocation2 + $0x10] sm:$0xff] %v2539_v25  ;;  %v2555_v34 = vadd.f32 %v2274_v32, %v631_v23  ;;  %v2276_v36 = vpop.f32.mrb[3].mxu1  ;;  %v627_v23 = vld [vmem:[#allocation2 + $0x70] sm:$0xff]  ;;  %v641_v27 = vld [vmem:[#allocation2 + $0xe0] sm:$0xff] }
 0x263   : > { %2570 = vst [vmem:[#allocation2 + $0x8] sm:$0xff] %v2538_v26  ;;  %v2554_v35 = vadd.f32 %v2233_v33, %v630_v24  ;;  %2572 = vst [vmem:[#allocation2 + $0x18] sm:$0xff] %v2540_v30  ;;  %v2556_v37 = vadd.f32 %v2276_v36, %v632_v29  ;;  %v626_v24 = vld [vmem:[#allocation2 + $0x68] sm:$0xff]  ;;  %v628_v26 = vld [vmem:[#allocation2 + $0x78] sm:$0xff] }
 0x264   : > { %2585 = vst [vmem:[#allocation2 + $0x80] sm:$0xff] %v2553_v31  ;;  %2587 = vst [vmem:[#allocation2 + $0x90] sm:$0xff] %v2555_v34  ;;  %v643_v31 = vld [vmem:[#allocation2 + $0xf0] sm:$0xff]  ;;  %v642_v32 = vld [vmem:[#allocation2 + $0xe8] sm:$0xff] }
 0x265   : > { %2586 = vst [vmem:[#allocation2 + $0x88] sm:$0xff] %v2554_v35  ;;  %2588 = vst [vmem:[#allocation2 + $0x98] sm:$0xff] %v2556_v37  ;;  %v644_v37 = vld [vmem:[#allocation2 + $0xf8] sm:$0xff] }
 0x29f   : > { %v2313_v40 = vpop.f32.mrb[4].mxu0  ;;  %v2356_v44 = vpop.f32.mrb[4].mxu1 }
 0x2a0   : > { %v2541_v43 = vadd.f32 %v2313_v40, %v617_v38  ;;  %v2315_v59 = vpop.f32.mrb[5].mxu0  ;;  %v2543_v47 = vadd.f32 %v2356_v44, %v619_v13  ;;  %v2358_v49 = vpop.f32.mrb[5].mxu1 }
 0x2a1   : > { %v2542_v48 = vadd.f32 %v2315_v59, %v618_v39  ;;  %v2317_v50 = vpop.f32.mrb[6].mxu0  ;;  %v2544_v52 = vadd.f32 %v2358_v49, %v620_v41  ;;  %v2360_v54 = vpop.f32.mrb[6].mxu1  ;;  %v2801_v59 = vld [vmem:[#allocation9] sm:$0xff] (!%p13420_p8) }
 0x2a2   : > { %2573 = vst [vmem:[#allocation2 + $0x20] sm:$0xff] %v2541_v43  ;;  %v2557_v53 = vadd.f32 %v2317_v50, %v633_v42  ;;  %v2319_v55 = vpop.f32.mrb[7].mxu0  ;;  %2575 = vst [vmem:[#allocation2 + $0x30] sm:$0xff] %v2543_v47  ;;  %v2559_v56 = vadd.f32 %v2360_v54, %v635_v45  ;;  %v2362_v58 = vpop.f32.mrb[7].mxu1  ;;  %v2805_v45 = vld [vmem:[#allocation9 + $0x20] sm:$0xff] (!%p13420_p8) }
 0x2a3   : > { %2574 = vst [vmem:[#allocation2 + $0x28] sm:$0xff] %v2542_v48  ;;  %v2558_v57 = vadd.f32 %v2319_v55, %v634_v46  ;;  %2576 = vst [vmem:[#allocation2 + $0x38] sm:$0xff] %v2544_v52  ;;  %v2560_v60 = vadd.f32 %v2362_v58, %v636_v51  ;;  %v2929_v46 = vld [vmem:[#allocation9 + $0x400] sm:$0xff] (!%p13420_p8)  ;;  %v13422_v47 = vcombine.high (!%p13420_p8), %v2801_v59, %v2805_v45 }
 0x2a4   : > { %2589 = vst [vmem:[#allocation2 + $0xa0] sm:$0xff] %v2557_v53  ;;  %2591 = vst [vmem:[#allocation2 + $0xb0] sm:$0xff] %v2559_v56  ;;  %v2933_v48 = vld [vmem:[#allocation9 + $0x420] sm:$0xff] (!%p13420_p8)  ;;  %v13421_v49 = vcombine.low (!%p13420_p8), %v2801_v59, %v2805_v45 }
 0x2a5   : > { %2590 = vst [vmem:[#allocation2 + $0xa8] sm:$0xff] %v2558_v57  ;;  %2592 = vst [vmem:[#allocation2 + $0xb8] sm:$0xff] %v2560_v60  ;;  %v2809_v50 = vld [vmem:[#allocation9 + $0x40] sm:$0xff] (!%p13420_p8)  ;;  %v13550_v52 = vcombine.high (!%p13420_p8), %v2929_v46, %v2933_v48  ;;  %v13549_v53 = vcombine.low (!%p13420_p8), %v2929_v46, %v2933_v48  ;;  %8987 = vmatprep.subr.bf16.mxu1 (!%p13420_p8), %v13422_v47  ;;  %v2608_v46 = vld [vmem:[#allocation2 + $0x18] sm:$0xff] (!%p13420_p8) }
 0x2a6   : > { %v2813_v51 = vld [vmem:[#allocation9 + $0x60] sm:$0xff] (!%p13420_p8)  ;;  %8988 = vmatpush1.bf16.msra.mxu1 (!%p13420_p8), %v13421_v49  ;;  %v2624_v47 = vld [vmem:[#allocation2 + $0x98] sm:$0xff] (!%p13420_p8) }
 0x2a7   : > { %v13430_v54 = vcombine.high (!%p13420_p8), %v2809_v50, %v2813_v51  ;;  %v2937_v55 = vld [vmem:[#allocation9 + $0x440] sm:$0xff] (!%p13420_p8)  ;;  %9030 = vmatprep.subr.bf16.mxu0 (!%p13420_p8), %v13550_v52 }
 0x2a8   : > { %v2941_v56 = vld [vmem:[#allocation9 + $0x460] sm:$0xff] (!%p13420_p8)  ;;  %9031 = vmatpush1.bf16.msra.mxu0 (!%p13420_p8), %v13549_v53 }
 0x2a9   : > { %v2817_v57 = vld [vmem:[#allocation9 + $0x80] sm:$0xff] (!%p13420_p8)  ;;  %v13558_v58 = vcombine.high (!%p13420_p8), %v2937_v55, %v2941_v56  ;;  %8989 = vmatprep.subr.bf16.mxu1 (!%p13420_p8), %v13430_v54 }
 0x2aa   : > { %v2821_v60 = vld [vmem:[#allocation9 + $0xa0] sm:$0xff] (!%p13420_p8) }
 0x2ab   : > { %9032 = vmatprep.subr.bf16.mxu0 (!%p13420_p8), %v13558_v58  ;;  %v2989_v59 = vld [vmem:[#allocation9 + $0x5e0] sm:$0xff] (!%p13420_p8) }
 0x2df   : > { %v2399_v0 = vpop.f32.mrb[8].mxu0  ;;  %v2442_v4 = vpop.f32.mrb[8].mxu1 }
 0x2e0   : > { %v2545_v3 = vadd.f32 %v2399_v0, %v621_v61  ;;  %v2401_v5 = vpop.f32.mrb[9].mxu0  ;;  %v2547_v8 = vadd.f32 %v2442_v4, %v623_v62  ;;  %v2444_v10 = vpop.f32.mrb[9].mxu1  ;;  %v2945_v61 = vld [vmem:[#allocation9 + $0x480] sm:$0xff] (!%p13420_p8)  ;;  %v13557_v0 = vcombine.low (!%p13420_p8), %v2937_v55, %v2941_v56 }
 0x2e1   : > { %v2546_v9 = vadd.f32 %v2401_v5, %v622_v63  ;;  %v2403_v11 = vpop.f32.mrb[10].mxu0  ;;  %v2548_v14 = vadd.f32 %v2444_v10, %v624_v1  ;;  %v2446_v16 = vpop.f32.mrb[10].mxu1  ;;  %v2949_v62 = vld [vmem:[#allocation9 + $0x4a0] sm:$0xff] (!%p13420_p8)  ;;  %v13429_v63 = vcombine.low (!%p13420_p8), %v2809_v50, %v2813_v51  ;;  %v13438_v1 = vcombine.high (!%p13420_p8), %v2817_v57, %v2821_v60 }
 0x2e2   : > { %2577 = vst [vmem:[#allocation2 + $0x40] sm:$0xff] %v2545_v3  ;;  %v2561_v15 = vadd.f32 %v2403_v11, %v637_v2  ;;  %v2405_v17 = vpop.f32.mrb[11].mxu0  ;;  %2579 = vst [vmem:[#allocation2 + $0x50] sm:$0xff] %v2547_v8  ;;  %v2563_v18 = vadd.f32 %v2446_v16, %v639_v6  ;;  %v2448_v20 = vpop.f32.mrb[11].mxu1  ;;  %v13566_v2 = vcombine.high (!%p13420_p8), %v2945_v61, %v2949_v62  ;;  %v2825_v3 = vld [vmem:[#allocation9 + $0xc0] sm:$0xff] (!%p13420_p8)  ;;  %9033 = vmatpush1.bf16.msra.mxu0 (!%p13420_p8), %v13557_v0  ;;  %v2641_v16 = vlaneseq (!%p13420_p8) }
 0x2e3   : > { %2578 = vst [vmem:[#allocation2 + $0x48] sm:$0xff] %v2546_v9  ;;  %v2562_v19 = vadd.f32 %v2405_v17, %v638_v7  ;;  %2580 = vst [vmem:[#allocation2 + $0x58] sm:$0xff] %v2548_v14  ;;  %v2564_v21 = vadd.f32 %v2448_v20, %v640_v12  ;;  %v2829_v4 = vld [vmem:[#allocation9 + $0xe0] sm:$0xff] (!%p13420_p8)  ;;  %8990 = vmatpush1.bf16.msra.mxu1 (!%p13420_p8), %v13429_v63  ;;  %v13437_v7 = vcombine.low (!%p13420_p8), %v2817_v57, %v2821_v60 }
 0x2e4   : > { %2593 = vst [vmem:[#allocation2 + $0xc0] sm:$0xff] %v2561_v15  ;;  %2595 = vst [vmem:[#allocation2 + $0xd0] sm:$0xff] %v2563_v18  ;;  %v2953_v5 = vld [vmem:[#allocation9 + $0x4c0] sm:$0xff] (!%p13420_p8)  ;;  %8991 = vmatprep.subr.bf16.mxu1 (!%p13420_p8), %v13438_v1  ;;  %v13565_v8 = vcombine.low (!%p13420_p8), %v2945_v61, %v2949_v62  ;;  %v13446_v9 = vcombine.high (!%p13420_p8), %v2825_v3, %v2829_v4  ;;  %9034 = vmatprep.subr.bf16.mxu0 (!%p13420_p8), %v13566_v2 }
 0x2e5   : > { %2594 = vst [vmem:[#allocation2 + $0xc8] sm:$0xff] %v2562_v19  ;;  %2596 = vst [vmem:[#allocation2 + $0xd8] sm:$0xff] %v2564_v21  ;;  %v2957_v6 = vld [vmem:[#allocation9 + $0x4e0] sm:$0xff] (!%p13420_p8)  ;;  %v13445_v17 = vcombine.low (!%p13420_p8), %v2825_v3, %v2829_v4 }
 0x2e6   : > { %v13574_v10 = vcombine.high (!%p13420_p8), %v2953_v5, %v2957_v6  ;;  %v2833_v11 = vld [vmem:[#allocation9 + $0x100] sm:$0xff] (!%p13420_p8)  ;;  %9035 = vmatpush1.bf16.msra.mxu0 (!%p13420_p8), %v13565_v8  ;;  %v13573_v18 = vcombine.low (!%p13420_p8), %v2953_v5, %v2957_v6 }
 0x2e7   : > { %v2837_v12 = vld [vmem:[#allocation9 + $0x120] sm:$0xff] (!%p13420_p8)  ;;  %8992 = vmatpush1.bf16.msra.mxu1 (!%p13420_p8), %v13437_v7 }
 0x2e8   : > { %v2961_v14 = vld [vmem:[#allocation9 + $0x500] sm:$0xff] (!%p13420_p8)  ;;  %8993 = vmatprep.subr.bf16.mxu1 (!%p13420_p8), %v13446_v9  ;;  %v13454_v19 = vcombine.high (!%p13420_p8), %v2833_v11, %v2837_v12  ;;  %9036 = vmatprep.subr.bf16.mxu0 (!%p13420_p8), %v13574_v10 }
 0x2e9   : > { %v2965_v15 = vld [vmem:[#allocation9 + $0x520] sm:$0xff] (!%p13420_p8) }
 0x2ea   : > { %v13582_v20 = vcombine.high (!%p13420_p8), %v2961_v14, %v2965_v15  ;;  %v2841_v21 = vld [vmem:[#allocation9 + $0x140] sm:$0xff] (!%p13420_p8)  ;;  %9037 = vmatpush1.bf16.msra.mxu0 (!%p13420_p8), %v13573_v18 }
 0x2eb   : > { %8994 = vmatpush1.bf16.msra.mxu1 (!%p13420_p8), %v13445_v17  ;;  %v2865_v55 = vld [vmem:[#allocation9 + $0x200] sm:$0xff] (!%p13420_p8) }
 0x2ec   : > { %8995 = vmatprep.subr.bf16.mxu1 (!%p13420_p8), %v13454_v19  ;;  %9038 = vmatprep.subr.bf16.mxu0 (!%p13420_p8), %v13582_v20  ;;  %v2869_v56 = vld [vmem:[#allocation9 + $0x220] sm:$0xff] (!%p13420_p8) }
 0x2ed   : > { %v2993_v60 = vld [vmem:[#allocation9 + $0x600] sm:$0xff] (!%p13420_p8)  ;;  %v13486_v4 = vcombine.high (!%p13420_p8), %v2865_v55, %v2869_v56 }
 0x2ee   : > { %v2997_v61 = vld [vmem:[#allocation9 + $0x620] sm:$0xff] (!%p13420_p8) }
 0x2ef   : > { %v13614_v6 = vcombine.high (!%p13420_p8), %v2993_v60, %v2997_v61  ;;  %v2873_v7 = vld [vmem:[#allocation9 + $0x240] sm:$0xff] (!%p13420_p8) }
 0x2f0   : > { %v2877_v8 = vld [vmem:[#allocation9 + $0x260] sm:$0xff] (!%p13420_p8) }
 0x2f1   : > { %v3001_v10 = vld [vmem:[#allocation9 + $0x640] sm:$0xff] (!%p13420_p8) }
 0x2f2   : > { %v2881_v17 = vld [vmem:[#allocation9 + $0x280] sm:$0xff] (!%p13420_p8) }
 0x2f3   : > { %v2885_v18 = vld [vmem:[#allocation9 + $0x2a0] sm:$0xff] (!%p13420_p8) }
 0x2f4   : > { %v3009_v19 = vld [vmem:[#allocation9 + $0x680] sm:$0xff] (!%p13420_p8) }
 0x2f5   : > { %v3013_v20 = vld [vmem:[#allocation9 + $0x6a0] sm:$0xff] (!%p13420_p8) }
 0x31f   : > { %v2485_v25 = vpop.f32.mrb[12].mxu0  ;;  %v2528_v29 = vpop.f32.mrb[12].mxu1  ;;  %2604 = sbr.rel (%p13420_p8) target bundleno = 2825 (0xb09), region = 150 }
 0x320   : > { %v2549_v28 = vadd.f32 %v2485_v25, %v625_v22  ;;  %v2487_v30 = vpop.f32.mrb[13].mxu0  ;;  %v2551_v33 = vadd.f32 %v2528_v29, %v627_v23  ;;  %v2530_v35 = vpop.f32.mrb[13].mxu1  ;;  %v2845_v22 = vld [vmem:[#allocation9 + $0x160] sm:$0xff] (!%p13420_p8)  ;;  %v16671_v25 = vshrl.u32 (!%p13420_p8), %v2641_v16, 7 }
 0x321   : > { %v2550_v34 = vadd.f32 %v2487_v30, %v626_v24  ;;  %v2489_v36 = vpop.f32.mrb[14].mxu0  ;;  %v2552_v38 = vadd.f32 %v2530_v35, %v628_v26  ;;  %v2532_v39 = vpop.f32.mrb[14].mxu1  ;;  %v2969_v23 = vld [vmem:[#allocation9 + $0x540] sm:$0xff] (!%p13420_p8)  ;;  %v13453_v26 = vcombine.low (!%p13420_p8), %v2833_v11, %v2837_v12  ;;  %v13485_v12 = vcombine.low (!%p13420_p8), %v2865_v55, %v2869_v56 }
 0x322   : > { %2581 = vst [vmem:[#allocation2 + $0x60] sm:$0xff] %v2549_v28  ;;  %v2565_v13 = vadd.f32 %v2489_v36, %v641_v27  ;;  %v2491_v40 = vpop.f32.mrb[15].mxu0  ;;  %2583 = vst [vmem:[#allocation2 + $0x70] sm:$0xff] %v2551_v33  ;;  %v2567_v41 = vadd.f32 %v2532_v39, %v643_v31  ;;  %v2534_v43 = vpop.f32.mrb[15].mxu1  ;;  %v2973_v24 = vld [vmem:[#allocation9 + $0x560] sm:$0xff] (!%p13420_p8)  ;;  %v13581_v27 = vcombine.low (!%p13420_p8), %v2961_v14, %v2965_v15  ;;  %v16677_v35 = vsub.s32 (!%p13420_p8), 3, %v16671_v25 }
 0x323   : > { %2582 = vst [vmem:[#allocation2 + $0x68] sm:$0xff] %v2550_v34  ;;  %v2566_v42 = vadd.f32 %v2491_v40, %v642_v32  ;;  %2584 = vst [vmem:[#allocation2 + $0x78] sm:$0xff] %v2552_v38  ;;  %v2568_v44 = vadd.f32 %v2534_v43, %v644_v37  ;;  %v13462_v28 = vcombine.high (!%p13420_p8), %v2841_v21, %v2845_v22  ;;  %v2849_v30 = vld [vmem:[#allocation9 + $0x180] sm:$0xff] (!%p13420_p8)  ;;  %v16674_v34 = vsub.s32 (!%p13420_p8), 1, %v16671_v25  ;;  %v2622_v43 = vld [vmem:[#allocation2 + $0x88] sm:$0xff] (!%p13420_p8) }
 0x324   : > { %2597 = vst [vmem:[#allocation2 + $0xe0] sm:$0xff] %v2565_v13  ;;  %2599 = vst [vmem:[#allocation2 + $0xf0] sm:$0xff] %v2567_v41  ;;  %v13590_v29 = vcombine.high (!%p13420_p8), %v2969_v23, %v2973_v24  ;;  %v2853_v31 = vld [vmem:[#allocation9 + $0x1a0] sm:$0xff] (!%p13420_p8)  ;;  %8996 = vmatpush1.bf16.msra.mxu1 (!%p13420_p8), %v13453_v26  ;;  %v13461_v36 = vcombine.low (!%p13420_p8), %v2841_v21, %v2845_v22  ;;  %9039 = vmatpush1.bf16.msra.mxu0 (!%p13420_p8), %v13581_v27  ;;  %v16698_v55 = vsub.s32 (!%p13420_p8), 5, %v16671_v25 }
 0x325   : > { %2598 = vst [vmem:[#allocation2 + $0xe8] sm:$0xff] %v2566_v42  ;;  %2600 = vst [vmem:[#allocation2 + $0xf8] sm:$0xff] %v2568_v44  ;;  %v2977_v32 = vld [vmem:[#allocation9 + $0x580] sm:$0xff] (!%p13420_p8)  ;;  %8997 = vmatprep.subr.bf16.mxu1 (!%p13420_p8), %v13462_v28  ;;  %v13589_v37 = vcombine.low (!%p13420_p8), %v2969_v23, %v2973_v24  ;;  %v13470_v38 = vcombine.high (!%p13420_p8), %v2849_v30, %v2853_v31  ;;  %v2606_v42 = vld [vmem:[#allocation2 + $0x8] sm:$0xff] (!%p13420_p8)  ;;  %v13469_v49 = vcombine.low (!%p13420_p8), %v2849_v30, %v2853_v31 }
 0x326   : > { %v2981_v33 = vld [vmem:[#allocation9 + $0x5a0] sm:$0xff]  ;;  %9040 = vmatprep.subr.bf16.mxu0 %v13590_v29  ;;  %v16679_v44 = vld [vmem:[#allocation7] sm:$0xff]  ;;  %v13613_v14 = vcombine.low %v2993_v60, %v2997_v61  ;;  %v13494_v15 = vcombine.high %v2873_v7, %v2877_v8  ;;  %v13493_v21 = vcombine.low %v2873_v7, %v2877_v8  ;;  %v13502_v23 = vcombine.high %v2881_v17, %v2885_v18 }
 0x327   : > { %v2857_v13 = vld [vmem:[#allocation9 + $0x1c0] sm:$0xff]  ;;  %v13598_v41 = vcombine.high %v2977_v32, %v2981_v33  ;;  %v2648_v45 = vrot.slane %v16679_v44, %v16674_v34  ;;  %v2656_v48 = vrot.slane %v16679_v44, %v16677_v35  ;;  %v13597_v50 = vcombine.low %v2977_v32, %v2981_v33  ;;  %v2605_v61 = vld [vmem:[#allocation2] sm:$0xff] }
 0x328   : > { %v2861_v39 = vld [vmem:[#allocation9 + $0x1e0] sm:$0xff]  ;;  %8998 = vmatpush1.bf16.msra.mxu1 %v13461_v36  ;;  %9041 = vmatpush1.bf16.msra.mxu0 %v13589_v37  ;;  %v13630_v24 = vcombine.high %v3009_v19, %v3013_v20  ;;  %v13501_v30 = vcombine.low %v2881_v17, %v2885_v18  ;;  %v13629_v31 = vcombine.low %v3009_v19, %v3013_v20 }
 0x329   : > { %v2985_v40 = vld [vmem:[#allocation9 + $0x5c0] sm:$0xff]  ;;  %8999 = vmatprep.subr.bf16.mxu1 %v13470_v38  ;;  %v13478_v51 = vcombine.high %v2857_v13, %v2861_v39  ;;  %v2722_v52 = vadd.f32 %v2648_v45, %v2606_v42  ;;  %v2738_v53 = vadd.f32 %v2648_v45, %v2622_v43  ;;  %9042 = vmatprep.subr.bf16.mxu0 %v13598_v41 }
 0x32a   : > { %v13606_v54 = vcombine.high %v2985_v40, %v2989_v59  ;;  %v2724_v57 = vadd.f32 %v2656_v48, %v2608_v46  ;;  %v2740_v58 = vadd.f32 %v2656_v48, %v2624_v47  ;;  %v13477_v0 = vcombine.low %v2857_v13, %v2861_v39  ;;  %v3005_v11 = vld [vmem:[#allocation9 + $0x660] sm:$0xff] }
 0x32b   : > { %v2754_v62 = vmax.f32 %v2722_v52, 0.0  ;;  %v2770_v63 = vmax.f32 %v2738_v53, 0.0  ;;  %v13605_v3 = vcombine.low %v2985_v40, %v2989_v59  ;;  %v13622_v16 = vcombine.high %v3001_v10, %v3005_v11  ;;  %v2889_v26 = vld [vmem:[#allocation9 + $0x2c0] sm:$0xff] }
 0x32c   : > { %9000 = vmatpush1.bf16.msra.mxu1 %v13469_v49  ;;  %v2756_v1 = vmax.f32 %v2724_v57, 0.0  ;;  %v2772_v2 = vmax.f32 %v2740_v58, 0.0  ;;  %9043 = vmatpush1.bf16.msra.mxu0 %v13597_v50  ;;  %v13621_v22 = vcombine.low %v3001_v10, %v3005_v11  ;;  %v2893_v27 = vld [vmem:[#allocation9 + $0x2e0] sm:$0xff]  ;;  %v16692_v47 = vsub.s32 0, %v16671_v25 }
 0x32d   : > { %9001 = vmatprep.subr.bf16.mxu1 %v13478_v51  ;;  %v16685_v5 = vpack.c.bf16 %v2770_v63, %v2754_v62  ;;  %9044 = vmatprep.subr.bf16.mxu0 %v13606_v54  ;;  %v3017_v28 = vld [vmem:[#allocation9 + $0x6c0] sm:$0xff]  ;;  %v13510_v32 = vcombine.high %v2889_v26, %v2893_v27  ;;  %v13509_v39 = vcombine.low %v2889_v26, %v2893_v27  ;;  %v16695_v49 = vsub.s32 2, %v16671_v25  ;;  %v2621_v62 = vld [vmem:[#allocation2 + $0x80] sm:$0xff] }
 0x32e   : > { %v16687_v9 = vpack.c.bf16 %v2772_v2, %v2756_v1  ;;  %v3021_v29 = vld [vmem:[#allocation9 + $0x6e0] sm:$0xff]  ;;  %v2644_v58 = vrot.slane %v16679_v44, %v16692_v47  ;;  %v2664_v10 = vrot.slane %v16679_v44, %v16698_v55 }
 0x32f   : > { %9019 = vmatprep.mubr.bf16.mxu1 %v16685_v5  ;;  %v13638_v33 = vcombine.high %v3017_v28, %v3021_v29  ;;  %v2897_v36 = vld [vmem:[#allocation9 + $0x300] sm:$0xff]  ;;  %v13637_v40 = vcombine.low %v3017_v28, %v3021_v29  ;;  %v2652_v63 = vrot.slane %v16679_v44, %v16695_v49 }
 0x330   : > { %9002 = vmatpush1.bf16.msra.mxu1 %v13477_v0  ;;  %9062 = vmatprep.mubr.bf16.mxu0 %v16687_v9  ;;  %v2901_v37 = vld [vmem:[#allocation9 + $0x320] sm:$0xff] }
 0x331   : > { %9045 = vmatpush1.bf16.msra.mxu0 %v13605_v3  ;;  %9003 = vmatprep.subr.bf16.mxu1 %v13486_v4  ;;  %v3025_v38 = vld [vmem:[#allocation9 + $0x700] sm:$0xff]  ;;  %v13518_v41 = vcombine.high %v2897_v36, %v2901_v37  ;;  %v13517_v48 = vcombine.low %v2897_v36, %v2901_v37 }
 0x332   : > { %9046 = vmatprep.subr.bf16.mxu0 %v13614_v6  ;;  %v3029_v13 = vld [vmem:[#allocation9 + $0x720] sm:$0xff] }
 0x333   : > { %v13646_v42 = vcombine.high %v3025_v38, %v3029_v13  ;;  %v2905_v43 = vld [vmem:[#allocation9 + $0x340] sm:$0xff]  ;;  %v13645_v50 = vcombine.low %v3025_v38, %v3029_v13 }
 0x334   : > { %9004 = vmatpush1.bf16.msra.mxu1 %v13485_v12  ;;  %v2909_v59 = vld [vmem:[#allocation9 + $0x360] sm:$0xff]  ;;  %v2721_v12 = vadd.f32 %v2644_v58, %v2605_v61 }
 0x335   : > { %9047 = vmatpush1.bf16.msra.mxu0 %v13613_v14  ;;  %9005 = vmatprep.subr.bf16.mxu1 %v13494_v15  ;;  %v3033_v45 = vld [vmem:[#allocation9 + $0x740] sm:$0xff]  ;;  %v13526_v51 = vcombine.high %v2905_v43, %v2909_v59  ;;  %v13525_v60 = vcombine.low %v2905_v43, %v2909_v59  ;;  %v2737_v14 = vadd.f32 %v2644_v58, %v2621_v62  ;;  %v2610_v15 = vld [vmem:[#allocation2 + $0x28] sm:$0xff] }
 0x336   : > { %9048 = vmatprep.subr.bf16.mxu0 %v13622_v16  ;;  %v3037_v46 = vld [vmem:[#allocation9 + $0x760] sm:$0xff]  ;;  %v2626_v16 = vld [vmem:[#allocation2 + $0xa8] sm:$0xff]  ;;  %v2726_v26 = vadd.f32 %v2664_v10, %v2610_v15  ;;  %v2753_v28 = vmax.f32 %v2721_v12, 0.0 }
 0x337   : > { %v13654_v52 = vcombine.high %v3033_v45, %v3037_v46  ;;  %v2913_v53 = vld [vmem:[#allocation9 + $0x380] sm:$0xff]  ;;  %v13653_v0 = vcombine.low %v3033_v45, %v3037_v46  ;;  %v2742_v27 = vadd.f32 %v2664_v10, %v2626_v16  ;;  %v2769_v29 = vmax.f32 %v2737_v14, 0.0  ;;  %v2838_v14 = vld [vmem:[#allocation9 + $0x128] sm:$0xff] }
 0x338   : > { %9006 = vmatpush1.bf16.msra.mxu1 %v13493_v21  ;;  %v2917_v54 = vld [vmem:[#allocation9 + $0x3a0] sm:$0xff] }
 0x339   : > { %9049 = vmatpush1.bf16.msra.mxu0 %v13621_v22  ;;  %9007 = vmatprep.subr.bf16.mxu1 %v13502_v23  ;;  %v3041_v56 = vld [vmem:[#allocation9 + $0x780] sm:$0xff]  ;;  %v13534_v1 = vcombine.high %v2913_v53, %v2917_v54  ;;  %v13533_v17 = vcombine.low %v2913_v53, %v2917_v54  ;;  %v2802_v23 = vld [vmem:[#allocation9 + $0x8] sm:$0xff]  ;;  %v16706_v43 = vpack.c.bf16 %v2769_v29, %v2753_v28 }
 0x33a   : > { %9050 = vmatprep.subr.bf16.mxu0 %v13630_v24  ;;  %v3045_v57 = vld [vmem:[#allocation9 + $0x7a0] sm:$0xff]  ;;  %v2806_v24 = vld [vmem:[#allocation9 + $0x28] sm:$0xff] }
 0x33b   : > { %v2607_v2 = vld [vmem:[#allocation2 + $0x10] sm:$0xff]  ;;  %v13662_v4 = vcombine.high %v3041_v56, %v3045_v57  ;;  %v13661_v20 = vcombine.low %v3041_v56, %v3045_v57  ;;  %v13424_v38 = vcombine.high %v2802_v23, %v2806_v24  ;;  %v13423_v46 = vcombine.low %v2802_v23, %v2806_v24  ;;  %v2818_v53 = vld [vmem:[#allocation9 + $0x88] sm:$0xff] }
 0x33c   : > { %9008 = vmatpush1.bf16.msra.mxu1 %v13501_v30  ;;  %v2623_v3 = vld [vmem:[#allocation2 + $0x90] sm:$0xff]  ;;  %v2723_v18 = vadd.f32 %v2652_v63, %v2607_v2  ;;  %v2822_v54 = vld [vmem:[#allocation9 + $0xa8] sm:$0xff] }
 0x33d   : > { %9051 = vmatpush1.bf16.msra.mxu0 %v13629_v31  ;;  %9009 = vmatprep.subr.bf16.mxu1 %v13510_v32  ;;  %v2921_v6 = vld [vmem:[#allocation9 + $0x3c0] sm:$0xff]  ;;  %v2739_v19 = vadd.f32 %v2652_v63, %v2623_v3  ;;  %v13440_v62 = vcombine.high %v2818_v53, %v2822_v54  ;;  %v2850_v29 = vld [vmem:[#allocation9 + $0x188] sm:$0xff] }
 0x33e   : > { %9052 = vmatprep.subr.bf16.mxu0 %v13638_v33  ;;  %v2925_v7 = vld [vmem:[#allocation9 + $0x3e0] sm:$0xff]  ;;  %v2755_v33 = vmax.f32 %v2723_v18, 0.0 }
 0x33f   : > { %v3049_v8 = vld [vmem:[#allocation9 + $0x7c0] sm:$0xff]  ;;  %v13542_v21 = vcombine.high %v2921_v6, %v2925_v7  ;;  %v13541_v32 = vcombine.low %v2921_v6, %v2925_v7  ;;  %v2771_v36 = vmax.f32 %v2739_v19, 0.0 }
 0x340   : > { %9010 = vmatpush1.bf16.msra.mxu1 %v13509_v39  ;;  %v3053_v11 = vld [vmem:[#allocation9 + $0x7e0] sm:$0xff]  ;;  %v2810_v39 = vld [vmem:[#allocation9 + $0x48] sm:$0xff] }
 0x341   : > { %9053 = vmatpush1.bf16.msra.mxu0 %v13637_v40  ;;  %9011 = vmatprep.subr.bf16.mxu1 %v13518_v41  ;;  %v13670_v22 = vcombine.high %v3049_v8, %v3053_v11  ;;  %v3057_v30 = vld [vmem:[#allocation9 + $0x800] sm:$0xff]  ;;  %v13669_v37 = vcombine.low %v3049_v8, %v3053_v11  ;;  %v2814_v40 = vld [vmem:[#allocation9 + $0x68] sm:$0xff]  ;;  %v2758_v41 = vmax.f32 %v2726_v26, 0.0 }
 0x342   : > { %9054 = vmatprep.subr.bf16.mxu0 %v13646_v42  ;;  %v3061_v31 = vld [vmem:[#allocation9 + $0x820] sm:$0xff]  ;;  %v2774_v42 = vmax.f32 %v2742_v27, 0.0  ;;  %v2834_v11 = vld [vmem:[#allocation9 + $0x108] sm:$0xff] }
 0x343   : > { %v13678_v13 = vcombine.high %v3057_v30, %v3061_v31  ;;  %v3065_v59 = vld [vmem:[#allocation9 + $0x840] sm:$0xff]  ;;  %v13455_v23 = vcombine.low %v2834_v11, %v2838_v14 }
 0x344   : > { %9012 = vmatpush1.bf16.msra.mxu1 %v13517_v48  ;;  %v3069_v45 = vld [vmem:[#allocation9 + $0x860] sm:$0xff]  ;;  %v16708_v48 = vpack.c.bf16 %v2771_v36, %v2755_v33  ;;  %v16710_v56 = vpack.c.bf16 %v2774_v42, %v2758_v41 }
 0x345   : > { %9055 = vmatpush1.bf16.msra.mxu0 %v13645_v50  ;;  %9013 = vmatprep.subr.bf16.mxu1 %v13526_v51  ;;  %v13677_v50 = vcombine.low %v3057_v30, %v3061_v31  ;;  %v13432_v51 = vcombine.high %v2810_v39, %v2814_v40  ;;  %v3073_v57 = vld [vmem:[#allocation9 + $0x880] sm:$0xff]  ;;  %v13685_v61 = vcombine.low %v3065_v59, %v3069_v45  ;;  %v2854_v31 = vld [vmem:[#allocation9 + $0x1a8] sm:$0xff] }
 0x346   : > { %9056 = vmatprep.subr.bf16.mxu0 %v13654_v52  ;;  %v13686_v52 = vcombine.high %v3065_v59, %v3069_v45  ;;  %v3077_v58 = vld [vmem:[#allocation9 + $0x8a0] sm:$0xff]  ;;  %v13472_v36 = vcombine.high %v2850_v29, %v2854_v31  ;;  %v13471_v41 = vcombine.low %v2850_v29, %v2854_v31 }
 0x347   : > { %v13694_v63 = vcombine.high %v3073_v57, %v3077_v58  ;;  %v3081_v2 = vld [vmem:[#allocation9 + $0x8c0] sm:$0xff]  ;;  %v13693_v6 = vcombine.low %v3073_v57, %v3077_v58 }
 0x348   : > { %9014 = vmatpush1.bf16.msra.mxu1 %v13525_v60  ;;  %v13431_v60 = vcombine.low %v2810_v39, %v2814_v40  ;;  %v3085_v3 = vld [vmem:[#allocation9 + $0x8e0] sm:$0xff]  ;;  %v2862_v40 = vld [vmem:[#allocation9 + $0x1e8] sm:$0xff] }
 0x349   : > { %9057 = vmatpush1.bf16.msra.mxu0 %v13653_v0  ;;  %9015 = vmatprep.subr.bf16.mxu1 %v13534_v1  ;;  %v2826_v0 = vld [vmem:[#allocation9 + $0xc8] sm:$0xff]  ;;  %v3089_v8 = vld [vmem:[#allocation9 + $0x900] sm:$0xff]  ;;  %v13702_v12 = vcombine.high %v3081_v2, %v3085_v3  ;;  %v13701_v16 = vcombine.low %v3081_v2, %v3085_v3 }
 0x34a   : > { %9058 = vmatprep.subr.bf16.mxu0 %v13662_v4  ;;  %v2830_v1 = vld [vmem:[#allocation9 + $0xe8] sm:$0xff]  ;;  %v13439_v4 = vcombine.low %v2818_v53, %v2822_v54  ;;  %v3093_v10 = vld [vmem:[#allocation9 + $0x920] sm:$0xff] }
 0x34b   : > { %v13448_v7 = vcombine.high %v2826_v0, %v2830_v1  ;;  %v13447_v15 = vcombine.low %v2826_v0, %v2830_v1  ;;  %v3097_v18 = vld [vmem:[#allocation9 + $0x940] sm:$0xff]  ;;  %v13709_v24 = vcombine.low %v3089_v8, %v3093_v10 }
 0x34c   : > { %9016 = vmatpush1.bf16.msra.mxu1 %v13533_v17  ;;  %v13456_v17 = vcombine.high %v2834_v11, %v2838_v14  ;;  %v3101_v19 = vld [vmem:[#allocation9 + $0x960] sm:$0xff] }
 0x34d   : > { %9059 = vmatpush1.bf16.msra.mxu0 %v13661_v20  ;;  %9017 = vmatprep.subr.bf16.mxu1 %v13542_v21  ;;  %v2842_v20 = vld [vmem:[#allocation9 + $0x148] sm:$0xff]  ;;  %v13710_v21 = vcombine.high %v3089_v8, %v3093_v10  ;;  %v3105_v27 = vld [vmem:[#allocation9 + $0x980] sm:$0xff]  ;;  %v13718_v30 = vcombine.high %v3097_v18, %v3101_v19  ;;  %v13717_v33 = vcombine.low %v3097_v18, %v3101_v19 }
 0x34e   : > { %9060 = vmatprep.subr.bf16.mxu0 %v13670_v22  ;;  %v2846_v22 = vld [vmem:[#allocation9 + $0x168] sm:$0xff]  ;;  %v3109_v28 = vld [vmem:[#allocation9 + $0x9a0] sm:$0xff] }
 0x34f   : > { %v13464_v26 = vcombine.high %v2842_v20, %v2846_v22  ;;  %v13726_v39 = vcombine.high %v3105_v27, %v3109_v28  ;;  %v13725_v42 = vcombine.low %v3105_v27, %v3109_v28  ;;  %v3121_v45 = vld [vmem:[#allocation9 + $0xa00] sm:$0xff]  ;;  %v2886_v8 = vld [vmem:[#allocation9 + $0x2a8] sm:$0xff] }
 0x350   : > { %9018 = vmatpush1.bf16.msra.mxu1 %v13541_v32  ;;  %v13463_v32 = vcombine.low %v2842_v20, %v2846_v22  ;;  %v3129_v58 = vld [vmem:[#allocation9 + $0xa40] sm:$0xff]  ;;  %v2894_v18 = vld [vmem:[#allocation9 + $0x2e8] sm:$0xff] }
 0x351   : > { %9061 = vmatpush1.bf16.msra.mxu0 %v13669_v37  ;;  %9331 = vmatprep.subr.bf16.mxu1 %v13424_v38  ;;  %v3113_v37 = vld [vmem:[#allocation9 + $0x9c0] sm:$0xff]  ;;  %v2902_v27 = vld [vmem:[#allocation9 + $0x328] sm:$0xff] }
 0x352   : > { %9073 = vmatprep.subr.bf16.mxu0 %v13678_v13  ;;  %v3117_v38 = vld [vmem:[#allocation9 + $0x9e0] sm:$0xff]  ;;  %v2858_v13 = vld [vmem:[#allocation9 + $0x1c8] sm:$0xff] }
 0x353   : > { %9020 = vmatmul.mubr.bf16.vlgmr.msra.gmra.mrb[0].mxu1 %v16706_v43  ;;  %v13480_v59 = vcombine.high %v2858_v13, %v2862_v40  ;;  %v13479_v53 = vcombine.low %v2858_v13, %v2862_v40  ;;  %v13733_v54 = vcombine.low %v3113_v37, %v3117_v38  ;;  %v3137_v3 = vld [vmem:[#allocation9 + $0xa80] sm:$0xff]  ;;  %v16717_v13 = vsub.s32 4, %v16671_v25 }
 0x354   : > { %9063 = vmatmul.mubr.bf16.vlgmr.msra.gmra.mrb[0].mxu0 %v16708_v48  ;;  %9332 = vmatpush1.bf16.msra.mxu1 %v13423_v46  ;;  %v3125_v46 = vld [vmem:[#allocation9 + $0xa20] sm:$0xff] }
 0x355   : > { %9074 = vmatpush1.bf16.msra.mxu0 %v13677_v50  ;;  %9333 = vmatprep.subr.bf16.mxu1 %v13432_v51  ;;  %v2866_v50 = vld [vmem:[#allocation9 + $0x208] sm:$0xff]  ;;  %v13734_v51 = vcombine.high %v3113_v37, %v3117_v38  ;;  %v13741_v1 = vcombine.low %v3121_v45, %v3125_v46  ;;  %v3145_v14 = vld [vmem:[#allocation9 + $0xac0] sm:$0xff] }
 0x356   : > { %9075 = vmatprep.subr.bf16.mxu0 %v13686_v52  ;;  %9105 = vmatprep.mubr.bf16.mxu0 %v16710_v56  ;;  %v2870_v52 = vld [vmem:[#allocation9 + $0x228] sm:$0xff]  ;;  %v3153_v22 = vld [vmem:[#allocation9 + $0xb00] sm:$0xff] }
 0x357   : > { %9363 = vmatprep.mubr.bf16.mxu1 %v16685_v5  ;;  %v13488_v57 = vcombine.high %v2866_v50, %v2870_v52  ;;  %v13487_v0 = vcombine.low %v2866_v50, %v2870_v52  ;;  %v3161_v31 = vld [vmem:[#allocation9 + $0xb40] sm:$0xff]  ;;  %v2910_v37 = vld [vmem:[#allocation9 + $0x368] sm:$0xff]  ;;  %v16720_v50 = vsub.s32 7, %v16671_v25 }
 0x358   : > { %9334 = vmatpush1.bf16.msra.mxu1 %v13431_v60  ;;  %v3133_v60 = vld [vmem:[#allocation9 + $0xa60] sm:$0xff]  ;;  %v2922_v52 = vld [vmem:[#allocation9 + $0x3c8] sm:$0xff] }
 0x359   : > { %9076 = vmatpush1.bf16.msra.mxu0 %v13685_v61  ;;  %9335 = vmatprep.subr.bf16.mxu1 %v13440_v62  ;;  %v2874_v61 = vld [vmem:[#allocation9 + $0x248] sm:$0xff]  ;;  %v13742_v62 = vcombine.high %v3121_v45, %v3125_v46  ;;  %v13749_v11 = vcombine.low %v3129_v58, %v3133_v60 }
 0x35a   : > { %9077 = vmatprep.subr.bf16.mxu0 %v13694_v63  ;;  %v2878_v63 = vld [vmem:[#allocation9 + $0x268] sm:$0xff] }
 0x35b   : > { %v13496_v2 = vcombine.high %v2874_v61, %v2878_v63  ;;  %v13495_v10 = vcombine.low %v2874_v61, %v2878_v63  ;;  %v2918_v46 = vld [vmem:[#allocation9 + $0x3a8] sm:$0xff]  ;;  %v3181_v61 = vld [vmem:[#allocation9 + $0xbe0] sm:$0xff]  ;;  %v2625_v63 = vld [vmem:[#allocation2 + $0xa0] sm:$0xff] }
 0x35c   : > { %9336 = vmatpush1.bf16.msra.mxu1 %v13439_v4  ;;  %v3141_v4 = vld [vmem:[#allocation9 + $0xaa0] sm:$0xff] }
 0x35d   : > { %9078 = vmatpush1.bf16.msra.mxu0 %v13693_v6  ;;  %9337 = vmatprep.subr.bf16.mxu1 %v13448_v7  ;;  %v2882_v6 = vld [vmem:[#allocation9 + $0x288] sm:$0xff]  ;;  %v13750_v7 = vcombine.high %v3129_v58, %v3133_v60  ;;  %v13757_v20 = vcombine.low %v3137_v3, %v3141_v4  ;;  %v3177_v60 = vld [vmem:[#allocation9 + $0xbc0] sm:$0xff] }
 0x35e   : > { %9079 = vmatprep.subr.bf16.mxu0 %v13702_v12  ;;  %v13504_v12 = vcombine.high %v2882_v6, %v2886_v8  ;;  %v13503_v19 = vcombine.low %v2882_v6, %v2886_v8 }
 0x360   : > { %9338 = vmatpush1.bf16.msra.mxu1 %v13447_v15  ;;  %v3149_v15 = vld [vmem:[#allocation9 + $0xae0] sm:$0xff] }
 0x361   : > { %9080 = vmatpush1.bf16.msra.mxu0 %v13701_v16  ;;  %9339 = vmatprep.subr.bf16.mxu1 %v13456_v17  ;;  %v2890_v16 = vld [vmem:[#allocation9 + $0x2c8] sm:$0xff]  ;;  %v13758_v17 = vcombine.high %v3137_v3, %v3141_v4  ;;  %v13765_v29 = vcombine.low %v3145_v14, %v3149_v15  ;;  %v2672_v3 = vrot.slane %v16679_v44, %v16720_v50 }
 0x362   : > { %9081 = vmatprep.subr.bf16.mxu0 %v13710_v21  ;;  %v13512_v21 = vcombine.high %v2890_v16, %v2894_v18  ;;  %v13511_v28 = vcombine.low %v2890_v16, %v2894_v18  ;;  %v3189_v18 = vld [vmem:[#allocation9 + $0xc20] sm:$0xff] }
 0x364   : > { %9340 = vmatpush1.bf16.msra.mxu1 %v13455_v23  ;;  %v3157_v23 = vld [vmem:[#allocation9 + $0xb20] sm:$0xff] }
 0x365   : > { %9082 = vmatpush1.bf16.msra.mxu0 %v13709_v24  ;;  %9341 = vmatprep.subr.bf16.mxu1 %v13464_v26  ;;  %v2898_v24 = vld [vmem:[#allocation9 + $0x308] sm:$0xff]  ;;  %v13766_v26 = vcombine.high %v3145_v14, %v3149_v15  ;;  %v13798_v14 = vcombine.high %v3177_v60, %v3181_v61 }
 0x366   : > { %9083 = vmatprep.subr.bf16.mxu0 %v13718_v30  ;;  %v13520_v30 = vcombine.high %v2898_v24, %v2902_v27  ;;  %v13519_v38 = vcombine.low %v2898_v24, %v2902_v27  ;;  %v2934_v15 = vld [vmem:[#allocation9 + $0x428] sm:$0xff] }
 0x367   : > { %v2938_v24 = vld [vmem:[#allocation9 + $0x448] sm:$0xff] }
 0x368   : > { %9342 = vmatpush1.bf16.msra.mxu1 %v13463_v32  ;;  %v3165_v32 = vld [vmem:[#allocation9 + $0xb60] sm:$0xff] }
 0x369   : > { %9084 = vmatpush1.bf16.msra.mxu0 %v13717_v33  ;;  %9343 = vmatprep.subr.bf16.mxu1 %v13472_v36  ;;  %v2906_v33 = vld [vmem:[#allocation9 + $0x348] sm:$0xff]  ;;  %v13774_v36 = vcombine.high %v3153_v22, %v3157_v23  ;;  %v13782_v45 = vcombine.high %v3161_v31, %v3165_v32 }
 0x36a   : > { %9085 = vmatprep.subr.bf16.mxu0 %v13726_v39  ;;  %v13773_v39 = vcombine.low %v3153_v22, %v3157_v23  ;;  %v13528_v40 = vcombine.high %v2906_v33, %v2910_v37 }
 0x36c   : > { %9344 = vmatpush1.bf16.msra.mxu1 %v13471_v41  ;;  %v3169_v41 = vld [vmem:[#allocation9 + $0xb80] sm:$0xff] }
 0x36d   : > { %9086 = vmatpush1.bf16.msra.mxu0 %v13725_v42  ;;  %9345 = vmatprep.subr.bf16.mxu1 %v13480_v59  ;;  %v3173_v42 = vld [vmem:[#allocation9 + $0xba0] sm:$0xff]  ;;  %v2914_v59 = vld [vmem:[#allocation9 + $0x388] sm:$0xff] }
 0x36e   : > { %9087 = vmatprep.subr.bf16.mxu0 %v13734_v51  ;;  %v13527_v51 = vcombine.low %v2906_v33, %v2910_v37  ;;  %v13536_v58 = vcombine.high %v2914_v59, %v2918_v46  ;;  %v13535_v4 = vcombine.low %v2914_v59, %v2918_v46  ;;  %v13789_v8 = vcombine.low %v3169_v41, %v3173_v42  ;;  %v3201_v37 = vld [vmem:[#allocation9 + $0xc80] sm:$0xff] }
 0x370   : > { %9346 = vmatpush1.bf16.msra.mxu1 %v13479_v53  ;;  %v2926_v53 = vld [vmem:[#allocation9 + $0x3e8] sm:$0xff] }
 0x371   : > { %9088 = vmatpush1.bf16.msra.mxu0 %v13733_v54  ;;  %9347 = vmatprep.subr.bf16.mxu1 %v13488_v57  ;;  %v2660_v54 = vrot.slane %v16679_v44, %v16717_v13  ;;  %v13781_v57 = vcombine.low %v3161_v31, %v3165_v32 }
 0x372   : > { %9089 = vmatprep.subr.bf16.mxu0 %v13742_v62  ;;  %v2609_v62 = vld [vmem:[#allocation2 + $0x20] sm:$0xff] }
 0x373   : > { %v2725_v6 = vadd.f32 %v2660_v54, %v2609_v62  ;;  %v3217_v62 = vld [vmem:[#allocation9 + $0xd00] sm:$0xff] }
 0x374   : > { %9348 = vmatpush1.bf16.msra.mxu1 %v13487_v0  ;;  %v2612_v0 = vld [vmem:[#allocation2 + $0x38] sm:$0xff] }
 0x375   : > { %9090 = vmatpush1.bf16.msra.mxu0 %v13741_v1  ;;  %9349 = vmatprep.subr.bf16.mxu1 %v13496_v2  ;;  %v13790_v1 = vcombine.high %v3169_v41, %v3173_v42  ;;  %v2628_v2 = vld [vmem:[#allocation2 + $0xb8] sm:$0xff]  ;;  %v2728_v16 = vadd.f32 %v2672_v3, %v2612_v0 }
 0x376   : > { %9091 = vmatprep.subr.bf16.mxu0 %v13750_v7  ;;  %v2741_v7 = vadd.f32 %v2660_v54, %v2625_v63  ;;  %v2950_v41 = vld [vmem:[#allocation9 + $0x4a8] sm:$0xff]  ;;  %v3221_v63 = vld [vmem:[#allocation9 + $0xd20] sm:$0xff] }
 0x377   : > { %v2760_v27 = vmax.f32 %v2728_v16, 0.0  ;;  %v2962_v0 = vld [vmem:[#allocation9 + $0x508] sm:$0xff] }
 0x378   : > { %9350 = vmatpush1.bf16.msra.mxu1 %v13495_v10  ;;  %v13544_v10 = vcombine.high %v2922_v52, %v2926_v53  ;;  %v2773_v44 = vmax.f32 %v2741_v7, 0.0  ;;  %v3225_v7 = vld [vmem:[#allocation9 + $0xd40] sm:$0xff] }
 0x379   : > { %9092 = vmatpush1.bf16.msra.mxu0 %v13749_v11  ;;  %9351 = vmatprep.subr.bf16.mxu1 %v13504_v12  ;;  %v3185_v11 = vld [vmem:[#allocation9 + $0xc00] sm:$0xff]  ;;  %v2930_v12 = vld [vmem:[#allocation9 + $0x408] sm:$0xff] }
 0x37a   : > { %9093 = vmatprep.subr.bf16.mxu0 %v13758_v17  ;;  %v2744_v17 = vadd.f32 %v2672_v3, %v2628_v2  ;;  %v13552_v22 = vcombine.high %v2930_v12, %v2934_v15  ;;  %v13806_v23 = vcombine.high %v3185_v11, %v3189_v18  ;;  %v13551_v31 = vcombine.low %v2930_v12, %v2934_v15  ;;  %v2966_v2 = vld [vmem:[#allocation9 + $0x528] sm:$0xff] }
 0x37b   : > { %v13805_v33 = vcombine.low %v3185_v11, %v3189_v18  ;;  %v13838_v11 = vcombine.high %v3217_v62, %v3221_v63  ;;  %v2974_v12 = vld [vmem:[#allocation9 + $0x568] sm:$0xff]  ;;  %v13837_v15 = vcombine.low %v3217_v62, %v3221_v63  ;;  %v3237_v18 = vld [vmem:[#allocation9 + $0xda0] sm:$0xff] }
 0x37c   : > { %9352 = vmatpush1.bf16.msra.mxu1 %v13503_v19  ;;  %v13543_v19 = vcombine.low %v2922_v52, %v2926_v53  ;;  %v3213_v52 = vld [vmem:[#allocation9 + $0xce0] sm:$0xff]  ;;  %v2954_v53 = vld [vmem:[#allocation9 + $0x4c8] sm:$0xff] }
 0x37d   : > { %9094 = vmatpush1.bf16.msra.mxu0 %v13757_v20  ;;  %9353 = vmatprep.subr.bf16.mxu1 %v13512_v21  ;;  %v2757_v20 = vmax.f32 %v2725_v6, 0.0  ;;  %v13797_v21 = vcombine.low %v3177_v60, %v3181_v61  ;;  %v13584_v6 = vcombine.high %v2962_v0, %v2966_v2  ;;  %v3269_v62 = vld [vmem:[#allocation9 + $0xea0] sm:$0xff]  ;;  %v3010_v63 = vld [vmem:[#allocation9 + $0x688] sm:$0xff] }
 0x37e   : > { %9095 = vmatprep.subr.bf16.mxu0 %v13766_v26  ;;  %v2942_v26 = vld [vmem:[#allocation9 + $0x468] sm:$0xff] }
 0x37f   : > { %v16726_v32 = vpack.c.bf16 %v2773_v44, %v2757_v20  ;;  %v13559_v59 = vcombine.low %v2938_v24, %v2942_v26  ;;  %v2982_v44 = vld [vmem:[#allocation9 + $0x5a8] sm:$0xff] }
 0x380   : > { %9354 = vmatpush1.bf16.msra.mxu1 %v13511_v28  ;;  %v2776_v28 = vmax.f32 %v2744_v17, 0.0  ;;  %v3233_v17 = vld [vmem:[#allocation9 + $0xd80] sm:$0xff] }
 0x381   : > { %9096 = vmatpush1.bf16.msra.mxu0 %v13765_v29  ;;  %9355 = vmatprep.subr.bf16.mxu1 %v13520_v30  ;;  %v3193_v29 = vld [vmem:[#allocation9 + $0xc40] sm:$0xff] }
 0x382   : > { %9097 = vmatprep.subr.bf16.mxu0 %v13774_v36  ;;  %v3197_v30 = vld [vmem:[#allocation9 + $0xc60] sm:$0xff]  ;;  %v13560_v36 = vcombine.high %v2938_v24, %v2942_v26  ;;  %v16728_v42 = vpack.c.bf16 %v2776_v28, %v2760_v27  ;;  %v13854_v27 = vcombine.high %v3233_v17, %v3237_v18  ;;  %v2986_v28 = vld [vmem:[#allocation9 + $0x5c8] sm:$0xff] }
 0x383   : > { %v3241_v24 = vld [vmem:[#allocation9 + $0xdc0] sm:$0xff] }
 0x384   : > { %9356 = vmatpush1.bf16.msra.mxu1 %v13519_v38  ;;  %v3205_v38 = vld [vmem:[#allocation9 + $0xca0] sm:$0xff] }
 0x385   : > { %9098 = vmatpush1.bf16.msra.mxu0 %v13773_v39  ;;  %9357 = vmatprep.subr.bf16.mxu1 %v13528_v40  ;;  %v2946_v39 = vld [vmem:[#allocation9 + $0x488] sm:$0xff]  ;;  %v13814_v40 = vcombine.high %v3193_v29, %v3197_v30  ;;  %v13822_v54 = vcombine.high %v3201_v37, %v3205_v38  ;;  %v13821_v60 = vcombine.low %v3201_v37, %v3205_v38  ;;  %v3245_v26 = vld [vmem:[#allocation9 + $0xde0] sm:$0xff] }
 0x386   : > { %9099 = vmatprep.subr.bf16.mxu0 %v13782_v45  ;;  %v13813_v45 = vcombine.low %v3193_v29, %v3197_v30  ;;  %v13568_v46 = vcombine.high %v2946_v39, %v2950_v41  ;;  %v2990_v29 = vld [vmem:[#allocation9 + $0x5e8] sm:$0xff]  ;;  %v3253_v37 = vld [vmem:[#allocation9 + $0xe20] sm:$0xff] }
 0x387   : > { %v2994_v38 = vld [vmem:[#allocation9 + $0x608] sm:$0xff] }
 0x388   : > { %9358 = vmatpush1.bf16.msra.mxu1 %v13527_v51  ;;  %v3209_v51 = vld [vmem:[#allocation9 + $0xcc0] sm:$0xff] }
 0x389   : > { %9100 = vmatpush1.bf16.msra.mxu0 %v13781_v57  ;;  %9359 = vmatprep.subr.bf16.mxu1 %v13536_v58  ;;  %v2958_v57 = vld [vmem:[#allocation9 + $0x4e8] sm:$0xff]  ;;  %v13567_v58 = vcombine.low %v2946_v39, %v2950_v41  ;;  %v13862_v39 = vcombine.high %v3241_v24, %v3245_v26  ;;  %v13607_v41 = vcombine.low %v2986_v28, %v2990_v29 }
 0x38a   : > { %9101 = vmatprep.subr.bf16.mxu0 %v13790_v1  ;;  %v13576_v61 = vcombine.high %v2954_v53, %v2958_v57  ;;  %v13830_v1 = vcombine.high %v3209_v51, %v3213_v52  ;;  %v13575_v3 = vcombine.low %v2954_v53, %v2958_v57 }
 0x38c   : > { %9360 = vmatpush1.bf16.msra.mxu1 %v13535_v4  ;;  %v13829_v4 = vcombine.low %v3209_v51, %v3213_v52  ;;  %v3261_v51 = vld [vmem:[#allocation9 + $0xe60] sm:$0xff]  ;;  %v3002_v52 = vld [vmem:[#allocation9 + $0x648] sm:$0xff] }
 0x38d   : > { %9102 = vmatpush1.bf16.msra.mxu0 %v13789_v8  ;;  %9361 = vmatprep.subr.bf16.mxu1 %v13544_v10  ;;  %v3229_v8 = vld [vmem:[#allocation9 + $0xd60] sm:$0xff]  ;;  %v2970_v10 = vld [vmem:[#allocation9 + $0x548] sm:$0xff] }
 0x38e   : > { %9103 = vmatprep.subr.bf16.mxu0 %v13798_v14  ;;  %v13583_v14 = vcombine.low %v2962_v0, %v2966_v2  ;;  %v13592_v16 = vcombine.high %v2970_v10, %v2974_v12  ;;  %v13846_v20 = vcombine.high %v3225_v7, %v3229_v8 }
 0x390   : > { %9362 = vmatpush1.bf16.msra.mxu1 %v13543_v19  ;;  %v2978_v19 = vld [vmem:[#allocation9 + $0x588] sm:$0xff] }
 0x391   : > { %9104 = vmatpush1.bf16.msra.mxu0 %v13797_v21  ;;  %9374 = vmatprep.subr.bf16.mxu1 %v13552_v22  ;;  %v13591_v21 = vcombine.low %v2970_v10, %v2974_v12  ;;  %v13845_v22 = vcombine.low %v3225_v7, %v3229_v8  ;;  %v13599_v30 = vcombine.low %v2978_v19, %v2982_v44  ;;  %v3277_v7 = vld [vmem:[#allocation9 + $0xee0] sm:$0xff]  ;;  %v3018_v8 = vld [vmem:[#allocation9 + $0x6c8] sm:$0xff] }
 0x392   : > { %9116 = vmatprep.subr.bf16.mxu0 %v13806_v23  ;;  %v13600_v23 = vcombine.high %v2978_v19, %v2982_v44 }
 0x393   : > { %9364 = vmatmul.mubr.bf16.vlgmr.msra.gmra.mrb[4].mxu1 %v16706_v43 }
 0x394   : > { %9106 = vmatmul.mubr.bf16.vlgmr.msra.gmra.mrb[0].mxu0 %v16726_v32  ;;  %9375 = vmatpush1.bf16.msra.mxu1 %v13551_v31  ;;  %v13853_v31 = vcombine.low %v3233_v17, %v3237_v18  ;;  %v3285_v17 = vld [vmem:[#allocation9 + $0xf20] sm:$0xff]  ;;  %v3026_v18 = vld [vmem:[#allocation9 + $0x708] sm:$0xff] }
 0x395   : > { %9117 = vmatpush1.bf16.msra.mxu0 %v13805_v33  ;;  %9376 = vmatprep.subr.bf16.mxu1 %v13560_v36  ;;  %v13608_v33 = vcombine.high %v2986_v28, %v2990_v29  ;;  %v3249_v36 = vld [vmem:[#allocation9 + $0xe00] sm:$0xff]  ;;  %v3038_v28 = vld [vmem:[#allocation9 + $0x768] sm:$0xff] }
 0x396   : > { %9118 = vmatprep.subr.bf16.mxu0 %v13814_v40  ;;  %9148 = vmatprep.mubr.bf16.mxu0 %v16728_v42  ;;  %v2998_v40 = vld [vmem:[#allocation9 + $0x628] sm:$0xff]  ;;  %v13870_v53 = vcombine.high %v3249_v36, %v3253_v37 }
 0x397   : > { %9406 = vmatprep.mubr.bf16.mxu1 %v16687_v9  ;;  %v13615_v57 = vcombine.low %v2994_v38, %v2998_v40 }
 0x398   : > { %9377 = vmatpush1.bf16.msra.mxu1 %v13559_v59  ;;  %v13861_v59 = vcombine.low %v3241_v24, %v3245_v26  ;;  %v3293_v24 = vld [vmem:[#allocation9 + $0xf60] sm:$0xff]  ;;  %v3034_v26 = vld [vmem:[#allocation9 + $0x748] sm:$0xff] }
 0x399   : > { %9119 = vmatpush1.bf16.msra.mxu0 %v13813_v45  ;;  %9378 = vmatprep.subr.bf16.mxu1 %v13568_v46  ;;  %v13616_v45 = vcombine.high %v2994_v38, %v2998_v40  ;;  %v3257_v46 = vld [vmem:[#allocation9 + $0xe40] sm:$0xff]  ;;  %v3042_v38 = vld [vmem:[#allocation9 + $0x788] sm:$0xff] }
 0x39a   : > { %9120 = vmatprep.subr.bf16.mxu0 %v13822_v54  ;;  %v3006_v54 = vld [vmem:[#allocation9 + $0x668] sm:$0xff]  ;;  %v13878_v0 = vcombine.high %v3257_v46, %v3261_v51 }
 0x39b   : > { %v13623_v2 = vcombine.low %v3002_v52, %v3006_v54 }
 0x39c   : > { %9379 = vmatpush1.bf16.msra.mxu1 %v13567_v58  ;;  %v13869_v58 = vcombine.low %v3249_v36, %v3253_v37  ;;  %v3297_v36 = vld [vmem:[#allocation9 + $0xf80] sm:$0xff] }
 0x39d   : > { %9121 = vmatpush1.bf16.msra.mxu0 %v13821_v60  ;;  %9380 = vmatprep.subr.bf16.mxu1 %v13576_v61  ;;  %v13624_v60 = vcombine.high %v3002_v52, %v3006_v54  ;;  %v3265_v61 = vld [vmem:[#allocation9 + $0xe80] sm:$0xff] }
 0x39e   : > { %9122 = vmatprep.subr.bf16.mxu0 %v13830_v1  ;;  %v3014_v1 = vld [vmem:[#allocation9 + $0x6a8] sm:$0xff]  ;;  %v13886_v10 = vcombine.high %v3265_v61, %v3269_v62  ;;  %v3301_v37 = vld [vmem:[#allocation9 + $0xfa0] sm:$0xff] }
 0x39f   : > { %v13631_v12 = vcombine.low %v3010_v63, %v3014_v1  ;;  %v3305_v54 = vld [vmem:[#allocation9 + $0xfc0] sm:$0xff] }
 0x3a0   : > { %9381 = vmatpush1.bf16.msra.mxu1 %v13575_v3  ;;  %v13877_v3 = vcombine.low %v3257_v46, %v3261_v51  ;;  %v3054_v46 = vld [vmem:[#allocation9 + $0x7e8] sm:$0xff]  ;;  %v15625_v51 = vld [vmem:[#allocation7] sm:$0xff] }
 0x3a1   : > { %9123 = vmatpush1.bf16.msra.mxu0 %v13829_v4  ;;  %9382 = vmatprep.subr.bf16.mxu1 %v13584_v6  ;;  %v13632_v4 = vcombine.high %v3010_v63, %v3014_v1  ;;  %v3273_v6 = vld [vmem:[#allocation9 + $0xec0] sm:$0xff]  ;;  %v2630_v63 = vld [vmem:[#allocation2 + $0xc8] sm:$0xff] }
 0x3a2   : > { %9124 = vmatprep.subr.bf16.mxu0 %v13838_v11  ;;  %v3022_v11 = vld [vmem:[#allocation9 + $0x6e8] sm:$0xff]  ;;  %v13894_v19 = vcombine.high %v3273_v6, %v3277_v7 }
 0x3a3   : > { %v13639_v44 = vcombine.low %v3018_v8, %v3022_v11 }
 0x3a4   : > { %9383 = vmatpush1.bf16.msra.mxu1 %v13583_v14  ;;  %v13885_v14 = vcombine.low %v3265_v61, %v3269_v62  ;;  %v2614_v61 = vld [vmem:[#allocation2 + $0x48] sm:$0xff]  ;;  %v13918_v62 = vcombine.high %v3297_v36, %v3301_v37 }
 0x3a5   : > { %9125 = vmatpush1.bf16.msra.mxu0 %v13837_v15  ;;  %9384 = vmatprep.subr.bf16.mxu1 %v13592_v16  ;;  %v13640_v15 = vcombine.high %v3018_v8, %v3022_v11  ;;  %v3281_v16 = vld [vmem:[#allocation9 + $0xf00] sm:$0xff] }
 0x3a6   : > { %9126 = vmatprep.subr.bf16.mxu0 %v13846_v20  ;;  %v3030_v20 = vld [vmem:[#allocation9 + $0x728] sm:$0xff]  ;;  %v3317_v8 = vld [vmem:[#allocation9 + $0x1020] sm:$0xff] }
 0x3a7   : > { %v13647_v29 = vcombine.low %v3026_v18, %v3030_v20 }
 0x3a8   : > { %9385 = vmatpush1.bf16.msra.mxu1 %v13591_v21  ;;  %v13893_v21 = vcombine.low %v3273_v6, %v3277_v7  ;;  %v3313_v7 = vld [vmem:[#allocation9 + $0x1000] sm:$0xff] }
 0x3a9   : > { %9127 = vmatpush1.bf16.msra.mxu0 %v13845_v22  ;;  %9386 = vmatprep.subr.bf16.mxu1 %v13600_v23  ;;  %v13648_v22 = vcombine.high %v3026_v18, %v3030_v20  ;;  %v3289_v23 = vld [vmem:[#allocation9 + $0xf40] sm:$0xff] }
 0x3aa   : > { %9128 = vmatprep.subr.bf16.mxu0 %v13854_v27  ;;  %v13902_v27 = vcombine.high %v3281_v16, %v3285_v17  ;;  %v13910_v40 = vcombine.high %v3289_v23, %v3293_v24  ;;  %v13909_v52 = vcombine.low %v3289_v23, %v3293_v24 }
 0x3ac   : > { %9387 = vmatpush1.bf16.msra.mxu1 %v13599_v30  ;;  %v16735_v30 = vsub.s32 6, %v16671_v25 }
 0x3ad   : > { %9129 = vmatpush1.bf16.msra.mxu0 %v13853_v31  ;;  %9388 = vmatprep.subr.bf16.mxu1 %v13608_v33  ;;  %v13901_v31 = vcombine.low %v3281_v16, %v3285_v17  ;;  %v13656_v33 = vcombine.high %v3034_v26, %v3038_v28 }
 0x3ae   : > { %9130 = vmatprep.subr.bf16.mxu0 %v13862_v39  ;;  %v3046_v39 = vld [vmem:[#allocation9 + $0x7a8] sm:$0xff]  ;;  %v2668_v25 = vrot.slane %v15625_v51, %v16735_v30 }
 0x3af   : > { %v13663_v1 = vcombine.low %v3042_v38, %v3046_v39 }
 0x3b0   : > { %9389 = vmatpush1.bf16.msra.mxu1 %v13607_v41  ;;  %v16737_v41 = vld [vmem:[#allocation7 + $0x8] sm:$0xff] }
 0x3b1   : > { %9131 = vmatpush1.bf16.msra.mxu0 %v13861_v59  ;;  %9390 = vmatprep.subr.bf16.mxu1 %v13616_v45  ;;  %v13655_v59 = vcombine.low %v3034_v26, %v3038_v28  ;;  %v3050_v45 = vld [vmem:[#allocation9 + $0x7c8] sm:$0xff]  ;;  %v3321_v26 = vld [vmem:[#allocation9 + $0x1040] sm:$0xff] }
 0x3b2   : > { %9132 = vmatprep.subr.bf16.mxu0 %v13870_v53  ;;  %v13664_v53 = vcombine.high %v3042_v38, %v3046_v39  ;;  %v13672_v6 = vcombine.high %v3050_v45, %v3054_v46  ;;  %v13671_v16 = vcombine.low %v3050_v45, %v3054_v46  ;;  %v3074_v38 = vld [vmem:[#allocation9 + $0x888] sm:$0xff] }
 0x3b4   : > { %9391 = vmatpush1.bf16.msra.mxu1 %v13615_v57  ;;  %v3309_v57 = vld [vmem:[#allocation9 + $0xfe0] sm:$0xff] }
 0x3b5   : > { %9133 = vmatpush1.bf16.msra.mxu0 %v13869_v58  ;;  %9392 = vmatprep.subr.bf16.mxu1 %v13624_v60  ;;  %v2611_v58 = vld [vmem:[#allocation2 + $0x30] sm:$0xff]  ;;  %v13926_v11 = vcombine.high %v3305_v54, %v3309_v57 }
 0x3b6   : > { %9134 = vmatprep.subr.bf16.mxu0 %v13878_v0  ;;  %v2627_v60 = vld [vmem:[#allocation2 + $0xb0] sm:$0xff]  ;;  %v2680_v0 = vrot.slane %v16737_v41, %v16674_v34 }
 0x3b8   : > { %9393 = vmatpush1.bf16.msra.mxu1 %v13623_v2  ;;  %v2727_v2 = vadd.f32 %v2668_v25, %v2611_v58 }
 0x3b9   : > { %9135 = vmatpush1.bf16.msra.mxu0 %v13877_v3  ;;  %9394 = vmatprep.subr.bf16.mxu1 %v13632_v4  ;;  %v2743_v3 = vadd.f32 %v2668_v25, %v2627_v60  ;;  %v13917_v4 = vcombine.low %v3297_v36, %v3301_v37  ;;  %v3329_v36 = vld [vmem:[#allocation9 + $0x1080] sm:$0xff] }
 0x3ba   : > { %9136 = vmatprep.subr.bf16.mxu0 %v13886_v10  ;;  %v3058_v10 = vld [vmem:[#allocation9 + $0x808] sm:$0xff]  ;;  %v2759_v17 = vmax.f32 %v2727_v2, 0.0  ;;  %v3333_v37 = vld [vmem:[#allocation9 + $0x10a0] sm:$0xff] }
 0x3bb   : > { %v2775_v18 = vmax.f32 %v2743_v3, 0.0  ;;  %v3337_v25 = vld [vmem:[#allocation9 + $0x10c0] sm:$0xff]  ;;  %v13949_v60 = vcombine.low %v3329_v36, %v3333_v37  ;;  %v3094_v2 = vld [vmem:[#allocation9 + $0x928] sm:$0xff] }
 0x3bc   : > { %9395 = vmatpush1.bf16.msra.mxu1 %v13631_v12  ;;  %v3062_v12 = vld [vmem:[#allocation9 + $0x828] sm:$0xff] }
 0x3bd   : > { %9137 = vmatpush1.bf16.msra.mxu0 %v13885_v14  ;;  %9396 = vmatprep.subr.bf16.mxu1 %v13640_v15  ;;  %v2730_v14 = vadd.f32 %v2680_v0, %v2614_v61  ;;  %v2746_v15 = vadd.f32 %v2680_v0, %v2630_v63  ;;  %v13680_v20 = vcombine.high %v3058_v10, %v3062_v12  ;;  %v3349_v63 = vld [vmem:[#allocation9 + $0x1120] sm:$0xff]  ;;  %v3090_v0 = vld [vmem:[#allocation9 + $0x908] sm:$0xff] }
 0x3be   : > { %9138 = vmatprep.subr.bf16.mxu0 %v13894_v19  ;;  %v13925_v19 = vcombine.low %v3305_v54, %v3309_v57  ;;  %v13679_v28 = vcombine.low %v3058_v10, %v3062_v12  ;;  %v13950_v54 = vcombine.high %v3329_v36, %v3333_v37  ;;  %v3086_v57 = vld [vmem:[#allocation9 + $0x8e8] sm:$0xff] }
 0x3bf   : > { %v2762_v23 = vmax.f32 %v2730_v14, 0.0  ;;  %v2778_v24 = vmax.f32 %v2746_v15, 0.0  ;;  %v3098_v10 = vld [vmem:[#allocation9 + $0x948] sm:$0xff]  ;;  %v13711_v14 = vcombine.low %v3090_v0, %v3094_v2 }
 0x3c0   : > { %9397 = vmatpush1.bf16.msra.mxu1 %v13639_v44  ;;  %v13934_v44 = vcombine.high %v3313_v7, %v3317_v8  ;;  %v3102_v12 = vld [vmem:[#allocation9 + $0x968] sm:$0xff] }
 0x3c1   : > { %9139 = vmatpush1.bf16.msra.mxu0 %v13893_v21  ;;  %9398 = vmatprep.subr.bf16.mxu1 %v13648_v22  ;;  %v3066_v21 = vld [vmem:[#allocation9 + $0x848] sm:$0xff] }
 0x3c2   : > { %9140 = vmatprep.subr.bf16.mxu0 %v13902_v27  ;;  %v3070_v22 = vld [vmem:[#allocation9 + $0x868] sm:$0xff]  ;;  %v3325_v27 = vld [vmem:[#allocation9 + $0x1060] sm:$0xff] }
 0x3c3   : > { %v13942_v39 = vcombine.high %v3321_v26, %v3325_v27  ;;  %v13687_v45 = vcombine.low %v3066_v21, %v3070_v22  ;;  %v13941_v46 = vcombine.low %v3321_v26, %v3325_v27  ;;  %v3373_v26 = vld [vmem:[#allocation9 + $0x11e0] sm:$0xff]  ;;  %v3114_v27 = vld [vmem:[#allocation9 + $0x9c8] sm:$0xff] }
 0x3c4   : > { %9399 = vmatpush1.bf16.msra.mxu1 %v13647_v29  ;;  %v16742_v29 = vpack.c.bf16 %v2775_v18, %v2759_v17  ;;  %v3361_v17 = vld [vmem:[#allocation9 + $0x1180] sm:$0xff] }
 0x3c5   : > { %9141 = vmatpush1.bf16.msra.mxu0 %v13901_v31  ;;  %9400 = vmatprep.subr.bf16.mxu1 %v13656_v33  ;;  %v13933_v31 = vcombine.low %v3313_v7, %v3317_v8  ;;  %v13688_v33 = vcombine.high %v3066_v21, %v3070_v22  ;;  %v3353_v7 = vld [vmem:[#allocation9 + $0x1140] sm:$0xff]  ;;  %v13719_v21 = vcombine.low %v3098_v10, %v3102_v12 }
 0x3c6   : > { %9142 = vmatprep.subr.bf16.mxu0 %v13910_v40  ;;  %v3078_v40 = vld [vmem:[#allocation9 + $0x8a8] sm:$0xff]  ;;  %v3357_v8 = vld [vmem:[#allocation9 + $0x1160] sm:$0xff] }
 0x3c7   : > { %v13696_v51 = vcombine.high %v3074_v38, %v3078_v40  ;;  %v13695_v58 = vcombine.low %v3074_v38, %v3078_v40  ;;  %v3365_v18 = vld [vmem:[#allocation9 + $0x11a0] sm:$0xff]  ;;  %v13973_v22 = vcombine.low %v3353_v7, %v3357_v8  ;;  %v3122_v40 = vld [vmem:[#allocation9 + $0xa08] sm:$0xff] }
 0x3c8   : > { %9401 = vmatpush1.bf16.msra.mxu1 %v13655_v59  ;;  %v16744_v59 = vpack.c.bf16 %v2778_v24, %v2762_v23  ;;  %v3369_v24 = vld [vmem:[#allocation9 + $0x11c0] sm:$0xff]  ;;  %v13981_v36 = vcombine.low %v3361_v17, %v3365_v18 }
 0x3c9   : > { %9143 = vmatpush1.bf16.msra.mxu0 %v13909_v52  ;;  %9402 = vmatprep.subr.bf16.mxu1 %v13664_v53  ;;  %v3341_v52 = vld [vmem:[#allocation9 + $0x10e0] sm:$0xff]  ;;  %v3082_v53 = vld [vmem:[#allocation9 + $0x8c8] sm:$0xff] }
 0x3ca   : > { %9144 = vmatprep.subr.bf16.mxu0 %v13918_v62  ;;  %v13704_v61 = vcombine.high %v3082_v53, %v3086_v57  ;;  %v3345_v62 = vld [vmem:[#allocation9 + $0x1100] sm:$0xff]  ;;  %v13703_v3 = vcombine.low %v3082_v53, %v3086_v57  ;;  %v3130_v57 = vld [vmem:[#allocation9 + $0xa48] sm:$0xff] }
 0x3cb   : > { %v13965_v15 = vcombine.low %v3345_v62, %v3349_v63  ;;  %v3377_v38 = vld [vmem:[#allocation9 + $0x1200] sm:$0xff] }
 0x3cc   : > { %9403 = vmatpush1.bf16.msra.mxu1 %v13663_v1  ;;  %v13958_v1 = vcombine.high %v3337_v25, %v3341_v52  ;;  %v3385_v53 = vld [vmem:[#allocation9 + $0x1240] sm:$0xff] }
 0x3cd   : > { %9145 = vmatpush1.bf16.msra.mxu0 %v13917_v4  ;;  %9404 = vmatprep.subr.bf16.mxu1 %v13672_v6  ;;  %v13957_v4 = vcombine.low %v3337_v25, %v3341_v52  ;;  %v13712_v6 = vcombine.high %v3090_v0, %v3094_v2  ;;  %v13989_v25 = vcombine.low %v3369_v24, %v3373_v26  ;;  %v3393_v0 = vld [vmem:[#allocation9 + $0x1280] sm:$0xff]  ;;  %v3138_v2 = vld [vmem:[#allocation9 + $0xa88] sm:$0xff] }
 0x3ce   : > { %9146 = vmatprep.subr.bf16.mxu0 %v13926_v11  ;;  %v13966_v11 = vcombine.high %v3345_v62, %v3349_v63 }
 0x3d0   : > { %9405 = vmatpush1.bf16.msra.mxu1 %v13671_v16  ;;  %v13720_v16 = vcombine.high %v3098_v10, %v3102_v12  ;;  %v3401_v10 = vld [vmem:[#allocation9 + $0x12c0] sm:$0xff]  ;;  %v3146_v12 = vld [vmem:[#allocation9 + $0xac8] sm:$0xff] }
 0x3d1   : > { %9147 = vmatpush1.bf16.msra.mxu0 %v13925_v19  ;;  %9417 = vmatprep.subr.bf16.mxu1 %v13680_v20  ;;  %v3106_v19 = vld [vmem:[#allocation9 + $0x988] sm:$0xff]  ;;  %v13974_v20 = vcombine.high %v3353_v7, %v3357_v8 }
 0x3d2   : > { %9159 = vmatprep.subr.bf16.mxu0 %v13934_v44  ;;  %v3110_v44 = vld [vmem:[#allocation9 + $0x9a8] sm:$0xff] }
 0x3d3   : > { %9407 = vmatmul.mubr.bf16.vlgmr.msra.gmra.mrb[4].mxu1 %v16708_v48  ;;  %v13728_v23 = vcombine.high %v3106_v19, %v3110_v44 }
 0x3d4   : > { %9149 = vmatmul.mubr.bf16.vlgmr.msra.gmra.mrb[0].mxu0 %v16742_v29  ;;  %9418 = vmatpush1.bf16.msra.mxu1 %v13679_v28  ;;  %v13982_v28 = vcombine.high %v3361_v17, %v3365_v18 }
 0x3d5   : > { %9160 = vmatpush1.bf16.msra.mxu0 %v13933_v31  ;;  %9419 = vmatprep.subr.bf16.mxu1 %v13688_v33  ;;  %v3118_v31 = vld [vmem:[#allocation9 + $0x9e8] sm:$0xff]  ;;  %v13727_v33 = vcombine.low %v3106_v19, %v3110_v44  ;;  %v3409_v19 = vld [vmem:[#allocation9 + $0x1300] sm:$0xff] }
 0x3d6   : > { %9161 = vmatprep.subr.bf16.mxu0 %v13942_v39  ;;  %9191 = vmatprep.mubr.bf16.mxu0 %v16744_v59  ;;  %v13736_v37 = vcombine.high %v3114_v27, %v3118_v31  ;;  %v3381_v39 = vld [vmem:[#allocation9 + $0x1220] sm:$0xff]  ;;  %v3154_v44 = vld [vmem:[#allocation9 + $0xb08] sm:$0xff] }
 0x3d7   : > { %9449 = vmatprep.mubr.bf16.mxu1 %v16710_v56  ;;  %v13997_v62 = vcombine.low %v3377_v38, %v3381_v39 }
 0x3d8   : > { %9420 = vmatpush1.bf16.msra.mxu1 %v13687_v45  ;;  %v13990_v45 = vcombine.high %v3369_v24, %v3373_v26 }
 0x3d9   : > { %9162 = vmatpush1.bf16.msra.mxu0 %v13941_v46  ;;  %9421 = vmatprep.subr.bf16.mxu1 %v13696_v51  ;;  %v3126_v46 = vld [vmem:[#allocation9 + $0xa28] sm:$0xff]  ;;  %v13735_v51 = vcombine.low %v3114_v27, %v3118_v31  ;;  %v3417_v27 = vld [vmem:[#allocation9 + $0x1340] sm:$0xff] }
 0x3da   : > { %9163 = vmatprep.subr.bf16.mxu0 %v13950_v54  ;;  %v13744_v52 = vcombine.high %v3122_v40, %v3126_v46  ;;  %v3389_v54 = vld [vmem:[#allocation9 + $0x1260] sm:$0xff]  ;;  %v3162_v31 = vld [vmem:[#allocation9 + $0xb48] sm:$0xff] }
 0x3db   : > { %v14005_v7 = vcombine.low %v3385_v53, %v3389_v54 }
 0x3dc   : > { %9422 = vmatpush1.bf16.msra.mxu1 %v13695_v58  ;;  %v13998_v58 = vcombine.high %v3377_v38, %v3381_v39 }
 0x3dd   : > { %9164 = vmatpush1.bf16.msra.mxu0 %v13949_v60  ;;  %9423 = vmatprep.subr.bf16.mxu1 %v13704_v61  ;;  %v3134_v60 = vld [vmem:[#allocation9 + $0xa68] sm:$0xff]  ;;  %v13743_v61 = vcombine.low %v3122_v40, %v3126_v46  ;;  %v3425_v40 = vld [vmem:[#allocation9 + $0x1380] sm:$0xff] }
 0x3de   : > { %9165 = vmatprep.subr.bf16.mxu0 %v13958_v1  ;;  %v13752_v63 = vcombine.high %v3130_v57, %v3134_v60  ;;  %v3397_v1 = vld [vmem:[#allocation9 + $0x12a0] sm:$0xff]  ;;  %v3170_v46 = vld [vmem:[#allocation9 + $0xb88] sm:$0xff] }
 0x3df   : > { %v14013_v17 = vcombine.low %v3393_v0, %v3397_v1 }
 0x3e0   : > { %9424 = vmatpush1.bf16.msra.mxu1 %v13703_v3  ;;  %v14006_v3 = vcombine.high %v3385_v53, %v3389_v54  ;;  %v2629_v53 = vld [vmem:[#allocation2 + $0xc0] sm:$0xff]  ;;  %v2676_v54 = vrot.slane %v16737_v41, %v16692_v47 }
 0x3e1   : > { %9166 = vmatpush1.bf16.msra.mxu0 %v13957_v4  ;;  %9425 = vmatprep.subr.bf16.mxu1 %v13712_v6  ;;  %v3142_v4 = vld [vmem:[#allocation9 + $0xaa8] sm:$0xff]  ;;  %v13751_v6 = vcombine.low %v3130_v57, %v3134_v60  ;;  %v3437_v60 = vld [vmem:[#allocation9 + $0x13e0] sm:$0xff] }
 0x3e2   : > { %9167 = vmatprep.subr.bf16.mxu0 %v13966_v11  ;;  %v13760_v8 = vcombine.high %v3138_v2, %v3142_v4  ;;  %v3405_v11 = vld [vmem:[#allocation9 + $0x12e0] sm:$0xff] }
 0x3e3   : > { %v14021_v24 = vcombine.low %v3401_v10, %v3405_v11 }
 0x3e4   : > { %9426 = vmatpush1.bf16.msra.mxu1 %v13711_v14  ;;  %v14014_v14 = vcombine.high %v3393_v0, %v3397_v1  ;;  %v3182_v0 = vld [vmem:[#allocation9 + $0xbe8] sm:$0xff] }
 0x3e5   : > { %9168 = vmatpush1.bf16.msra.mxu0 %v13965_v15  ;;  %9427 = vmatprep.subr.bf16.mxu1 %v13720_v16  ;;  %v3150_v15 = vld [vmem:[#allocation9 + $0xae8] sm:$0xff]  ;;  %v13759_v16 = vcombine.low %v3138_v2, %v3142_v4  ;;  %v2745_v4 = vadd.f32 %v2676_v54, %v2629_v53 }
 0x3e6   : > { %9169 = vmatprep.subr.bf16.mxu0 %v13974_v20  ;;  %v13768_v18 = vcombine.high %v3146_v12, %v3150_v15  ;;  %v3413_v20 = vld [vmem:[#allocation9 + $0x1320] sm:$0xff]  ;;  %v2616_v1 = vld [vmem:[#allocation2 + $0x58] sm:$0xff] }
 0x3e7   : > { %v14029_v38 = vcombine.low %v3409_v19, %v3413_v20 }
 0x3e8   : > { %9428 = vmatpush1.bf16.msra.mxu1 %v13719_v21  ;;  %v14022_v21 = vcombine.high %v3401_v10, %v3405_v11 }
 0x3e9   : > { %9170 = vmatpush1.bf16.msra.mxu0 %v13973_v22  ;;  %9429 = vmatprep.subr.bf16.mxu1 %v13728_v23  ;;  %v3158_v22 = vld [vmem:[#allocation9 + $0xb28] sm:$0xff]  ;;  %v13767_v23 = vcombine.low %v3146_v12, %v3150_v15  ;;  %v3445_v15 = vld [vmem:[#allocation9 + $0x1420] sm:$0xff] }
 0x3ea   : > { %9171 = vmatprep.subr.bf16.mxu0 %v13982_v28  ;;  %v13776_v26 = vcombine.high %v3154_v44, %v3158_v22  ;;  %v3421_v28 = vld [vmem:[#allocation9 + $0x1360] sm:$0xff] }
 0x3ec   : > { %9430 = vmatpush1.bf16.msra.mxu1 %v13727_v33  ;;  %v14030_v33 = vcombine.high %v3409_v19, %v3413_v20  ;;  %v2777_v19 = vmax.f32 %v2745_v4, 0.0  ;;  %v3218_v4 = vld [vmem:[#allocation9 + $0xd08] sm:$0xff] }
 0x3ed   : > { %9172 = vmatpush1.bf16.msra.mxu0 %v13981_v36  ;;  %9431 = vmatprep.subr.bf16.mxu1 %v13736_v37  ;;  %v3166_v36 = vld [vmem:[#allocation9 + $0xb68] sm:$0xff]  ;;  %v13775_v37 = vcombine.low %v3154_v44, %v3158_v22 }
 0x3ee   : > { %9173 = vmatprep.subr.bf16.mxu0 %v13990_v45  ;;  %v13784_v39 = vcombine.high %v3162_v31, %v3166_v36  ;;  %v3429_v45 = vld [vmem:[#allocation9 + $0x13a0] sm:$0xff]  ;;  %v13783_v57 = vcombine.low %v3162_v31, %v3166_v36 }
 0x3ef   : > { %v14046_v2 = vcombine.high %v3425_v40, %v3429_v45  ;;  %v14045_v10 = vcombine.low %v3425_v40, %v3429_v45  ;;  %v3449_v31 = vld [vmem:[#allocation9 + $0x1440] sm:$0xff]  ;;  %v3202_v45 = vld [vmem:[#allocation9 + $0xc88] sm:$0xff] }
 0x3f0   : > { %9432 = vmatpush1.bf16.msra.mxu1 %v13735_v51  ;;  %v3174_v51 = vld [vmem:[#allocation9 + $0xba8] sm:$0xff] }
 0x3f1   : > { %9174 = vmatpush1.bf16.msra.mxu0 %v13989_v25  ;;  %9433 = vmatprep.subr.bf16.mxu1 %v13744_v52  ;;  %v2613_v25 = vld [vmem:[#allocation2 + $0x40] sm:$0xff]  ;;  %v14038_v52 = vcombine.high %v3417_v27, %v3421_v28 }
 0x3f2   : > { %9175 = vmatprep.subr.bf16.mxu0 %v13998_v58  ;;  %v3433_v58 = vld [vmem:[#allocation9 + $0x13c0] sm:$0xff] }
 0x3f3   : > { %v14054_v11 = vcombine.high %v3433_v58, %v3437_v60 }
 0x3f4   : > { %9434 = vmatpush1.bf16.msra.mxu1 %v13743_v61  ;;  %v14037_v61 = vcombine.low %v3417_v27, %v3421_v28 }
 0x3f5   : > { %9176 = vmatpush1.bf16.msra.mxu0 %v13997_v62  ;;  %9435 = vmatprep.subr.bf16.mxu1 %v13752_v63  ;;  %v13792_v62 = vcombine.high %v3170_v46, %v3174_v51  ;;  %v3178_v63 = vld [vmem:[#allocation9 + $0xbc8] sm:$0xff] }
 0x3f6   : > { %9177 = vmatprep.subr.bf16.mxu0 %v14006_v3  ;;  %v2729_v3 = vadd.f32 %v2676_v54, %v2613_v25  ;;  %v13800_v12 = vcombine.high %v3178_v63, %v3182_v0  ;;  %v3457_v25 = vld [vmem:[#allocation9 + $0x1480] sm:$0xff] }
 0x3f8   : > { %9436 = vmatpush1.bf16.msra.mxu1 %v13751_v6  ;;  %v2632_v6 = vld [vmem:[#allocation2 + $0xd8] sm:$0xff] }
 0x3f9   : > { %9178 = vmatpush1.bf16.msra.mxu0 %v14005_v7  ;;  %9437 = vmatprep.subr.bf16.mxu1 %v13760_v8  ;;  %v2688_v7 = vrot.slane %v16737_v41, %v16677_v35  ;;  %v13791_v8 = vcombine.low %v3170_v46, %v3174_v51  ;;  %v14053_v41 = vcombine.low %v3433_v58, %v3437_v60  ;;  %v3206_v46 = vld [vmem:[#allocation9 + $0xca8] sm:$0xff] }
 0x3fa   : > { %9179 = vmatprep.subr.bf16.mxu0 %v14014_v14  ;;  %v3441_v14 = vld [vmem:[#allocation9 + $0x1400] sm:$0xff]  ;;  %v3210_v60 = vld [vmem:[#allocation9 + $0xcc8] sm:$0xff] }
 0x3fb   : > { %v2732_v20 = vadd.f32 %v2688_v7, %v2616_v1  ;;  %v2748_v44 = vadd.f32 %v2688_v7, %v2632_v6  ;;  %v3222_v6 = vld [vmem:[#allocation9 + $0xd28] sm:$0xff]  ;;  %v3473_v7 = vld [vmem:[#allocation9 + $0x1500] sm:$0xff] }
 0x3fc   : > { %9438 = vmatpush1.bf16.msra.mxu1 %v13759_v16  ;;  %v3186_v16 = vld [vmem:[#allocation9 + $0xc08] sm:$0xff] }
 0x3fd   : > { %9180 = vmatpush1.bf16.msra.mxu0 %v14013_v17  ;;  %9439 = vmatprep.subr.bf16.mxu1 %v13768_v18  ;;  %v3190_v17 = vld [vmem:[#allocation9 + $0xc28] sm:$0xff]  ;;  %v2761_v18 = vmax.f32 %v2729_v3, 0.0  ;;  %v2764_v27 = vmax.f32 %v2732_v20, 0.0  ;;  %v2780_v28 = vmax.f32 %v2748_v44, 0.0 }
 0x3fe   : > { %9181 = vmatprep.subr.bf16.mxu0 %v14022_v21  ;;  %v13799_v21 = vcombine.low %v3178_v63, %v3182_v0  ;;  %v13808_v22 = vcombine.high %v3186_v16, %v3190_v17  ;;  %v13807_v36 = vcombine.low %v3186_v16, %v3190_v17  ;;  %v3469_v63 = vld [vmem:[#allocation9 + $0x14e0] sm:$0xff]  ;;  %v13823_v0 = vcombine.low %v3202_v45, %v3206_v46  ;;  %v3230_v16 = vld [vmem:[#allocation9 + $0xd68] sm:$0xff] }
 0x3ff   : > { %v16756_v51 = vpack.c.bf16 %v2780_v28, %v2764_v27  ;;  %v3481_v17 = vld [vmem:[#allocation9 + $0x1540] sm:$0xff] }
 0x400   : > { %9440 = vmatpush1.bf16.msra.mxu1 %v13767_v23  ;;  %v14062_v23 = vcombine.high %v3441_v14, %v3445_v15 }
 0x401   : > { %9182 = vmatpush1.bf16.msra.mxu0 %v14021_v24  ;;  %9441 = vmatprep.subr.bf16.mxu1 %v13776_v26  ;;  %v3194_v24 = vld [vmem:[#allocation9 + $0xc48] sm:$0xff] }
 0x402   : > { %9183 = vmatprep.subr.bf16.mxu0 %v14030_v33  ;;  %v3198_v26 = vld [vmem:[#allocation9 + $0xc68] sm:$0xff]  ;;  %v3453_v33 = vld [vmem:[#allocation9 + $0x1460] sm:$0xff] }
 0x403   : > { %v14070_v40 = vcombine.high %v3449_v31, %v3453_v33  ;;  %v13815_v53 = vcombine.low %v3194_v24, %v3198_v26  ;;  %v14069_v54 = vcombine.low %v3449_v31, %v3453_v33 }
 0x404   : > { %9442 = vmatpush1.bf16.msra.mxu1 %v13775_v37  ;;  %v16754_v37 = vpack.c.bf16 %v2777_v19, %v2761_v18  ;;  %v3485_v18 = vld [vmem:[#allocation9 + $0x1560] sm:$0xff]  ;;  %v13839_v19 = vcombine.low %v3218_v4, %v3222_v6 }
 0x405   : > { %9184 = vmatpush1.bf16.msra.mxu0 %v14029_v38  ;;  %9443 = vmatprep.subr.bf16.mxu1 %v13784_v39  ;;  %v14061_v38 = vcombine.low %v3441_v14, %v3445_v15  ;;  %v13816_v39 = vcombine.high %v3194_v24, %v3198_v26  ;;  %v3226_v15 = vld [vmem:[#allocation9 + $0xd48] sm:$0xff]  ;;  %v3493_v24 = vld [vmem:[#allocation9 + $0x15a0] sm:$0xff]  ;;  %v14101_v27 = vcombine.low %v3481_v17, %v3485_v18 }
 0x406   : > { %9185 = vmatprep.subr.bf16.mxu0 %v14038_v52  ;;  %v3461_v52 = vld [vmem:[#allocation9 + $0x14a0] sm:$0xff]  ;;  %v13848_v44 = vcombine.high %v3226_v15, %v3230_v16  ;;  %v13847_v26 = vcombine.low %v3226_v15, %v3230_v16  ;;  %v3270_v15 = vld [vmem:[#allocation9 + $0xea8] sm:$0xff] }
 0x407   : > { %v14078_v58 = vcombine.high %v3457_v25, %v3461_v52  ;;  %v14077_v1 = vcombine.low %v3457_v25, %v3461_v52  ;;  %v3521_v16 = vld [vmem:[#allocation9 + $0x1680] sm:$0xff] }
 0x408   : > { %9444 = vmatpush1.bf16.msra.mxu1 %v13783_v57  ;;  %v13824_v57 = vcombine.high %v3202_v45, %v3206_v46  ;;  %v3501_v45 = vld [vmem:[#allocation9 + $0x15e0] sm:$0xff] }
 0x409   : > { %9186 = vmatpush1.bf16.msra.mxu0 %v14037_v61  ;;  %9445 = vmatprep.subr.bf16.mxu1 %v13792_v62  ;;  %v3214_v61 = vld [vmem:[#allocation9 + $0xce8] sm:$0xff]  ;;  %v3465_v62 = vld [vmem:[#allocation9 + $0x14c0] sm:$0xff] }
 0x40a   : > { %9187 = vmatprep.subr.bf16.mxu0 %v14046_v2  ;;  %v13832_v2 = vcombine.high %v3210_v60, %v3214_v61  ;;  %v14086_v3 = vcombine.high %v3465_v62, %v3469_v63 }
 0x40c   : > { %9446 = vmatpush1.bf16.msra.mxu1 %v13791_v8  ;;  %v3477_v8 = vld [vmem:[#allocation9 + $0x1520] sm:$0xff] }
 0x40d   : > { %9188 = vmatpush1.bf16.msra.mxu0 %v14045_v10  ;;  %9447 = vmatprep.subr.bf16.mxu1 %v13800_v12  ;;  %v13831_v10 = vcombine.low %v3210_v60, %v3214_v61  ;;  %v13840_v12 = vcombine.high %v3218_v4, %v3222_v6  ;;  %v14094_v14 = vcombine.high %v3473_v7, %v3477_v8  ;;  %v3254_v60 = vld [vmem:[#allocation9 + $0xe28] sm:$0xff]  ;;  %v3505_v61 = vld [vmem:[#allocation9 + $0x1600] sm:$0xff] }
 0x40e   : > { %9189 = vmatprep.subr.bf16.mxu0 %v14054_v11  ;;  %v14085_v11 = vcombine.low %v3465_v62, %v3469_v63  ;;  %v14093_v20 = vcombine.low %v3473_v7, %v3477_v8  ;;  %v3509_v62 = vld [vmem:[#allocation9 + $0x1620] sm:$0xff]  ;;  %v3262_v4 = vld [vmem:[#allocation9 + $0xe68] sm:$0xff] }
 0x40f   : > { %v3513_v6 = vld [vmem:[#allocation9 + $0x1640] sm:$0xff] }
 0x410   : > { %9448 = vmatpush1.bf16.msra.mxu1 %v13799_v21  ;;  %v14102_v21 = vcombine.high %v3481_v17, %v3485_v18  ;;  %v3517_v7 = vld [vmem:[#allocation9 + $0x1660] sm:$0xff] }
 0x411   : > { %9190 = vmatpush1.bf16.msra.mxu0 %v14053_v41  ;;  %9460 = vmatprep.subr.bf16.mxu1 %v13808_v22  ;;  %v3234_v41 = vld [vmem:[#allocation9 + $0xd88] sm:$0xff]  ;;  %v3525_v17 = vld [vmem:[#allocation9 + $0x16a0] sm:$0xff] }
 0x412   : > { %9202 = vmatprep.subr.bf16.mxu0 %v14062_v23  ;;  %v3238_v22 = vld [vmem:[#allocation9 + $0xda8] sm:$0xff]  ;;  %v3489_v23 = vld [vmem:[#allocation9 + $0x1580] sm:$0xff] }
 0x413   : > { %9450 = vmatmul.mubr.bf16.vlgmr.msra.gmra.mrb[4].mxu1 %v16726_v32  ;;  %v13856_v28 = vcombine.high %v3234_v41, %v3238_v22  ;;  %v14110_v33 = vcombine.high %v3489_v23, %v3493_v24  ;;  %v13855_v25 = vcombine.low %v3234_v41, %v3238_v22  ;;  %v3278_v41 = vld [vmem:[#allocation9 + $0xee8] sm:$0xff]  ;;  %v3529_v22 = vld [vmem:[#allocation9 + $0x16c0] sm:$0xff] }
 0x414   : > { %9192 = vmatmul.mubr.bf16.vlgmr.msra.gmra.mrb[0].mxu0 %v16754_v37  ;;  %9461 = vmatpush1.bf16.msra.mxu1 %v13807_v36  ;;  %v3242_v36 = vld [vmem:[#allocation9 + $0xdc8] sm:$0xff] }
 0x415   : > { %9203 = vmatpush1.bf16.msra.mxu0 %v14061_v38  ;;  %9462 = vmatprep.subr.bf16.mxu1 %v13816_v39  ;;  %v3246_v38 = vld [vmem:[#allocation9 + $0xde8] sm:$0xff] }
 0x416   : > { %9204 = vmatprep.subr.bf16.mxu0 %v14070_v40  ;;  %9234 = vmatprep.mubr.bf16.mxu0 %v16756_v51  ;;  %v3497_v40 = vld [vmem:[#allocation9 + $0x15c0] sm:$0xff]  ;;  %v13863_v63 = vcombine.low %v3242_v36, %v3246_v38 }
 0x417   : > { %9492 = vmatprep.mubr.bf16.mxu1 %v16728_v42 }
 0x418   : > { %9463 = vmatpush1.bf16.msra.mxu1 %v13815_v53  ;;  %v14109_v53 = vcombine.low %v3489_v23, %v3493_v24  ;;  %v3533_v23 = vld [vmem:[#allocation9 + $0x16e0] sm:$0xff] }
 0x419   : > { %9205 = vmatpush1.bf16.msra.mxu0 %v14069_v54  ;;  %9464 = vmatprep.subr.bf16.mxu1 %v13824_v57  ;;  %v13864_v54 = vcombine.high %v3242_v36, %v3246_v38  ;;  %v14118_v57 = vcombine.high %v3497_v40, %v3501_v45  ;;  %v3286_v36 = vld [vmem:[#allocation9 + $0xf28] sm:$0xff]  ;;  %v3537_v38 = vld [vmem:[#allocation9 + $0x1700] sm:$0xff] }
 0x41a   : > { %9206 = vmatprep.subr.bf16.mxu0 %v14078_v58  ;;  %v3250_v58 = vld [vmem:[#allocation9 + $0xe08] sm:$0xff] }
 0x41b   : > { %v13871_v8 = vcombine.low %v3250_v58, %v3254_v60 }
 0x41c   : > { %9465 = vmatpush1.bf16.msra.mxu1 %v13823_v0  ;;  %v14117_v0 = vcombine.low %v3497_v40, %v3501_v45  ;;  %v3541_v40 = vld [vmem:[#allocation9 + $0x1720] sm:$0xff] }
 0x41d   : > { %9207 = vmatpush1.bf16.msra.mxu0 %v14077_v1  ;;  %9466 = vmatprep.subr.bf16.mxu1 %v13832_v2  ;;  %v13872_v1 = vcombine.high %v3250_v58, %v3254_v60  ;;  %v14126_v2 = vcombine.high %v3505_v61, %v3509_v62  ;;  %v3294_v58 = vld [vmem:[#allocation9 + $0xf68] sm:$0xff]  ;;  %v3545_v60 = vld [vmem:[#allocation9 + $0x1740] sm:$0xff] }
 0x41e   : > { %9208 = vmatprep.subr.bf16.mxu0 %v14086_v3  ;;  %v3258_v3 = vld [vmem:[#allocation9 + $0xe48] sm:$0xff] }
 0x41f   : > { %v13879_v18 = vcombine.low %v3258_v3, %v3262_v4 }
 0x420   : > { %9467 = vmatpush1.bf16.msra.mxu1 %v13831_v10  ;;  %v14125_v10 = vcombine.low %v3505_v61, %v3509_v62  ;;  %v3549_v61 = vld [vmem:[#allocation9 + $0x1760] sm:$0xff] }
 0x421   : > { %9209 = vmatpush1.bf16.msra.mxu0 %v14085_v11  ;;  %9468 = vmatprep.subr.bf16.mxu1 %v13840_v12  ;;  %v13880_v11 = vcombine.high %v3258_v3, %v3262_v4  ;;  %v14134_v12 = vcombine.high %v3513_v6, %v3517_v7  ;;  %v3302_v3 = vld [vmem:[#allocation9 + $0xfa8] sm:$0xff]  ;;  %v3553_v4 = vld [vmem:[#allocation9 + $0x1780] sm:$0xff] }
 0x422   : > { %9210 = vmatprep.subr.bf16.mxu0 %v14094_v14  ;;  %v3266_v14 = vld [vmem:[#allocation9 + $0xe88] sm:$0xff] }
 0x423   : > { %v13887_v24 = vcombine.low %v3266_v14, %v3270_v15 }
 0x424   : > { %9469 = vmatpush1.bf16.msra.mxu1 %v13839_v19  ;;  %v14133_v19 = vcombine.low %v3513_v6, %v3517_v7  ;;  %v3557_v6 = vld [vmem:[#allocation9 + $0x17a0] sm:$0xff] }
 0x425   : > { %9211 = vmatpush1.bf16.msra.mxu0 %v14093_v20  ;;  %9470 = vmatprep.subr.bf16.mxu1 %v13848_v44  ;;  %v13888_v20 = vcombine.high %v3266_v14, %v3270_v15  ;;  %v14142_v44 = vcombine.high %v3521_v16, %v3525_v17  ;;  %v2615_v14 = vld [vmem:[#allocation2 + $0x50] sm:$0xff] }
 0x426   : > { %v16762_v31 = vpop.f32.mrb[0].mxu1  ;;  %9212 = vmatprep.subr.bf16.mxu0 %v14102_v21  ;;  %v3274_v21 = vld [vmem:[#allocation9 + $0xec8] sm:$0xff]  ;;  %v2631_v15 = vld [vmem:[#allocation2 + $0xd0] sm:$0xff] }
 0x427   : > { %v16764_v39 = vpop.f32.mrb[1].mxu1  ;;  %v13895_v45 = vcombine.low %v3274_v21, %v3278_v41 }
 0x428   : > { %v16766_v46 = vpop.f32.mrb[2].mxu1  ;;  %9471 = vmatpush1.bf16.msra.mxu1 %v13847_v26  ;;  %v14141_v26 = vcombine.low %v3521_v16, %v3525_v17  ;;  %v14174_v16 = vcombine.high %v3553_v4, %v3557_v6  ;;  %v3561_v17 = vld [vmem:[#allocation9 + $0x17c0] sm:$0xff] }
 0x429   : > { %9213 = vmatpush1.bf16.msra.mxu0 %v14101_v27  ;;  %v16768_v52 = vpop.f32.mrb[3].mxu1  ;;  %9472 = vmatprep.subr.bf16.mxu1 %v13856_v28  ;;  %v13896_v27 = vcombine.high %v3274_v21, %v3278_v41  ;;  %v14150_v28 = vcombine.high %v3529_v22, %v3533_v23  ;;  %v2618_v21 = vld [vmem:[#allocation2 + $0x68] sm:$0xff] }
 0x42a   : > { %9214 = vmatprep.subr.bf16.mxu0 %v14110_v33  ;;  %v3282_v33 = vld [vmem:[#allocation9 + $0xf08] sm:$0xff]  ;;  %v2634_v41 = vld [vmem:[#allocation2 + $0xe8] sm:$0xff] }
 0x42b   : > { %v13903_v62 = vcombine.low %v3282_v33, %v3286_v36 }
 0x42c   : > { %9473 = vmatpush1.bf16.msra.mxu1 %v13855_v25  ;;  %v14149_v25 = vcombine.low %v3529_v22, %v3533_v23 }
 0x42d   : > { %9215 = vmatpush1.bf16.msra.mxu0 %v14109_v53  ;;  %9474 = vmatprep.subr.bf16.mxu1 %v13864_v54  ;;  %v13904_v53 = vcombine.high %v3282_v33, %v3286_v36  ;;  %v14158_v54 = vcombine.high %v3537_v38, %v3541_v40  ;;  %v3314_v33 = vld [vmem:[#allocation9 + $0x1008] sm:$0xff] }
 0x42e   : > { %9216 = vmatprep.subr.bf16.mxu0 %v14118_v57  ;;  %v3290_v57 = vld [vmem:[#allocation9 + $0xf48] sm:$0xff] }
 0x42f   : > { %v13911_v7 = vcombine.low %v3290_v57, %v3294_v58  ;;  %v3318_v36 = vld [vmem:[#allocation9 + $0x1028] sm:$0xff] }
 0x430   : > { %9475 = vmatpush1.bf16.msra.mxu1 %v13863_v63  ;;  %v14157_v63 = vcombine.low %v3537_v38, %v3541_v40 }
 0x431   : > { %9217 = vmatpush1.bf16.msra.mxu0 %v14117_v0  ;;  %9476 = vmatprep.subr.bf16.mxu1 %v13872_v1  ;;  %v13912_v0 = vcombine.high %v3290_v57, %v3294_v58  ;;  %v14166_v1 = vcombine.high %v3545_v60, %v3549_v61 }
 0x432   : > { %9218 = vmatprep.subr.bf16.mxu0 %v14126_v2  ;;  %v3298_v2 = vld [vmem:[#allocation9 + $0xf88] sm:$0xff] }
 0x433   : > { %v13919_v22 = vcombine.low %v3298_v2, %v3302_v3 }
 0x434   : > { %9477 = vmatpush1.bf16.msra.mxu1 %v13871_v8  ;;  %v16770_v8 = vld [vmem:[#allocation7 + $0x8] sm:$0xff] }
 0x435   : > { %9219 = vmatpush1.bf16.msra.mxu0 %v14125_v10  ;;  %9478 = vmatprep.subr.bf16.mxu1 %v13880_v11  ;;  %v2684_v10 = vrot.slane %v16770_v8, %v16695_v49  ;;  %v14165_v11 = vcombine.low %v3545_v60, %v3549_v61  ;;  %v13936_v60 = vcombine.high %v3314_v33, %v3318_v36 }
 0x436   : > { %9220 = vmatprep.subr.bf16.mxu0 %v14134_v12  ;;  %v13920_v12 = vcombine.high %v3298_v2, %v3302_v3  ;;  %v3577_v2 = vld [vmem:[#allocation9 + $0x1840] sm:$0xff] }
 0x437   : > { %v2731_v23 = vadd.f32 %v2684_v10, %v2615_v14  ;;  %v3581_v3 = vld [vmem:[#allocation9 + $0x1860] sm:$0xff]  ;;  %v3334_v14 = vld [vmem:[#allocation9 + $0x10a8] sm:$0xff] }
 0x438   : > { %9479 = vmatpush1.bf16.msra.mxu1 %v13879_v18  ;;  %v3306_v18 = vld [vmem:[#allocation9 + $0xfc8] sm:$0xff] }
 0x439   : > { %9221 = vmatpush1.bf16.msra.mxu0 %v14133_v19  ;;  %9480 = vmatprep.subr.bf16.mxu1 %v13888_v20  ;;  %v3310_v19 = vld [vmem:[#allocation9 + $0xfe8] sm:$0xff]  ;;  %v2696_v20 = vrot.slane %v16770_v8, %v16698_v55 }
 0x43a   : > { %9222 = vmatprep.subr.bf16.mxu0 %v14142_v44  ;;  %v3565_v44 = vld [vmem:[#allocation9 + $0x17e0] sm:$0xff] }
 0x43b   : > { %v2734_v38 = vadd.f32 %v2696_v20, %v2618_v21  ;;  %v2750_v40 = vadd.f32 %v2696_v20, %v2634_v41  ;;  %v14181_v58 = vcombine.low %v3561_v17, %v3565_v44  ;;  %v3338_v21 = vld [vmem:[#allocation9 + $0x10c8] sm:$0xff] }
 0x43c   : > { %9481 = vmatpush1.bf16.msra.mxu1 %v13887_v24  ;;  %v2747_v24 = vadd.f32 %v2684_v10, %v2631_v15  ;;  %v3342_v41 = vld [vmem:[#allocation9 + $0x10e8] sm:$0xff] }
 0x43d   : > { %9223 = vmatpush1.bf16.msra.mxu0 %v14141_v26  ;;  %9482 = vmatprep.subr.bf16.mxu1 %v13896_v27  ;;  %v14173_v26 = vcombine.low %v3553_v4, %v3557_v6  ;;  %v13928_v27 = vcombine.high %v3306_v18, %v3310_v19  ;;  %v13935_v4 = vcombine.low %v3314_v33, %v3318_v36  ;;  %v3346_v33 = vld [vmem:[#allocation9 + $0x1108] sm:$0xff] }
 0x43e   : > { %9224 = vmatprep.subr.bf16.mxu0 %v14150_v28  ;;  %v14182_v28 = vcombine.high %v3561_v17, %v3565_v44  ;;  %v2779_v57 = vmax.f32 %v2747_v24, 0.0  ;;  %v3589_v17 = vld [vmem:[#allocation9 + $0x18a0] sm:$0xff]  ;;  %v3350_v36 = vld [vmem:[#allocation9 + $0x1128] sm:$0xff] }
 0x440   : > { %9483 = vmatpush1.bf16.msra.mxu1 %v13895_v45  ;;  %v3569_v45 = vld [vmem:[#allocation9 + $0x1800] sm:$0xff] }
 0x441   : > { %9225 = vmatpush1.bf16.msra.mxu0 %v14149_v25  ;;  %9484 = vmatprep.subr.bf16.mxu1 %v13904_v53  ;;  %v3573_v25 = vld [vmem:[#allocation9 + $0x1820] sm:$0xff]  ;;  %v13927_v53 = vcombine.low %v3306_v18, %v3310_v19  ;;  %v14197_v19 = vcombine.low %v3577_v2, %v3581_v3 }
 0x442   : > { %9226 = vmatprep.subr.bf16.mxu0 %v14158_v54  ;;  %v2763_v54 = vmax.f32 %v2731_v23, 0.0  ;;  %v14190_v61 = vcombine.high %v3569_v45, %v3573_v25  ;;  %v3597_v23 = vld [vmem:[#allocation9 + $0x18e0] sm:$0xff] }
 0x444   : > { %9485 = vmatpush1.bf16.msra.mxu1 %v13903_v62  ;;  %v3322_v62 = vld [vmem:[#allocation9 + $0x1048] sm:$0xff]  ;;  %v16776_v6 = vpack.c.bf16 %v2779_v57, %v2763_v54 }
 0x445   : > { %9227 = vmatpush1.bf16.msra.mxu0 %v14157_v63  ;;  %9486 = vmatprep.subr.bf16.mxu1 %v13912_v0  ;;  %v3326_v63 = vld [vmem:[#allocation9 + $0x1068] sm:$0xff]  ;;  %v2766_v0 = vmax.f32 %v2734_v38, 0.0  ;;  %v3601_v38 = vld [vmem:[#allocation9 + $0x1900] sm:$0xff] }
 0x446   : > { %9228 = vmatprep.subr.bf16.mxu0 %v14166_v1  ;;  %v2782_v1 = vmax.f32 %v2750_v40, 0.0  ;;  %v13944_v10 = vcombine.high %v3322_v62, %v3326_v63  ;;  %v13943_v18 = vcombine.low %v3322_v62, %v3326_v63  ;;  %v3605_v40 = vld [vmem:[#allocation9 + $0x1920] sm:$0xff]  ;;  %v3354_v57 = vld [vmem:[#allocation9 + $0x1148] sm:$0xff]  ;;  %v13967_v62 = vcombine.low %v3346_v33, %v3350_v36 }
 0x447   : > { %v14222_v54 = vcombine.high %v3601_v38, %v3605_v40  ;;  %v14221_v63 = vcombine.low %v3601_v38, %v3605_v40  ;;  %v3386_v38 = vld [vmem:[#allocation9 + $0x1248] sm:$0xff] }
 0x448   : > { %9487 = vmatpush1.bf16.msra.mxu1 %v13911_v7  ;;  %v14189_v7 = vcombine.low %v3569_v45, %v3573_v25  ;;  %v16778_v15 = vpack.c.bf16 %v2782_v1, %v2766_v0  ;;  %v13959_v45 = vcombine.low %v3338_v21, %v3342_v41  ;;  %v3390_v40 = vld [vmem:[#allocation9 + $0x1268] sm:$0xff] }
 0x449   : > { %9229 = vmatpush1.bf16.msra.mxu0 %v14165_v11  ;;  %9488 = vmatprep.subr.bf16.mxu1 %v13920_v12  ;;  %v14198_v11 = vcombine.high %v3577_v2, %v3581_v3  ;;  %v3330_v12 = vld [vmem:[#allocation9 + $0x1088] sm:$0xff] }
 0x44a   : > { %9230 = vmatprep.subr.bf16.mxu0 %v14174_v16  ;;  %v3585_v16 = vld [vmem:[#allocation9 + $0x1880] sm:$0xff]  ;;  %v13952_v20 = vcombine.high %v3330_v12, %v3334_v14  ;;  %v13951_v24 = vcombine.low %v3330_v12, %v3334_v14  ;;  %v3362_v2 = vld [vmem:[#allocation9 + $0x1188] sm:$0xff] }
 0x44b   : > { %v14206_v44 = vcombine.high %v3585_v16, %v3589_v17  ;;  %v3366_v3 = vld [vmem:[#allocation9 + $0x11a8] sm:$0xff] }
 0x44c   : > { %9489 = vmatpush1.bf16.msra.mxu1 %v13919_v22  ;;  %v3593_v22 = vld [vmem:[#allocation9 + $0x18c0] sm:$0xff]  ;;  %v13984_v12 = vcombine.high %v3362_v2, %v3366_v3 }
 0x44d   : > { %9231 = vmatpush1.bf16.msra.mxu0 %v14173_v26  ;;  %9490 = vmatprep.subr.bf16.mxu1 %v13928_v27  ;;  %v14205_v26 = vcombine.low %v3585_v16, %v3589_v17  ;;  %v13960_v27 = vcombine.high %v3338_v21, %v3342_v41  ;;  %v14213_v25 = vcombine.low %v3593_v22, %v3597_v23  ;;  %v3370_v16 = vld [vmem:[#allocation9 + $0x11c8] sm:$0xff] }
 0x44e   : > { %9232 = vmatprep.subr.bf16.mxu0 %v14182_v28  ;;  %v14214_v28 = vcombine.high %v3593_v22, %v3597_v23  ;;  %v3374_v17 = vld [vmem:[#allocation9 + $0x11e8] sm:$0xff] }
 0x44f   : > { %v13992_v21 = vcombine.high %v3370_v16, %v3374_v17  ;;  %v3378_v22 = vld [vmem:[#allocation9 + $0x1208] sm:$0xff] }
 0x450   : > { %9491 = vmatpush1.bf16.msra.mxu1 %v13927_v53  ;;  %v13968_v53 = vcombine.high %v3346_v33, %v3350_v36  ;;  %v3382_v23 = vld [vmem:[#allocation9 + $0x1228] sm:$0xff] }
 0x451   : > { %9233 = vmatpush1.bf16.msra.mxu0 %v14181_v58  ;;  %9503 = vmatprep.subr.bf16.mxu1 %v13936_v60  ;;  %v3358_v58 = vld [vmem:[#allocation9 + $0x1168] sm:$0xff]  ;;  %v3609_v60 = vld [vmem:[#allocation9 + $0x1940] sm:$0xff]  ;;  %v14000_v33 = vcombine.high %v3378_v22, %v3382_v23 }
 0x452   : > { %9245 = vmatprep.subr.bf16.mxu0 %v14190_v61  ;;  %v3613_v61 = vld [vmem:[#allocation9 + $0x1960] sm:$0xff]  ;;  %v13976_v0 = vcombine.high %v3354_v57, %v3358_v58 }
 0x453   : > { %9493 = vmatmul.mubr.bf16.vlgmr.msra.gmra.mrb[4].mxu1 %v16742_v29  ;;  %v14230_v1 = vcombine.high %v3609_v60, %v3613_v61 }
 0x454   : > { %9235 = vmatmul.mubr.bf16.vlgmr.msra.gmra.mrb[0].mxu0 %v16776_v6  ;;  %9504 = vmatpush1.bf16.msra.mxu1 %v13935_v4  ;;  %v3617_v4 = vld [vmem:[#allocation9 + $0x1980] sm:$0xff] }
 0x455   : > { %9246 = vmatpush1.bf16.msra.mxu0 %v14189_v7  ;;  %9505 = vmatprep.subr.bf16.mxu1 %v13944_v10  ;;  %v3621_v7 = vld [vmem:[#allocation9 + $0x19a0] sm:$0xff]  ;;  %v13975_v10 = vcombine.low %v3354_v57, %v3358_v58  ;;  %v14008_v57 = vcombine.high %v3386_v38, %v3390_v40 }
 0x456   : > { %9247 = vmatprep.subr.bf16.mxu0 %v14198_v11  ;;  %9277 = vmatprep.mubr.bf16.mxu0 %v16778_v15  ;;  %v14229_v11 = vcombine.low %v3609_v60, %v3613_v61  ;;  %v14238_v14 = vcombine.high %v3617_v4, %v3621_v7  ;;  %v3394_v60 = vld [vmem:[#allocation9 + $0x1288] sm:$0xff] }
 0x457   : > { %9535 = vmatprep.mubr.bf16.mxu1 %v16744_v59  ;;  %v3398_v61 = vld [vmem:[#allocation9 + $0x12a8] sm:$0xff] }
 0x458   : > { %9506 = vmatpush1.bf16.msra.mxu1 %v13943_v18  ;;  %v3625_v18 = vld [vmem:[#allocation9 + $0x19c0] sm:$0xff] }
 0x459   : > { %9248 = vmatpush1.bf16.msra.mxu0 %v14197_v19  ;;  %9507 = vmatprep.subr.bf16.mxu1 %v13952_v20  ;;  %v3629_v19 = vld [vmem:[#allocation9 + $0x19e0] sm:$0xff]  ;;  %v13983_v20 = vcombine.low %v3362_v2, %v3366_v3  ;;  %v14016_v2 = vcombine.high %v3394_v60, %v3398_v61 }
 0x45a   : > { %9249 = vmatprep.subr.bf16.mxu0 %v14206_v44  ;;  %v14237_v44 = vcombine.low %v3617_v4, %v3621_v7  ;;  %v14246_v41 = vcombine.high %v3625_v18, %v3629_v19  ;;  %v3402_v4 = vld [vmem:[#allocation9 + $0x12c8] sm:$0xff] }
 0x45b   : > { %v3406_v7 = vld [vmem:[#allocation9 + $0x12e8] sm:$0xff] }
 0x45c   : > { %9508 = vmatpush1.bf16.msra.mxu1 %v13951_v24  ;;  %v3633_v24 = vld [vmem:[#allocation9 + $0x1a00] sm:$0xff] }
 0x45d   : > { %9250 = vmatpush1.bf16.msra.mxu0 %v14205_v26  ;;  %9509 = vmatprep.subr.bf16.mxu1 %v13960_v27  ;;  %v3637_v26 = vld [vmem:[#allocation9 + $0x1a20] sm:$0xff]  ;;  %v13991_v27 = vcombine.low %v3370_v16, %v3374_v17  ;;  %v14024_v16 = vcombine.high %v3402_v4, %v3406_v7 }
 0x45e   : > { %9251 = vmatprep.subr.bf16.mxu0 %v14214_v28  ;;  %v14245_v28 = vcombine.low %v3625_v18, %v3629_v19  ;;  %v14254_v36 = vcombine.high %v3633_v24, %v3637_v26  ;;  %v3410_v18 = vld [vmem:[#allocation9 + $0x1308] sm:$0xff] }
 0x45f   : > { %v3414_v19 = vld [vmem:[#allocation9 + $0x1328] sm:$0xff] }
 0x460   : > { %9510 = vmatpush1.bf16.msra.mxu1 %v13959_v45  ;;  %v3641_v45 = vld [vmem:[#allocation9 + $0x1a40] sm:$0xff] }
 0x461   : > { %9252 = vmatpush1.bf16.msra.mxu0 %v14213_v25  ;;  %9511 = vmatprep.subr.bf16.mxu1 %v13968_v53  ;;  %v3645_v25 = vld [vmem:[#allocation9 + $0x1a60] sm:$0xff]  ;;  %v13999_v53 = vcombine.low %v3378_v22, %v3382_v23  ;;  %v14032_v22 = vcombine.high %v3410_v18, %v3414_v19 }
 0x462   : > { %9253 = vmatprep.subr.bf16.mxu0 %v14222_v54  ;;  %v14253_v54 = vcombine.low %v3633_v24, %v3637_v26  ;;  %v14262_v58 = vcombine.high %v3641_v45, %v3645_v25  ;;  %v3418_v24 = vld [vmem:[#allocation9 + $0x1348] sm:$0xff] }
 0x463   : > { %v3422_v26 = vld [vmem:[#allocation9 + $0x1368] sm:$0xff] }
 0x464   : > { %9512 = vmatpush1.bf16.msra.mxu1 %v13967_v62  ;;  %v3649_v62 = vld [vmem:[#allocation9 + $0x1a80] sm:$0xff] }
 0x465   : > { %9254 = vmatpush1.bf16.msra.mxu0 %v14221_v63  ;;  %9513 = vmatprep.subr.bf16.mxu1 %v13976_v0  ;;  %v3653_v63 = vld [vmem:[#allocation9 + $0x1aa0] sm:$0xff]  ;;  %v14007_v0 = vcombine.low %v3386_v38, %v3390_v40  ;;  %v14040_v38 = vcombine.high %v3418_v24, %v3422_v26 }
 0x466   : > { %9255 = vmatprep.subr.bf16.mxu0 %v14230_v1  ;;  %v14261_v1 = vcombine.low %v3641_v45, %v3645_v25  ;;  %v14270_v3 = vcombine.high %v3649_v62, %v3653_v63  ;;  %v3426_v45 = vld [vmem:[#allocation9 + $0x1388] sm:$0xff] }
 0x467   : > { %v3430_v25 = vld [vmem:[#allocation9 + $0x13a8] sm:$0xff] }
 0x468   : > { %9514 = vmatpush1.bf16.msra.mxu1 %v13975_v10  ;;  %v3657_v10 = vld [vmem:[#allocation9 + $0x1ac0] sm:$0xff] }
 0x469   : > { %9256 = vmatpush1.bf16.msra.mxu0 %v14229_v11  ;;  %9515 = vmatprep.subr.bf16.mxu1 %v13984_v12  ;;  %v3661_v11 = vld [vmem:[#allocation9 + $0x1ae0] sm:$0xff]  ;;  %v14015_v12 = vcombine.low %v3394_v60, %v3398_v61  ;;  %v14048_v61 = vcombine.high %v3426_v45, %v3430_v25 }
 0x46a   : > { %9257 = vmatprep.subr.bf16.mxu0 %v14238_v14  ;;  %v14269_v14 = vcombine.low %v3649_v62, %v3653_v63  ;;  %v14278_v17 = vcombine.high %v3657_v10, %v3661_v11  ;;  %v2617_v62 = vld [vmem:[#allocation2 + $0x60] sm:$0xff] }
 0x46b   : > { %v2633_v63 = vld [vmem:[#allocation2 + $0xe0] sm:$0xff] }
 0x46c   : > { %9516 = vmatpush1.bf16.msra.mxu1 %v13983_v20  ;;  %v3665_v20 = vld [vmem:[#allocation9 + $0x1b00] sm:$0xff] }
 0x46d   : > { %9258 = vmatpush1.bf16.msra.mxu0 %v14237_v44  ;;  %9517 = vmatprep.subr.bf16.mxu1 %v13992_v21  ;;  %v3669_v44 = vld [vmem:[#allocation9 + $0x1b20] sm:$0xff]  ;;  %v14023_v21 = vcombine.low %v3402_v4, %v3406_v7  ;;  %v2704_v4 = vrot.slane %v16770_v8, %v16720_v50 }
 0x46e   : > { %9259 = vmatprep.subr.bf16.mxu0 %v14246_v41  ;;  %v14277_v41 = vcombine.low %v3657_v10, %v3661_v11  ;;  %v14286_v23 = vcombine.high %v3665_v20, %v3669_v44  ;;  %v3693_v7 = vld [vmem:[#allocation9 + $0x1be0] sm:$0xff]  ;;  %v2620_v10 = vld [vmem:[#allocation2 + $0x78] sm:$0xff] }
 0x46f   : > { %v2636_v11 = vld [vmem:[#allocation2 + $0xf8] sm:$0xff] }
 0x470   : > { %9518 = vmatpush1.bf16.msra.mxu1 %v13991_v27  ;;  %v3673_v27 = vld [vmem:[#allocation9 + $0x1b40] sm:$0xff] }
 0x471   : > { %9260 = vmatpush1.bf16.msra.mxu0 %v14245_v28  ;;  %9519 = vmatprep.subr.bf16.mxu1 %v14000_v33  ;;  %v3677_v28 = vld [vmem:[#allocation9 + $0x1b60] sm:$0xff]  ;;  %v14031_v33 = vcombine.low %v3410_v18, %v3414_v19 }
 0x472   : > { %9261 = vmatprep.subr.bf16.mxu0 %v14254_v36  ;;  %v14285_v36 = vcombine.low %v3665_v20, %v3669_v44  ;;  %v14294_v40 = vcombine.high %v3673_v27, %v3677_v28  ;;  %v14293_v60 = vcombine.low %v3673_v27, %v3677_v28  ;;  %v3442_v20 = vld [vmem:[#allocation9 + $0x1408] sm:$0xff] }
 0x473   : > { %v3446_v44 = vld [vmem:[#allocation9 + $0x1428] sm:$0xff] }
 0x474   : > { %9520 = vmatpush1.bf16.msra.mxu1 %v13999_v53  ;;  %v3681_v53 = vld [vmem:[#allocation9 + $0x1b80] sm:$0xff] }
 0x475   : > { %9262 = vmatpush1.bf16.msra.mxu0 %v14253_v54  ;;  %9521 = vmatprep.subr.bf16.mxu1 %v14008_v57  ;;  %v3685_v54 = vld [vmem:[#allocation9 + $0x1ba0] sm:$0xff]  ;;  %v14039_v57 = vcombine.low %v3418_v24, %v3422_v26 }
 0x476   : > { %9263 = vmatprep.subr.bf16.mxu0 %v14262_v58  ;;  %v2692_v58 = vrot.slane %v16770_v8, %v16717_v13 }
 0x478   : > { %9522 = vmatpush1.bf16.msra.mxu1 %v14007_v0  ;;  %v14302_v0 = vcombine.high %v3681_v53, %v3685_v54 }
 0x479   : > { %9264 = vmatpush1.bf16.msra.mxu0 %v14261_v1  ;;  %9523 = vmatprep.subr.bf16.mxu1 %v14016_v2  ;;  %v3689_v1 = vld [vmem:[#allocation9 + $0x1bc0] sm:$0xff]  ;;  %v3434_v2 = vld [vmem:[#allocation9 + $0x13c8] sm:$0xff] }
 0x47a   : > { %9265 = vmatprep.subr.bf16.mxu0 %v14270_v3  ;;  %v3438_v3 = vld [vmem:[#allocation9 + $0x13e8] sm:$0xff]  ;;  %v14310_v19 = vcombine.high %v3689_v1, %v3693_v7  ;;  %v14309_v28 = vcombine.low %v3689_v1, %v3693_v7 }
 0x47b   : > { %v14056_v18 = vcombine.high %v3434_v2, %v3438_v3  ;;  %v14055_v24 = vcombine.low %v3434_v2, %v3438_v3  ;;  %v3713_v2 = vld [vmem:[#allocation9 + $0x1c80] sm:$0xff] }
 0x47c   : > { %9524 = vmatpush1.bf16.msra.mxu1 %v14015_v12  ;;  %v14047_v12 = vcombine.low %v3426_v45, %v3430_v25  ;;  %v3717_v3 = vld [vmem:[#allocation9 + $0x1ca0] sm:$0xff] }
 0x47d   : > { %9266 = vmatpush1.bf16.msra.mxu0 %v14269_v14  ;;  %9525 = vmatprep.subr.bf16.mxu1 %v14024_v16  ;;  %v2733_v14 = vadd.f32 %v2692_v58, %v2617_v62  ;;  %v2749_v16 = vadd.f32 %v2692_v58, %v2633_v63  ;;  %v3458_v63 = vld [vmem:[#allocation9 + $0x1488] sm:$0xff] }
 0x47e   : > { %9267 = vmatprep.subr.bf16.mxu0 %v14278_v17  ;;  %v14301_v17 = vcombine.low %v3681_v53, %v3685_v54  ;;  %v3705_v53 = vld [vmem:[#allocation9 + $0x1c40] sm:$0xff] }
 0x47f   : > { %v2765_v26 = vmax.f32 %v2733_v14, 0.0  ;;  %v2781_v27 = vmax.f32 %v2749_v16, 0.0  ;;  %v3709_v54 = vld [vmem:[#allocation9 + $0x1c60] sm:$0xff]  ;;  %v3470_v14 = vld [vmem:[#allocation9 + $0x14e8] sm:$0xff] }
 0x480   : > { %9526 = vmatpush1.bf16.msra.mxu1 %v14023_v21  ;;  %v2736_v21 = vadd.f32 %v2704_v4, %v2620_v10  ;;  %v14326_v62 = vcombine.high %v3705_v53, %v3709_v54  ;;  %v14325_v7 = vcombine.low %v3705_v53, %v3709_v54  ;;  %v3721_v16 = vld [vmem:[#allocation9 + $0x1cc0] sm:$0xff] }
 0x481   : > { %9268 = vmatpush1.bf16.msra.mxu0 %v14277_v41  ;;  %9527 = vmatprep.subr.bf16.mxu1 %v14032_v22  ;;  %v2752_v41 = vadd.f32 %v2704_v4, %v2636_v11  ;;  %v3697_v22 = vld [vmem:[#allocation9 + $0x1c00] sm:$0xff]  ;;  %v16788_v58 = vpack.c.bf16 %v2781_v27, %v2765_v26  ;;  %v14334_v11 = vcombine.high %v3713_v2, %v3717_v3 }
 0x482   : > { %9269 = vmatprep.subr.bf16.mxu0 %v14286_v23  ;;  %v3701_v23 = vld [vmem:[#allocation9 + $0x1c20] sm:$0xff]  ;;  %v2768_v45 = vmax.f32 %v2736_v21, 0.0  ;;  %v3474_v21 = vld [vmem:[#allocation9 + $0x1508] sm:$0xff] }
 0x483   : > { %v2784_v25 = vmax.f32 %v2752_v41, 0.0  ;;  %v3478_v41 = vld [vmem:[#allocation9 + $0x1528] sm:$0xff] }
 0x484   : > { %9528 = vmatpush1.bf16.msra.mxu1 %v14031_v33  ;;  %v14064_v33 = vcombine.high %v3442_v20, %v3446_v44  ;;  %v14096_v27 = vcombine.high %v3474_v21, %v3478_v41 }
 0x485   : > { %9270 = vmatpush1.bf16.msra.mxu0 %v14285_v36  ;;  %9529 = vmatprep.subr.bf16.mxu1 %v14040_v38  ;;  %v14318_v36 = vcombine.high %v3697_v22, %v3701_v23  ;;  %v3450_v38 = vld [vmem:[#allocation9 + $0x1448] sm:$0xff]  ;;  %v16790_v1 = vpack.c.bf16 %v2784_v25, %v2768_v45  ;;  %v14095_v45 = vcombine.low %v3474_v21, %v3478_v41 }
 0x486   : > { %9271 = vmatprep.subr.bf16.mxu0 %v14294_v40  ;;  %v3454_v40 = vld [vmem:[#allocation9 + $0x1468] sm:$0xff] }
 0x487   : > { %v14071_v4 = vcombine.low %v3450_v38, %v3454_v40 }
 0x488   : > { %9530 = vmatpush1.bf16.msra.mxu1 %v14039_v57  ;;  %v14063_v57 = vcombine.low %v3442_v20, %v3446_v44 }
 0x489   : > { %9272 = vmatpush1.bf16.msra.mxu0 %v14293_v60  ;;  %9531 = vmatprep.subr.bf16.mxu1 %v14048_v61  ;;  %v14317_v60 = vcombine.low %v3697_v22, %v3701_v23  ;;  %v14072_v61 = vcombine.high %v3450_v38, %v3454_v40  ;;  %v3729_v22 = vld [vmem:[#allocation9 + $0x1d00] sm:$0xff] }
 0x48a   : > { %9273 = vmatprep.subr.bf16.mxu0 %v14302_v0  ;;  %v3462_v0 = vld [vmem:[#allocation9 + $0x14a8] sm:$0xff]  ;;  %v3733_v23 = vld [vmem:[#allocation9 + $0x1d20] sm:$0xff] }
 0x48b   : > { %v14080_v10 = vcombine.high %v3458_v63, %v3462_v0  ;;  %v3737_v38 = vld [vmem:[#allocation9 + $0x1d40] sm:$0xff]  ;;  %v14349_v25 = vcombine.low %v3729_v22, %v3733_v23 }
 0x48c   : > { %9532 = vmatpush1.bf16.msra.mxu1 %v14047_v12  ;;  %v3466_v12 = vld [vmem:[#allocation9 + $0x14c8] sm:$0xff]  ;;  %v3741_v40 = vld [vmem:[#allocation9 + $0x1d60] sm:$0xff] }
 0x48d   : > { %9274 = vmatpush1.bf16.msra.mxu0 %v14301_v17  ;;  %9533 = vmatprep.subr.bf16.mxu1 %v14056_v18  ;;  %v3725_v17 = vld [vmem:[#allocation9 + $0x1ce0] sm:$0xff]  ;;  %v14079_v18 = vcombine.low %v3458_v63, %v3462_v0  ;;  %v14088_v20 = vcombine.high %v3466_v12, %v3470_v14  ;;  %v14358_v54 = vcombine.high %v3737_v38, %v3741_v40 }
 0x48e   : > { %9275 = vmatprep.subr.bf16.mxu0 %v14310_v19  ;;  %v14333_v19 = vcombine.low %v3713_v2, %v3717_v3  ;;  %v14342_v44 = vcombine.high %v3721_v16, %v3725_v17  ;;  %v14341_v26 = vcombine.low %v3721_v16, %v3725_v17  ;;  %v14357_v0 = vcombine.low %v3737_v38, %v3741_v40 }
 0x490   : > { %9534 = vmatpush1.bf16.msra.mxu1 %v14055_v24  ;;  %v14087_v24 = vcombine.low %v3466_v12, %v3470_v14 }
 0x491   : > { %9276 = vmatpush1.bf16.msra.mxu0 %v14309_v28  ;;  %9546 = vmatprep.subr.bf16.mxu1 %v14064_v33  ;;  %v14350_v28 = vcombine.high %v3729_v22, %v3733_v23  ;;  %v3482_v33 = vld [vmem:[#allocation9 + $0x1548] sm:$0xff] }
 0x492   : > { %9288 = vmatprep.subr.bf16.mxu0 %v14318_v36  ;;  %v3486_v36 = vld [vmem:[#allocation9 + $0x1568] sm:$0xff] }
 0x493   : > { %9536 = vmatmul.mubr.bf16.vlgmr.msra.gmra.mrb[4].mxu1 %v16754_v37  ;;  %v14104_v53 = vcombine.high %v3482_v33, %v3486_v36  ;;  %v14103_v63 = vcombine.low %v3482_v33, %v3486_v36 }
 0x494   : > { %9278 = vmatmul.mubr.bf16.vlgmr.msra.gmra.mrb[0].mxu0 %v16788_v58  ;;  %9547 = vmatpush1.bf16.msra.mxu1 %v14063_v57  ;;  %v3490_v57 = vld [vmem:[#allocation9 + $0x1588] sm:$0xff] }
 0x495   : > { %9289 = vmatpush1.bf16.msra.mxu0 %v14317_v60  ;;  %9548 = vmatprep.subr.bf16.mxu1 %v14072_v61  ;;  %v3494_v60 = vld [vmem:[#allocation9 + $0x15a8] sm:$0xff]  ;;  %v3745_v61 = vld [vmem:[#allocation9 + $0x1d80] sm:$0xff] }
 0x496   : > { %9290 = vmatprep.subr.bf16.mxu0 %v14326_v62  ;;  %9320 = vmatprep.mubr.bf16.mxu0 %v16790_v1  ;;  %v3749_v62 = vld [vmem:[#allocation9 + $0x1da0] sm:$0xff]  ;;  %v14112_v2 = vcombine.high %v3490_v57, %v3494_v60  ;;  %v14111_v12 = vcombine.low %v3490_v57, %v3494_v60 }
 0x497   : > { %9578 = vmatprep.mubr.bf16.mxu1 %v16756_v51  ;;  %v14366_v3 = vcombine.high %v3745_v61, %v3749_v62  ;;  %v14365_v14 = vcombine.low %v3745_v61, %v3749_v62 }
 0x498   : > { %9549 = vmatpush1.bf16.msra.mxu1 %v14071_v4  ;;  %v3498_v4 = vld [vmem:[#allocation9 + $0x15c8] sm:$0xff] }
 0x499   : > { %9291 = vmatpush1.bf16.msra.mxu0 %v14325_v7  ;;  %9550 = vmatprep.subr.bf16.mxu1 %v14080_v10  ;;  %v3502_v7 = vld [vmem:[#allocation9 + $0x15e8] sm:$0xff]  ;;  %v3753_v10 = vld [vmem:[#allocation9 + $0x1dc0] sm:$0xff] }
 0x49a   : > { %9292 = vmatprep.subr.bf16.mxu0 %v14334_v11  ;;  %v3757_v11 = vld [vmem:[#allocation9 + $0x1de0] sm:$0xff]  ;;  %v14120_v16 = vcombine.high %v3498_v4, %v3502_v7  ;;  %v14119_v21 = vcombine.low %v3498_v4, %v3502_v7 }
 0x49b   : > { %v14374_v17 = vcombine.high %v3753_v10, %v3757_v11  ;;  %v14373_v41 = vcombine.low %v3753_v10, %v3757_v11 }
 0x49c   : > { %9551 = vmatpush1.bf16.msra.mxu1 %v14079_v18  ;;  %v3506_v18 = vld [vmem:[#allocation9 + $0x1608] sm:$0xff] }
 0x49d   : > { %9293 = vmatpush1.bf16.msra.mxu0 %v14333_v19  ;;  %9552 = vmatprep.subr.bf16.mxu1 %v14088_v20  ;;  %v3510_v19 = vld [vmem:[#allocation9 + $0x1628] sm:$0xff]  ;;  %v3761_v20 = vld [vmem:[#allocation9 + $0x1e00] sm:$0xff] }
 0x49e   : > { %9294 = vmatprep.subr.bf16.mxu0 %v14342_v44  ;;  %v3765_v44 = vld [vmem:[#allocation9 + $0x1e20] sm:$0xff]  ;;  %v14128_v22 = vcombine.high %v3506_v18, %v3510_v19  ;;  %v14127_v33 = vcombine.low %v3506_v18, %v3510_v19 }
 0x49f   : > { %v14382_v23 = vcombine.high %v3761_v20, %v3765_v44  ;;  %v14381_v36 = vcombine.low %v3761_v20, %v3765_v44 }
 0x4a0   : > { %9553 = vmatpush1.bf16.msra.mxu1 %v14087_v24  ;;  %v3514_v24 = vld [vmem:[#allocation9 + $0x1648] sm:$0xff] }
 0x4a1   : > { %9295 = vmatpush1.bf16.msra.mxu0 %v14341_v26  ;;  %9554 = vmatprep.subr.bf16.mxu1 %v14096_v27  ;;  %v3518_v26 = vld [vmem:[#allocation9 + $0x1668] sm:$0xff]  ;;  %v3769_v27 = vld [vmem:[#allocation9 + $0x1e40] sm:$0xff] }
 0x4a2   : > { %9296 = vmatprep.subr.bf16.mxu0 %v14350_v28  ;;  %v3773_v28 = vld [vmem:[#allocation9 + $0x1e60] sm:$0xff]  ;;  %v14136_v38 = vcombine.high %v3514_v24, %v3518_v26  ;;  %v14135_v57 = vcombine.low %v3514_v24, %v3518_v26 }
 0x4a3   : > { %v14390_v40 = vcombine.high %v3769_v27, %v3773_v28  ;;  %v14389_v60 = vcombine.low %v3769_v27, %v3773_v28 }
 0x4a4   : > { %9555 = vmatpush1.bf16.msra.mxu1 %v14095_v45  ;;  %v3522_v45 = vld [vmem:[#allocation9 + $0x1688] sm:$0xff] }
 0x4a5   : > { %9297 = vmatpush1.bf16.msra.mxu0 %v14349_v25  ;;  %9556 = vmatprep.subr.bf16.mxu1 %v14104_v53  ;;  %v3526_v25 = vld [vmem:[#allocation9 + $0x16a8] sm:$0xff]  ;;  %v3777_v53 = vld [vmem:[#allocation9 + $0x1e80] sm:$0xff] }
 0x4a6   : > { %9298 = vmatprep.subr.bf16.mxu0 %v14358_v54  ;;  %v3781_v54 = vld [vmem:[#allocation9 + $0x1ea0] sm:$0xff]  ;;  %v14144_v61 = vcombine.high %v3522_v45, %v3526_v25  ;;  %v14143_v4 = vcombine.low %v3522_v45, %v3526_v25  ;;  %v2700_v25 = vrot.slane %v16770_v8, %v16735_v30 }
 0x4a7   : > { %v14398_v62 = vcombine.high %v3777_v53, %v3781_v54  ;;  %v14397_v7 = vcombine.low %v3777_v53, %v3781_v54 }
 0x4a8   : > { %9557 = vmatpush1.bf16.msra.mxu1 %v14103_v63  ;;  %v3530_v63 = vld [vmem:[#allocation9 + $0x16c8] sm:$0xff] }
 0x4a9   : > { %9299 = vmatpush1.bf16.msra.mxu0 %v14357_v0  ;;  %9558 = vmatprep.subr.bf16.mxu1 %v14112_v2  ;;  %v3534_v0 = vld [vmem:[#allocation9 + $0x16e8] sm:$0xff]  ;;  %v3785_v2 = vld [vmem:[#allocation9 + $0x1ec0] sm:$0xff] }
 0x4aa   : > { %9300 = vmatprep.subr.bf16.mxu0 %v14366_v3  ;;  %v3789_v3 = vld [vmem:[#allocation9 + $0x1ee0] sm:$0xff]  ;;  %v14152_v10 = vcombine.high %v3530_v63, %v3534_v0  ;;  %v14151_v18 = vcombine.low %v3530_v63, %v3534_v0  ;;  %v3566_v63 = vld [vmem:[#allocation9 + $0x17e8] sm:$0xff] }
 0x4ab   : > { %v14406_v11 = vcombine.high %v3785_v2, %v3789_v3  ;;  %v14405_v19 = vcombine.low %v3785_v2, %v3789_v3  ;;  %v3817_v0 = vld [vmem:[#allocation9 + $0x1fc0] sm:$0xff] }
 0x4ac   : > { %9559 = vmatpush1.bf16.msra.mxu1 %v14111_v12  ;;  %v3538_v12 = vld [vmem:[#allocation9 + $0x1708] sm:$0xff]  ;;  %v3821_v2 = vld [vmem:[#allocation9 + $0x1fe0] sm:$0xff] }
 0x4ad   : > { %9301 = vmatpush1.bf16.msra.mxu0 %v14365_v14  ;;  %9560 = vmatprep.subr.bf16.mxu1 %v14120_v16  ;;  %v3542_v14 = vld [vmem:[#allocation9 + $0x1728] sm:$0xff]  ;;  %v3793_v16 = vld [vmem:[#allocation9 + $0x1f00] sm:$0xff] }
 0x4ae   : > { %9302 = vmatprep.subr.bf16.mxu0 %v14374_v17  ;;  %v3797_v17 = vld [vmem:[#allocation9 + $0x1f20] sm:$0xff]  ;;  %v14160_v20 = vcombine.high %v3538_v12, %v3542_v14  ;;  %v14159_v24 = vcombine.low %v3538_v12, %v3542_v14  ;;  %v3570_v12 = vld [vmem:[#allocation9 + $0x1808] sm:$0xff] }
 0x4af   : > { %v14414_v44 = vcombine.high %v3793_v16, %v3797_v17  ;;  %v14413_v26 = vcombine.low %v3793_v16, %v3797_v17  ;;  %v3574_v14 = vld [vmem:[#allocation9 + $0x1828] sm:$0xff]  ;;  %v2803_v16 = vld [vmem:[#allocation9 + $0x10] sm:$0xff] }
 0x4b0   : > { %9561 = vmatpush1.bf16.msra.mxu1 %v14119_v21  ;;  %v3546_v21 = vld [vmem:[#allocation9 + $0x1748] sm:$0xff]  ;;  %v2807_v17 = vld [vmem:[#allocation9 + $0x30] sm:$0xff] }
 0x4b1   : > { %9303 = vmatpush1.bf16.msra.mxu0 %v14373_v41  ;;  %9562 = vmatprep.subr.bf16.mxu1 %v14128_v22  ;;  %v3550_v41 = vld [vmem:[#allocation9 + $0x1768] sm:$0xff]  ;;  %v3801_v22 = vld [vmem:[#allocation9 + $0x1f40] sm:$0xff] }
 0x4b2   : > { %9304 = vmatprep.subr.bf16.mxu0 %v14382_v23  ;;  %v3805_v23 = vld [vmem:[#allocation9 + $0x1f60] sm:$0xff]  ;;  %v14168_v27 = vcombine.high %v3546_v21, %v3550_v41  ;;  %v14167_v45 = vcombine.low %v3546_v21, %v3550_v41  ;;  %v14192_v21 = vcombine.high %v3570_v12, %v3574_v14  ;;  %v13426_v41 = vcombine.high %v2803_v16, %v2807_v17 }
 0x4b3   : > { %v14422_v28 = vcombine.high %v3801_v22, %v3805_v23  ;;  %v14421_v53 = vcombine.low %v3801_v22, %v3805_v23  ;;  %v3578_v22 = vld [vmem:[#allocation9 + $0x1848] sm:$0xff] }
 0x4b4   : > { %9563 = vmatpush1.bf16.msra.mxu1 %v14127_v33  ;;  %v3554_v33 = vld [vmem:[#allocation9 + $0x1788] sm:$0xff] }
 0x4b5   : > { %9305 = vmatpush1.bf16.msra.mxu0 %v14381_v36  ;;  %9564 = vmatprep.subr.bf16.mxu1 %v14136_v38  ;;  %v3558_v36 = vld [vmem:[#allocation9 + $0x17a8] sm:$0xff]  ;;  %v3809_v38 = vld [vmem:[#allocation9 + $0x1f80] sm:$0xff] }
 0x4b6   : > { %9306 = vmatprep.subr.bf16.mxu0 %v14390_v40  ;;  %v3813_v40 = vld [vmem:[#allocation9 + $0x1fa0] sm:$0xff]  ;;  %v14176_v54 = vcombine.high %v3554_v33, %v3558_v36  ;;  %v14175_v3 = vcombine.low %v3554_v33, %v3558_v36  ;;  %v3582_v23 = vld [vmem:[#allocation9 + $0x1868] sm:$0xff]  ;;  %v13425_v33 = vcombine.low %v2803_v16, %v2807_v17 }
 0x4b7   : > { %v14200_v36 = vcombine.high %v3578_v22, %v3582_v23 }
 0x4b8   : > { %9565 = vmatpush1.bf16.msra.mxu1 %v14135_v57  ;;  %v2619_v57 = vld [vmem:[#allocation2 + $0x70] sm:$0xff] }
 0x4b9   : > { %9307 = vmatpush1.bf16.msra.mxu0 %v14389_v60  ;;  %9566 = vmatprep.subr.bf16.mxu1 %v14144_v61  ;;  %v2635_v60 = vld [vmem:[#allocation2 + $0xf0] sm:$0xff]  ;;  %v14430_v61 = vcombine.high %v3809_v38, %v3813_v40 }
 0x4ba   : > { %9308 = vmatprep.subr.bf16.mxu0 %v14398_v62  ;;  %v3562_v62 = vld [vmem:[#allocation9 + $0x17c8] sm:$0xff] }
 0x4bb   : > { %v14184_v8 = vcombine.high %v3562_v62, %v3566_v63 }
 0x4bc   : > { %9567 = vmatpush1.bf16.msra.mxu1 %v14143_v4  ;;  %v2735_v4 = vadd.f32 %v2700_v25, %v2619_v57 }
 0x4bd   : > { %9309 = vmatpush1.bf16.msra.mxu0 %v14397_v7  ;;  %9568 = vmatprep.subr.bf16.mxu1 %v14152_v10  ;;  %v2751_v7 = vadd.f32 %v2700_v25, %v2635_v60  ;;  %v14429_v10 = vcombine.low %v3809_v38, %v3813_v40  ;;  %v3586_v40 = vld [vmem:[#allocation9 + $0x1888] sm:$0xff]  ;;  %v2819_v25 = vld [vmem:[#allocation9 + $0x90] sm:$0xff] }
 0x4be   : > { %9310 = vmatprep.subr.bf16.mxu0 %v14406_v11  ;;  %v14438_v11 = vcombine.high %v3817_v0, %v3821_v2 }
 0x4c0   : > { %9569 = vmatpush1.bf16.msra.mxu1 %v14151_v18  ;;  %v14183_v18 = vcombine.low %v3562_v62, %v3566_v63  ;;  %v3594_v62 = vld [vmem:[#allocation9 + $0x18c8] sm:$0xff] }
 0x4c1   : > { %9311 = vmatpush1.bf16.msra.mxu0 %v14405_v19  ;;  %9570 = vmatprep.subr.bf16.mxu1 %v14160_v20  ;;  %v2767_v19 = vmax.f32 %v2735_v4, 0.0  ;;  %v2783_v20 = vmax.f32 %v2751_v7, 0.0  ;;  %v3598_v63 = vld [vmem:[#allocation9 + $0x18e8] sm:$0xff] }
 0x4c2   : > { %9312 = vmatprep.subr.bf16.mxu0 %v14414_v44  ;;  %v14437_v44 = vcombine.low %v3817_v0, %v3821_v2  ;;  %v2827_v0 = vld [vmem:[#allocation9 + $0xd0] sm:$0xff]  ;;  %v14216_v7 = vcombine.high %v3594_v62, %v3598_v63  ;;  %v14215_v16 = vcombine.low %v3594_v62, %v3598_v63 }
 0x4c3   : > { %v2831_v2 = vld [vmem:[#allocation9 + $0xf0] sm:$0xff] }
 0x4c4   : > { %9571 = vmatpush1.bf16.msra.mxu1 %v14159_v24  ;;  %v2811_v24 = vld [vmem:[#allocation9 + $0x50] sm:$0xff]  ;;  %v13449_v17 = vcombine.low %v2827_v0, %v2831_v2 }
 0x4c5   : > { %9313 = vmatpush1.bf16.msra.mxu0 %v14413_v26  ;;  %9572 = vmatprep.subr.bf16.mxu1 %v14168_v27  ;;  %v2815_v26 = vld [vmem:[#allocation9 + $0x70] sm:$0xff]  ;;  %v16798_v27 = vpack.c.bf16 %v2783_v20, %v2767_v19  ;;  %v3610_v20 = vld [vmem:[#allocation9 + $0x1948] sm:$0xff] }
 0x4c6   : > { %9314 = vmatprep.subr.bf16.mxu0 %v14422_v28  ;;  %v14191_v28 = vcombine.low %v3570_v12, %v3574_v14  ;;  %v13434_v38 = vcombine.high %v2811_v24, %v2815_v26  ;;  %v13433_v57 = vcombine.low %v2811_v24, %v2815_v26  ;;  %v2835_v12 = vld [vmem:[#allocation9 + $0x110] sm:$0xff] }
 0x4c7   : > { %v2839_v14 = vld [vmem:[#allocation9 + $0x130] sm:$0xff] }
 0x4c8   : > { %9573 = vmatpush1.bf16.msra.mxu1 %v14167_v45  ;;  %v3590_v45 = vld [vmem:[#allocation9 + $0x18a8] sm:$0xff]  ;;  %v13458_v19 = vcombine.high %v2835_v12, %v2839_v14 }
 0x4c9   : > { %9315 = vmatpush1.bf16.msra.mxu0 %v14421_v53  ;;  %9574 = vmatprep.subr.bf16.mxu1 %v14176_v54  ;;  %v2823_v53 = vld [vmem:[#allocation9 + $0xb0] sm:$0xff]  ;;  %v14199_v54 = vcombine.low %v3578_v22, %v3582_v23  ;;  %v14208_v60 = vcombine.high %v3586_v40, %v3590_v45  ;;  %v13457_v23 = vcombine.low %v2835_v12, %v2839_v14 }
 0x4ca   : > { %9316 = vmatprep.subr.bf16.mxu0 %v14430_v61  ;;  %v13442_v61 = vcombine.high %v2819_v25, %v2823_v53  ;;  %v13441_v4 = vcombine.low %v2819_v25, %v2823_v53 }
 0x4cc   : > { %9575 = vmatpush1.bf16.msra.mxu1 %v14175_v3  ;;  %v14207_v3 = vcombine.low %v3586_v40, %v3590_v45 }
 0x4cd   : > { %9317 = vmatpush1.bf16.msra.mxu0 %v14429_v10  ;;  %9576 = vmatprep.subr.bf16.mxu1 %v14184_v8  ;;  %v13450_v10 = vcombine.high %v2827_v0, %v2831_v2  ;;  %v3602_v8 = vld [vmem:[#allocation9 + $0x1908] sm:$0xff] }
 0x4ce   : > { %9318 = vmatprep.subr.bf16.mxu0 %v14438_v11  ;;  %v3606_v11 = vld [vmem:[#allocation9 + $0x1928] sm:$0xff] }
 0x4cf   : > { %v14223_v22 = vcombine.low %v3602_v8, %v3606_v11 }
 0x4d0   : > { %9577 = vmatpush1.bf16.msra.mxu1 %v14183_v18  ;;  %v14224_v18 = vcombine.high %v3602_v8, %v3606_v11 }
 0x4d1   : > { %9319 = vmatpush1.bf16.msra.mxu0 %v14437_v44  ;;  %9589 = vmatprep.subr.bf16.mxu1 %v14192_v21  ;;  %v3614_v44 = vld [vmem:[#allocation9 + $0x1968] sm:$0xff]  ;;  %v2843_v21 = vld [vmem:[#allocation9 + $0x150] sm:$0xff] }
 0x4d2   : > { %9675 = vmatprep.subr.bf16.mxu0 %v13426_v41  ;;  %v2847_v41 = vld [vmem:[#allocation9 + $0x170] sm:$0xff]  ;;  %v14232_v24 = vcombine.high %v3610_v20, %v3614_v44  ;;  %v14231_v40 = vcombine.low %v3610_v20, %v3614_v44 }
 0x4d3   : > { %9579 = vmatmul.mubr.bf16.vlgmr.msra.gmra.mrb[4].mxu1 %v16776_v6  ;;  %v13466_v26 = vcombine.high %v2843_v21, %v2847_v41  ;;  %v13465_v45 = vcombine.low %v2843_v21, %v2847_v41 }
 0x4d4   : > { %9321 = vmatmul.mubr.bf16.vlgmr.msra.gmra.mrb[0].mxu0 %v16798_v27  ;;  %9590 = vmatpush1.bf16.msra.mxu1 %v14191_v28  ;;  %v3618_v28 = vld [vmem:[#allocation9 + $0x1988] sm:$0xff] }
 0x4d5   : > { %9676 = vmatpush1.bf16.msra.mxu0 %v13425_v33  ;;  %9591 = vmatprep.subr.bf16.mxu1 %v14200_v36  ;;  %v3622_v33 = vld [vmem:[#allocation9 + $0x19a8] sm:$0xff]  ;;  %v2851_v36 = vld [vmem:[#allocation9 + $0x190] sm:$0xff] }
 0x4d6   : > { %9677 = vmatprep.subr.bf16.mxu0 %v13434_v38  ;;  %9621 = vmatprep.mubr.bf16.mxu1 %v16778_v15  ;;  %v2855_v38 = vld [vmem:[#allocation9 + $0x1b0] sm:$0xff]  ;;  %v14240_v25 = vcombine.high %v3618_v28, %v3622_v33  ;;  %v14239_v62 = vcombine.low %v3618_v28, %v3622_v33 }
 0x4d7   : > { %9707 = vmatprep.mubr.bf16.mxu0 %v16685_v5  ;;  %v13474_v53 = vcombine.high %v2851_v36, %v2855_v38  ;;  %v13473_v63 = vcombine.low %v2851_v36, %v2855_v38 }
 0x4d8   : > { %9592 = vmatpush1.bf16.msra.mxu1 %v14199_v54  ;;  %v3626_v54 = vld [vmem:[#allocation9 + $0x19c8] sm:$0xff] }
 0x4d9   : > { %9678 = vmatpush1.bf16.msra.mxu0 %v13433_v57  ;;  %9593 = vmatprep.subr.bf16.mxu1 %v14208_v60  ;;  %v3630_v57 = vld [vmem:[#allocation9 + $0x19e8] sm:$0xff]  ;;  %v2859_v60 = vld [vmem:[#allocation9 + $0x1d0] sm:$0xff] }
 0x4da   : > { %9679 = vmatprep.subr.bf16.mxu0 %v13442_v61  ;;  %v2863_v61 = vld [vmem:[#allocation9 + $0x1f0] sm:$0xff]  ;;  %v14248_v0 = vcombine.high %v3626_v54, %v3630_v57  ;;  %v14247_v8 = vcombine.low %v3626_v54, %v3630_v57 }
 0x4db   : > { %v13482_v2 = vcombine.high %v2859_v60, %v2863_v61  ;;  %v13481_v11 = vcombine.low %v2859_v60, %v2863_v61 }
 0x4dc   : > { %9594 = vmatpush1.bf16.msra.mxu1 %v14207_v3  ;;  %v3634_v3 = vld [vmem:[#allocation9 + $0x1a08] sm:$0xff] }
 0x4dd   : > { %9680 = vmatpush1.bf16.msra.mxu0 %v13441_v4  ;;  %9595 = vmatprep.subr.bf16.mxu1 %v14216_v7  ;;  %v3638_v4 = vld [vmem:[#allocation9 + $0x1a28] sm:$0xff]  ;;  %v2867_v7 = vld [vmem:[#allocation9 + $0x210] sm:$0xff] }
 0x4de   : > { %9681 = vmatprep.subr.bf16.mxu0 %v13450_v10  ;;  %v2871_v10 = vld [vmem:[#allocation9 + $0x230] sm:$0xff]  ;;  %v14256_v12 = vcombine.high %v3634_v3, %v3638_v4  ;;  %v14255_v20 = vcombine.low %v3634_v3, %v3638_v4 }
 0x4df   : > { %v13490_v14 = vcombine.high %v2867_v7, %v2871_v10  ;;  %v13489_v44 = vcombine.low %v2867_v7, %v2871_v10 }
 0x4e0   : > { %9596 = vmatpush1.bf16.msra.mxu1 %v14215_v16  ;;  %v3642_v16 = vld [vmem:[#allocation9 + $0x1a48] sm:$0xff] }
 0x4e1   : > { %9682 = vmatpush1.bf16.msra.mxu0 %v13449_v17  ;;  %9597 = vmatprep.subr.bf16.mxu1 %v14224_v18  ;;  %v3646_v17 = vld [vmem:[#allocation9 + $0x1a68] sm:$0xff]  ;;  %v2875_v18 = vld [vmem:[#allocation9 + $0x250] sm:$0xff] }
 0x4e2   : > { %9683 = vmatprep.subr.bf16.mxu0 %v13458_v19  ;;  %v2879_v19 = vld [vmem:[#allocation9 + $0x270] sm:$0xff]  ;;  %v14264_v21 = vcombine.high %v3642_v16, %v3646_v17  ;;  %v14263_v28 = vcombine.low %v3642_v16, %v3646_v17 }
 0x4e3   : > { %v13498_v41 = vcombine.high %v2875_v18, %v2879_v19  ;;  %v13497_v33 = vcombine.low %v2875_v18, %v2879_v19 }
 0x4e4   : > { %9598 = vmatpush1.bf16.msra.mxu1 %v14223_v22  ;;  %v3650_v22 = vld [vmem:[#allocation9 + $0x1a88] sm:$0xff] }
 0x4e5   : > { %9684 = vmatpush1.bf16.msra.mxu0 %v13457_v23  ;;  %9599 = vmatprep.subr.bf16.mxu1 %v14232_v24  ;;  %v3654_v23 = vld [vmem:[#allocation9 + $0x1aa8] sm:$0xff]  ;;  %v2883_v24 = vld [vmem:[#allocation9 + $0x290] sm:$0xff] }
 0x4e6   : > { %9685 = vmatprep.subr.bf16.mxu0 %v13466_v26  ;;  %v2887_v26 = vld [vmem:[#allocation9 + $0x2b0] sm:$0xff]  ;;  %v14272_v36 = vcombine.high %v3650_v22, %v3654_v23  ;;  %v14271_v54 = vcombine.low %v3650_v22, %v3654_v23 }
 0x4e7   : > { %v13506_v38 = vcombine.high %v2883_v24, %v2887_v26  ;;  %v13505_v57 = vcombine.low %v2883_v24, %v2887_v26 }
 0x4e8   : > { %9600 = vmatpush1.bf16.msra.mxu1 %v14231_v40  ;;  %v3658_v40 = vld [vmem:[#allocation9 + $0x1ac8] sm:$0xff] }
 0x4e9   : > { %9686 = vmatpush1.bf16.msra.mxu0 %v13465_v45  ;;  %9601 = vmatprep.subr.bf16.mxu1 %v14240_v25  ;;  %v3662_v45 = vld [vmem:[#allocation9 + $0x1ae8] sm:$0xff]  ;;  %v2891_v25 = vld [vmem:[#allocation9 + $0x2d0] sm:$0xff] }
 0x4ea   : > { %9687 = vmatprep.subr.bf16.mxu0 %v13474_v53  ;;  %v2895_v53 = vld [vmem:[#allocation9 + $0x2f0] sm:$0xff]  ;;  %v14280_v60 = vcombine.high %v3658_v40, %v3662_v45  ;;  %v14279_v3 = vcombine.low %v3658_v40, %v3662_v45 }
 0x4eb   : > { %v13514_v61 = vcombine.high %v2891_v25, %v2895_v53  ;;  %v13513_v4 = vcombine.low %v2891_v25, %v2895_v53 }
 0x4ec   : > { %9602 = vmatpush1.bf16.msra.mxu1 %v14239_v62  ;;  %v3666_v62 = vld [vmem:[#allocation9 + $0x1b08] sm:$0xff] }
 0x4ed   : > { %9688 = vmatpush1.bf16.msra.mxu0 %v13473_v63  ;;  %9603 = vmatprep.subr.bf16.mxu1 %v14248_v0  ;;  %v3670_v63 = vld [vmem:[#allocation9 + $0x1b28] sm:$0xff]  ;;  %v2899_v0 = vld [vmem:[#allocation9 + $0x310] sm:$0xff] }
 0x4ee   : > { %9689 = vmatprep.subr.bf16.mxu0 %v13482_v2  ;;  %v2903_v2 = vld [vmem:[#allocation9 + $0x330] sm:$0xff]  ;;  %v14288_v7 = vcombine.high %v3666_v62, %v3670_v63  ;;  %v14287_v16 = vcombine.low %v3666_v62, %v3670_v63 }
 0x4ef   : > { %v13522_v10 = vcombine.high %v2899_v0, %v2903_v2  ;;  %v13521_v17 = vcombine.low %v2899_v0, %v2903_v2 }
 0x4f0   : > { %9604 = vmatpush1.bf16.msra.mxu1 %v14247_v8  ;;  %v3674_v8 = vld [vmem:[#allocation9 + $0x1b48] sm:$0xff] }
 0x4f1   : > { %9690 = vmatpush1.bf16.msra.mxu0 %v13481_v11  ;;  %9605 = vmatprep.subr.bf16.mxu1 %v14256_v12  ;;  %v3678_v11 = vld [vmem:[#allocation9 + $0x1b68] sm:$0xff]  ;;  %v2907_v12 = vld [vmem:[#allocation9 + $0x350] sm:$0xff] }
 0x4f2   : > { %9691 = vmatprep.subr.bf16.mxu0 %v13490_v14  ;;  %v2911_v14 = vld [vmem:[#allocation9 + $0x370] sm:$0xff]  ;;  %v14296_v18 = vcombine.high %v3674_v8, %v3678_v11  ;;  %v14295_v22 = vcombine.low %v3674_v8, %v3678_v11 }
 0x4f3   : > { %v13530_v19 = vcombine.high %v2907_v12, %v2911_v14  ;;  %v13529_v23 = vcombine.low %v2907_v12, %v2911_v14 }
 0x4f4   : > { %9606 = vmatpush1.bf16.msra.mxu1 %v14255_v20  ;;  %v3682_v20 = vld [vmem:[#allocation9 + $0x1b88] sm:$0xff] }
 0x4f5   : > { %9692 = vmatpush1.bf16.msra.mxu0 %v13489_v44  ;;  %9607 = vmatprep.subr.bf16.mxu1 %v14264_v21  ;;  %v3686_v44 = vld [vmem:[#allocation9 + $0x1ba8] sm:$0xff]  ;;  %v2915_v21 = vld [vmem:[#allocation9 + $0x390] sm:$0xff] }
 0x4f6   : > { %9693 = vmatprep.subr.bf16.mxu0 %v13498_v41  ;;  %v2919_v41 = vld [vmem:[#allocation9 + $0x3b0] sm:$0xff]  ;;  %v14304_v24 = vcombine.high %v3682_v20, %v3686_v44  ;;  %v14303_v40 = vcombine.low %v3682_v20, %v3686_v44 }
 0x4f7   : > { %v13538_v26 = vcombine.high %v2915_v21, %v2919_v41  ;;  %v13537_v45 = vcombine.low %v2915_v21, %v2919_v41 }
 0x4f8   : > { %9608 = vmatpush1.bf16.msra.mxu1 %v14263_v28  ;;  %v3690_v28 = vld [vmem:[#allocation9 + $0x1bc8] sm:$0xff] }
 0x4f9   : > { %9694 = vmatpush1.bf16.msra.mxu0 %v13497_v33  ;;  %9609 = vmatprep.subr.bf16.mxu1 %v14272_v36  ;;  %v3694_v33 = vld [vmem:[#allocation9 + $0x1be8] sm:$0xff]  ;;  %v2923_v36 = vld [vmem:[#allocation9 + $0x3d0] sm:$0xff] }
 0x4fa   : > { %9695 = vmatprep.subr.bf16.mxu0 %v13506_v38  ;;  %v2927_v38 = vld [vmem:[#allocation9 + $0x3f0] sm:$0xff]  ;;  %v14312_v25 = vcombine.high %v3690_v28, %v3694_v33  ;;  %v14311_v62 = vcombine.low %v3690_v28, %v3694_v33 }
 0x4fb   : > { %v13546_v53 = vcombine.high %v2923_v36, %v2927_v38  ;;  %v13545_v63 = vcombine.low %v2923_v36, %v2927_v38 }
 0x4fc   : > { %9610 = vmatpush1.bf16.msra.mxu1 %v14271_v54  ;;  %v3698_v54 = vld [vmem:[#allocation9 + $0x1c08] sm:$0xff] }
 0x4fd   : > { %9696 = vmatpush1.bf16.msra.mxu0 %v13505_v57  ;;  %9611 = vmatprep.subr.bf16.mxu1 %v14280_v60  ;;  %v3702_v57 = vld [vmem:[#allocation9 + $0x1c28] sm:$0xff]  ;;  %v2931_v60 = vld [vmem:[#allocation9 + $0x410] sm:$0xff] }
 0x4fe   : > { %9697 = vmatprep.subr.bf16.mxu0 %v13514_v61  ;;  %v2935_v61 = vld [vmem:[#allocation9 + $0x430] sm:$0xff]  ;;  %v14320_v0 = vcombine.high %v3698_v54, %v3702_v57  ;;  %v14319_v8 = vcombine.low %v3698_v54, %v3702_v57 }
 0x4ff   : > { %v13554_v2 = vcombine.high %v2931_v60, %v2935_v61  ;;  %v13553_v11 = vcombine.low %v2931_v60, %v2935_v61 }
 0x500   : > { %9612 = vmatpush1.bf16.msra.mxu1 %v14279_v3  ;;  %v3706_v3 = vld [vmem:[#allocation9 + $0x1c48] sm:$0xff] }
 0x501   : > { %9698 = vmatpush1.bf16.msra.mxu0 %v13513_v4  ;;  %9613 = vmatprep.subr.bf16.mxu1 %v14288_v7  ;;  %v3710_v4 = vld [vmem:[#allocation9 + $0x1c68] sm:$0xff]  ;;  %v2939_v7 = vld [vmem:[#allocation9 + $0x450] sm:$0xff] }
 0x502   : > { %9699 = vmatprep.subr.bf16.mxu0 %v13522_v10  ;;  %v2943_v10 = vld [vmem:[#allocation9 + $0x470] sm:$0xff]  ;;  %v14328_v12 = vcombine.high %v3706_v3, %v3710_v4  ;;  %v14327_v20 = vcombine.low %v3706_v3, %v3710_v4 }
 0x503   : > { %v13562_v14 = vcombine.high %v2939_v7, %v2943_v10  ;;  %v13561_v44 = vcombine.low %v2939_v7, %v2943_v10 }
 0x504   : > { %9614 = vmatpush1.bf16.msra.mxu1 %v14287_v16  ;;  %v3714_v16 = vld [vmem:[#allocation9 + $0x1c88] sm:$0xff] }
 0x505   : > { %9700 = vmatpush1.bf16.msra.mxu0 %v13521_v17  ;;  %9615 = vmatprep.subr.bf16.mxu1 %v14296_v18  ;;  %v3718_v17 = vld [vmem:[#allocation9 + $0x1ca8] sm:$0xff]  ;;  %v2947_v18 = vld [vmem:[#allocation9 + $0x490] sm:$0xff] }
 0x506   : > { %9701 = vmatprep.subr.bf16.mxu0 %v13530_v19  ;;  %v2951_v19 = vld [vmem:[#allocation9 + $0x4b0] sm:$0xff]  ;;  %v14336_v21 = vcombine.high %v3714_v16, %v3718_v17  ;;  %v14335_v28 = vcombine.low %v3714_v16, %v3718_v17 }
 0x507   : > { %v13570_v41 = vcombine.high %v2947_v18, %v2951_v19  ;;  %v13569_v33 = vcombine.low %v2947_v18, %v2951_v19 }
 0x508   : > { %9616 = vmatpush1.bf16.msra.mxu1 %v14295_v22  ;;  %v3722_v22 = vld [vmem:[#allocation9 + $0x1cc8] sm:$0xff] }
 0x509   : > { %9702 = vmatpush1.bf16.msra.mxu0 %v13529_v23  ;;  %9617 = vmatprep.subr.bf16.mxu1 %v14304_v24  ;;  %v3726_v23 = vld [vmem:[#allocation9 + $0x1ce8] sm:$0xff]  ;;  %v2955_v24 = vld [vmem:[#allocation9 + $0x4d0] sm:$0xff] }
 0x50a   : > { %9703 = vmatprep.subr.bf16.mxu0 %v13538_v26  ;;  %v2959_v26 = vld [vmem:[#allocation9 + $0x4f0] sm:$0xff]  ;;  %v14344_v36 = vcombine.high %v3722_v22, %v3726_v23  ;;  %v14343_v54 = vcombine.low %v3722_v22, %v3726_v23 }
 0x50b   : > { %v13578_v38 = vcombine.high %v2955_v24, %v2959_v26  ;;  %v13577_v57 = vcombine.low %v2955_v24, %v2959_v26 }
 0x50c   : > { %9618 = vmatpush1.bf16.msra.mxu1 %v14303_v40  ;;  %v3730_v40 = vld [vmem:[#allocation9 + $0x1d08] sm:$0xff] }
 0x50d   : > { %9704 = vmatpush1.bf16.msra.mxu0 %v13537_v45  ;;  %9619 = vmatprep.subr.bf16.mxu1 %v14312_v25  ;;  %v3734_v45 = vld [vmem:[#allocation9 + $0x1d28] sm:$0xff]  ;;  %v2963_v25 = vld [vmem:[#allocation9 + $0x510] sm:$0xff] }
 0x50e   : > { %9705 = vmatprep.subr.bf16.mxu0 %v13546_v53  ;;  %v2967_v53 = vld [vmem:[#allocation9 + $0x530] sm:$0xff]  ;;  %v14352_v60 = vcombine.high %v3730_v40, %v3734_v45  ;;  %v14351_v3 = vcombine.low %v3730_v40, %v3734_v45 }
 0x50f   : > { %v13586_v61 = vcombine.high %v2963_v25, %v2967_v53  ;;  %v13585_v4 = vcombine.low %v2963_v25, %v2967_v53 }
 0x510   : > { %9620 = vmatpush1.bf16.msra.mxu1 %v14311_v62  ;;  %v3738_v62 = vld [vmem:[#allocation9 + $0x1d48] sm:$0xff] }
 0x511   : > { %9706 = vmatpush1.bf16.msra.mxu0 %v13545_v63  ;;  %9632 = vmatprep.subr.bf16.mxu1 %v14320_v0  ;;  %v3742_v63 = vld [vmem:[#allocation9 + $0x1d68] sm:$0xff]  ;;  %v2971_v0 = vld [vmem:[#allocation9 + $0x550] sm:$0xff] }
 0x512   : > { %9718 = vmatprep.subr.bf16.mxu0 %v13554_v2  ;;  %v2975_v2 = vld [vmem:[#allocation9 + $0x570] sm:$0xff]  ;;  %v14360_v7 = vcombine.high %v3738_v62, %v3742_v63  ;;  %v14359_v16 = vcombine.low %v3738_v62, %v3742_v63 }
 0x513   : > { %9622 = vmatmul.mubr.bf16.vlgmr.msra.gmra.mrb[4].mxu1 %v16788_v58  ;;  %v13594_v10 = vcombine.high %v2971_v0, %v2975_v2  ;;  %v13593_v17 = vcombine.low %v2971_v0, %v2975_v2 }
 0x514   : > { %9633 = vmatpush1.bf16.msra.mxu1 %v14319_v8  ;;  %9708 = vmatmul.mubr.bf16.vlgmr.msra.gmra.mrb[4].mxu0 %v16706_v43  ;;  %v3746_v8 = vld [vmem:[#allocation9 + $0x1d88] sm:$0xff] }
 0x515   : > { %9719 = vmatpush1.bf16.msra.mxu0 %v13553_v11  ;;  %9634 = vmatprep.subr.bf16.mxu1 %v14328_v12  ;;  %v3750_v11 = vld [vmem:[#allocation9 + $0x1da8] sm:$0xff]  ;;  %v2979_v12 = vld [vmem:[#allocation9 + $0x590] sm:$0xff] }
 0x516   : > { %9720 = vmatprep.subr.bf16.mxu0 %v13562_v14  ;;  %9664 = vmatprep.mubr.bf16.mxu1 %v16790_v1  ;;  %v2983_v14 = vld [vmem:[#allocation9 + $0x5b0] sm:$0xff]  ;;  %v14368_v18 = vcombine.high %v3746_v8, %v3750_v11  ;;  %v14367_v22 = vcombine.low %v3746_v8, %v3750_v11 }
 0x517   : > { %9750 = vmatprep.mubr.bf16.mxu0 %v16687_v9  ;;  %v13602_v19 = vcombine.high %v2979_v12, %v2983_v14  ;;  %v13601_v23 = vcombine.low %v2979_v12, %v2983_v14 }
 0x518   : > { %9635 = vmatpush1.bf16.msra.mxu1 %v14327_v20  ;;  %v3754_v20 = vld [vmem:[#allocation9 + $0x1dc8] sm:$0xff] }
 0x519   : > { %9721 = vmatpush1.bf16.msra.mxu0 %v13561_v44  ;;  %9636 = vmatprep.subr.bf16.mxu1 %v14336_v21  ;;  %v3758_v44 = vld [vmem:[#allocation9 + $0x1de8] sm:$0xff]  ;;  %v2987_v21 = vld [vmem:[#allocation9 + $0x5d0] sm:$0xff] }
 0x51a   : > { %9722 = vmatprep.subr.bf16.mxu0 %v13570_v41  ;;  %v2991_v41 = vld [vmem:[#allocation9 + $0x5f0] sm:$0xff]  ;;  %v14376_v24 = vcombine.high %v3754_v20, %v3758_v44  ;;  %v14375_v40 = vcombine.low %v3754_v20, %v3758_v44 }
 0x51b   : > { %v13610_v26 = vcombine.high %v2987_v21, %v2991_v41  ;;  %v13609_v45 = vcombine.low %v2987_v21, %v2991_v41 }
 0x51c   : > { %9637 = vmatpush1.bf16.msra.mxu1 %v14335_v28  ;;  %v3762_v28 = vld [vmem:[#allocation9 + $0x1e08] sm:$0xff] }
 0x51d   : > { %9723 = vmatpush1.bf16.msra.mxu0 %v13569_v33  ;;  %9638 = vmatprep.subr.bf16.mxu1 %v14344_v36  ;;  %v3766_v33 = vld [vmem:[#allocation9 + $0x1e28] sm:$0xff]  ;;  %v2995_v36 = vld [vmem:[#allocation9 + $0x610] sm:$0xff] }
 0x51e   : > { %9724 = vmatprep.subr.bf16.mxu0 %v13578_v38  ;;  %v2999_v38 = vld [vmem:[#allocation9 + $0x630] sm:$0xff]  ;;  %v14384_v25 = vcombine.high %v3762_v28, %v3766_v33  ;;  %v14383_v62 = vcombine.low %v3762_v28, %v3766_v33 }
 0x51f   : > { %v13618_v53 = vcombine.high %v2995_v36, %v2999_v38  ;;  %v13617_v63 = vcombine.low %v2995_v36, %v2999_v38 }
 0x520   : > { %9639 = vmatpush1.bf16.msra.mxu1 %v14343_v54  ;;  %v3770_v54 = vld [vmem:[#allocation9 + $0x1e48] sm:$0xff] }
 0x521   : > { %9725 = vmatpush1.bf16.msra.mxu0 %v13577_v57  ;;  %9640 = vmatprep.subr.bf16.mxu1 %v14352_v60  ;;  %v3774_v57 = vld [vmem:[#allocation9 + $0x1e68] sm:$0xff]  ;;  %v3003_v60 = vld [vmem:[#allocation9 + $0x650] sm:$0xff] }
 0x522   : > { %9726 = vmatprep.subr.bf16.mxu0 %v13586_v61  ;;  %v3007_v61 = vld [vmem:[#allocation9 + $0x670] sm:$0xff]  ;;  %v14392_v0 = vcombine.high %v3770_v54, %v3774_v57  ;;  %v14391_v8 = vcombine.low %v3770_v54, %v3774_v57 }
 0x523   : > { %v13626_v2 = vcombine.high %v3003_v60, %v3007_v61  ;;  %v13625_v11 = vcombine.low %v3003_v60, %v3007_v61 }
 0x524   : > { %9641 = vmatpush1.bf16.msra.mxu1 %v14351_v3  ;;  %v3778_v3 = vld [vmem:[#allocation9 + $0x1e88] sm:$0xff] }
 0x525   : > { %9727 = vmatpush1.bf16.msra.mxu0 %v13585_v4  ;;  %9642 = vmatprep.subr.bf16.mxu1 %v14360_v7  ;;  %v3782_v4 = vld [vmem:[#allocation9 + $0x1ea8] sm:$0xff]  ;;  %v3011_v7 = vld [vmem:[#allocation9 + $0x690] sm:$0xff] }
 0x526   : > { %9728 = vmatprep.subr.bf16.mxu0 %v13594_v10  ;;  %v3015_v10 = vld [vmem:[#allocation9 + $0x6b0] sm:$0xff]  ;;  %v14400_v12 = vcombine.high %v3778_v3, %v3782_v4  ;;  %v14399_v20 = vcombine.low %v3778_v3, %v3782_v4 }
 0x527   : > { %v13634_v14 = vcombine.high %v3011_v7, %v3015_v10  ;;  %v13633_v44 = vcombine.low %v3011_v7, %v3015_v10 }
 0x528   : > { %9643 = vmatpush1.bf16.msra.mxu1 %v14359_v16  ;;  %v3786_v16 = vld [vmem:[#allocation9 + $0x1ec8] sm:$0xff] }
 0x529   : > { %9729 = vmatpush1.bf16.msra.mxu0 %v13593_v17  ;;  %9644 = vmatprep.subr.bf16.mxu1 %v14368_v18  ;;  %v3790_v17 = vld [vmem:[#allocation9 + $0x1ee8] sm:$0xff]  ;;  %v3019_v18 = vld [vmem:[#allocation9 + $0x6d0] sm:$0xff] }
 0x52a   : > { %9730 = vmatprep.subr.bf16.mxu0 %v13602_v19  ;;  %v3023_v19 = vld [vmem:[#allocation9 + $0x6f0] sm:$0xff]  ;;  %v14408_v21 = vcombine.high %v3786_v16, %v3790_v17  ;;  %v14407_v28 = vcombine.low %v3786_v16, %v3790_v17 }
 0x52b   : > { %v13642_v41 = vcombine.high %v3019_v18, %v3023_v19  ;;  %v13641_v33 = vcombine.low %v3019_v18, %v3023_v19 }
 0x52c   : > { %9645 = vmatpush1.bf16.msra.mxu1 %v14367_v22  ;;  %v3794_v22 = vld [vmem:[#allocation9 + $0x1f08] sm:$0xff] }
 0x52d   : > { %9731 = vmatpush1.bf16.msra.mxu0 %v13601_v23  ;;  %9646 = vmatprep.subr.bf16.mxu1 %v14376_v24  ;;  %v3798_v23 = vld [vmem:[#allocation9 + $0x1f28] sm:$0xff]  ;;  %v3027_v24 = vld [vmem:[#allocation9 + $0x710] sm:$0xff] }
 0x52e   : > { %9732 = vmatprep.subr.bf16.mxu0 %v13610_v26  ;;  %v3031_v26 = vld [vmem:[#allocation9 + $0x730] sm:$0xff]  ;;  %v14416_v36 = vcombine.high %v3794_v22, %v3798_v23  ;;  %v14415_v54 = vcombine.low %v3794_v22, %v3798_v23 }
 0x52f   : > { %v13650_v38 = vcombine.high %v3027_v24, %v3031_v26  ;;  %v13649_v57 = vcombine.low %v3027_v24, %v3031_v26 }
 0x530   : > { %9647 = vmatpush1.bf16.msra.mxu1 %v14375_v40  ;;  %v3802_v40 = vld [vmem:[#allocation9 + $0x1f48] sm:$0xff] }
 0x531   : > { %9733 = vmatpush1.bf16.msra.mxu0 %v13609_v45  ;;  %9648 = vmatprep.subr.bf16.mxu1 %v14384_v25  ;;  %v3806_v45 = vld [vmem:[#allocation9 + $0x1f68] sm:$0xff]  ;;  %v3035_v25 = vld [vmem:[#allocation9 + $0x750] sm:$0xff] }
 0x532   : > { %9734 = vmatprep.subr.bf16.mxu0 %v13618_v53  ;;  %v3039_v53 = vld [vmem:[#allocation9 + $0x770] sm:$0xff]  ;;  %v14424_v60 = vcombine.high %v3802_v40, %v3806_v45  ;;  %v14423_v3 = vcombine.low %v3802_v40, %v3806_v45 }
 0x533   : > { %v13658_v61 = vcombine.high %v3035_v25, %v3039_v53  ;;  %v13657_v4 = vcombine.low %v3035_v25, %v3039_v53 }
 0x534   : > { %9649 = vmatpush1.bf16.msra.mxu1 %v14383_v62  ;;  %v3810_v62 = vld [vmem:[#allocation9 + $0x1f88] sm:$0xff] }
 0x535   : > { %9735 = vmatpush1.bf16.msra.mxu0 %v13617_v63  ;;  %9650 = vmatprep.subr.bf16.mxu1 %v14392_v0  ;;  %v3814_v63 = vld [vmem:[#allocation9 + $0x1fa8] sm:$0xff]  ;;  %v3043_v0 = vld [vmem:[#allocation9 + $0x790] sm:$0xff] }
 0x536   : > { %9736 = vmatprep.subr.bf16.mxu0 %v13626_v2  ;;  %v3047_v2 = vld [vmem:[#allocation9 + $0x7b0] sm:$0xff]  ;;  %v14432_v7 = vcombine.high %v3810_v62, %v3814_v63  ;;  %v14431_v16 = vcombine.low %v3810_v62, %v3814_v63 }
 0x537   : > { %v13666_v10 = vcombine.high %v3043_v0, %v3047_v2  ;;  %v13665_v17 = vcombine.low %v3043_v0, %v3047_v2 }
 0x538   : > { %9651 = vmatpush1.bf16.msra.mxu1 %v14391_v8  ;;  %v3818_v8 = vld [vmem:[#allocation9 + $0x1fc8] sm:$0xff] }
 0x539   : > { %9737 = vmatpush1.bf16.msra.mxu0 %v13625_v11  ;;  %9652 = vmatprep.subr.bf16.mxu1 %v14400_v12  ;;  %v3822_v11 = vld [vmem:[#allocation9 + $0x1fe8] sm:$0xff]  ;;  %v3051_v12 = vld [vmem:[#allocation9 + $0x7d0] sm:$0xff] }
 0x53a   : > { %9738 = vmatprep.subr.bf16.mxu0 %v13634_v14  ;;  %v3055_v14 = vld [vmem:[#allocation9 + $0x7f0] sm:$0xff]  ;;  %v14440_v18 = vcombine.high %v3818_v8, %v3822_v11  ;;  %v14439_v22 = vcombine.low %v3818_v8, %v3822_v11 }
 0x53b   : > { %v13674_v19 = vcombine.high %v3051_v12, %v3055_v14  ;;  %v13673_v23 = vcombine.low %v3051_v12, %v3055_v14 }
 0x53c   : > { %9653 = vmatpush1.bf16.msra.mxu1 %v14399_v20  ;;  %v2804_v20 = vld [vmem:[#allocation9 + $0x18] sm:$0xff] }
 0x53d   : > { %9739 = vmatpush1.bf16.msra.mxu0 %v13633_v44  ;;  %9654 = vmatprep.subr.bf16.mxu1 %v14408_v21  ;;  %v2808_v44 = vld [vmem:[#allocation9 + $0x38] sm:$0xff]  ;;  %v3059_v21 = vld [vmem:[#allocation9 + $0x810] sm:$0xff] }
 0x53e   : > { %9740 = vmatprep.subr.bf16.mxu0 %v13642_v41  ;;  %v3063_v41 = vld [vmem:[#allocation9 + $0x830] sm:$0xff]  ;;  %v13428_v24 = vcombine.high %v2804_v20, %v2808_v44  ;;  %v13427_v40 = vcombine.low %v2804_v20, %v2808_v44 }
 0x53f   : > { %v13682_v26 = vcombine.high %v3059_v21, %v3063_v41  ;;  %v13681_v45 = vcombine.low %v3059_v21, %v3063_v41  ;;  %v2844_v41 = vld [vmem:[#allocation9 + $0x158] sm:$0xff] }
 0x540   : > { %9655 = vmatpush1.bf16.msra.mxu1 %v14407_v28  ;;  %v2812_v28 = vld [vmem:[#allocation9 + $0x58] sm:$0xff] }
 0x541   : > { %9741 = vmatpush1.bf16.msra.mxu0 %v13641_v33  ;;  %9656 = vmatprep.subr.bf16.mxu1 %v14416_v36  ;;  %v2816_v33 = vld [vmem:[#allocation9 + $0x78] sm:$0xff]  ;;  %v3067_v36 = vld [vmem:[#allocation9 + $0x850] sm:$0xff] }
 0x542   : > { %9742 = vmatprep.subr.bf16.mxu0 %v13650_v38  ;;  %v3071_v38 = vld [vmem:[#allocation9 + $0x870] sm:$0xff]  ;;  %v13436_v25 = vcombine.high %v2812_v28, %v2816_v33  ;;  %v13435_v62 = vcombine.low %v2812_v28, %v2816_v33 }
 0x543   : > { %v13690_v53 = vcombine.high %v3067_v36, %v3071_v38  ;;  %v13689_v63 = vcombine.low %v3067_v36, %v3071_v38  ;;  %v2852_v38 = vld [vmem:[#allocation9 + $0x198] sm:$0xff] }
 0x544   : > { %9657 = vmatpush1.bf16.msra.mxu1 %v14415_v54  ;;  %v2820_v54 = vld [vmem:[#allocation9 + $0x98] sm:$0xff] }
 0x545   : > { %9743 = vmatpush1.bf16.msra.mxu0 %v13649_v57  ;;  %9658 = vmatprep.subr.bf16.mxu1 %v14424_v60  ;;  %v2824_v57 = vld [vmem:[#allocation9 + $0xb8] sm:$0xff]  ;;  %v3075_v60 = vld [vmem:[#allocation9 + $0x890] sm:$0xff] }
 0x546   : > { %9744 = vmatprep.subr.bf16.mxu0 %v13658_v61  ;;  %v3079_v61 = vld [vmem:[#allocation9 + $0x8b0] sm:$0xff]  ;;  %v13444_v0 = vcombine.high %v2820_v54, %v2824_v57  ;;  %v13443_v8 = vcombine.low %v2820_v54, %v2824_v57 }
 0x547   : > { %v13698_v2 = vcombine.high %v3075_v60, %v3079_v61  ;;  %v13697_v11 = vcombine.low %v3075_v60, %v3079_v61  ;;  %v2860_v61 = vld [vmem:[#allocation9 + $0x1d8] sm:$0xff] }
 0x548   : > { %9659 = vmatpush1.bf16.msra.mxu1 %v14423_v3  ;;  %v2828_v3 = vld [vmem:[#allocation9 + $0xd8] sm:$0xff] }
 0x549   : > { %9745 = vmatpush1.bf16.msra.mxu0 %v13657_v4  ;;  %9660 = vmatprep.subr.bf16.mxu1 %v14432_v7  ;;  %v2832_v4 = vld [vmem:[#allocation9 + $0xf8] sm:$0xff]  ;;  %v3083_v7 = vld [vmem:[#allocation9 + $0x8d0] sm:$0xff] }
 0x54a   : > { %9746 = vmatprep.subr.bf16.mxu0 %v13666_v10  ;;  %v3087_v10 = vld [vmem:[#allocation9 + $0x8f0] sm:$0xff]  ;;  %v13452_v12 = vcombine.high %v2828_v3, %v2832_v4  ;;  %v13451_v20 = vcombine.low %v2828_v3, %v2832_v4 }
 0x54b   : > { %v13706_v14 = vcombine.high %v3083_v7, %v3087_v10  ;;  %v13705_v44 = vcombine.low %v3083_v7, %v3087_v10  ;;  %v2868_v10 = vld [vmem:[#allocation9 + $0x218] sm:$0xff] }
 0x54c   : > { %9661 = vmatpush1.bf16.msra.mxu1 %v14431_v16  ;;  %v2836_v16 = vld [vmem:[#allocation9 + $0x118] sm:$0xff] }
 0x54d   : > { %9747 = vmatpush1.bf16.msra.mxu0 %v13665_v17  ;;  %9662 = vmatprep.subr.bf16.mxu1 %v14440_v18  ;;  %v2840_v17 = vld [vmem:[#allocation9 + $0x138] sm:$0xff]  ;;  %v3091_v18 = vld [vmem:[#allocation9 + $0x910] sm:$0xff] }
 0x54e   : > { %9748 = vmatprep.subr.bf16.mxu0 %v13674_v19  ;;  %v3095_v19 = vld [vmem:[#allocation9 + $0x930] sm:$0xff]  ;;  %v13460_v21 = vcombine.high %v2836_v16, %v2840_v17 }
 0x54f   : > { %v13713_v28 = vcombine.low %v3091_v18, %v3095_v19 }
 0x550   : > { %9663 = vmatpush1.bf16.msra.mxu1 %v14439_v22  ;;  %v2848_v22 = vld [vmem:[#allocation9 + $0x178] sm:$0xff] }
 0x551   : > { %9749 = vmatpush1.bf16.msra.mxu0 %v13673_v23  ;;  %10019 = vmatprep.subr.bf16.mxu1 %v13428_v24  ;;  %v3099_v23 = vld [vmem:[#allocation9 + $0x950] sm:$0xff]  ;;  %v13468_v33 = vcombine.high %v2844_v41, %v2848_v22 }
 0x552   : > { %9761 = vmatprep.subr.bf16.mxu0 %v13682_v26  ;;  %v3103_v24 = vld [vmem:[#allocation9 + $0x970] sm:$0xff]  ;;  %v13459_v26 = vcombine.low %v2836_v16, %v2840_v17 }
 0x553   : > { %9665 = vmatmul.mubr.bf16.vlgmr.msra.gmra.mrb[4].mxu1 %v16798_v27  ;;  %v13722_v36 = vcombine.high %v3099_v23, %v3103_v24  ;;  %v13721_v54 = vcombine.low %v3099_v23, %v3103_v24  ;;  %v2884_v24 = vld [vmem:[#allocation9 + $0x298] sm:$0xff] }
 0x554   : > { %9751 = vmatmul.mubr.bf16.vlgmr.msra.gmra.mrb[4].mxu0 %v16708_v48  ;;  %10020 = vmatpush1.bf16.msra.mxu1 %v13427_v40  ;;  %v2856_v40 = vld [vmem:[#allocation9 + $0x1b8] sm:$0xff] }
 0x555   : > { %9762 = vmatpush1.bf16.msra.mxu0 %v13681_v45  ;;  %10021 = vmatprep.subr.bf16.mxu1 %v13436_v25  ;;  %v3107_v45 = vld [vmem:[#allocation9 + $0x990] sm:$0xff]  ;;  %v13476_v57 = vcombine.high %v2852_v38, %v2856_v40 }
 0x556   : > { %9763 = vmatprep.subr.bf16.mxu0 %v13690_v53  ;;  %9793 = vmatprep.mubr.bf16.mxu0 %v16710_v56  ;;  %v3111_v25 = vld [vmem:[#allocation9 + $0x9b0] sm:$0xff]  ;;  %v13467_v53 = vcombine.low %v2844_v41, %v2848_v22 }
 0x557   : > { %10051 = vmatprep.mubr.bf16.mxu1 %v16685_v5  ;;  %v13714_v5 = vcombine.high %v3091_v18, %v3095_v19  ;;  %v13730_v60 = vcombine.high %v3107_v45, %v3111_v25  ;;  %v13729_v3 = vcombine.low %v3107_v45, %v3111_v25  ;;  %v2876_v19 = vld [vmem:[#allocation9 + $0x258] sm:$0xff] }
 0x558   : > { %10022 = vmatpush1.bf16.msra.mxu1 %v13435_v62  ;;  %v2864_v62 = vld [vmem:[#allocation9 + $0x1f8] sm:$0xff] }
 0x559   : > { %9764 = vmatpush1.bf16.msra.mxu0 %v13689_v63  ;;  %10023 = vmatprep.subr.bf16.mxu1 %v13444_v0  ;;  %v3115_v63 = vld [vmem:[#allocation9 + $0x9d0] sm:$0xff]  ;;  %v13484_v4 = vcombine.high %v2860_v61, %v2864_v62  ;;  %v2892_v25 = vld [vmem:[#allocation9 + $0x2d8] sm:$0xff] }
 0x55a   : > { %9765 = vmatprep.subr.bf16.mxu0 %v13698_v2  ;;  %v3119_v0 = vld [vmem:[#allocation9 + $0x9f0] sm:$0xff]  ;;  %v13475_v2 = vcombine.low %v2852_v38, %v2856_v40 }
 0x55b   : > { %v13738_v7 = vcombine.high %v3115_v63, %v3119_v0  ;;  %v13737_v16 = vcombine.low %v3115_v63, %v3119_v0  ;;  %v2900_v0 = vld [vmem:[#allocation9 + $0x318] sm:$0xff] }
 0x55c   : > { %10024 = vmatpush1.bf16.msra.mxu1 %v13443_v8  ;;  %v2872_v8 = vld [vmem:[#allocation9 + $0x238] sm:$0xff] }
 0x55d   : > { %9766 = vmatpush1.bf16.msra.mxu0 %v13697_v11  ;;  %10025 = vmatprep.subr.bf16.mxu1 %v13452_v12  ;;  %v3123_v11 = vld [vmem:[#allocation9 + $0xa10] sm:$0xff]  ;;  %v13492_v17 = vcombine.high %v2868_v10, %v2872_v8 }
 0x55e   : > { %9767 = vmatprep.subr.bf16.mxu0 %v13706_v14  ;;  %v3127_v12 = vld [vmem:[#allocation9 + $0xa30] sm:$0xff]  ;;  %v13483_v14 = vcombine.low %v2860_v61, %v2864_v62 }
 0x55f   : > { %v13746_v18 = vcombine.high %v3123_v11, %v3127_v12  ;;  %v13745_v41 = vcombine.low %v3123_v11, %v3127_v12  ;;  %v2908_v12 = vld [vmem:[#allocation9 + $0x358] sm:$0xff] }
 0x560   : > { %10026 = vmatpush1.bf16.msra.mxu1 %v13451_v20  ;;  %v2880_v20 = vld [vmem:[#allocation9 + $0x278] sm:$0xff] }
 0x561   : > { %9768 = vmatpush1.bf16.msra.mxu0 %v13705_v44  ;;  %10027 = vmatprep.subr.bf16.mxu1 %v13460_v21  ;;  %v3131_v44 = vld [vmem:[#allocation9 + $0xa50] sm:$0xff]  ;;  %v13500_v22 = vcombine.high %v2876_v19, %v2880_v20 }
 0x562   : > { %9769 = vmatprep.subr.bf16.mxu0 %v13714_v5  ;;  %v3135_v21 = vld [vmem:[#allocation9 + $0xa70] sm:$0xff]  ;;  %v13491_v5 = vcombine.low %v2868_v10, %v2872_v8 }
 0x563   : > { %v13754_v23 = vcombine.high %v3131_v44, %v3135_v21  ;;  %v13753_v38 = vcombine.low %v3131_v44, %v3135_v21  ;;  %v2916_v21 = vld [vmem:[#allocation9 + $0x398] sm:$0xff] }
 0x564   : > { %10028 = vmatpush1.bf16.msra.mxu1 %v13459_v26  ;;  %v2888_v26 = vld [vmem:[#allocation9 + $0x2b8] sm:$0xff] }
 0x565   : > { %9770 = vmatpush1.bf16.msra.mxu0 %v13713_v28  ;;  %10029 = vmatprep.subr.bf16.mxu1 %v13468_v33  ;;  %v3139_v28 = vld [vmem:[#allocation9 + $0xa90] sm:$0xff]  ;;  %v13508_v40 = vcombine.high %v2884_v24, %v2888_v26 }
 0x566   : > { %9771 = vmatprep.subr.bf16.mxu0 %v13722_v36  ;;  %v3143_v33 = vld [vmem:[#allocation9 + $0xab0] sm:$0xff]  ;;  %v13499_v36 = vcombine.low %v2876_v19, %v2880_v20 }
 0x567   : > { %v13762_v45 = vcombine.high %v3139_v28, %v3143_v33  ;;  %v13761_v61 = vcombine.low %v3139_v28, %v3143_v33  ;;  %v2924_v33 = vld [vmem:[#allocation9 + $0x3d8] sm:$0xff] }
 0x568   : > { %10030 = vmatpush1.bf16.msra.mxu1 %v13467_v53  ;;  %v2896_v53 = vld [vmem:[#allocation9 + $0x2f8] sm:$0xff] }
 0x569   : > { %9772 = vmatpush1.bf16.msra.mxu0 %v13721_v54  ;;  %10031 = vmatprep.subr.bf16.mxu1 %v13476_v57  ;;  %v3147_v54 = vld [vmem:[#allocation9 + $0xad0] sm:$0xff]  ;;  %v13516_v62 = vcombine.high %v2892_v25, %v2896_v53 }
 0x56a   : > { %9773 = vmatprep.subr.bf16.mxu0 %v13730_v60  ;;  %v3151_v57 = vld [vmem:[#allocation9 + $0xaf0] sm:$0xff]  ;;  %v13507_v60 = vcombine.low %v2884_v24, %v2888_v26 }
 0x56b   : > { %v13770_v63 = vcombine.high %v3147_v54, %v3151_v57  ;;  %v13769_v10 = vcombine.low %v3147_v54, %v3151_v57  ;;  %v2932_v57 = vld [vmem:[#allocation9 + $0x418] sm:$0xff] }
 0x56c   : > { %10032 = vmatpush1.bf16.msra.mxu1 %v13475_v2  ;;  %v2904_v2 = vld [vmem:[#allocation9 + $0x338] sm:$0xff] }
 0x56d   : > { %9774 = vmatpush1.bf16.msra.mxu0 %v13729_v3  ;;  %10033 = vmatprep.subr.bf16.mxu1 %v13484_v4  ;;  %v3155_v3 = vld [vmem:[#allocation9 + $0xb10] sm:$0xff]  ;;  %v13524_v8 = vcombine.high %v2900_v0, %v2904_v2 }
 0x56e   : > { %9775 = vmatprep.subr.bf16.mxu0 %v13738_v7  ;;  %v3159_v4 = vld [vmem:[#allocation9 + $0xb30] sm:$0xff]  ;;  %v13515_v7 = vcombine.low %v2892_v25, %v2896_v53 }
 0x56f   : > { %v13778_v11 = vcombine.high %v3155_v3, %v3159_v4  ;;  %v13777_v19 = vcombine.low %v3155_v3, %v3159_v4  ;;  %v2940_v4 = vld [vmem:[#allocation9 + $0x458] sm:$0xff] }
 0x570   : > { %10034 = vmatpush1.bf16.msra.mxu1 %v13483_v14  ;;  %v2912_v14 = vld [vmem:[#allocation9 + $0x378] sm:$0xff] }
 0x571   : > { %9776 = vmatpush1.bf16.msra.mxu0 %v13737_v16  ;;  %10035 = vmatprep.subr.bf16.mxu1 %v13492_v17  ;;  %v3163_v16 = vld [vmem:[#allocation9 + $0xb50] sm:$0xff]  ;;  %v13532_v20 = vcombine.high %v2908_v12, %v2912_v14 }
 0x572   : > { %9777 = vmatprep.subr.bf16.mxu0 %v13746_v18  ;;  %v3167_v17 = vld [vmem:[#allocation9 + $0xb70] sm:$0xff]  ;;  %v13523_v18 = vcombine.low %v2900_v0, %v2904_v2 }
 0x573   : > { %v13786_v44 = vcombine.high %v3163_v16, %v3167_v17  ;;  %v13785_v24 = vcombine.low %v3163_v16, %v3167_v17  ;;  %v2948_v17 = vld [vmem:[#allocation9 + $0x498] sm:$0xff] }
 0x574   : > { %10036 = vmatpush1.bf16.msra.mxu1 %v13491_v5  ;;  %v2920_v5 = vld [vmem:[#allocation9 + $0x3b8] sm:$0xff] }
 0x575   : > { %9778 = vmatpush1.bf16.msra.mxu0 %v13745_v41  ;;  %10037 = vmatprep.subr.bf16.mxu1 %v13500_v22  ;;  %v3171_v41 = vld [vmem:[#allocation9 + $0xb90] sm:$0xff]  ;;  %v13540_v26 = vcombine.high %v2916_v21, %v2920_v5 }
 0x576   : > { %9779 = vmatprep.subr.bf16.mxu0 %v13754_v23  ;;  %v3175_v22 = vld [vmem:[#allocation9 + $0xbb0] sm:$0xff]  ;;  %v13531_v23 = vcombine.low %v2908_v12, %v2912_v14 }
 0x577   : > { %v13794_v28 = vcombine.high %v3171_v41, %v3175_v22  ;;  %v13793_v25 = vcombine.low %v3171_v41, %v3175_v22  ;;  %v2956_v22 = vld [vmem:[#allocation9 + $0x4d8] sm:$0xff] }
 0x578   : > { %10038 = vmatpush1.bf16.msra.mxu1 %v13499_v36  ;;  %v2928_v36 = vld [vmem:[#allocation9 + $0x3f8] sm:$0xff] }
 0x579   : > { %9780 = vmatpush1.bf16.msra.mxu0 %v13753_v38  ;;  %10039 = vmatprep.subr.bf16.mxu1 %v13508_v40  ;;  %v3179_v38 = vld [vmem:[#allocation9 + $0xbd0] sm:$0xff]  ;;  %v13548_v53 = vcombine.high %v2924_v33, %v2928_v36 }
 0x57a   : > { %9781 = vmatprep.subr.bf16.mxu0 %v13762_v45  ;;  %v3183_v40 = vld [vmem:[#allocation9 + $0xbf0] sm:$0xff]  ;;  %v13539_v45 = vcombine.low %v2916_v21, %v2920_v5 }
 0x57b   : > { %v13802_v54 = vcombine.high %v3179_v38, %v3183_v40  ;;  %v13801_v0 = vcombine.low %v3179_v38, %v3183_v40  ;;  %v2964_v38 = vld [vmem:[#allocation9 + $0x518] sm:$0xff] }
 0x57c   : > { %10040 = vmatpush1.bf16.msra.mxu1 %v13507_v60  ;;  %v2936_v60 = vld [vmem:[#allocation9 + $0x438] sm:$0xff] }
 0x57d   : > { %9782 = vmatpush1.bf16.msra.mxu0 %v13761_v61  ;;  %10041 = vmatprep.subr.bf16.mxu1 %v13516_v62  ;;  %v3187_v61 = vld [vmem:[#allocation9 + $0xc10] sm:$0xff]  ;;  %v13556_v2 = vcombine.high %v2932_v57, %v2936_v60  ;;  %v2968_v40 = vld [vmem:[#allocation9 + $0x538] sm:$0xff] }
 0x57e   : > { %9783 = vmatprep.subr.bf16.mxu0 %v13770_v63  ;;  %v3191_v62 = vld [vmem:[#allocation9 + $0xc30] sm:$0xff]  ;;  %v13547_v63 = vcombine.low %v2924_v33, %v2928_v36 }
 0x57f   : > { %v13810_v3 = vcombine.high %v3187_v61, %v3191_v62  ;;  %v13809_v12 = vcombine.low %v3187_v61, %v3191_v62  ;;  %v2976_v61 = vld [vmem:[#allocation9 + $0x578] sm:$0xff]  ;;  %v16816_v62 = vld [vmem:[#allocation10] sm:$0xff] }
 0x580   : > { %10042 = vmatpush1.bf16.msra.mxu1 %v13515_v7  ;;  %v2944_v7 = vld [vmem:[#allocation9 + $0x478] sm:$0xff] }
 0x581   : > { %9784 = vmatpush1.bf16.msra.mxu0 %v13769_v10  ;;  %10043 = vmatprep.subr.bf16.mxu1 %v13524_v8  ;;  %v3195_v10 = vld [vmem:[#allocation9 + $0xc50] sm:$0xff]  ;;  %v13564_v14 = vcombine.high %v2940_v4, %v2944_v7 }
 0x582   : > { %9785 = vmatprep.subr.bf16.mxu0 %v13778_v11  ;;  %v3199_v8 = vld [vmem:[#allocation9 + $0xc70] sm:$0xff]  ;;  %v13555_v11 = vcombine.low %v2932_v57, %v2936_v60  ;;  %v13588_v57 = vcombine.high %v2964_v38, %v2968_v40  ;;  %v2972_v60 = vld [vmem:[#allocation9 + $0x558] sm:$0xff] }
 0x583   : > { %v13818_v16 = vcombine.high %v3195_v10, %v3199_v8  ;;  %v13817_v21 = vcombine.low %v3195_v10, %v3199_v8  ;;  %v2980_v8 = vld [vmem:[#allocation9 + $0x598] sm:$0xff] }
 0x584   : > { %10044 = vmatpush1.bf16.msra.mxu1 %v13523_v18  ;;  %v2952_v18 = vld [vmem:[#allocation9 + $0x4b8] sm:$0xff] }
 0x585   : > { %9786 = vmatpush1.bf16.msra.mxu0 %v13777_v19  ;;  %10045 = vmatprep.subr.bf16.mxu1 %v13532_v20  ;;  %v3203_v19 = vld [vmem:[#allocation9 + $0xc90] sm:$0xff]  ;;  %v13572_v5 = vcombine.high %v2948_v17, %v2952_v18 }
 0x586   : > { %9787 = vmatprep.subr.bf16.mxu0 %v13786_v44  ;;  %v3207_v20 = vld [vmem:[#allocation9 + $0xcb0] sm:$0xff]  ;;  %v13563_v44 = vcombine.low %v2940_v4, %v2944_v7  ;;  %v13596_v4 = vcombine.high %v2972_v60, %v2976_v61  ;;  %v3830_v7 = vrot.slane %v16816_v62, %v16692_v47 }
 0x587   : > { %v13826_v41 = vcombine.high %v3203_v19, %v3207_v20 }
 0x588   : > { %10046 = vmatpush1.bf16.msra.mxu1 %v13531_v23  ;;  %v2960_v23 = vld [vmem:[#allocation9 + $0x4f8] sm:$0xff] }
 0x589   : > { %9788 = vmatpush1.bf16.msra.mxu0 %v13785_v24  ;;  %10047 = vmatprep.subr.bf16.mxu1 %v13540_v26  ;;  %v3211_v24 = vld [vmem:[#allocation9 + $0xcd0] sm:$0xff]  ;;  %v13580_v33 = vcombine.high %v2956_v22, %v2960_v23 }
 0x58a   : > { %9789 = vmatprep.subr.bf16.mxu0 %v13794_v28  ;;  %v3215_v26 = vld [vmem:[#allocation9 + $0xcf0] sm:$0xff]  ;;  %v13825_v28 = vcombine.low %v3203_v19, %v3207_v20  ;;  %v9022_v20 = vadd.f32 %v16762_v31, %v3830_v7 }
 0x58b   : > { %v13834_v36 = vcombine.high %v3211_v24, %v3215_v26 }
 0x58c   : > { %10048 = vmatpush1.bf16.msra.mxu1 %v13539_v45  ;;  %v3219_v45 = vld [vmem:[#allocation9 + $0xd10] sm:$0xff] }
 0x58d   : > { %9790 = vmatpush1.bf16.msra.mxu0 %v13793_v25  ;;  %10049 = vmatprep.subr.bf16.mxu1 %v13548_v53  ;;  %v3223_v25 = vld [vmem:[#allocation9 + $0xd30] sm:$0xff]  ;;  %v13579_v53 = vcombine.low %v2956_v22, %v2960_v23 }
 0x58e   : > { %9791 = vmatprep.subr.bf16.mxu0 %v13802_v54  ;;  %v13833_v54 = vcombine.low %v3211_v24, %v3215_v26  ;;  %v3243_v23 = vld [vmem:[#allocation9 + $0xdd0] sm:$0xff]  ;;  %v9026_v26 = vadd.f32 %v16766_v46, %v3830_v7 }
 0x58f   : > { %v3247_v24 = vld [vmem:[#allocation9 + $0xdf0] sm:$0xff] }
 0x590   : > { %10050 = vmatpush1.bf16.msra.mxu1 %v13547_v63  ;;  %v3227_v63 = vld [vmem:[#allocation9 + $0xd50] sm:$0xff] }
 0x591   : > { %9792 = vmatpush1.bf16.msra.mxu0 %v13801_v0  ;;  %10062 = vmatprep.subr.bf16.mxu1 %v13556_v2  ;;  %v3231_v0 = vld [vmem:[#allocation9 + $0xd70] sm:$0xff]  ;;  %v13587_v2 = vcombine.low %v2964_v38, %v2968_v40 }
 0x592   : > { %9804 = vmatprep.subr.bf16.mxu0 %v13810_v3  ;;  %v13841_v3 = vcombine.low %v3219_v45, %v3223_v25  ;;  %v13850_v10 = vcombine.high %v3227_v63, %v3231_v0  ;;  %v3251_v46 = vld [vmem:[#allocation9 + $0xe10] sm:$0xff] }
 0x593   : > { %10052 = vmatmul.mubr.bf16.vlgmr.msra.gmra.mrb[8].mxu1 %v16706_v43  ;;  %v13571_v43 = vcombine.low %v2948_v17, %v2952_v18  ;;  %v13595_v17 = vcombine.low %v2972_v60, %v2976_v61  ;;  %v13849_v18 = vcombine.low %v3227_v63, %v3231_v0  ;;  %v3255_v60 = vld [vmem:[#allocation9 + $0xe30] sm:$0xff] }
 0x594   : > { %9794 = vmatmul.mubr.bf16.vlgmr.msra.gmra.mrb[4].mxu0 %v16726_v32  ;;  %10063 = vmatpush1.bf16.msra.mxu1 %v13555_v11  ;;  %v2984_v11 = vld [vmem:[#allocation9 + $0x5b8] sm:$0xff] }
 0x595   : > { %9805 = vmatpush1.bf16.msra.mxu0 %v13809_v12  ;;  %10064 = vmatprep.subr.bf16.mxu1 %v13564_v14  ;;  %v3834_v12 = vrot.slane %v16816_v62, %v16674_v34  ;;  %v3235_v14 = vld [vmem:[#allocation9 + $0xd90] sm:$0xff]  ;;  %v13604_v19 = vcombine.high %v2980_v8, %v2984_v11 }
 0x596   : > { %9806 = vmatprep.subr.bf16.mxu0 %v13818_v16  ;;  %9836 = vmatprep.mubr.bf16.mxu0 %v16728_v42  ;;  %v3239_v16 = vld [vmem:[#allocation9 + $0xdb0] sm:$0xff] }
 0x597   : > { %10094 = vmatprep.mubr.bf16.mxu1 %v16687_v9  ;;  %v13842_v9 = vcombine.high %v3219_v45, %v3223_v25  ;;  %v13857_v31 = vcombine.low %v3235_v14, %v3239_v16 }
 0x598   : > { %10065 = vmatpush1.bf16.msra.mxu1 %v13563_v44  ;;  %v13858_v44 = vcombine.high %v3235_v14, %v3239_v16  ;;  %v3259_v14 = vld [vmem:[#allocation9 + $0xe50] sm:$0xff] }
 0x599   : > { %9807 = vmatpush1.bf16.msra.mxu0 %v13817_v21  ;;  %10066 = vmatprep.subr.bf16.mxu1 %v13572_v5  ;;  %v2988_v21 = vld [vmem:[#allocation9 + $0x5d8] sm:$0xff]  ;;  %v3263_v16 = vld [vmem:[#allocation9 + $0xe70] sm:$0xff] }
 0x59a   : > { %9808 = vmatprep.subr.bf16.mxu0 %v13826_v41  ;;  %v2992_v5 = vld [vmem:[#allocation9 + $0x5f8] sm:$0xff]  ;;  %v9024_v41 = vadd.f32 %v16764_v39, %v3834_v12  ;;  %v13866_v39 = vcombine.high %v3243_v23, %v3247_v24 }
 0x59b   : > { %v13612_v45 = vcombine.high %v2988_v21, %v2992_v5  ;;  %v13611_v63 = vcombine.low %v2988_v21, %v2992_v5  ;;  %v3016_v21 = vld [vmem:[#allocation9 + $0x6b8] sm:$0xff]  ;;  %v3267_v5 = vld [vmem:[#allocation9 + $0xe90] sm:$0xff] }
 0x59c   : > { %10067 = vmatpush1.bf16.msra.mxu1 %v13571_v43  ;;  %v9028_v43 = vadd.f32 %v16768_v52, %v3834_v12 }
 0x59d   : > { %9809 = vmatpush1.bf16.msra.mxu0 %v13825_v28  ;;  %10068 = vmatprep.subr.bf16.mxu1 %v13580_v33 }
 0x59e   : > { %9810 = vmatprep.subr.bf16.mxu0 %v13834_v36  ;;  %v13603_v36 = vcombine.low %v2980_v8, %v2984_v11  ;;  %v3004_v8 = vld [vmem:[#allocation9 + $0x658] sm:$0xff] }
 0x59f   : > { %v3008_v11 = vld [vmem:[#allocation9 + $0x678] sm:$0xff] }
 0x5a0   : > { %10069 = vmatpush1.bf16.msra.mxu1 %v13579_v53 }
 0x5a1   : > { %9811 = vmatpush1.bf16.msra.mxu0 %v13833_v54  ;;  %10070 = vmatprep.subr.bf16.mxu1 %v13588_v57  ;;  %v2996_v54 = vld [vmem:[#allocation9 + $0x618] sm:$0xff] }
 0x5a2   : > { %9812 = vmatprep.subr.bf16.mxu0 %v13842_v9  ;;  %v3000_v57 = vld [vmem:[#allocation9 + $0x638] sm:$0xff] }
 0x5a4   : > { %10071 = vmatpush1.bf16.msra.mxu1 %v13587_v2 }
 0x5a5   : > { %9813 = vmatpush1.bf16.msra.mxu0 %v13841_v3  ;;  %10072 = vmatprep.subr.bf16.mxu1 %v13596_v4  ;;  %v13865_v3 = vcombine.low %v3243_v23, %v3247_v24  ;;  %v13620_v4 = vcombine.high %v2996_v54, %v3000_v57  ;;  %v13881_v23 = vcombine.low %v3259_v14, %v3263_v16 }
 0x5a6   : > { %9814 = vmatprep.subr.bf16.mxu0 %v13850_v10  ;;  %v13874_v10 = vcombine.high %v3251_v46, %v3255_v60 }
 0x5a7   : > { %v9322_v22 = vpop.f32.mrb[0].mxu0 }
 0x5a8   : > { %v14812_v28 = vadd.f32 %v9322_v22, %v9022_v20  ;;  %v9324_v33 = vpop.f32.mrb[1].mxu0  ;;  %10073 = vmatpush1.bf16.msra.mxu1 %v13595_v17  ;;  %v13619_v17 = vcombine.low %v2996_v54, %v3000_v57  ;;  %v13882_v20 = vcombine.high %v3259_v14, %v3263_v16  ;;  %v13627_v22 = vcombine.low %v3004_v8, %v3008_v11  ;;  %v3287_v54 = vld [vmem:[#allocation9 + $0xf30] sm:$0xff] }
 0x5a9   : > { %v14814_v38 = vadd.f32 %v9324_v33, %v9024_v41  ;;  %v9326_v40 = vpop.f32.mrb[2].mxu0  ;;  %9815 = vmatpush1.bf16.msra.mxu0 %v13849_v18  ;;  %10074 = vmatprep.subr.bf16.mxu1 %v13604_v19  ;;  %v13873_v18 = vcombine.low %v3251_v46, %v3255_v60  ;;  %v13628_v19 = vcombine.high %v3004_v8, %v3008_v11  ;;  %v3271_v41 = vld [vmem:[#allocation9 + $0xeb0] sm:$0xff]  ;;  %v3044_v8 = vld [vmem:[#allocation9 + $0x798] sm:$0xff] }
 0x5aa   : > { %v14816_v25 = vadd.f32 %v9326_v40, %v9026_v26  ;;  %v9328_v53 = vpop.f32.mrb[3].mxu0  ;;  %9816 = vmatprep.subr.bf16.mxu0 %v13858_v44  ;;  %v10363_v52 = vmax.f32 %v14812_v28, 0.0  ;;  %v3012_v44 = vld [vmem:[#allocation9 + $0x698] sm:$0xff]  ;;  %v13890_v26 = vcombine.high %v3267_v5, %v3271_v41  ;;  %v3275_v33 = vld [vmem:[#allocation9 + $0xed0] sm:$0xff]  ;;  %v13889_v40 = vcombine.low %v3267_v5, %v3271_v41 }
 0x5ab   : > { %v14818_v9 = vadd.f32 %v9328_v53, %v9028_v43  ;;  %v10364_v0 = vmax.f32 %v14814_v38, 0.0  ;;  %v13636_v24 = vcombine.high %v3012_v44, %v3016_v21  ;;  %v3020_v43 = vld [vmem:[#allocation9 + $0x6d8] sm:$0xff]  ;;  %v13635_v38 = vcombine.low %v3012_v44, %v3016_v21  ;;  %v3299_v14 = vld [vmem:[#allocation9 + $0xf90] sm:$0xff] }
 0x5ac   : > { %v10371_v61 = vmax.f32 %v14816_v25, 0.0  ;;  %10075 = vmatpush1.bf16.msra.mxu1 %v13603_v36  ;;  %v3024_v28 = vld [vmem:[#allocation9 + $0x6f8] sm:$0xff]  ;;  %v3279_v36 = vld [vmem:[#allocation9 + $0xef0] sm:$0xff] }
 0x5ad   : > { %v10372_v2 = vmax.f32 %v14818_v9, 0.0  ;;  %9817 = vmatpush1.bf16.msra.mxu0 %v13857_v31  ;;  %10076 = vmatprep.subr.bf16.mxu1 %v13612_v45  ;;  %v13644_v31 = vcombine.high %v3020_v43, %v3024_v28  ;;  %v13898_v45 = vcombine.high %v3275_v33, %v3279_v36  ;;  %v3028_v25 = vld [vmem:[#allocation9 + $0x718] sm:$0xff]  ;;  %v13643_v57 = vcombine.low %v3020_v43, %v3024_v28  ;;  %v3303_v16 = vld [vmem:[#allocation9 + $0xfb0] sm:$0xff] }
 0x5ae   : > { %v16826_v7 = vpack.c.bf16 %v10371_v61, %v10363_v52  ;;  %9818 = vmatprep.subr.bf16.mxu0 %v13866_v39  ;;  %v3032_v53 = vld [vmem:[#allocation9 + $0x738] sm:$0xff]  ;;  %v3283_v39 = vld [vmem:[#allocation9 + $0xf10] sm:$0xff]  ;;  %v13897_v9 = vcombine.low %v3275_v33, %v3279_v36 }
 0x5af   : > { %v16828_v12 = vpack.c.bf16 %v10372_v2, %v10364_v0  ;;  %v13652_v46 = vcombine.high %v3028_v25, %v3032_v53  ;;  %v13906_v60 = vcombine.high %v3283_v39, %v3287_v54  ;;  %v3036_v52 = vld [vmem:[#allocation9 + $0x758] sm:$0xff]  ;;  %v3295_v0 = vld [vmem:[#allocation9 + $0xf70] sm:$0xff]  ;;  %v13651_v2 = vcombine.low %v3028_v25, %v3032_v53 }
 0x5b0   : > { %10077 = vmatpush1.bf16.msra.mxu1 %v13611_v63  ;;  %v3040_v61 = vld [vmem:[#allocation9 + $0x778] sm:$0xff]  ;;  %v3291_v63 = vld [vmem:[#allocation9 + $0xf50] sm:$0xff] }
 0x5b1   : > { %9819 = vmatpush1.bf16.msra.mxu0 %v13865_v3  ;;  %10078 = vmatprep.subr.bf16.mxu1 %v13620_v4  ;;  %v13905_v3 = vcombine.low %v3283_v39, %v3287_v54  ;;  %v13660_v4 = vcombine.high %v3036_v52, %v3040_v61  ;;  %v3048_v11 = vld [vmem:[#allocation9 + $0x7b8] sm:$0xff]  ;;  %v3307_v5 = vld [vmem:[#allocation9 + $0xfd0] sm:$0xff] }
 0x5b2   : > { %9820 = vmatprep.subr.bf16.mxu0 %v13874_v10  ;;  %v13914_v10 = vcombine.high %v3291_v63, %v3295_v0  ;;  %v3052_v44 = vld [vmem:[#allocation9 + $0x7d8] sm:$0xff]  ;;  %v3311_v41 = vld [vmem:[#allocation9 + $0xff0] sm:$0xff] }
 0x5b3   : > { %v3056_v21 = vld [vmem:[#allocation9 + $0x7f8] sm:$0xff]  ;;  %v3315_v33 = vld [vmem:[#allocation9 + $0x1010] sm:$0xff] }
 0x5b4   : > { %10079 = vmatpush1.bf16.msra.mxu1 %v13619_v17  ;;  %v13659_v17 = vcombine.low %v3036_v52, %v3040_v61  ;;  %v3060_v43 = vld [vmem:[#allocation9 + $0x818] sm:$0xff]  ;;  %v3319_v36 = vld [vmem:[#allocation9 + $0x1030] sm:$0xff] }
 0x5b5   : > { %9821 = vmatpush1.bf16.msra.mxu0 %v13873_v18  ;;  %10080 = vmatprep.subr.bf16.mxu1 %v13628_v19  ;;  %v13913_v18 = vcombine.low %v3291_v63, %v3295_v0  ;;  %v13668_v19 = vcombine.high %v3044_v8, %v3048_v11  ;;  %v3064_v28 = vld [vmem:[#allocation9 + $0x838] sm:$0xff]  ;;  %v3323_v39 = vld [vmem:[#allocation9 + $0x1050] sm:$0xff] }
 0x5b6   : > { %9822 = vmatprep.subr.bf16.mxu0 %v13882_v20  ;;  %v13922_v20 = vcombine.high %v3299_v14, %v3303_v16  ;;  %v3068_v25 = vld [vmem:[#allocation9 + $0x858] sm:$0xff]  ;;  %v3327_v54 = vld [vmem:[#allocation9 + $0x1070] sm:$0xff] }
 0x5b7   : > { %v3072_v53 = vld [vmem:[#allocation9 + $0x878] sm:$0xff]  ;;  %v3331_v63 = vld [vmem:[#allocation9 + $0x1090] sm:$0xff] }
 0x5b8   : > { %10081 = vmatpush1.bf16.msra.mxu1 %v13627_v22  ;;  %v13667_v22 = vcombine.low %v3044_v8, %v3048_v11  ;;  %v3076_v52 = vld [vmem:[#allocation9 + $0x898] sm:$0xff]  ;;  %v3335_v0 = vld [vmem:[#allocation9 + $0x10b0] sm:$0xff] }
 0x5b9   : > { %9823 = vmatpush1.bf16.msra.mxu0 %v13881_v23  ;;  %10082 = vmatprep.subr.bf16.mxu1 %v13636_v24  ;;  %v13921_v23 = vcombine.low %v3299_v14, %v3303_v16  ;;  %v13676_v24 = vcombine.high %v3052_v44, %v3056_v21  ;;  %v3080_v61 = vld [vmem:[#allocation9 + $0x8b8] sm:$0xff]  ;;  %v3339_v14 = vld [vmem:[#allocation9 + $0x10d0] sm:$0xff] }
 0x5ba   : > { %9824 = vmatprep.subr.bf16.mxu0 %v13890_v26  ;;  %v13930_v26 = vcombine.high %v3307_v5, %v3311_v41  ;;  %v3084_v8 = vld [vmem:[#allocation9 + $0x8d8] sm:$0xff]  ;;  %v3343_v16 = vld [vmem:[#allocation9 + $0x10f0] sm:$0xff] }
 0x5bb   : > { %v3088_v11 = vld [vmem:[#allocation9 + $0x8f8] sm:$0xff] }
 0x5bc   : > { %10083 = vmatpush1.bf16.msra.mxu1 %v13635_v38  ;;  %v13675_v38 = vcombine.low %v3052_v44, %v3056_v21  ;;  %v3096_v44 = vld [vmem:[#allocation9 + $0x938] sm:$0xff]  ;;  %v3347_v21 = vld [vmem:[#allocation9 + $0x1110] sm:$0xff] }
 0x5bd   : > { %9825 = vmatpush1.bf16.msra.mxu0 %v13889_v40  ;;  %10084 = vmatprep.subr.bf16.mxu1 %v13644_v31  ;;  %v13929_v40 = vcombine.low %v3307_v5, %v3311_v41  ;;  %v13684_v31 = vcombine.high %v3060_v43, %v3064_v28  ;;  %v3351_v5 = vld [vmem:[#allocation9 + $0x1130] sm:$0xff]  ;;  %v13707_v41 = vcombine.low %v3084_v8, %v3088_v11 }
 0x5be   : > { %9826 = vmatprep.subr.bf16.mxu0 %v13898_v45  ;;  %v13938_v45 = vcombine.high %v3315_v33, %v3319_v36 }
 0x5c0   : > { %10085 = vmatpush1.bf16.msra.mxu1 %v13643_v57  ;;  %v13683_v57 = vcombine.low %v3060_v43, %v3064_v28  ;;  %v3355_v43 = vld [vmem:[#allocation9 + $0x1150] sm:$0xff] }
 0x5c1   : > { %9827 = vmatpush1.bf16.msra.mxu0 %v13897_v9  ;;  %10086 = vmatprep.subr.bf16.mxu1 %v13652_v46  ;;  %v13937_v9 = vcombine.low %v3315_v33, %v3319_v36  ;;  %v13692_v46 = vcombine.high %v3068_v25, %v3072_v53  ;;  %v3359_v28 = vld [vmem:[#allocation9 + $0x1170] sm:$0xff]  ;;  %v13969_v36 = vcombine.low %v3347_v21, %v3351_v5 }
 0x5c2   : > { %9828 = vmatprep.subr.bf16.mxu0 %v13906_v60  ;;  %v13946_v60 = vcombine.high %v3323_v39, %v3327_v54 }
 0x5c4   : > { %10087 = vmatpush1.bf16.msra.mxu1 %v13651_v2  ;;  %v13691_v2 = vcombine.low %v3068_v25, %v3072_v53  ;;  %v3363_v25 = vld [vmem:[#allocation9 + $0x1190] sm:$0xff] }
 0x5c5   : > { %9829 = vmatpush1.bf16.msra.mxu0 %v13905_v3  ;;  %10088 = vmatprep.subr.bf16.mxu1 %v13660_v4  ;;  %v13945_v3 = vcombine.low %v3323_v39, %v3327_v54  ;;  %v13700_v4 = vcombine.high %v3076_v52, %v3080_v61  ;;  %v3367_v53 = vld [vmem:[#allocation9 + $0x11b0] sm:$0xff]  ;;  %v13977_v54 = vcombine.low %v3355_v43, %v3359_v28 }
 0x5c6   : > { %9830 = vmatprep.subr.bf16.mxu0 %v13914_v10  ;;  %v13954_v10 = vcombine.high %v3331_v63, %v3335_v0 }
 0x5c8   : > { %10089 = vmatpush1.bf16.msra.mxu1 %v13659_v17  ;;  %v13953_v17 = vcombine.low %v3331_v63, %v3335_v0  ;;  %v13985_v0 = vcombine.low %v3363_v25, %v3367_v53 }
 0x5c9   : > { %9831 = vmatpush1.bf16.msra.mxu0 %v13913_v18  ;;  %10090 = vmatprep.subr.bf16.mxu1 %v13668_v19  ;;  %v13708_v18 = vcombine.high %v3084_v8, %v3088_v11  ;;  %v13962_v19 = vcombine.high %v3339_v14, %v3343_v16  ;;  %v3379_v8 = vld [vmem:[#allocation9 + $0x1210] sm:$0xff] }
 0x5ca   : > { %9832 = vmatprep.subr.bf16.mxu0 %v13922_v20  ;;  %v3092_v20 = vld [vmem:[#allocation9 + $0x918] sm:$0xff]  ;;  %v3383_v11 = vld [vmem:[#allocation9 + $0x1230] sm:$0xff] }
 0x5cb   : > { %v13715_v33 = vcombine.low %v3092_v20, %v3096_v44 }
 0x5cc   : > { %10091 = vmatpush1.bf16.msra.mxu1 %v13667_v22  ;;  %v13961_v22 = vcombine.low %v3339_v14, %v3343_v16 }
 0x5cd   : > { %9833 = vmatpush1.bf16.msra.mxu0 %v13921_v23  ;;  %10092 = vmatprep.subr.bf16.mxu1 %v13676_v24  ;;  %v13716_v23 = vcombine.high %v3092_v20, %v3096_v44  ;;  %v3100_v24 = vld [vmem:[#allocation9 + $0x958] sm:$0xff]  ;;  %v3387_v20 = vld [vmem:[#allocation9 + $0x1250] sm:$0xff] }
 0x5ce   : > { %9834 = vmatprep.subr.bf16.mxu0 %v13930_v26  ;;  %v3104_v26 = vld [vmem:[#allocation9 + $0x978] sm:$0xff]  ;;  %v3391_v44 = vld [vmem:[#allocation9 + $0x1270] sm:$0xff] }
 0x5cf   : > { %v13723_v39 = vcombine.low %v3100_v24, %v3104_v26 }
 0x5d0   : > { %10093 = vmatpush1.bf16.msra.mxu1 %v13675_v38  ;;  %v13724_v38 = vcombine.high %v3100_v24, %v3104_v26  ;;  %v3395_v24 = vld [vmem:[#allocation9 + $0x1290] sm:$0xff] }
 0x5d1   : > { %9835 = vmatpush1.bf16.msra.mxu0 %v13929_v40  ;;  %10105 = vmatprep.subr.bf16.mxu1 %v13684_v31  ;;  %v13978_v40 = vcombine.high %v3355_v43, %v3359_v28  ;;  %v3108_v31 = vld [vmem:[#allocation9 + $0x998] sm:$0xff]  ;;  %v3399_v26 = vld [vmem:[#allocation9 + $0x12b0] sm:$0xff]  ;;  %v14009_v28 = vcombine.low %v3387_v20, %v3391_v44 }
 0x5d2   : > { %9847 = vmatprep.subr.bf16.mxu0 %v13938_v45  ;;  %v3112_v45 = vld [vmem:[#allocation9 + $0x9b8] sm:$0xff] }
 0x5d3   : > { %10095 = vmatmul.mubr.bf16.vlgmr.msra.gmra.mrb[8].mxu1 %v16708_v48  ;;  %v13699_v48 = vcombine.low %v3076_v52, %v3080_v61  ;;  %v3371_v52 = vld [vmem:[#allocation9 + $0x11d0] sm:$0xff]  ;;  %v13731_v63 = vcombine.low %v3108_v31, %v3112_v45 }
 0x5d4   : > { %9837 = vmatmul.mubr.bf16.vlgmr.msra.gmra.mrb[4].mxu0 %v16742_v29  ;;  %10106 = vmatpush1.bf16.msra.mxu1 %v13683_v57  ;;  %v13732_v57 = vcombine.high %v3108_v31, %v3112_v45  ;;  %v3375_v61 = vld [vmem:[#allocation9 + $0x11f0] sm:$0xff] }
 0x5d5   : > { %9848 = vmatpush1.bf16.msra.mxu0 %v13937_v9  ;;  %10107 = vmatprep.subr.bf16.mxu1 %v13692_v46  ;;  %v13986_v9 = vcombine.high %v3363_v25, %v3367_v53  ;;  %v3116_v46 = vld [vmem:[#allocation9 + $0x9d8] sm:$0xff]  ;;  %v13993_v16 = vcombine.low %v3371_v52, %v3375_v61  ;;  %v3403_v31 = vld [vmem:[#allocation9 + $0x12d0] sm:$0xff]  ;;  %v14017_v53 = vcombine.low %v3395_v24, %v3399_v26 }
 0x5d6   : > { %9849 = vmatprep.subr.bf16.mxu0 %v13946_v60  ;;  %9879 = vmatprep.mubr.bf16.mxu0 %v16744_v59  ;;  %v3120_v60 = vld [vmem:[#allocation9 + $0x9f8] sm:$0xff]  ;;  %v3407_v45 = vld [vmem:[#allocation9 + $0x12f0] sm:$0xff] }
 0x5d7   : > { %10137 = vmatprep.mubr.bf16.mxu1 %v16710_v56  ;;  %v13970_v56 = vcombine.high %v3347_v21, %v3351_v5  ;;  %v13739_v14 = vcombine.low %v3116_v46, %v3120_v60  ;;  %v14001_v5 = vcombine.low %v3379_v8, %v3383_v11 }
 0x5d8   : > { %10108 = vmatpush1.bf16.msra.mxu1 %v13691_v2  ;;  %v13740_v2 = vcombine.high %v3116_v46, %v3120_v60  ;;  %v3411_v46 = vld [vmem:[#allocation9 + $0x1310] sm:$0xff] }
 0x5d9   : > { %9850 = vmatpush1.bf16.msra.mxu0 %v13945_v3  ;;  %10109 = vmatprep.subr.bf16.mxu1 %v13700_v4  ;;  %v13994_v3 = vcombine.high %v3371_v52, %v3375_v61  ;;  %v3124_v4 = vld [vmem:[#allocation9 + $0xa18] sm:$0xff]  ;;  %v3415_v60 = vld [vmem:[#allocation9 + $0x1330] sm:$0xff]  ;;  %v14025_v61 = vcombine.low %v3403_v31, %v3407_v45 }
 0x5da   : > { %9851 = vmatprep.subr.bf16.mxu0 %v13954_v10  ;;  %v3128_v10 = vld [vmem:[#allocation9 + $0xa38] sm:$0xff] }
 0x5db   : > { %v13747_v21 = vcombine.low %v3124_v4, %v3128_v10 }
 0x5dc   : > { %10110 = vmatpush1.bf16.msra.mxu1 %v13699_v48  ;;  %v13748_v48 = vcombine.high %v3124_v4, %v3128_v10  ;;  %v3419_v4 = vld [vmem:[#allocation9 + $0x1350] sm:$0xff] }
 0x5dd   : > { %9852 = vmatpush1.bf16.msra.mxu0 %v13953_v17  ;;  %10111 = vmatprep.subr.bf16.mxu1 %v13708_v18  ;;  %v14002_v17 = vcombine.high %v3379_v8, %v3383_v11  ;;  %v3132_v18 = vld [vmem:[#allocation9 + $0xa58] sm:$0xff]  ;;  %v3423_v10 = vld [vmem:[#allocation9 + $0x1370] sm:$0xff]  ;;  %v14033_v11 = vcombine.low %v3411_v46, %v3415_v60 }
 0x5de   : > { %9853 = vmatprep.subr.bf16.mxu0 %v13962_v19  ;;  %v3136_v19 = vld [vmem:[#allocation9 + $0xa78] sm:$0xff] }
 0x5df   : > { %v13755_v43 = vcombine.low %v3132_v18, %v3136_v19 }
 0x5e0   : > { %10112 = vmatpush1.bf16.msra.mxu1 %v13707_v41  ;;  %v13756_v41 = vcombine.high %v3132_v18, %v3136_v19  ;;  %v3427_v18 = vld [vmem:[#allocation9 + $0x1390] sm:$0xff] }
 0x5e1   : > { %9854 = vmatpush1.bf16.msra.mxu0 %v13961_v22  ;;  %10113 = vmatprep.subr.bf16.mxu1 %v13716_v23  ;;  %v14010_v22 = vcombine.high %v3387_v20, %v3391_v44  ;;  %v3140_v23 = vld [vmem:[#allocation9 + $0xa98] sm:$0xff]  ;;  %v3431_v19 = vld [vmem:[#allocation9 + $0x13b0] sm:$0xff]  ;;  %v14041_v44 = vcombine.low %v3419_v4, %v3423_v10 }
 0x5e2   : > { %9855 = vmatprep.subr.bf16.mxu0 %v13970_v56  ;;  %v3144_v56 = vld [vmem:[#allocation9 + $0xab8] sm:$0xff] }
 0x5e3   : > { %v13763_v25 = vcombine.low %v3140_v23, %v3144_v56 }
 0x5e4   : > { %10114 = vmatpush1.bf16.msra.mxu1 %v13715_v33  ;;  %v13764_v33 = vcombine.high %v3140_v23, %v3144_v56  ;;  %v3435_v23 = vld [vmem:[#allocation9 + $0x13d0] sm:$0xff] }
 0x5e5   : > { %9856 = vmatpush1.bf16.msra.mxu0 %v13969_v36  ;;  %10115 = vmatprep.subr.bf16.mxu1 %v13724_v38  ;;  %v14018_v36 = vcombine.high %v3395_v24, %v3399_v26  ;;  %v3148_v38 = vld [vmem:[#allocation9 + $0xad8] sm:$0xff]  ;;  %v3439_v56 = vld [vmem:[#allocation9 + $0x13f0] sm:$0xff]  ;;  %v14049_v26 = vcombine.low %v3427_v18, %v3431_v19 }
 0x5e6   : > { %9857 = vmatprep.subr.bf16.mxu0 %v13978_v40  ;;  %v3152_v40 = vld [vmem:[#allocation9 + $0xaf8] sm:$0xff] }
 0x5e7   : > { %v13771_v52 = vcombine.low %v3148_v38, %v3152_v40 }
 0x5e8   : > { %10116 = vmatpush1.bf16.msra.mxu1 %v13723_v39  ;;  %v13772_v39 = vcombine.high %v3148_v38, %v3152_v40  ;;  %v3443_v38 = vld [vmem:[#allocation9 + $0x1410] sm:$0xff] }
 0x5e9   : > { %9858 = vmatpush1.bf16.msra.mxu0 %v13977_v54  ;;  %10117 = vmatprep.subr.bf16.mxu1 %v13732_v57  ;;  %v14026_v54 = vcombine.high %v3403_v31, %v3407_v45  ;;  %v3156_v57 = vld [vmem:[#allocation9 + $0xb18] sm:$0xff]  ;;  %v3447_v40 = vld [vmem:[#allocation9 + $0x1430] sm:$0xff]  ;;  %v14057_v45 = vcombine.low %v3435_v23, %v3439_v56 }
 0x5ea   : > { %9859 = vmatprep.subr.bf16.mxu0 %v13986_v9  ;;  %v3160_v9 = vld [vmem:[#allocation9 + $0xb38] sm:$0xff] }
 0x5eb   : > { %v13779_v8 = vcombine.low %v3156_v57, %v3160_v9 }
 0x5ec   : > { %10118 = vmatpush1.bf16.msra.mxu1 %v13731_v63  ;;  %v13780_v63 = vcombine.high %v3156_v57, %v3160_v9  ;;  %v3451_v57 = vld [vmem:[#allocation9 + $0x1450] sm:$0xff] }
 0x5ed   : > { %9860 = vmatpush1.bf16.msra.mxu0 %v13985_v0  ;;  %10119 = vmatprep.subr.bf16.mxu1 %v13740_v2  ;;  %v14034_v0 = vcombine.high %v3411_v46, %v3415_v60  ;;  %v3164_v2 = vld [vmem:[#allocation9 + $0xb58] sm:$0xff]  ;;  %v3455_v9 = vld [vmem:[#allocation9 + $0x1470] sm:$0xff]  ;;  %v14065_v60 = vcombine.low %v3443_v38, %v3447_v40 }
 0x5ee   : > { %9861 = vmatprep.subr.bf16.mxu0 %v13994_v3  ;;  %v3168_v3 = vld [vmem:[#allocation9 + $0xb78] sm:$0xff] }
 0x5ef   : > { %v13787_v20 = vcombine.low %v3164_v2, %v3168_v3 }
 0x5f0   : > { %10120 = vmatpush1.bf16.msra.mxu1 %v13739_v14  ;;  %v13788_v14 = vcombine.high %v3164_v2, %v3168_v3  ;;  %v3459_v2 = vld [vmem:[#allocation9 + $0x1490] sm:$0xff] }
 0x5f1   : > { %9862 = vmatpush1.bf16.msra.mxu0 %v13993_v16  ;;  %10121 = vmatprep.subr.bf16.mxu1 %v13748_v48  ;;  %v14042_v16 = vcombine.high %v3419_v4, %v3423_v10  ;;  %v3172_v48 = vld [vmem:[#allocation9 + $0xb98] sm:$0xff]  ;;  %v3463_v3 = vld [vmem:[#allocation9 + $0x14b0] sm:$0xff]  ;;  %v14073_v10 = vcombine.low %v3451_v57, %v3455_v9 }
 0x5f2   : > { %9863 = vmatprep.subr.bf16.mxu0 %v14002_v17  ;;  %v3176_v17 = vld [vmem:[#allocation9 + $0xbb8] sm:$0xff] }
 0x5f3   : > { %v13795_v24 = vcombine.low %v3172_v48, %v3176_v17 }
 0x5f4   : > { %10122 = vmatpush1.bf16.msra.mxu1 %v13747_v21  ;;  %v13796_v21 = vcombine.high %v3172_v48, %v3176_v17  ;;  %v3467_v48 = vld [vmem:[#allocation9 + $0x14d0] sm:$0xff] }
 0x5f5   : > { %9864 = vmatpush1.bf16.msra.mxu0 %v14001_v5  ;;  %10123 = vmatprep.subr.bf16.mxu1 %v13756_v41  ;;  %v14050_v5 = vcombine.high %v3427_v18, %v3431_v19  ;;  %v3180_v41 = vld [vmem:[#allocation9 + $0xbd8] sm:$0xff]  ;;  %v3471_v17 = vld [vmem:[#allocation9 + $0x14f0] sm:$0xff]  ;;  %v14081_v18 = vcombine.low %v3459_v2, %v3463_v3 }
 0x5f6   : > { %9865 = vmatprep.subr.bf16.mxu0 %v14010_v22  ;;  %v3184_v22 = vld [vmem:[#allocation9 + $0xbf8] sm:$0xff] }
 0x5f7   : > { %v13803_v31 = vcombine.low %v3180_v41, %v3184_v22 }
 0x5f8   : > { %10124 = vmatpush1.bf16.msra.mxu1 %v13755_v43  ;;  %v13804_v43 = vcombine.high %v3180_v41, %v3184_v22  ;;  %v3479_v41 = vld [vmem:[#allocation9 + $0x1530] sm:$0xff] }
 0x5f9   : > { %9866 = vmatpush1.bf16.msra.mxu0 %v14009_v28  ;;  %10125 = vmatprep.subr.bf16.mxu1 %v13764_v33  ;;  %v14058_v28 = vcombine.high %v3435_v23, %v3439_v56  ;;  %v3188_v33 = vld [vmem:[#allocation9 + $0xc18] sm:$0xff]  ;;  %v14089_v23 = vcombine.low %v3467_v48, %v3471_v17 }
 0x5fa   : > { %9867 = vmatprep.subr.bf16.mxu0 %v14018_v36  ;;  %v3192_v36 = vld [vmem:[#allocation9 + $0xc38] sm:$0xff] }
 0x5fb   : > { %v13811_v46 = vcombine.low %v3188_v33, %v3192_v36 }
 0x5fc   : > { %10126 = vmatpush1.bf16.msra.mxu1 %v13763_v25  ;;  %v13812_v25 = vcombine.high %v3188_v33, %v3192_v36 }
 0x5fd   : > { %9868 = vmatpush1.bf16.msra.mxu0 %v14017_v53  ;;  %10127 = vmatprep.subr.bf16.mxu1 %v13772_v39  ;;  %v14066_v53 = vcombine.high %v3443_v38, %v3447_v40  ;;  %v3196_v39 = vld [vmem:[#allocation9 + $0xc58] sm:$0xff] }
 0x5fe   : > { %9869 = vmatprep.subr.bf16.mxu0 %v14026_v54  ;;  %v3200_v54 = vld [vmem:[#allocation9 + $0xc78] sm:$0xff] }
 0x5ff   : > { %v13819_v4 = vcombine.low %v3196_v39, %v3200_v54 }
 0x600   : > { %10128 = vmatpush1.bf16.msra.mxu1 %v13771_v52  ;;  %v13820_v52 = vcombine.high %v3196_v39, %v3200_v54  ;;  %v3495_v39 = vld [vmem:[#allocation9 + $0x15b0] sm:$0xff]  ;;  %v3842_v54 = vrot.slane %v16816_v62, %v16677_v35 }
 0x601   : > { %9870 = vmatpush1.bf16.msra.mxu0 %v14025_v61  ;;  %10129 = vmatprep.subr.bf16.mxu1 %v13780_v63  ;;  %v14074_v61 = vcombine.high %v3451_v57, %v3455_v9  ;;  %v3204_v63 = vld [vmem:[#allocation9 + $0xc98] sm:$0xff] }
 0x602   : > { %9871 = vmatprep.subr.bf16.mxu0 %v14034_v0  ;;  %v3208_v0 = vld [vmem:[#allocation9 + $0xcb8] sm:$0xff] }
 0x604   : > { %10130 = vmatpush1.bf16.msra.mxu1 %v13779_v8  ;;  %v13828_v8 = vcombine.high %v3204_v63, %v3208_v0 }
 0x605   : > { %9872 = vmatpush1.bf16.msra.mxu0 %v14033_v11  ;;  %10131 = vmatprep.subr.bf16.mxu1 %v13788_v14  ;;  %v14082_v11 = vcombine.high %v3459_v2, %v3463_v3  ;;  %v3212_v14 = vld [vmem:[#allocation9 + $0xcd8] sm:$0xff]  ;;  %v3499_v3 = vld [vmem:[#allocation9 + $0x15d0] sm:$0xff] }
 0x606   : > { %9873 = vmatprep.subr.bf16.mxu0 %v14042_v16  ;;  %v3216_v16 = vld [vmem:[#allocation9 + $0xcf8] sm:$0xff] }
 0x607   : > { %v13836_v19 = vcombine.high %v3212_v14, %v3216_v16  ;;  %v13835_v22 = vcombine.low %v3212_v14, %v3216_v16 }
 0x608   : > { %10132 = vmatpush1.bf16.msra.mxu1 %v13787_v20  ;;  %v14090_v20 = vcombine.high %v3467_v48, %v3471_v17 }
 0x609   : > { %9874 = vmatpush1.bf16.msra.mxu0 %v14041_v44  ;;  %10133 = vmatprep.subr.bf16.mxu1 %v13796_v21  ;;  %v3220_v44 = vld [vmem:[#allocation9 + $0xd18] sm:$0xff] }
 0x60a   : > { %9875 = vmatprep.subr.bf16.mxu0 %v14050_v5  ;;  %v3224_v21 = vld [vmem:[#allocation9 + $0xd38] sm:$0xff]  ;;  %v3475_v5 = vld [vmem:[#allocation9 + $0x1510] sm:$0xff] }
 0x60b   : > { %v13844_v56 = vcombine.high %v3220_v44, %v3224_v21  ;;  %v13843_v33 = vcombine.low %v3220_v44, %v3224_v21  ;;  %v14097_v36 = vcombine.low %v3475_v5, %v3479_v41  ;;  %v3507_v21 = vld [vmem:[#allocation9 + $0x1610] sm:$0xff] }
 0x60c   : > { %10134 = vmatpush1.bf16.msra.mxu1 %v13795_v24  ;;  %v3228_v24 = vld [vmem:[#allocation9 + $0xd58] sm:$0xff] }
 0x60d   : > { %9876 = vmatpush1.bf16.msra.mxu0 %v14049_v26  ;;  %10135 = vmatprep.subr.bf16.mxu1 %v13804_v43  ;;  %v3232_v26 = vld [vmem:[#allocation9 + $0xd78] sm:$0xff]  ;;  %v3483_v43 = vld [vmem:[#allocation9 + $0x1550] sm:$0xff] }
 0x60e   : > { %9877 = vmatprep.subr.bf16.mxu0 %v14058_v28  ;;  %v3487_v28 = vld [vmem:[#allocation9 + $0x1570] sm:$0xff]  ;;  %v13852_v38 = vcombine.high %v3228_v24, %v3232_v26  ;;  %v13851_v57 = vcombine.low %v3228_v24, %v3232_v26 }
 0x60f   : > { %v14106_v40 = vcombine.high %v3483_v43, %v3487_v28  ;;  %v14105_v9 = vcombine.low %v3483_v43, %v3487_v28  ;;  %v3260_v28 = vld [vmem:[#allocation9 + $0xe58] sm:$0xff] }
 0x610   : > { %10136 = vmatpush1.bf16.msra.mxu1 %v13803_v31  ;;  %v3236_v31 = vld [vmem:[#allocation9 + $0xd98] sm:$0xff] }
 0x611   : > { %9878 = vmatpush1.bf16.msra.mxu0 %v14057_v45  ;;  %10148 = vmatprep.subr.bf16.mxu1 %v13812_v25  ;;  %v3240_v45 = vld [vmem:[#allocation9 + $0xdb8] sm:$0xff]  ;;  %v3838_v25 = vrot.slane %v16816_v62, %v16695_v49 }
 0x612   : > { %9890 = vmatprep.subr.bf16.mxu0 %v14066_v53  ;;  %v3491_v53 = vld [vmem:[#allocation9 + $0x1590] sm:$0xff] }
 0x613   : > { %10138 = vmatmul.mubr.bf16.vlgmr.msra.gmra.mrb[8].mxu1 %v16726_v32  ;;  %v13827_v32 = vcombine.low %v3204_v63, %v3208_v0  ;;  %v3248_v63 = vld [vmem:[#allocation9 + $0xdf8] sm:$0xff]  ;;  %v14113_v16 = vcombine.low %v3491_v53, %v3495_v39 }
 0x614   : > { %9880 = vmatmul.mubr.bf16.vlgmr.msra.gmra.mrb[4].mxu0 %v16754_v37  ;;  %10149 = vmatpush1.bf16.msra.mxu1 %v13811_v46  ;;  %v13860_v46 = vcombine.high %v3236_v31, %v3240_v45 }
 0x615   : > { %9891 = vmatpush1.bf16.msra.mxu0 %v14065_v60  ;;  %10150 = vmatprep.subr.bf16.mxu1 %v13820_v52  ;;  %v14114_v52 = vcombine.high %v3491_v53, %v3495_v39  ;;  %v3268_v53 = vld [vmem:[#allocation9 + $0xe98] sm:$0xff] }
 0x616   : > { %9892 = vmatprep.subr.bf16.mxu0 %v14074_v61  ;;  %9922 = vmatprep.mubr.bf16.mxu0 %v16756_v51  ;;  %v3244_v61 = vld [vmem:[#allocation9 + $0xdd8] sm:$0xff] }
 0x617   : > { %10180 = vmatprep.mubr.bf16.mxu1 %v16728_v42  ;;  %v14098_v42 = vcombine.high %v3475_v5, %v3479_v41  ;;  %v13868_v48 = vcombine.high %v3244_v61, %v3248_v63  ;;  %v3511_v5 = vld [vmem:[#allocation9 + $0x1630] sm:$0xff]  ;;  %v3272_v39 = vld [vmem:[#allocation9 + $0xeb8] sm:$0xff] }
 0x618   : > { %10151 = vmatpush1.bf16.msra.mxu1 %v13819_v4  ;;  %v3503_v4 = vld [vmem:[#allocation9 + $0x15f0] sm:$0xff]  ;;  %v14130_v43 = vcombine.high %v3507_v21, %v3511_v5 }
 0x619   : > { %9893 = vmatpush1.bf16.msra.mxu0 %v14073_v10  ;;  %10152 = vmatprep.subr.bf16.mxu1 %v13828_v8 }
 0x61a   : > { %9894 = vmatprep.subr.bf16.mxu0 %v14082_v11  ;;  %v13859_v11 = vcombine.low %v3236_v31, %v3240_v45  ;;  %v14129_v31 = vcombine.low %v3507_v21, %v3511_v5  ;;  %v3551_v21 = vld [vmem:[#allocation9 + $0x1770] sm:$0xff] }
 0x61c   : > { %10153 = vmatpush1.bf16.msra.mxu1 %v13827_v32  ;;  %v14122_v32 = vcombine.high %v3499_v3, %v3503_v4 }
 0x61d   : > { %9895 = vmatpush1.bf16.msra.mxu0 %v14081_v18  ;;  %10154 = vmatprep.subr.bf16.mxu1 %v13836_v19  ;;  %v3252_v18 = vld [vmem:[#allocation9 + $0xe18] sm:$0xff] }
 0x61e   : > { %9896 = vmatprep.subr.bf16.mxu0 %v14090_v20  ;;  %v3256_v19 = vld [vmem:[#allocation9 + $0xe38] sm:$0xff] }
 0x61f   : > { %v13876_v24 = vcombine.high %v3252_v18, %v3256_v19 }
 0x620   : > { %10155 = vmatpush1.bf16.msra.mxu1 %v13835_v22 }
 0x621   : > { %9897 = vmatpush1.bf16.msra.mxu0 %v14089_v23  ;;  %10156 = vmatprep.subr.bf16.mxu1 %v13844_v56  ;;  %v13867_v23 = vcombine.low %v3244_v61, %v3248_v63  ;;  %v3276_v61 = vld [vmem:[#allocation9 + $0xed8] sm:$0xff] }
 0x622   : > { %9898 = vmatprep.subr.bf16.mxu0 %v14098_v42  ;;  %v14121_v42 = vcombine.low %v3499_v3, %v3503_v4  ;;  %v3280_v63 = vld [vmem:[#allocation9 + $0xef8] sm:$0xff]  ;;  %v13891_v3 = vcombine.low %v3268_v53, %v3272_v39 }
 0x624   : > { %10157 = vmatpush1.bf16.msra.mxu1 %v13843_v33  ;;  %v3264_v33 = vld [vmem:[#allocation9 + $0xe78] sm:$0xff] }
 0x625   : > { %9899 = vmatpush1.bf16.msra.mxu0 %v14097_v36  ;;  %10158 = vmatprep.subr.bf16.mxu1 %v13852_v38  ;;  %v3515_v36 = vld [vmem:[#allocation9 + $0x1650] sm:$0xff]  ;;  %v13884_v45 = vcombine.high %v3260_v28, %v3264_v33 }
 0x626   : > { %v9666_v60 = vpop.f32.mrb[4].mxu1  ;;  %9900 = vmatprep.subr.bf16.mxu0 %v14106_v40  ;;  %v3519_v38 = vld [vmem:[#allocation9 + $0x1670] sm:$0xff]  ;;  %v13875_v40 = vcombine.low %v3252_v18, %v3256_v19  ;;  %v3292_v19 = vld [vmem:[#allocation9 + $0xf58] sm:$0xff] }
 0x627   : > { %v14819_v0 = vadd.f32 %v9666_v60, %v3838_v25  ;;  %v9668_v2 = vpop.f32.mrb[5].mxu1  ;;  %v13892_v60 = vcombine.high %v3268_v53, %v3272_v39  ;;  %v3567_v53 = vld [vmem:[#allocation9 + $0x17f0] sm:$0xff] }
 0x628   : > { %v14820_v10 = vadd.f32 %v9668_v2, %v3842_v54  ;;  %v9670_v8 = vpop.f32.mrb[6].mxu1  ;;  %10159 = vmatpush1.bf16.msra.mxu1 %v13851_v57  ;;  %v3527_v57 = vld [vmem:[#allocation9 + $0x16b0] sm:$0xff] }
 0x629   : > { %v14821_v14 = vadd.f32 %v9670_v8, %v3838_v25  ;;  %9901 = vmatpush1.bf16.msra.mxu0 %v14105_v9  ;;  %v9672_v62 = vpop.f32.mrb[7].mxu1  ;;  %10160 = vmatprep.subr.bf16.mxu1 %v13860_v46  ;;  %v10365_v20 = vmax.f32 %v14819_v0, 0.0  ;;  %v14138_v25 = vcombine.high %v3515_v36, %v3519_v38  ;;  %v13883_v9 = vcombine.low %v3260_v28, %v3264_v33  ;;  %v3531_v0 = vld [vmem:[#allocation9 + $0x16d0] sm:$0xff] }
 0x62a   : > { %v14822_v17 = vadd.f32 %v9672_v62, %v3842_v54  ;;  %9902 = vmatprep.subr.bf16.mxu0 %v14114_v52  ;;  %v10366_v41 = vmax.f32 %v14820_v10, 0.0  ;;  %v3523_v54 = vld [vmem:[#allocation9 + $0x1690] sm:$0xff]  ;;  %v14137_v46 = vcombine.low %v3515_v36, %v3519_v38  ;;  %v13900_v10 = vcombine.high %v3276_v61, %v3280_v63 }
 0x62b   : > { %v10373_v44 = vmax.f32 %v14821_v14, 0.0  ;;  %v14146_v52 = vcombine.high %v3523_v54, %v3527_v57  ;;  %v3535_v2 = vld [vmem:[#allocation9 + $0x16f0] sm:$0xff]  ;;  %v14145_v4 = vcombine.low %v3523_v54, %v3527_v57  ;;  %v3288_v14 = vld [vmem:[#allocation9 + $0xf38] sm:$0xff] }
 0x62c   : > { %v10374_v22 = vmax.f32 %v14822_v17, 0.0  ;;  %10161 = vmatpush1.bf16.msra.mxu1 %v13859_v11  ;;  %v14154_v8 = vcombine.high %v3531_v0, %v3535_v2  ;;  %v3284_v11 = vld [vmem:[#allocation9 + $0xf18] sm:$0xff]  ;;  %v3539_v62 = vld [vmem:[#allocation9 + $0x1710] sm:$0xff]  ;;  %v14153_v17 = vcombine.low %v3531_v0, %v3535_v2 }
 0x62d   : > { %v16842_v56 = vpack.c.bf16 %v10373_v44, %v10365_v20  ;;  %9903 = vmatpush1.bf16.msra.mxu0 %v14113_v16  ;;  %10162 = vmatprep.subr.bf16.mxu1 %v13868_v48  ;;  %v3543_v16 = vld [vmem:[#allocation9 + $0x1730] sm:$0xff]  ;;  %v13899_v48 = vcombine.low %v3276_v61, %v3280_v63  ;;  %v3296_v20 = vld [vmem:[#allocation9 + $0xf78] sm:$0xff]  ;;  %v13907_v5 = vcombine.low %v3284_v11, %v3288_v14 }
 0x62e   : > { %v16844_v26 = vpack.c.bf16 %v10374_v22, %v10366_v41  ;;  %9904 = vmatprep.subr.bf16.mxu0 %v14122_v32  ;;  %v13908_v32 = vcombine.high %v3284_v11, %v3288_v14  ;;  %v14162_v18 = vcombine.high %v3539_v62, %v3543_v16  ;;  %v3547_v44 = vld [vmem:[#allocation9 + $0x1750] sm:$0xff]  ;;  %v14161_v41 = vcombine.low %v3539_v62, %v3543_v16 }
 0x62f   : > { %v13916_v22 = vcombine.high %v3292_v19, %v3296_v20  ;;  %v3559_v28 = vld [vmem:[#allocation9 + $0x17b0] sm:$0xff]  ;;  %v13915_v33 = vcombine.low %v3292_v19, %v3296_v20  ;;  %v14169_v36 = vcombine.low %v3547_v44, %v3551_v21 }
 0x630   : > { %10163 = vmatpush1.bf16.msra.mxu1 %v13867_v23  ;;  %v14170_v23 = vcombine.high %v3547_v44, %v3551_v21  ;;  %v3575_v61 = vld [vmem:[#allocation9 + $0x1830] sm:$0xff] }
 0x631   : > { %9905 = vmatpush1.bf16.msra.mxu0 %v14121_v42  ;;  %10164 = vmatprep.subr.bf16.mxu1 %v13876_v24  ;;  %v3300_v42 = vld [vmem:[#allocation9 + $0xf98] sm:$0xff]  ;;  %v3583_v11 = vld [vmem:[#allocation9 + $0x1870] sm:$0xff] }
 0x632   : > { %9906 = vmatprep.subr.bf16.mxu0 %v14130_v43  ;;  %v3304_v24 = vld [vmem:[#allocation9 + $0xfb8] sm:$0xff]  ;;  %v3555_v43 = vld [vmem:[#allocation9 + $0x1790] sm:$0xff] }
 0x633   : > { %v13924_v38 = vcombine.high %v3300_v42, %v3304_v24  ;;  %v13923_v39 = vcombine.low %v3300_v42, %v3304_v24  ;;  %v14177_v54 = vcombine.low %v3555_v43, %v3559_v28  ;;  %v3591_v19 = vld [vmem:[#allocation9 + $0x18b0] sm:$0xff] }
 0x634   : > { %10165 = vmatpush1.bf16.msra.mxu1 %v13875_v40  ;;  %v14178_v40 = vcombine.high %v3555_v43, %v3559_v28  ;;  %v3599_v42 = vld [vmem:[#allocation9 + $0x18f0] sm:$0xff] }
 0x635   : > { %9907 = vmatpush1.bf16.msra.mxu0 %v14129_v31  ;;  %10166 = vmatprep.subr.bf16.mxu1 %v13884_v45  ;;  %v3308_v31 = vld [vmem:[#allocation9 + $0xfd8] sm:$0xff] }
 0x636   : > { %9908 = vmatprep.subr.bf16.mxu0 %v14138_v25  ;;  %v3312_v45 = vld [vmem:[#allocation9 + $0xff8] sm:$0xff]  ;;  %v3563_v25 = vld [vmem:[#allocation9 + $0x17d0] sm:$0xff] }
 0x637   : > { %v13932_v57 = vcombine.high %v3308_v31, %v3312_v45  ;;  %v13931_v63 = vcombine.low %v3308_v31, %v3312_v45  ;;  %v14185_v0 = vcombine.low %v3563_v25, %v3567_v53 }
 0x638   : > { %10167 = vmatpush1.bf16.msra.mxu1 %v13883_v9  ;;  %v14186_v9 = vcombine.high %v3563_v25, %v3567_v53  ;;  %v3356_v53 = vld [vmem:[#allocation9 + $0x1158] sm:$0xff] }
 0x639   : > { %9909 = vmatpush1.bf16.msra.mxu0 %v14137_v46  ;;  %10168 = vmatprep.subr.bf16.mxu1 %v13892_v60  ;;  %v3316_v46 = vld [vmem:[#allocation9 + $0x1018] sm:$0xff] }
 0x63a   : > { %9910 = vmatprep.subr.bf16.mxu0 %v14146_v52  ;;  %v3320_v60 = vld [vmem:[#allocation9 + $0x1038] sm:$0xff]  ;;  %v3571_v52 = vld [vmem:[#allocation9 + $0x1810] sm:$0xff] }
 0x63b   : > { %v13940_v2 = vcombine.high %v3316_v46, %v3320_v60  ;;  %v13939_v14 = vcombine.low %v3316_v46, %v3320_v60  ;;  %v14193_v62 = vcombine.low %v3571_v52, %v3575_v61 }
 0x63c   : > { %10169 = vmatpush1.bf16.msra.mxu1 %v13891_v3  ;;  %v14194_v3 = vcombine.high %v3571_v52, %v3575_v61  ;;  %v3364_v61 = vld [vmem:[#allocation9 + $0x1198] sm:$0xff] }
 0x63d   : > { %9911 = vmatpush1.bf16.msra.mxu0 %v14145_v4  ;;  %10170 = vmatprep.subr.bf16.mxu1 %v13900_v10  ;;  %v3324_v4 = vld [vmem:[#allocation9 + $0x1058] sm:$0xff] }
 0x63e   : > { %9912 = vmatprep.subr.bf16.mxu0 %v14154_v8  ;;  %v3328_v10 = vld [vmem:[#allocation9 + $0x1078] sm:$0xff]  ;;  %v3579_v8 = vld [vmem:[#allocation9 + $0x1850] sm:$0xff] }
 0x63f   : > { %v13948_v16 = vcombine.high %v3324_v4, %v3328_v10  ;;  %v13947_v20 = vcombine.low %v3324_v4, %v3328_v10  ;;  %v14201_v44 = vcombine.low %v3579_v8, %v3583_v11 }
 0x640   : > { %10171 = vmatpush1.bf16.msra.mxu1 %v13899_v48  ;;  %v14202_v48 = vcombine.high %v3579_v8, %v3583_v11  ;;  %v3372_v11 = vld [vmem:[#allocation9 + $0x11d8] sm:$0xff] }
 0x641   : > { %9913 = vmatpush1.bf16.msra.mxu0 %v14153_v17  ;;  %10172 = vmatprep.subr.bf16.mxu1 %v13908_v32  ;;  %v3332_v17 = vld [vmem:[#allocation9 + $0x1098] sm:$0xff] }
 0x642   : > { %9914 = vmatprep.subr.bf16.mxu0 %v14162_v18  ;;  %v3336_v32 = vld [vmem:[#allocation9 + $0x10b8] sm:$0xff]  ;;  %v3587_v18 = vld [vmem:[#allocation9 + $0x1890] sm:$0xff] }
 0x643   : > { %v13956_v21 = vcombine.high %v3332_v17, %v3336_v32  ;;  %v14209_v24 = vcombine.low %v3587_v18, %v3591_v19 }
 0x644   : > { %10173 = vmatpush1.bf16.msra.mxu1 %v13907_v5  ;;  %v14210_v5 = vcombine.high %v3587_v18, %v3591_v19  ;;  %v3380_v19 = vld [vmem:[#allocation9 + $0x1218] sm:$0xff] }
 0x645   : > { %9915 = vmatpush1.bf16.msra.mxu0 %v14161_v41  ;;  %10174 = vmatprep.subr.bf16.mxu1 %v13916_v22  ;;  %v3340_v41 = vld [vmem:[#allocation9 + $0x10d8] sm:$0xff] }
 0x646   : > { %9916 = vmatprep.subr.bf16.mxu0 %v14170_v23  ;;  %v3344_v22 = vld [vmem:[#allocation9 + $0x10f8] sm:$0xff]  ;;  %v3595_v23 = vld [vmem:[#allocation9 + $0x18d0] sm:$0xff] }
 0x647   : > { %v13964_v43 = vcombine.high %v3340_v41, %v3344_v22  ;;  %v14218_v28 = vcombine.high %v3595_v23, %v3599_v42  ;;  %v13963_v31 = vcombine.low %v3340_v41, %v3344_v22  ;;  %v14217_v45 = vcombine.low %v3595_v23, %v3599_v42  ;;  %v3388_v42 = vld [vmem:[#allocation9 + $0x1258] sm:$0xff] }
 0x648   : > { %10175 = vmatpush1.bf16.msra.mxu1 %v13915_v33  ;;  %v3348_v33 = vld [vmem:[#allocation9 + $0x1118] sm:$0xff] }
 0x649   : > { %9917 = vmatpush1.bf16.msra.mxu0 %v14169_v36  ;;  %10176 = vmatprep.subr.bf16.mxu1 %v13924_v38  ;;  %v3352_v36 = vld [vmem:[#allocation9 + $0x1138] sm:$0xff]  ;;  %v3603_v38 = vld [vmem:[#allocation9 + $0x1910] sm:$0xff] }
 0x64a   : > { %9918 = vmatprep.subr.bf16.mxu0 %v14178_v40  ;;  %v3607_v40 = vld [vmem:[#allocation9 + $0x1930] sm:$0xff]  ;;  %v13972_v25 = vcombine.high %v3348_v33, %v3352_v36 }
 0x64b   : > { %v14225_v46 = vcombine.low %v3603_v38, %v3607_v40 }
 0x64c   : > { %10177 = vmatpush1.bf16.msra.mxu1 %v13923_v39  ;;  %v3360_v39 = vld [vmem:[#allocation9 + $0x1178] sm:$0xff] }
 0x64d   : > { %9919 = vmatpush1.bf16.msra.mxu0 %v14177_v54  ;;  %10178 = vmatprep.subr.bf16.mxu1 %v13932_v57  ;;  %v3611_v54 = vld [vmem:[#allocation9 + $0x1950] sm:$0xff]  ;;  %v13980_v60 = vcombine.high %v3356_v53, %v3360_v39 }
 0x64e   : > { %9920 = vmatprep.subr.bf16.mxu0 %v14186_v9  ;;  %v3615_v57 = vld [vmem:[#allocation9 + $0x1970] sm:$0xff]  ;;  %v13971_v9 = vcombine.low %v3348_v33, %v3352_v36 }
 0x64f   : > { %v14234_v52 = vcombine.high %v3611_v54, %v3615_v57  ;;  %v14233_v4 = vcombine.low %v3611_v54, %v3615_v57  ;;  %v3404_v57 = vld [vmem:[#allocation9 + $0x12d8] sm:$0xff] }
 0x650   : > { %10179 = vmatpush1.bf16.msra.mxu1 %v13931_v63  ;;  %v3368_v63 = vld [vmem:[#allocation9 + $0x11b8] sm:$0xff] }
 0x651   : > { %9921 = vmatpush1.bf16.msra.mxu0 %v14185_v0  ;;  %10191 = vmatprep.subr.bf16.mxu1 %v13940_v2  ;;  %v3619_v0 = vld [vmem:[#allocation9 + $0x1990] sm:$0xff]  ;;  %v13988_v10 = vcombine.high %v3364_v61, %v3368_v63 }
 0x652   : > { %9933 = vmatprep.subr.bf16.mxu0 %v14194_v3  ;;  %v3623_v2 = vld [vmem:[#allocation9 + $0x19b0] sm:$0xff]  ;;  %v13979_v3 = vcombine.low %v3356_v53, %v3360_v39 }
 0x653   : > { %10181 = vmatmul.mubr.bf16.vlgmr.msra.gmra.mrb[8].mxu1 %v16742_v29  ;;  %v13955_v29 = vcombine.low %v3332_v17, %v3336_v32  ;;  %v14242_v8 = vcombine.high %v3619_v0, %v3623_v2  ;;  %v14241_v17 = vcombine.low %v3619_v0, %v3623_v2  ;;  %v3412_v2 = vld [vmem:[#allocation9 + $0x1318] sm:$0xff] }
 0x654   : > { %9923 = vmatmul.mubr.bf16.vlgmr.msra.gmra.mrb[4].mxu0 %v16776_v6  ;;  %10192 = vmatpush1.bf16.msra.mxu1 %v13939_v14  ;;  %v3376_v14 = vld [vmem:[#allocation9 + $0x11f8] sm:$0xff] }
 0x655   : > { %9934 = vmatpush1.bf16.msra.mxu0 %v14193_v62  ;;  %10193 = vmatprep.subr.bf16.mxu1 %v13948_v16  ;;  %v3627_v62 = vld [vmem:[#allocation9 + $0x19d0] sm:$0xff]  ;;  %v13996_v32 = vcombine.high %v3372_v11, %v3376_v14 }
 0x656   : > { %9935 = vmatprep.subr.bf16.mxu0 %v14202_v48  ;;  %9965 = vmatprep.mubr.bf16.mxu0 %v16778_v15  ;;  %v3631_v16 = vld [vmem:[#allocation9 + $0x19f0] sm:$0xff]  ;;  %v13987_v48 = vcombine.low %v3364_v61, %v3368_v63 }
 0x657   : > { %10223 = vmatprep.mubr.bf16.mxu1 %v16744_v59  ;;  %v14226_v59 = vcombine.high %v3603_v38, %v3607_v40  ;;  %v14250_v18 = vcombine.high %v3627_v62, %v3631_v16  ;;  %v14249_v41 = vcombine.low %v3627_v62, %v3631_v16  ;;  %v3396_v40 = vld [vmem:[#allocation9 + $0x1298] sm:$0xff] }
 0x658   : > { %10194 = vmatpush1.bf16.msra.mxu1 %v13947_v20  ;;  %v3384_v20 = vld [vmem:[#allocation9 + $0x1238] sm:$0xff] }
 0x659   : > { %9936 = vmatpush1.bf16.msra.mxu0 %v14201_v44  ;;  %10195 = vmatprep.subr.bf16.mxu1 %v13956_v21  ;;  %v3635_v44 = vld [vmem:[#allocation9 + $0x1a10] sm:$0xff]  ;;  %v14004_v22 = vcombine.high %v3380_v19, %v3384_v20  ;;  %v3420_v16 = vld [vmem:[#allocation9 + $0x1358] sm:$0xff] }
 0x65a   : > { %9937 = vmatprep.subr.bf16.mxu0 %v14210_v5  ;;  %v3639_v21 = vld [vmem:[#allocation9 + $0x1a30] sm:$0xff]  ;;  %v13995_v5 = vcombine.low %v3372_v11, %v3376_v14 }
 0x65b   : > { %v14258_v23 = vcombine.high %v3635_v44, %v3639_v21  ;;  %v14257_v33 = vcombine.low %v3635_v44, %v3639_v21  ;;  %v3428_v21 = vld [vmem:[#allocation9 + $0x1398] sm:$0xff] }
 0x65c   : > { %10196 = vmatpush1.bf16.msra.mxu1 %v13955_v29  ;;  %v3392_v29 = vld [vmem:[#allocation9 + $0x1278] sm:$0xff] }
 0x65d   : > { %9938 = vmatpush1.bf16.msra.mxu0 %v14209_v24  ;;  %10197 = vmatprep.subr.bf16.mxu1 %v13964_v43  ;;  %v3643_v24 = vld [vmem:[#allocation9 + $0x1a50] sm:$0xff]  ;;  %v14012_v36 = vcombine.high %v3388_v42, %v3392_v29 }
 0x65e   : > { %9939 = vmatprep.subr.bf16.mxu0 %v14218_v28  ;;  %v3647_v43 = vld [vmem:[#allocation9 + $0x1a70] sm:$0xff]  ;;  %v14003_v28 = vcombine.low %v3380_v19, %v3384_v20 }
 0x65f   : > { %v14266_v38 = vcombine.high %v3643_v24, %v3647_v43  ;;  %v14265_v53 = vcombine.low %v3643_v24, %v3647_v43  ;;  %v3436_v43 = vld [vmem:[#allocation9 + $0x13d8] sm:$0xff] }
 0x660   : > { %10198 = vmatpush1.bf16.msra.mxu1 %v13963_v31  ;;  %v3400_v31 = vld [vmem:[#allocation9 + $0x12b8] sm:$0xff] }
 0x661   : > { %9940 = vmatpush1.bf16.msra.mxu0 %v14217_v45  ;;  %10199 = vmatprep.subr.bf16.mxu1 %v13972_v25  ;;  %v3651_v45 = vld [vmem:[#allocation9 + $0x1a90] sm:$0xff]  ;;  %v14020_v39 = vcombine.high %v3396_v40, %v3400_v31 }
 0x662   : > { %9941 = vmatprep.subr.bf16.mxu0 %v14226_v59  ;;  %v3655_v25 = vld [vmem:[#allocation9 + $0x1ab0] sm:$0xff]  ;;  %v14011_v59 = vcombine.low %v3388_v42, %v3392_v29 }
 0x663   : > { %v14274_v54 = vcombine.high %v3651_v45, %v3655_v25  ;;  %v14273_v61 = vcombine.low %v3651_v45, %v3655_v25  ;;  %v3444_v25 = vld [vmem:[#allocation9 + $0x1418] sm:$0xff] }
 0x664   : > { %10200 = vmatpush1.bf16.msra.mxu1 %v13971_v9  ;;  %v3408_v9 = vld [vmem:[#allocation9 + $0x12f8] sm:$0xff] }
 0x665   : > { %9942 = vmatpush1.bf16.msra.mxu0 %v14225_v46  ;;  %10201 = vmatprep.subr.bf16.mxu1 %v13980_v60  ;;  %v3659_v46 = vld [vmem:[#allocation9 + $0x1ad0] sm:$0xff]  ;;  %v14028_v63 = vcombine.high %v3404_v57, %v3408_v9 }
 0x666   : > { %9943 = vmatprep.subr.bf16.mxu0 %v14234_v52  ;;  %v3663_v60 = vld [vmem:[#allocation9 + $0x1af0] sm:$0xff]  ;;  %v14019_v52 = vcombine.low %v3396_v40, %v3400_v31 }
 0x667   : > { %v14282_v0 = vcombine.high %v3659_v46, %v3663_v60  ;;  %v14281_v11 = vcombine.low %v3659_v46, %v3663_v60  ;;  %v3452_v60 = vld [vmem:[#allocation9 + $0x1458] sm:$0xff] }
 0x668   : > { %10202 = vmatpush1.bf16.msra.mxu1 %v13979_v3  ;;  %v3416_v3 = vld [vmem:[#allocation9 + $0x1338] sm:$0xff] }
 0x669   : > { %9944 = vmatpush1.bf16.msra.mxu0 %v14233_v4  ;;  %10203 = vmatprep.subr.bf16.mxu1 %v13988_v10  ;;  %v3667_v4 = vld [vmem:[#allocation9 + $0x1b10] sm:$0xff]  ;;  %v14036_v14 = vcombine.high %v3412_v2, %v3416_v3 }
 0x66a   : > { %9945 = vmatprep.subr.bf16.mxu0 %v14242_v8  ;;  %v3671_v10 = vld [vmem:[#allocation9 + $0x1b30] sm:$0xff]  ;;  %v14027_v8 = vcombine.low %v3404_v57, %v3408_v9 }
 0x66b   : > { %v14290_v62 = vcombine.high %v3667_v4, %v3671_v10  ;;  %v14289_v19 = vcombine.low %v3667_v4, %v3671_v10  ;;  %v3460_v10 = vld [vmem:[#allocation9 + $0x1498] sm:$0xff] }
 0x66c   : > { %10204 = vmatpush1.bf16.msra.mxu1 %v13987_v48  ;;  %v3424_v48 = vld [vmem:[#allocation9 + $0x1378] sm:$0xff] }
 0x66d   : > { %9946 = vmatpush1.bf16.msra.mxu0 %v14241_v17  ;;  %10205 = vmatprep.subr.bf16.mxu1 %v13996_v32  ;;  %v3675_v17 = vld [vmem:[#allocation9 + $0x1b50] sm:$0xff]  ;;  %v14044_v20 = vcombine.high %v3420_v16, %v3424_v48 }
 0x66e   : > { %9947 = vmatprep.subr.bf16.mxu0 %v14250_v18  ;;  %v3679_v32 = vld [vmem:[#allocation9 + $0x1b70] sm:$0xff]  ;;  %v14035_v18 = vcombine.low %v3412_v2, %v3416_v3 }
 0x66f   : > { %v14298_v44 = vcombine.high %v3675_v17, %v3679_v32  ;;  %v14297_v42 = vcombine.low %v3675_v17, %v3679_v32  ;;  %v3468_v32 = vld [vmem:[#allocation9 + $0x14d8] sm:$0xff] }
 0x670   : > { %10206 = vmatpush1.bf16.msra.mxu1 %v13995_v5  ;;  %v3432_v5 = vld [vmem:[#allocation9 + $0x13b8] sm:$0xff] }
 0x671   : > { %9948 = vmatpush1.bf16.msra.mxu0 %v14249_v41  ;;  %10207 = vmatprep.subr.bf16.mxu1 %v14004_v22  ;;  %v3683_v41 = vld [vmem:[#allocation9 + $0x1b90] sm:$0xff]  ;;  %v14052_v29 = vcombine.high %v3428_v21, %v3432_v5 }
 0x672   : > { %9949 = vmatprep.subr.bf16.mxu0 %v14258_v23  ;;  %v3687_v22 = vld [vmem:[#allocation9 + $0x1bb0] sm:$0xff]  ;;  %v14043_v23 = vcombine.low %v3420_v16, %v3424_v48 }
 0x673   : > { %v14306_v24 = vcombine.high %v3683_v41, %v3687_v22  ;;  %v14305_v40 = vcombine.low %v3683_v41, %v3687_v22  ;;  %v3476_v41 = vld [vmem:[#allocation9 + $0x1518] sm:$0xff] }
 0x674   : > { %10208 = vmatpush1.bf16.msra.mxu1 %v14003_v28  ;;  %v3440_v28 = vld [vmem:[#allocation9 + $0x13f8] sm:$0xff] }
 0x675   : > { %9950 = vmatpush1.bf16.msra.mxu0 %v14257_v33  ;;  %10209 = vmatprep.subr.bf16.mxu1 %v14012_v36  ;;  %v3691_v33 = vld [vmem:[#allocation9 + $0x1bd0] sm:$0xff]  ;;  %v14060_v31 = vcombine.high %v3436_v43, %v3440_v28  ;;  %v3480_v22 = vld [vmem:[#allocation9 + $0x1538] sm:$0xff] }
 0x676   : > { %9951 = vmatprep.subr.bf16.mxu0 %v14266_v38  ;;  %v3695_v36 = vld [vmem:[#allocation9 + $0x1bf0] sm:$0xff]  ;;  %v14051_v38 = vcombine.low %v3428_v21, %v3432_v5 }
 0x677   : > { %v14314_v45 = vcombine.high %v3691_v33, %v3695_v36  ;;  %v14313_v57 = vcombine.low %v3691_v33, %v3695_v36  ;;  %v3488_v33 = vld [vmem:[#allocation9 + $0x1578] sm:$0xff]  ;;  %v3739_v36 = vld [vmem:[#allocation9 + $0x1d50] sm:$0xff] }
 0x678   : > { %10210 = vmatpush1.bf16.msra.mxu1 %v14011_v59  ;;  %v3448_v59 = vld [vmem:[#allocation9 + $0x1438] sm:$0xff] }
 0x679   : > { %9952 = vmatpush1.bf16.msra.mxu0 %v14265_v53  ;;  %10211 = vmatprep.subr.bf16.mxu1 %v14020_v39  ;;  %v3699_v53 = vld [vmem:[#allocation9 + $0x1c10] sm:$0xff]  ;;  %v14068_v9 = vcombine.high %v3444_v25, %v3448_v59 }
 0x67a   : > { %9953 = vmatprep.subr.bf16.mxu0 %v14274_v54  ;;  %v3703_v39 = vld [vmem:[#allocation9 + $0x1c30] sm:$0xff]  ;;  %v14059_v54 = vcombine.low %v3436_v43, %v3440_v28  ;;  %v14100_v43 = vcombine.high %v3476_v41, %v3480_v22  ;;  %v3484_v28 = vld [vmem:[#allocation9 + $0x1558] sm:$0xff] }
 0x67b   : > { %v14322_v46 = vcombine.high %v3699_v53, %v3703_v39  ;;  %v14321_v2 = vcombine.low %v3699_v53, %v3703_v39  ;;  %v3496_v53 = vld [vmem:[#allocation9 + $0x15b8] sm:$0xff]  ;;  %v3747_v39 = vld [vmem:[#allocation9 + $0x1d90] sm:$0xff] }
 0x67c   : > { %10212 = vmatpush1.bf16.msra.mxu1 %v14019_v52  ;;  %v3456_v52 = vld [vmem:[#allocation9 + $0x1478] sm:$0xff] }
 0x67d   : > { %9954 = vmatpush1.bf16.msra.mxu0 %v14273_v61  ;;  %10213 = vmatprep.subr.bf16.mxu1 %v14028_v63  ;;  %v3707_v61 = vld [vmem:[#allocation9 + $0x1c50] sm:$0xff]  ;;  %v14076_v3 = vcombine.high %v3452_v60, %v3456_v52 }
 0x67e   : > { %9955 = vmatprep.subr.bf16.mxu0 %v14282_v0  ;;  %v3711_v63 = vld [vmem:[#allocation9 + $0x1c70] sm:$0xff]  ;;  %v14067_v0 = vcombine.low %v3444_v25, %v3448_v59  ;;  %v3492_v59 = vld [vmem:[#allocation9 + $0x1598] sm:$0xff] }
 0x67f   : > { %v14330_v4 = vcombine.high %v3707_v61, %v3711_v63  ;;  %v14329_v16 = vcombine.low %v3707_v61, %v3711_v63  ;;  %v3504_v61 = vld [vmem:[#allocation9 + $0x15f8] sm:$0xff]  ;;  %v3755_v63 = vld [vmem:[#allocation9 + $0x1dd0] sm:$0xff] }
 0x680   : > { %10214 = vmatpush1.bf16.msra.mxu1 %v14027_v8  ;;  %v3464_v8 = vld [vmem:[#allocation9 + $0x14b8] sm:$0xff] }
 0x681   : > { %9956 = vmatpush1.bf16.msra.mxu0 %v14281_v11  ;;  %10215 = vmatprep.subr.bf16.mxu1 %v14036_v14  ;;  %v3715_v11 = vld [vmem:[#allocation9 + $0x1c90] sm:$0xff]  ;;  %v14084_v48 = vcombine.high %v3460_v10, %v3464_v8 }
 0x682   : > { %9957 = vmatprep.subr.bf16.mxu0 %v14290_v62  ;;  %v3719_v14 = vld [vmem:[#allocation9 + $0x1cb0] sm:$0xff]  ;;  %v14075_v62 = vcombine.low %v3452_v60, %v3456_v52  ;;  %v3500_v52 = vld [vmem:[#allocation9 + $0x15d8] sm:$0xff] }
 0x683   : > { %v14338_v17 = vcombine.high %v3715_v11, %v3719_v14 }
 0x684   : > { %10216 = vmatpush1.bf16.msra.mxu1 %v14035_v18  ;;  %v3472_v18 = vld [vmem:[#allocation9 + $0x14f8] sm:$0xff] }
 0x685   : > { %9958 = vmatpush1.bf16.msra.mxu0 %v14289_v19  ;;  %10217 = vmatprep.subr.bf16.mxu1 %v14044_v20  ;;  %v3723_v19 = vld [vmem:[#allocation9 + $0x1cd0] sm:$0xff]  ;;  %v14092_v21 = vcombine.high %v3468_v32, %v3472_v18 }
 0x686   : > { %9959 = vmatprep.subr.bf16.mxu0 %v14298_v44  ;;  %v3727_v20 = vld [vmem:[#allocation9 + $0x1cf0] sm:$0xff]  ;;  %v14337_v44 = vcombine.low %v3715_v11, %v3719_v14  ;;  %v3512_v11 = vld [vmem:[#allocation9 + $0x1638] sm:$0xff] }
 0x687   : > { %v14346_v5 = vcombine.high %v3723_v19, %v3727_v20  ;;  %v3763_v14 = vld [vmem:[#allocation9 + $0x1e10] sm:$0xff] }
 0x688   : > { %10218 = vmatpush1.bf16.msra.mxu1 %v14043_v23  ;;  %v3731_v23 = vld [vmem:[#allocation9 + $0x1d10] sm:$0xff] }
 0x689   : > { %9960 = vmatpush1.bf16.msra.mxu0 %v14297_v42  ;;  %10219 = vmatprep.subr.bf16.mxu1 %v14052_v29  ;;  %v3735_v42 = vld [vmem:[#allocation9 + $0x1d30] sm:$0xff]  ;;  %v14091_v29 = vcombine.low %v3468_v32, %v3472_v18  ;;  %v3516_v18 = vld [vmem:[#allocation9 + $0x1658] sm:$0xff] }
 0x68a   : > { %9961 = vmatprep.subr.bf16.mxu0 %v14306_v24  ;;  %v14345_v24 = vcombine.low %v3723_v19, %v3727_v20  ;;  %v3520_v19 = vld [vmem:[#allocation9 + $0x1678] sm:$0xff]  ;;  %v3771_v20 = vld [vmem:[#allocation9 + $0x1e50] sm:$0xff] }
 0x68c   : > { %10220 = vmatpush1.bf16.msra.mxu1 %v14051_v38  ;;  %v3743_v38 = vld [vmem:[#allocation9 + $0x1d70] sm:$0xff] }
 0x68d   : > { %9962 = vmatpush1.bf16.msra.mxu0 %v14305_v40  ;;  %10221 = vmatprep.subr.bf16.mxu1 %v14060_v31  ;;  %v14099_v40 = vcombine.low %v3476_v41, %v3480_v22  ;;  %v14353_v31 = vcombine.low %v3731_v23, %v3735_v42  ;;  %v14362_v25 = vcombine.high %v3739_v36, %v3743_v38  ;;  %v3524_v22 = vld [vmem:[#allocation9 + $0x1698] sm:$0xff] }
 0x68e   : > { %9963 = vmatprep.subr.bf16.mxu0 %v14314_v45  ;;  %v14108_v45 = vcombine.high %v3484_v28, %v3488_v33 }
 0x690   : > { %10222 = vmatpush1.bf16.msra.mxu1 %v14059_v54  ;;  %v3751_v54 = vld [vmem:[#allocation9 + $0x1db0] sm:$0xff] }
 0x691   : > { %9964 = vmatpush1.bf16.msra.mxu0 %v14313_v57  ;;  %10234 = vmatprep.subr.bf16.mxu1 %v14068_v9  ;;  %v14107_v57 = vcombine.low %v3484_v28, %v3488_v33  ;;  %v14361_v9 = vcombine.low %v3739_v36, %v3743_v38  ;;  %v14370_v60 = vcombine.high %v3747_v39, %v3751_v54  ;;  %v3532_v33 = vld [vmem:[#allocation9 + $0x16d8] sm:$0xff]  ;;  %v3787_v38 = vld [vmem:[#allocation9 + $0x1ed0] sm:$0xff] }
 0x692   : > { %9976 = vmatprep.subr.bf16.mxu0 %v14322_v46  ;;  %v14116_v46 = vcombine.high %v3492_v59, %v3496_v53  ;;  %v3536_v36 = vld [vmem:[#allocation9 + $0x16f8] sm:$0xff] }
 0x693   : > { %10224 = vmatmul.mubr.bf16.vlgmr.msra.gmra.mrb[8].mxu1 %v16754_v37  ;;  %v14083_v37 = vcombine.low %v3460_v10, %v3464_v8  ;;  %v3508_v8 = vld [vmem:[#allocation9 + $0x1618] sm:$0xff] }
 0x694   : > { %9966 = vmatmul.mubr.bf16.vlgmr.msra.gmra.mrb[4].mxu0 %v16788_v58  ;;  %10235 = vmatpush1.bf16.msra.mxu1 %v14067_v0  ;;  %v3759_v0 = vld [vmem:[#allocation9 + $0x1df0] sm:$0xff] }
 0x695   : > { %9977 = vmatpush1.bf16.msra.mxu0 %v14321_v2  ;;  %10236 = vmatprep.subr.bf16.mxu1 %v14076_v3  ;;  %v14115_v2 = vcombine.low %v3492_v59, %v3496_v53  ;;  %v14369_v3 = vcombine.low %v3747_v39, %v3751_v54  ;;  %v14378_v10 = vcombine.high %v3755_v63, %v3759_v0  ;;  %v3540_v53 = vld [vmem:[#allocation9 + $0x1718] sm:$0xff]  ;;  %v3795_v54 = vld [vmem:[#allocation9 + $0x1f10] sm:$0xff] }
 0x696   : > { %9978 = vmatprep.subr.bf16.mxu0 %v14330_v4  ;;  %10008 = vmatprep.mubr.bf16.mxu0 %v16790_v1  ;;  %v14124_v4 = vcombine.high %v3500_v52, %v3504_v61  ;;  %v3544_v39 = vld [vmem:[#allocation9 + $0x1738] sm:$0xff] }
 0x697   : > { %10266 = vmatprep.mubr.bf16.mxu1 %v16756_v51  ;;  %v14354_v51 = vcombine.high %v3731_v23, %v3735_v42  ;;  %v3528_v23 = vld [vmem:[#allocation9 + $0x16b8] sm:$0xff]  ;;  %v3779_v42 = vld [vmem:[#allocation9 + $0x1e90] sm:$0xff] }
 0x698   : > { %10237 = vmatpush1.bf16.msra.mxu1 %v14075_v62  ;;  %v3767_v62 = vld [vmem:[#allocation9 + $0x1e30] sm:$0xff] }
 0x699   : > { %9979 = vmatpush1.bf16.msra.mxu0 %v14329_v16  ;;  %10238 = vmatprep.subr.bf16.mxu1 %v14084_v48  ;;  %v14123_v16 = vcombine.low %v3500_v52, %v3504_v61  ;;  %v14377_v48 = vcombine.low %v3755_v63, %v3759_v0  ;;  %v14386_v32 = vcombine.high %v3763_v14, %v3767_v62  ;;  %v3548_v61 = vld [vmem:[#allocation9 + $0x1758] sm:$0xff]  ;;  %v3803_v0 = vld [vmem:[#allocation9 + $0x1f50] sm:$0xff] }
 0x69a   : > { %9980 = vmatprep.subr.bf16.mxu0 %v14338_v17  ;;  %v14132_v17 = vcombine.high %v3508_v8, %v3512_v11  ;;  %v3552_v63 = vld [vmem:[#allocation9 + $0x1778] sm:$0xff] }
 0x69c   : > { %10239 = vmatpush1.bf16.msra.mxu1 %v14083_v37  ;;  %v3775_v37 = vld [vmem:[#allocation9 + $0x1e70] sm:$0xff] }
 0x69d   : > { %9981 = vmatpush1.bf16.msra.mxu0 %v14337_v44  ;;  %10240 = vmatprep.subr.bf16.mxu1 %v14092_v21  ;;  %v14131_v44 = vcombine.low %v3508_v8, %v3512_v11  ;;  %v14385_v21 = vcombine.low %v3763_v14, %v3767_v62  ;;  %v14394_v41 = vcombine.high %v3771_v20, %v3775_v37  ;;  %v3556_v11 = vld [vmem:[#allocation9 + $0x1798] sm:$0xff]  ;;  %v3811_v62 = vld [vmem:[#allocation9 + $0x1f90] sm:$0xff] }
 0x69e   : > { %9982 = vmatprep.subr.bf16.mxu0 %v14346_v5  ;;  %v14140_v5 = vcombine.high %v3516_v18, %v3520_v19  ;;  %v3560_v14 = vld [vmem:[#allocation9 + $0x17b8] sm:$0xff] }
 0x6a0   : > { %10241 = vmatpush1.bf16.msra.mxu1 %v14091_v29  ;;  %v3783_v29 = vld [vmem:[#allocation9 + $0x1eb0] sm:$0xff] }
 0x6a1   : > { %9983 = vmatpush1.bf16.msra.mxu0 %v14345_v24  ;;  %10242 = vmatprep.subr.bf16.mxu1 %v14100_v43  ;;  %v14139_v24 = vcombine.low %v3516_v18, %v3520_v19  ;;  %v14393_v43 = vcombine.low %v3771_v20, %v3775_v37  ;;  %v14402_v28 = vcombine.high %v3779_v42, %v3783_v29  ;;  %v3564_v19 = vld [vmem:[#allocation9 + $0x17d8] sm:$0xff]  ;;  %v3819_v37 = vld [vmem:[#allocation9 + $0x1fd0] sm:$0xff] }
 0x6a2   : > { %9984 = vmatprep.subr.bf16.mxu0 %v14354_v51  ;;  %v14148_v51 = vcombine.high %v3524_v22, %v3528_v23  ;;  %v3568_v20 = vld [vmem:[#allocation9 + $0x17f8] sm:$0xff] }
 0x6a4   : > { %10243 = vmatpush1.bf16.msra.mxu1 %v14099_v40  ;;  %v3791_v40 = vld [vmem:[#allocation9 + $0x1ef0] sm:$0xff] }
 0x6a5   : > { %9985 = vmatpush1.bf16.msra.mxu0 %v14353_v31  ;;  %10244 = vmatprep.subr.bf16.mxu1 %v14108_v45  ;;  %v14147_v31 = vcombine.low %v3524_v22, %v3528_v23  ;;  %v14401_v45 = vcombine.low %v3779_v42, %v3783_v29  ;;  %v14410_v59 = vcombine.high %v3787_v38, %v3791_v40  ;;  %v3572_v23 = vld [vmem:[#allocation9 + $0x1818] sm:$0xff] }
 0x6a6   : > { %9986 = vmatprep.subr.bf16.mxu0 %v14362_v25  ;;  %v14156_v25 = vcombine.high %v3532_v33, %v3536_v36  ;;  %v3576_v42 = vld [vmem:[#allocation9 + $0x1838] sm:$0xff]  ;;  %v14187_v29 = vcombine.low %v3564_v19, %v3568_v20 }
 0x6a8   : > { %10245 = vmatpush1.bf16.msra.mxu1 %v14107_v57  ;;  %v3799_v57 = vld [vmem:[#allocation9 + $0x1f30] sm:$0xff] }
 0x6a9   : > { %9987 = vmatpush1.bf16.msra.mxu0 %v14361_v9  ;;  %10246 = vmatprep.subr.bf16.mxu1 %v14116_v46  ;;  %v14155_v9 = vcombine.low %v3532_v33, %v3536_v36  ;;  %v14409_v46 = vcombine.low %v3787_v38, %v3791_v40  ;;  %v14418_v52 = vcombine.high %v3795_v54, %v3799_v57  ;;  %v3584_v33 = vld [vmem:[#allocation9 + $0x1878] sm:$0xff] }
 0x6aa   : > { %9988 = vmatprep.subr.bf16.mxu0 %v14370_v60  ;;  %v14164_v60 = vcombine.high %v3540_v53, %v3544_v39  ;;  %v14195_v36 = vcombine.low %v3572_v23, %v3576_v42  ;;  %v15129_v38 = vld [vmem:[#allocation12] ss:$16 sps:$4 sm:$0xff]  }
 0x6ac   : > { %10247 = vmatpush1.bf16.msra.mxu1 %v14115_v2  ;;  %v3807_v2 = vld [vmem:[#allocation9 + $0x1f70] sm:$0xff] }
 0x6ad   : > { %9989 = vmatpush1.bf16.msra.mxu0 %v14369_v3  ;;  %10248 = vmatprep.subr.bf16.mxu1 %v14124_v4  ;;  %v14163_v3 = vcombine.low %v3540_v53, %v3544_v39  ;;  %v14417_v4 = vcombine.low %v3795_v54, %v3799_v57  ;;  %v14426_v8 = vcombine.high %v3803_v0, %v3807_v2  ;;  %v15132_v53 = vld [vmem:[#allocation12 + $0x20] ss:$16 sps:$4 sm:$0xff]   ;;  %v15137_v54 = vld [vmem:[#allocation12 + $0x44] ss:$16 sps:$4 sm:$0xff]  }
 0x6ae   : > { %9990 = vmatprep.subr.bf16.mxu0 %v14378_v10  ;;  %v14172_v10 = vcombine.high %v3548_v61, %v3552_v63  ;;  %v3596_v57 = vld [vmem:[#allocation9 + $0x18d8] sm:$0xff] }
 0x6b0   : > { %10249 = vmatpush1.bf16.msra.mxu1 %v14123_v16  ;;  %v3815_v16 = vld [vmem:[#allocation9 + $0x1fb0] sm:$0xff] }
 0x6b1   : > { %9991 = vmatpush1.bf16.msra.mxu0 %v14377_v48  ;;  %10250 = vmatprep.subr.bf16.mxu1 %v14132_v17  ;;  %v14171_v48 = vcombine.low %v3548_v61, %v3552_v63  ;;  %v14425_v17 = vcombine.low %v3803_v0, %v3807_v2  ;;  %v14434_v18 = vcombine.high %v3811_v62, %v3815_v16  ;;  %v3604_v61 = vld [vmem:[#allocation9 + $0x1918] sm:$0xff] }
 0x6b2   : > { %9992 = vmatprep.subr.bf16.mxu0 %v14386_v32  ;;  %v14180_v32 = vcombine.high %v3556_v11, %v3560_v14  ;;  %v3608_v63 = vld [vmem:[#allocation9 + $0x1938] sm:$0xff] }
 0x6b3   : > { %v15138_v2 = vld [vmem:[#allocation12 + $0x60] ss:$16 sps:$4 sm:$0xff]  }
 0x6b4   : > { %10251 = vmatpush1.bf16.msra.mxu1 %v14131_v44  ;;  %v3823_v44 = vld [vmem:[#allocation9 + $0x1ff0] sm:$0xff] }
 0x6b5   : > { %9993 = vmatpush1.bf16.msra.mxu0 %v14385_v21  ;;  %10252 = vmatprep.subr.bf16.mxu1 %v14140_v5  ;;  %v14179_v21 = vcombine.low %v3556_v11, %v3560_v14  ;;  %v14433_v5 = vcombine.low %v3811_v62, %v3815_v16  ;;  %v14442_v22 = vcombine.high %v3819_v37, %v3823_v44  ;;  %v15141_v11 = vld [vmem:[#allocation12 + $0x80] ss:$16 sps:$4 sm:$0xff]   ;;  %v15146_v62 = vld [vmem:[#allocation12 + $0xa4] ss:$16 sps:$4 sm:$0xff]  }
 0x6b6   : > { %9994 = vmatprep.subr.bf16.mxu0 %v14394_v41  ;;  %v14188_v41 = vcombine.high %v3564_v19, %v3568_v20  ;;  %v3620_v16 = vld [vmem:[#allocation9 + $0x1998] sm:$0xff] }
 0x6b7   : > { %v15149_v19 = vld [vmem:[#allocation12 + $0xc4] ss:$16 sps:$4 sm:$0xff]  }
 0x6b8   : > { %10253 = vmatpush1.bf16.msra.mxu1 %v14139_v24  ;;  %v14441_v24 = vcombine.low %v3819_v37, %v3823_v44  ;;  %v3628_v20 = vld [vmem:[#allocation9 + $0x19d8] sm:$0xff] }
 0x6b9   : > { %9995 = vmatpush1.bf16.msra.mxu0 %v14393_v43  ;;  %10254 = vmatprep.subr.bf16.mxu1 %v14148_v51  ;;  %v14196_v43 = vcombine.high %v3572_v23, %v3576_v42  ;;  %v15131_v51 = vld [vmem:[#allocation12 + $0x4] ss:$16 sps:$4 sm:$0xff]  }
 0x6ba   : > { %9996 = vmatprep.subr.bf16.mxu0 %v14402_v28  ;;  %v3580_v28 = vld [vmem:[#allocation9 + $0x1858] sm:$0xff] }
 0x6bb   : > { %v14204_v40 = vcombine.high %v3580_v28, %v3584_v33  ;;  %v3632_v37 = vld [vmem:[#allocation9 + $0x19f8] sm:$0xff] }
 0x6bc   : > { %10255 = vmatpush1.bf16.msra.mxu1 %v14147_v31  ;;  %v15134_v31 = vld [vmem:[#allocation12 + $0x24] ss:$16 sps:$4 sm:$0xff]   ;;  %v14251_v42 = vcombine.low %v3628_v20, %v3632_v37 }
 0x6bd   : > { %9997 = vmatpush1.bf16.msra.mxu0 %v14401_v45  ;;  %10256 = vmatprep.subr.bf16.mxu1 %v14156_v25  ;;  %v3588_v45 = vld [vmem:[#allocation9 + $0x1898] sm:$0xff] }
 0x6be   : > { %9998 = vmatprep.subr.bf16.mxu0 %v14410_v59  ;;  %v3592_v25 = vld [vmem:[#allocation9 + $0x18b8] sm:$0xff]  ;;  %v14203_v59 = vcombine.low %v3580_v28, %v3584_v33 }
 0x6bf   : > { %v14212_v39 = vcombine.high %v3588_v45, %v3592_v25  ;;  %v3640_v23 = vld [vmem:[#allocation9 + $0x1a38] sm:$0xff] }
 0x6c0   : > { %10257 = vmatpush1.bf16.msra.mxu1 %v14155_v9  ;;  %v3600_v9 = vld [vmem:[#allocation9 + $0x18f8] sm:$0xff] }
 0x6c1   : > { %9999 = vmatpush1.bf16.msra.mxu0 %v14409_v46  ;;  %10258 = vmatprep.subr.bf16.mxu1 %v14164_v60  ;;  %v14211_v46 = vcombine.low %v3588_v45, %v3592_v25  ;;  %v14220_v60 = vcombine.high %v3596_v57, %v3600_v9  ;;  %v14219_v0 = vcombine.low %v3596_v57, %v3600_v9  ;;  %v3648_v28 = vld [vmem:[#allocation9 + $0x1a78] sm:$0xff] }
 0x6c2   : > { %10000 = vmatprep.subr.bf16.mxu0 %v14418_v52  ;;  %v15140_v52 = vld [vmem:[#allocation12 + $0x64] ss:$16 sps:$4 sm:$0xff]  }
 0x6c3   : > { %v3656_v45 = vld [vmem:[#allocation9 + $0x1ab8] sm:$0xff] }
 0x6c4   : > { %10259 = vmatpush1.bf16.msra.mxu1 %v14163_v3  ;;  %v14228_v3 = vcombine.high %v3604_v61, %v3608_v63  ;;  %v3664_v57 = vld [vmem:[#allocation9 + $0x1af8] sm:$0xff] }
 0x6c5   : > { %10001 = vmatpush1.bf16.msra.mxu0 %v14417_v4  ;;  %10260 = vmatprep.subr.bf16.mxu1 %v14172_v10  ;;  %v15143_v4 = vld [vmem:[#allocation12 + $0x84] ss:$16 sps:$4 sm:$0xff]  }
 0x6c6   : > { %10002 = vmatprep.subr.bf16.mxu0 %v14426_v8  ;;  %v3612_v10 = vld [vmem:[#allocation9 + $0x1958] sm:$0xff]  ;;  %v14227_v8 = vcombine.low %v3604_v61, %v3608_v63 }
 0x6c7   : > { %v3672_v61 = vld [vmem:[#allocation9 + $0x1b38] sm:$0xff] }
 0x6c8   : > { %10261 = vmatpush1.bf16.msra.mxu1 %v14171_v48  ;;  %v3624_v48 = vld [vmem:[#allocation9 + $0x19b8] sm:$0xff] }
 0x6c9   : > { %10003 = vmatpush1.bf16.msra.mxu0 %v14425_v17  ;;  %10262 = vmatprep.subr.bf16.mxu1 %v14180_v32  ;;  %v15144_v32 = vld [vmem:[#allocation12 + $0xa0] ss:$16 sps:$4 sm:$0xff]   ;;  %v14243_v44 = vcombine.low %v3620_v16, %v3624_v48 }
 0x6ca   : > { %10004 = vmatprep.subr.bf16.mxu0 %v14434_v18  ;;  %v14244_v18 = vcombine.high %v3620_v16, %v3624_v48  ;;  %v3688_v16 = vld [vmem:[#allocation9 + $0x1bb8] sm:$0xff] }
 0x6cc   : > { %10263 = vmatpush1.bf16.msra.mxu1 %v14179_v21  ;;  %v15147_v21 = vld [vmem:[#allocation12 + $0xc0] ss:$16 sps:$4 sm:$0xff]  }
 0x6cd   : > { %10005 = vmatpush1.bf16.msra.mxu0 %v14433_v5  ;;  %10264 = vmatprep.subr.bf16.mxu1 %v14188_v41  ;;  %v14252_v5 = vcombine.high %v3628_v20, %v3632_v37  ;;  %v15152_v41 = vld [vmem:[#allocation12 + $0xe4] ss:$16 sps:$4 sm:$0xff]  }
 0x6ce   : > { %10006 = vmatprep.subr.bf16.mxu0 %v14442_v22  ;;  %v3636_v22 = vld [vmem:[#allocation9 + $0x1a18] sm:$0xff] }
 0x6cf   : > { %v14259_v33 = vcombine.low %v3636_v22, %v3640_v23  ;;  %v3696_v20 = vld [vmem:[#allocation9 + $0x1bf8] sm:$0xff] }
 0x6d0   : > { %10265 = vmatpush1.bf16.msra.mxu1 %v14187_v29  ;;  %v15150_v29 = vld [vmem:[#allocation12 + $0xe0] ss:$16 sps:$4 sm:$0xff]  }
 0x6d1   : > { %10007 = vmatpush1.bf16.msra.mxu0 %v14441_v24  ;;  %10277 = vmatprep.subr.bf16.mxu1 %v14196_v43  ;;  %v14260_v24 = vcombine.high %v3636_v22, %v3640_v23  ;;  %v15155_v43 = vld [vmem:[#allocation12 + $0x104] ss:$16 sps:$4 sm:$0xff]  }
 0x6d2   : > { %11945 = vmatprep.subr.bf16.mxu0 %v15131_v51  ;;  %v3644_v51 = vld [vmem:[#allocation9 + $0x1a58] sm:$0xff] }
 0x6d3   : > { %10267 = vmatmul.mubr.bf16.vlgmr.msra.gmra.mrb[8].mxu1 %v16776_v6  ;;  %v15135_v6 = vld [vmem:[#allocation12 + $0x40] ss:$16 sps:$4 sm:$0xff]   ;;  %v14267_v25 = vcombine.low %v3644_v51, %v3648_v28 }
 0x6d4   : > { %10009 = vmatmul.mubr.bf16.vlgmr.msra.gmra.mrb[4].mxu0 %v16798_v27  ;;  %10278 = vmatpush1.bf16.msra.mxu1 %v14195_v36  ;;  %v15153_v36 = vld [vmem:[#allocation12 + $0x100] ss:$16 sps:$4 sm:$0xff]  }
 0x6d5   : > { %11946 = vmatpush1.bf16.msra.mxu0 %v15129_v38  ;;  %11977 = vmatprep.mubr.bf16.mxu0 %v16828_v12  ;;  %v14268_v38 = vcombine.high %v3644_v51, %v3648_v28  ;;  %v3704_v22 = vld [vmem:[#allocation9 + $0x1c38] sm:$0xff] }
 0x6d6   : > { %10279 = vmatprep.subr.bf16.mxu1 %v14204_v40  ;;  %11947 = vmatprep.subr.bf16.mxu0 %v15134_v31  ;;  %v15158_v40 = vld [vmem:[#allocation12 + $0x124] ss:$16 sps:$4 sm:$0xff]  }
 0x6d7   : > { %10309 = vmatprep.mubr.bf16.mxu1 %v16778_v15  ;;  %v3616_v15 = vld [vmem:[#allocation9 + $0x1978] sm:$0xff] }
 0x6d8   : > { %10280 = vmatpush1.bf16.msra.mxu1 %v14203_v59  ;;  %v14236_v14 = vcombine.high %v3612_v10, %v3616_v15  ;;  %v14235_v17 = vcombine.low %v3612_v10, %v3616_v15  ;;  %v3652_v31 = vld [vmem:[#allocation9 + $0x1a98] sm:$0xff] }
 0x6d9   : > { %11948 = vmatpush1.bf16.msra.mxu0 %v15132_v53  ;;  %10281 = vmatprep.subr.bf16.mxu1 %v14212_v39  ;;  %v15156_v59 = vld [vmem:[#allocation12 + $0x120] ss:$16 sps:$4 sm:$0xff]   ;;  %v14276_v53 = vcombine.high %v3652_v31, %v3656_v45  ;;  %v15161_v39 = vld [vmem:[#allocation12 + $0x144] ss:$16 sps:$4 sm:$0xff]   ;;  %v14275_v9 = vcombine.low %v3652_v31, %v3656_v45 }
 0x6da   : > { %11949 = vmatprep.subr.bf16.mxu0 %v15137_v54  ;;  %v3660_v54 = vld [vmem:[#allocation9 + $0x1ad8] sm:$0xff] }
 0x6db   : > { %v14283_v63 = vcombine.low %v3660_v54, %v3664_v57  ;;  %v3680_v10 = vld [vmem:[#allocation9 + $0x1b78] sm:$0xff] }
 0x6dc   : > { %10282 = vmatpush1.bf16.msra.mxu1 %v14211_v46  ;;  %v15159_v46 = vld [vmem:[#allocation12 + $0x140] ss:$16 sps:$4 sm:$0xff]  }
 0x6dd   : > { %11950 = vmatpush1.bf16.msra.mxu0 %v15135_v6  ;;  %10283 = vmatprep.subr.bf16.mxu1 %v14220_v60  ;;  %v14284_v6 = vcombine.high %v3660_v54, %v3664_v57  ;;  %v15164_v60 = vld [vmem:[#allocation12 + $0x164] ss:$16 sps:$4 sm:$0xff]  }
 0x6de   : > { %11951 = vmatprep.subr.bf16.mxu0 %v15140_v52  ;;  %v3668_v52 = vld [vmem:[#allocation9 + $0x1b18] sm:$0xff] }
 0x6df   : > { %v14291_v15 = vcombine.low %v3668_v52, %v3672_v61  ;;  %v3712_v51 = vld [vmem:[#allocation9 + $0x1c78] sm:$0xff] }
 0x6e0   : > { %10284 = vmatpush1.bf16.msra.mxu1 %v14219_v0  ;;  %v15162_v0 = vld [vmem:[#allocation12 + $0x160] ss:$16 sps:$4 sm:$0xff]  }
 0x6e1   : > { %11952 = vmatpush1.bf16.msra.mxu0 %v15138_v2  ;;  %10285 = vmatprep.subr.bf16.mxu1 %v14228_v3  ;;  %v14292_v2 = vcombine.high %v3668_v52, %v3672_v61  ;;  %v15167_v3 = vld [vmem:[#allocation12 + $0x184] ss:$16 sps:$4 sm:$0xff]   ;;  %v15186_v61 = vld [vmem:[#allocation12 + $0x260] ss:$16 sps:$4 sm:$0xff]  }
 0x6e2   : > { %11953 = vmatprep.subr.bf16.mxu0 %v15143_v4  ;;  %v3676_v4 = vld [vmem:[#allocation9 + $0x1b58] sm:$0xff] }
 0x6e3   : > { %v14299_v48 = vcombine.low %v3676_v4, %v3680_v10  ;;  %v3720_v31 = vld [vmem:[#allocation9 + $0x1cb8] sm:$0xff] }
 0x6e4   : > { %10286 = vmatpush1.bf16.msra.mxu1 %v14227_v8  ;;  %v15165_v8 = vld [vmem:[#allocation12 + $0x180] ss:$16 sps:$4 sm:$0xff]  }
 0x6e5   : > { %11954 = vmatpush1.bf16.msra.mxu0 %v15141_v11  ;;  %10287 = vmatprep.subr.bf16.mxu1 %v14236_v14  ;;  %v14300_v11 = vcombine.high %v3676_v4, %v3680_v10  ;;  %v15170_v14 = vld [vmem:[#allocation12 + $0x1a4] ss:$16 sps:$4 sm:$0xff]   ;;  %v15189_v4 = vld [vmem:[#allocation12 + $0x280] ss:$16 sps:$4 sm:$0xff]  }
 0x6e6   : > { %11955 = vmatprep.subr.bf16.mxu0 %v15146_v62  ;;  %v3684_v62 = vld [vmem:[#allocation9 + $0x1b98] sm:$0xff] }
 0x6e7   : > { %v14307_v37 = vcombine.low %v3684_v62, %v3688_v16  ;;  %v3728_v54 = vld [vmem:[#allocation9 + $0x1cf8] sm:$0xff] }
 0x6e8   : > { %10288 = vmatpush1.bf16.msra.mxu1 %v14235_v17  ;;  %v15168_v17 = vld [vmem:[#allocation12 + $0x1a0] ss:$16 sps:$4 sm:$0xff]  }
 0x6e9   : > { %11956 = vmatpush1.bf16.msra.mxu0 %v15144_v32  ;;  %10289 = vmatprep.subr.bf16.mxu1 %v14244_v18  ;;  %v14308_v32 = vcombine.high %v3684_v62, %v3688_v16  ;;  %v15173_v18 = vld [vmem:[#allocation12 + $0x1c4] ss:$16 sps:$4 sm:$0xff]   ;;  %v15192_v62 = vld [vmem:[#allocation12 + $0x2a0] ss:$16 sps:$4 sm:$0xff]  }
 0x6ea   : > { %11957 = vmatprep.subr.bf16.mxu0 %v15149_v19  ;;  %v3692_v19 = vld [vmem:[#allocation9 + $0x1bd8] sm:$0xff] }
 0x6eb   : > { %v14315_v23 = vcombine.low %v3692_v19, %v3696_v20 }
 0x6ec   : > { %10290 = vmatpush1.bf16.msra.mxu1 %v14243_v44  ;;  %v15171_v44 = vld [vmem:[#allocation12 + $0x1c0] ss:$16 sps:$4 sm:$0xff]  }
 0x6ed   : > { %11958 = vmatpush1.bf16.msra.mxu0 %v15147_v21  ;;  %10291 = vmatprep.subr.bf16.mxu1 %v14252_v5  ;;  %v14316_v21 = vcombine.high %v3692_v19, %v3696_v20  ;;  %v15176_v5 = vld [vmem:[#allocation12 + $0x1e4] ss:$16 sps:$4 sm:$0xff]   ;;  %v15195_v19 = vld [vmem:[#allocation12 + $0x2c0] ss:$16 sps:$4 sm:$0xff]  }
 0x6ee   : > { %11959 = vmatprep.subr.bf16.mxu0 %v15152_v41  ;;  %v3700_v41 = vld [vmem:[#allocation9 + $0x1c18] sm:$0xff] }
 0x6ef   : > { %v14323_v28 = vcombine.low %v3700_v41, %v3704_v22 }
 0x6f0   : > { %10292 = vmatpush1.bf16.msra.mxu1 %v14251_v42  ;;  %v15174_v42 = vld [vmem:[#allocation12 + $0x1e0] ss:$16 sps:$4 sm:$0xff]  }
 0x6f1   : > { %11960 = vmatpush1.bf16.msra.mxu0 %v15150_v29  ;;  %10293 = vmatprep.subr.bf16.mxu1 %v14260_v24  ;;  %v14324_v29 = vcombine.high %v3700_v41, %v3704_v22  ;;  %v15179_v24 = vld [vmem:[#allocation12 + $0x204] ss:$16 sps:$4 sm:$0xff]   ;;  %v15198_v41 = vld [vmem:[#allocation12 + $0x2e0] ss:$16 sps:$4 sm:$0xff]  }
 0x6f2   : > { %11961 = vmatprep.subr.bf16.mxu0 %v15155_v43  ;;  %v3708_v43 = vld [vmem:[#allocation9 + $0x1c58] sm:$0xff] }
 0x6f3   : > { %v14331_v45 = vcombine.low %v3708_v43, %v3712_v51 }
 0x6f4   : > { %10294 = vmatpush1.bf16.msra.mxu1 %v14259_v33  ;;  %v15177_v33 = vld [vmem:[#allocation12 + $0x200] ss:$16 sps:$4 sm:$0xff]  }
 0x6f5   : > { %11962 = vmatpush1.bf16.msra.mxu0 %v15153_v36  ;;  %10295 = vmatprep.subr.bf16.mxu1 %v14268_v38  ;;  %v14332_v36 = vcombine.high %v3708_v43, %v3712_v51  ;;  %v15182_v38 = vld [vmem:[#allocation12 + $0x224] ss:$16 sps:$4 sm:$0xff]   ;;  %v15201_v43 = vld [vmem:[#allocation12 + $0x300] ss:$16 sps:$4 sm:$0xff]  }
 0x6f6   : > { %11963 = vmatprep.subr.bf16.mxu0 %v15158_v40  ;;  %v3716_v40 = vld [vmem:[#allocation9 + $0x1c98] sm:$0xff] }
 0x6f7   : > { %v14339_v57 = vcombine.low %v3716_v40, %v3720_v31 }
 0x6f8   : > { %10296 = vmatpush1.bf16.msra.mxu1 %v14267_v25  ;;  %v15180_v25 = vld [vmem:[#allocation12 + $0x220] ss:$16 sps:$4 sm:$0xff]  }
 0x6f9   : > { %11964 = vmatpush1.bf16.msra.mxu0 %v15156_v59  ;;  %10297 = vmatprep.subr.bf16.mxu1 %v14276_v53  ;;  %v14340_v59 = vcombine.high %v3716_v40, %v3720_v31  ;;  %v15185_v53 = vld [vmem:[#allocation12 + $0x244] ss:$16 sps:$4 sm:$0xff]   ;;  %v15204_v40 = vld [vmem:[#allocation12 + $0x320] ss:$16 sps:$4 sm:$0xff]  }
 0x6fa   : > { %11965 = vmatprep.subr.bf16.mxu0 %v15161_v39  ;;  %v3724_v39 = vld [vmem:[#allocation9 + $0x1cd8] sm:$0xff] }
 0x6fb   : > { %v14347_v52 = vcombine.low %v3724_v39, %v3728_v54 }
 0x6fc   : > { %10298 = vmatpush1.bf16.msra.mxu1 %v14275_v9  ;;  %v14348_v9 = vcombine.high %v3724_v39, %v3728_v54  ;;  %v15207_v39 = vld [vmem:[#allocation12 + $0x340] ss:$16 sps:$4 sm:$0xff]  }
 0x6fd   : > { %11966 = vmatpush1.bf16.msra.mxu0 %v15159_v46  ;;  %10299 = vmatprep.subr.bf16.mxu1 %v14284_v6  ;;  %v15188_v46 = vld [vmem:[#allocation12 + $0x264] ss:$16 sps:$4 sm:$0xff]  }
 0x6fe   : > { %11967 = vmatprep.subr.bf16.mxu0 %v15164_v60  ;;  %v3732_v6 = vld [vmem:[#allocation9 + $0x1d18] sm:$0xff] }
 0x6ff   : > { %v3736_v60 = vld [vmem:[#allocation9 + $0x1d38] sm:$0xff] }
 0x700   : > { %10300 = vmatpush1.bf16.msra.mxu1 %v14283_v63  ;;  %v14356_v63 = vcombine.high %v3732_v6, %v3736_v60 }
 0x701   : > { %11968 = vmatpush1.bf16.msra.mxu0 %v15162_v0  ;;  %10301 = vmatprep.subr.bf16.mxu1 %v14292_v2  ;;  %v15191_v0 = vld [vmem:[#allocation12 + $0x284] ss:$16 sps:$4 sm:$0xff]  }
 0x702   : > { %11969 = vmatprep.subr.bf16.mxu0 %v15167_v3  ;;  %v3740_v2 = vld [vmem:[#allocation9 + $0x1d58] sm:$0xff]  ;;  %v14355_v3 = vcombine.low %v3732_v6, %v3736_v60 }
 0x703   : > { %v15210_v6 = vld [vmem:[#allocation12 + $0x360] ss:$16 sps:$4 sm:$0xff]  }
 0x704   : > { %10302 = vmatpush1.bf16.msra.mxu1 %v14291_v15  ;;  %v15194_v15 = vld [vmem:[#allocation12 + $0x2a4] ss:$16 sps:$4 sm:$0xff]  }
 0x705   : > { %11970 = vmatpush1.bf16.msra.mxu0 %v15165_v8  ;;  %10303 = vmatprep.subr.bf16.mxu1 %v14300_v11  ;;  %v3748_v8 = vld [vmem:[#allocation9 + $0x1d98] sm:$0xff] }
 0x706   : > { %11971 = vmatprep.subr.bf16.mxu0 %v15170_v14  ;;  %v3752_v11 = vld [vmem:[#allocation9 + $0x1db8] sm:$0xff] }
 0x707   : > { %v14372_v16 = vcombine.high %v3748_v8, %v3752_v11 }
 0x708   : > { %10304 = vmatpush1.bf16.msra.mxu1 %v14299_v48  ;;  %v15197_v48 = vld [vmem:[#allocation12 + $0x2c4] ss:$16 sps:$4 sm:$0xff]  }
 0x709   : > { %11972 = vmatpush1.bf16.msra.mxu0 %v15168_v17  ;;  %10305 = vmatprep.subr.bf16.mxu1 %v14308_v32  ;;  %v3756_v17 = vld [vmem:[#allocation9 + $0x1dd8] sm:$0xff] }
 0x70a   : > { %11973 = vmatprep.subr.bf16.mxu0 %v15173_v18  ;;  %v3760_v32 = vld [vmem:[#allocation9 + $0x1df8] sm:$0xff]  ;;  %v14371_v18 = vcombine.low %v3748_v8, %v3752_v11 }
 0x70b   : > { %v14380_v20 = vcombine.high %v3756_v17, %v3760_v32  ;;  %v15216_v8 = vld [vmem:[#allocation12 + $0x3a0] ss:$16 sps:$4 sm:$0xff]  }
 0x70c   : > { %10306 = vmatpush1.bf16.msra.mxu1 %v14307_v37  ;;  %v15200_v37 = vld [vmem:[#allocation12 + $0x2e4] ss:$16 sps:$4 sm:$0xff]  }
 0x70d   : > { %11974 = vmatpush1.bf16.msra.mxu0 %v15171_v44  ;;  %10307 = vmatprep.subr.bf16.mxu1 %v14316_v21  ;;  %v3764_v44 = vld [vmem:[#allocation9 + $0x1e18] sm:$0xff] }
 0x70e   : > { %11975 = vmatprep.subr.bf16.mxu0 %v15176_v5  ;;  %v3768_v21 = vld [vmem:[#allocation9 + $0x1e38] sm:$0xff]  ;;  %v14379_v5 = vcombine.low %v3756_v17, %v3760_v32 }
 0x70f   : > { %v14388_v22 = vcombine.high %v3764_v44, %v3768_v21  ;;  %v15219_v17 = vld [vmem:[#allocation12 + $0x3c0] ss:$16 sps:$4 sm:$0xff]  }
 0x710   : > { %10308 = vmatpush1.bf16.msra.mxu1 %v14315_v23  ;;  %v15203_v23 = vld [vmem:[#allocation12 + $0x304] ss:$16 sps:$4 sm:$0xff]  }
 0x711   : > { %11976 = vmatpush1.bf16.msra.mxu0 %v15174_v42  ;;  %10320 = vmatprep.subr.bf16.mxu1 %v14324_v29  ;;  %v3772_v42 = vld [vmem:[#allocation9 + $0x1e58] sm:$0xff] }
 0x712   : > { %11988 = vmatprep.subr.bf16.mxu0 %v15179_v24  ;;  %v3776_v29 = vld [vmem:[#allocation9 + $0x1e78] sm:$0xff]  ;;  %v14387_v24 = vcombine.low %v3764_v44, %v3768_v21  ;;  %v15225_v21 = vld [vmem:[#allocation12 + $0x8] ss:$16 sps:$4 sm:$0xff]  }
 0x713   : > { %10310 = vmatmul.mubr.bf16.vlgmr.msra.gmra.mrb[8].mxu1 %v16788_v58  ;;  %v15183_v58 = vld [vmem:[#allocation12 + $0x240] ss:$16 sps:$4 sm:$0xff]   ;;  %v14396_v51 = vcombine.high %v3772_v42, %v3776_v29  ;;  %v15251_v44 = vld [vmem:[#allocation12 + $0x404] ss:$16 sps:$4 sm:$0xff]  }
 0x714   : > { %11978 = vmatmul.mubr.bf16.vlgmr.msra.gmra.mrb[8].mxu0 %v16826_v7  ;;  %10321 = vmatpush1.bf16.msra.mxu1 %v14323_v28  ;;  %v15206_v28 = vld [vmem:[#allocation12 + $0x324] ss:$16 sps:$4 sm:$0xff]  }
 0x715   : > { %11989 = vmatpush1.bf16.msra.mxu0 %v15177_v33  ;;  %12020 = vmatprep.mubr.bf16.mxu0 %v16844_v26  ;;  %v3780_v33 = vld [vmem:[#allocation9 + $0x1e98] sm:$0xff] }
 0x716   : > { %10322 = vmatprep.subr.bf16.mxu1 %v14332_v36  ;;  %11990 = vmatprep.subr.bf16.mxu0 %v15182_v38  ;;  %v3784_v36 = vld [vmem:[#allocation9 + $0x1eb8] sm:$0xff]  ;;  %v14395_v38 = vcombine.low %v3772_v42, %v3776_v29  ;;  %v15233_v42 = vld [vmem:[#allocation12 + $0x4c] ss:$16 sps:$4 sm:$0xff]  }
 0x717   : > { %10352 = vmatprep.mubr.bf16.mxu1 %v16790_v1  ;;  %v3744_v1 = vld [vmem:[#allocation9 + $0x1d78] sm:$0xff]  ;;  %v14404_v31 = vcombine.high %v3780_v33, %v3784_v36 }
 0x718   : > { %10323 = vmatpush1.bf16.msra.mxu1 %v14331_v45  ;;  %v14364_v10 = vcombine.high %v3740_v2, %v3744_v1  ;;  %v14363_v14 = vcombine.low %v3740_v2, %v3744_v1  ;;  %v15209_v45 = vld [vmem:[#allocation12 + $0x344] ss:$16 sps:$4 sm:$0xff]   ;;  %v15213_v2 = vld [vmem:[#allocation12 + $0x380] ss:$16 sps:$4 sm:$0xff]  }
 0x719   : > { %11991 = vmatpush1.bf16.msra.mxu0 %v15180_v25  ;;  %10324 = vmatprep.subr.bf16.mxu1 %v14340_v59  ;;  %v3788_v25 = vld [vmem:[#allocation9 + $0x1ed8] sm:$0xff] }
 0x71a   : > { %11992 = vmatprep.subr.bf16.mxu0 %v15185_v53  ;;  %v3792_v59 = vld [vmem:[#allocation9 + $0x1ef8] sm:$0xff]  ;;  %v14403_v53 = vcombine.low %v3780_v33, %v3784_v36  ;;  %v15234_v33 = vld [vmem:[#allocation12 + $0x68] ss:$16 sps:$4 sm:$0xff]   ;;  %v15239_v36 = vld [vmem:[#allocation12 + $0x8c] ss:$16 sps:$4 sm:$0xff]  }
 0x71b   : > { %v14412_v54 = vcombine.high %v3788_v25, %v3792_v59  ;;  %v15255_v29 = vld [vmem:[#allocation12 + $0x420] ss:$16 sps:$4 sm:$0xff]  }
 0x71c   : > { %10325 = vmatpush1.bf16.msra.mxu1 %v14339_v57  ;;  %v15212_v57 = vld [vmem:[#allocation12 + $0x364] ss:$16 sps:$4 sm:$0xff]  }
 0x71d   : > { %11993 = vmatpush1.bf16.msra.mxu0 %v15183_v58  ;;  %10326 = vmatprep.subr.bf16.mxu1 %v14348_v9  ;;  %v3796_v58 = vld [vmem:[#allocation9 + $0x1f18] sm:$0xff] }
 0x71e   : > { %11994 = vmatprep.subr.bf16.mxu0 %v15188_v46  ;;  %v3800_v9 = vld [vmem:[#allocation9 + $0x1f38] sm:$0xff]  ;;  %v14411_v46 = vcombine.low %v3788_v25, %v3792_v59  ;;  %v15240_v59 = vld [vmem:[#allocation12 + $0xa8] ss:$16 sps:$4 sm:$0xff]  }
 0x71f   : > { %v14420_v60 = vcombine.high %v3796_v58, %v3800_v9  ;;  %v15281_v25 = vld [vmem:[#allocation12 + $0x4a4] ss:$16 sps:$4 sm:$0xff]  }
 0x720   : > { %10327 = vmatpush1.bf16.msra.mxu1 %v14347_v52  ;;  %v15215_v52 = vld [vmem:[#allocation12 + $0x384] ss:$16 sps:$4 sm:$0xff]  }
 0x721   : > { %11995 = vmatpush1.bf16.msra.mxu0 %v15186_v61  ;;  %10328 = vmatprep.subr.bf16.mxu1 %v14356_v63  ;;  %v3804_v61 = vld [vmem:[#allocation9 + $0x1f58] sm:$0xff] }
 0x722   : > { %11996 = vmatprep.subr.bf16.mxu0 %v15191_v0  ;;  %v3808_v63 = vld [vmem:[#allocation9 + $0x1f78] sm:$0xff]  ;;  %v14419_v0 = vcombine.low %v3796_v58, %v3800_v9  ;;  %v15248_v58 = vld [vmem:[#allocation12 + $0xec] ss:$16 sps:$4 sm:$0xff]  }
 0x723   : > { %v14428_v1 = vcombine.high %v3804_v61, %v3808_v63  ;;  %v15285_v9 = vld [vmem:[#allocation12 + $0x4c0] ss:$16 sps:$4 sm:$0xff]  }
 0x724   : > { %10329 = vmatpush1.bf16.msra.mxu1 %v14355_v3  ;;  %v15218_v3 = vld [vmem:[#allocation12 + $0x3a4] ss:$16 sps:$4 sm:$0xff]  }
 0x725   : > { %11997 = vmatpush1.bf16.msra.mxu0 %v15189_v4  ;;  %10330 = vmatprep.subr.bf16.mxu1 %v14364_v10  ;;  %v3812_v4 = vld [vmem:[#allocation9 + $0x1f98] sm:$0xff] }
 0x726   : > { %11998 = vmatprep.subr.bf16.mxu0 %v15194_v15  ;;  %v3816_v10 = vld [vmem:[#allocation9 + $0x1fb8] sm:$0xff]  ;;  %v14427_v15 = vcombine.low %v3804_v61, %v3808_v63  ;;  %v15252_v63 = vld [vmem:[#allocation12 + $0x108] ss:$16 sps:$4 sm:$0xff]  }
 0x727   : > { %v14436_v11 = vcombine.high %v3812_v4, %v3816_v10  ;;  %v15299_v61 = vld [vmem:[#allocation12 + $0x504] ss:$16 sps:$4 sm:$0xff]  }
 0x728   : > { %10331 = vmatpush1.bf16.msra.mxu1 %v14363_v14  ;;  %v15221_v14 = vld [vmem:[#allocation12 + $0x3c4] ss:$16 sps:$4 sm:$0xff]  }
 0x729   : > { %11999 = vmatpush1.bf16.msra.mxu0 %v15192_v62  ;;  %10332 = vmatprep.subr.bf16.mxu1 %v14372_v16  ;;  %v3820_v62 = vld [vmem:[#allocation9 + $0x1fd8] sm:$0xff] }
 0x72a   : > { %12000 = vmatprep.subr.bf16.mxu0 %v15197_v48  ;;  %v3824_v16 = vld [vmem:[#allocation9 + $0x1ff8] sm:$0xff]  ;;  %v14435_v48 = vcombine.low %v3812_v4, %v3816_v10  ;;  %v15266_v4 = vld [vmem:[#allocation12 + $0x14c] ss:$16 sps:$4 sm:$0xff]  }
 0x72b   : > { %v14444_v32 = vcombine.high %v3820_v62, %v3824_v16  ;;  %v15303_v10 = vld [vmem:[#allocation12 + $0x520] ss:$16 sps:$4 sm:$0xff]  }
 0x72c   : > { %10333 = vmatpush1.bf16.msra.mxu1 %v14371_v18  ;;  %v15224_v18 = vld [vmem:[#allocation12 + $0x3e4] ss:$16 sps:$4 sm:$0xff]  }
 0x72d   : > { %12001 = vmatpush1.bf16.msra.mxu0 %v15195_v19  ;;  %10334 = vmatprep.subr.bf16.mxu1 %v14380_v20  ;;  %v14443_v19 = vcombine.low %v3820_v62, %v3824_v16  ;;  %v15222_v20 = vld [vmem:[#allocation12 + $0x3e0] ss:$16 sps:$4 sm:$0xff]   ;;  %v15317_v62 = vld [vmem:[#allocation12 + $0x564] ss:$16 sps:$4 sm:$0xff]   ;;  %v15270_v16 = vld [vmem:[#allocation12 + $0x168] ss:$16 sps:$4 sm:$0xff]  }
 0x72e   : > { %12002 = vmatprep.subr.bf16.mxu0 %v15200_v37  ;;  %v15227_v37 = vld [vmem:[#allocation12 + $0xc] ss:$16 sps:$4 sm:$0xff]  }
 0x730   : > { %10335 = vmatpush1.bf16.msra.mxu1 %v14379_v5  ;;  %v15230_v5 = vld [vmem:[#allocation12 + $0x2c] ss:$16 sps:$4 sm:$0xff]  }
 0x731   : > { %12003 = vmatpush1.bf16.msra.mxu0 %v15198_v41  ;;  %10336 = vmatprep.subr.bf16.mxu1 %v14388_v22  ;;  %v15249_v41 = vld [vmem:[#allocation12 + $0x400] ss:$16 sps:$4 sm:$0xff]   ;;  %v15257_v22 = vld [vmem:[#allocation12 + $0x424] ss:$16 sps:$4 sm:$0xff]  }
 0x732   : > { %12004 = vmatprep.subr.bf16.mxu0 %v15203_v23  ;;  %v15228_v23 = vld [vmem:[#allocation12 + $0x28] ss:$16 sps:$4 sm:$0xff]  }
 0x734   : > { %10337 = vmatpush1.bf16.msra.mxu1 %v14387_v24  ;;  %v15263_v24 = vld [vmem:[#allocation12 + $0x444] ss:$16 sps:$4 sm:$0xff]  }
 0x735   : > { %12005 = vmatpush1.bf16.msra.mxu0 %v15201_v43  ;;  %10338 = vmatprep.subr.bf16.mxu1 %v14396_v51  ;;  %v15231_v43 = vld [vmem:[#allocation12 + $0x48] ss:$16 sps:$4 sm:$0xff]   ;;  %v15236_v51 = vld [vmem:[#allocation12 + $0x6c] ss:$16 sps:$4 sm:$0xff]  }
 0x736   : > { %12006 = vmatprep.subr.bf16.mxu0 %v15206_v28  ;;  %v15261_v28 = vld [vmem:[#allocation12 + $0x440] ss:$16 sps:$4 sm:$0xff]  }
 0x738   : > { %10339 = vmatpush1.bf16.msra.mxu1 %v14395_v38  ;;  %v15275_v38 = vld [vmem:[#allocation12 + $0x484] ss:$16 sps:$4 sm:$0xff]  }
 0x739   : > { %12007 = vmatpush1.bf16.msra.mxu0 %v15204_v40  ;;  %10340 = vmatprep.subr.bf16.mxu1 %v14404_v31  ;;  %v15237_v40 = vld [vmem:[#allocation12 + $0x88] ss:$16 sps:$4 sm:$0xff]   ;;  %v15242_v31 = vld [vmem:[#allocation12 + $0xac] ss:$16 sps:$4 sm:$0xff]  }
 0x73a   : > { %12008 = vmatprep.subr.bf16.mxu0 %v15209_v45  ;;  %v15273_v45 = vld [vmem:[#allocation12 + $0x480] ss:$16 sps:$4 sm:$0xff]  }
 0x73c   : > { %10341 = vmatpush1.bf16.msra.mxu1 %v14403_v53  ;;  %v15245_v53 = vld [vmem:[#allocation12 + $0xcc] ss:$16 sps:$4 sm:$0xff]  }
 0x73d   : > { %12009 = vmatpush1.bf16.msra.mxu0 %v15207_v39  ;;  %10342 = vmatprep.subr.bf16.mxu1 %v14412_v54  ;;  %v15279_v39 = vld [vmem:[#allocation12 + $0x4a0] ss:$16 sps:$4 sm:$0xff]   ;;  %v15287_v54 = vld [vmem:[#allocation12 + $0x4c4] ss:$16 sps:$4 sm:$0xff]  }
 0x73e   : > { %12010 = vmatprep.subr.bf16.mxu0 %v15212_v57  ;;  %v15243_v57 = vld [vmem:[#allocation12 + $0xc8] ss:$16 sps:$4 sm:$0xff]  }
 0x740   : > { %10343 = vmatpush1.bf16.msra.mxu1 %v14411_v46  ;;  %v15293_v46 = vld [vmem:[#allocation12 + $0x4e4] ss:$16 sps:$4 sm:$0xff]  }
 0x741   : > { %12011 = vmatpush1.bf16.msra.mxu0 %v15210_v6  ;;  %10344 = vmatprep.subr.bf16.mxu1 %v14420_v60  ;;  %v15246_v6 = vld [vmem:[#allocation12 + $0xe8] ss:$16 sps:$4 sm:$0xff]   ;;  %v15254_v60 = vld [vmem:[#allocation12 + $0x10c] ss:$16 sps:$4 sm:$0xff]  }
 0x742   : > { %12012 = vmatprep.subr.bf16.mxu0 %v15215_v52  ;;  %v15291_v52 = vld [vmem:[#allocation12 + $0x4e0] ss:$16 sps:$4 sm:$0xff]  }
 0x744   : > { %10345 = vmatpush1.bf16.msra.mxu1 %v14419_v0  ;;  %v15260_v0 = vld [vmem:[#allocation12 + $0x12c] ss:$16 sps:$4 sm:$0xff]  }
 0x745   : > { %12013 = vmatpush1.bf16.msra.mxu0 %v15213_v2  ;;  %10346 = vmatprep.subr.bf16.mxu1 %v14428_v1  ;;  %v15297_v2 = vld [vmem:[#allocation12 + $0x500] ss:$16 sps:$4 sm:$0xff]   ;;  %v15305_v1 = vld [vmem:[#allocation12 + $0x524] ss:$16 sps:$4 sm:$0xff]  }
 0x746   : > { %12014 = vmatprep.subr.bf16.mxu0 %v15218_v3  ;;  %v15258_v3 = vld [vmem:[#allocation12 + $0x128] ss:$16 sps:$4 sm:$0xff]  }
 0x748   : > { %10347 = vmatpush1.bf16.msra.mxu1 %v14427_v15  ;;  %v15311_v15 = vld [vmem:[#allocation12 + $0x544] ss:$16 sps:$4 sm:$0xff]  }
 0x749   : > { %12015 = vmatpush1.bf16.msra.mxu0 %v15216_v8  ;;  %10348 = vmatprep.subr.bf16.mxu1 %v14436_v11  ;;  %v15264_v8 = vld [vmem:[#allocation12 + $0x148] ss:$16 sps:$4 sm:$0xff]   ;;  %v15272_v11 = vld [vmem:[#allocation12 + $0x16c] ss:$16 sps:$4 sm:$0xff]  }
 0x74a   : > { %12016 = vmatprep.subr.bf16.mxu0 %v15221_v14  ;;  %v15309_v14 = vld [vmem:[#allocation12 + $0x540] ss:$16 sps:$4 sm:$0xff]  }
 0x74c   : > { %10349 = vmatpush1.bf16.msra.mxu1 %v14435_v48  ;;  %v15278_v48 = vld [vmem:[#allocation12 + $0x18c] ss:$16 sps:$4 sm:$0xff]  }
 0x74d   : > { %12017 = vmatpush1.bf16.msra.mxu0 %v15219_v17  ;;  %10350 = vmatprep.subr.bf16.mxu1 %v14444_v32  ;;  %v15315_v17 = vld [vmem:[#allocation12 + $0x560] ss:$16 sps:$4 sm:$0xff]   ;;  %v15323_v32 = vld [vmem:[#allocation12 + $0x584] ss:$16 sps:$4 sm:$0xff]  }
 0x74e   : > { %12018 = vmatprep.subr.bf16.mxu0 %v15224_v18  ;;  %v15276_v18 = vld [vmem:[#allocation12 + $0x188] ss:$16 sps:$4 sm:$0xff]  }
 0x750   : > { %10351 = vmatpush1.bf16.msra.mxu1 %v14443_v19  ;;  %v15284_v19 = vld [vmem:[#allocation12 + $0x1ac] ss:$16 sps:$4 sm:$0xff]  }
 0x751   : > { %12019 = vmatpush1.bf16.msra.mxu0 %v15222_v20  ;;  %12117 = vmatprep.subr.bf16.mxu1 %v15227_v37  ;;  %v15321_v20 = vld [vmem:[#allocation12 + $0x580] ss:$16 sps:$4 sm:$0xff]   ;;  %v15329_v37 = vld [vmem:[#allocation12 + $0x5a4] ss:$16 sps:$4 sm:$0xff]  }
 0x752   : > { %12031 = vmatprep.subr.bf16.mxu0 %v15251_v44  ;;  %v15282_v44 = vld [vmem:[#allocation12 + $0x1a8] ss:$16 sps:$4 sm:$0xff]  }
 0x753   : > { %10353 = vmatmul.mubr.bf16.vlgmr.msra.gmra.mrb[8].mxu1 %v16798_v27  ;;  %v15269_v27 = vld [vmem:[#allocation12 + $0x464] ss:$16 sps:$4 sm:$0xff]  }
 0x754   : > { %12021 = vmatmul.mubr.bf16.vlgmr.msra.gmra.mrb[8].mxu0 %v16842_v56  ;;  %12118 = vmatpush1.bf16.msra.mxu1 %v15225_v21  ;;  %v15290_v21 = vld [vmem:[#allocation12 + $0x1cc] ss:$16 sps:$4 sm:$0xff]  }
 0x755   : > { %12149 = vmatprep.mubr.bf16.mxu1 %v16828_v12  ;;  %12119 = vmatprep.subr.bf16.mxu1 %v15230_v5  ;;  %v15267_v12 = vld [vmem:[#allocation12 + $0x460] ss:$16 sps:$4 sm:$0xff]  }
 0x756   : > { %12032 = vmatpush1.bf16.msra.mxu0 %v15249_v41  ;;  %v15327_v5 = vld [vmem:[#allocation12 + $0x5a0] ss:$16 sps:$4 sm:$0xff]   ;;  %v15335_v41 = vld [vmem:[#allocation12 + $0x5c4] ss:$16 sps:$4 sm:$0xff]  }
 0x757   : > { %12033 = vmatprep.subr.bf16.mxu0 %v15257_v22  ;;  %v15288_v22 = vld [vmem:[#allocation12 + $0x1c8] ss:$16 sps:$4 sm:$0xff]  }
 0x758   : > { %12120 = vmatpush1.bf16.msra.mxu1 %v15228_v23  ;;  %v15296_v23 = vld [vmem:[#allocation12 + $0x1ec] ss:$16 sps:$4 sm:$0xff]  }
 0x759   : > { %12121 = vmatprep.subr.bf16.mxu1 %v15233_v42  ;;  %v15333_v42 = vld [vmem:[#allocation12 + $0x5c0] ss:$16 sps:$4 sm:$0xff]  }
 0x75a   : > { %12034 = vmatpush1.bf16.msra.mxu0 %v15255_v29  ;;  %v15341_v29 = vld [vmem:[#allocation12 + $0x5e4] ss:$16 sps:$4 sm:$0xff]  }
 0x75b   : > { %12035 = vmatprep.subr.bf16.mxu0 %v15263_v24  ;;  %v15294_v24 = vld [vmem:[#allocation12 + $0x1e8] ss:$16 sps:$4 sm:$0xff]  }
 0x75c   : > { %12122 = vmatpush1.bf16.msra.mxu1 %v15231_v43  ;;  %v15302_v43 = vld [vmem:[#allocation12 + $0x20c] ss:$16 sps:$4 sm:$0xff]  }
 0x75d   : > { %12123 = vmatprep.subr.bf16.mxu1 %v15236_v51  ;;  %v15339_v51 = vld [vmem:[#allocation12 + $0x5e0] ss:$16 sps:$4 sm:$0xff]  }
 0x75e   : > { %12036 = vmatpush1.bf16.msra.mxu0 %v15261_v28  ;;  %v15395_v28 = vld [vmem:[#allocation12 + $0x604] ss:$16 sps:$4 sm:$0xff]  }
 0x75f   : > { %12037 = vmatprep.subr.bf16.mxu0 %v15269_v27  ;;  %v15300_v27 = vld [vmem:[#allocation12 + $0x208] ss:$16 sps:$4 sm:$0xff]  }
 0x760   : > { %12124 = vmatpush1.bf16.msra.mxu1 %v15234_v33  ;;  %v15308_v33 = vld [vmem:[#allocation12 + $0x22c] ss:$16 sps:$4 sm:$0xff]  }
 0x761   : > { %12125 = vmatprep.subr.bf16.mxu1 %v15239_v36  ;;  %v15306_v36 = vld [vmem:[#allocation12 + $0x228] ss:$16 sps:$4 sm:$0xff]  }
 0x762   : > { %12038 = vmatpush1.bf16.msra.mxu0 %v15267_v12  ;;  %v15314_v12 = vld [vmem:[#allocation12 + $0x24c] ss:$16 sps:$4 sm:$0xff]  }
 0x763   : > { %12039 = vmatprep.subr.bf16.mxu0 %v15275_v38  ;;  %v15312_v38 = vld [vmem:[#allocation12 + $0x248] ss:$16 sps:$4 sm:$0xff]  }
 0x764   : > { %12126 = vmatpush1.bf16.msra.mxu1 %v15237_v40  ;;  %v15320_v40 = vld [vmem:[#allocation12 + $0x26c] ss:$16 sps:$4 sm:$0xff]  }
 0x765   : > { %12127 = vmatprep.subr.bf16.mxu1 %v15242_v31  ;;  %v15318_v31 = vld [vmem:[#allocation12 + $0x268] ss:$16 sps:$4 sm:$0xff]  }
 0x766   : > { %12040 = vmatpush1.bf16.msra.mxu0 %v15273_v45  ;;  %v15326_v45 = vld [vmem:[#allocation12 + $0x28c] ss:$16 sps:$4 sm:$0xff]  }
 0x767   : > { %12041 = vmatprep.subr.bf16.mxu0 %v15281_v25  ;;  %v15324_v25 = vld [vmem:[#allocation12 + $0x288] ss:$16 sps:$4 sm:$0xff]  }
 0x768   : > { %12128 = vmatpush1.bf16.msra.mxu1 %v15240_v59  ;;  %v15332_v59 = vld [vmem:[#allocation12 + $0x2ac] ss:$16 sps:$4 sm:$0xff]  }
 0x769   : > { %12129 = vmatprep.subr.bf16.mxu1 %v15245_v53  ;;  %v15330_v53 = vld [vmem:[#allocation12 + $0x2a8] ss:$16 sps:$4 sm:$0xff]  }
 0x76a   : > { %12042 = vmatpush1.bf16.msra.mxu0 %v15279_v39 }
 0x76b   : > { %12043 = vmatprep.subr.bf16.mxu0 %v15287_v54  ;;  %v15338_v54 = vld [vmem:[#allocation12 + $0x2cc] ss:$16 sps:$4 sm:$0xff]  }
 0x76c   : > { %12130 = vmatpush1.bf16.msra.mxu1 %v15243_v57 }
 0x76d   : > { %12131 = vmatprep.subr.bf16.mxu1 %v15248_v58 }
 0x76e   : > { %12044 = vmatpush1.bf16.msra.mxu0 %v15285_v9 }
 0x76f   : > { %12045 = vmatprep.subr.bf16.mxu0 %v15293_v46  ;;  %v15336_v46 = vld [vmem:[#allocation12 + $0x2c8] ss:$16 sps:$4 sm:$0xff]  }
 0x770   : > { %12132 = vmatpush1.bf16.msra.mxu1 %v15246_v6 }
 0x771   : > { %12133 = vmatprep.subr.bf16.mxu1 %v15254_v60 }
 0x772   : > { %12046 = vmatpush1.bf16.msra.mxu0 %v15291_v52  ;;  %v15344_v52 = vld [vmem:[#allocation12 + $0x2ec] ss:$16 sps:$4 sm:$0xff]  }
 0x773   : > { %12047 = vmatprep.subr.bf16.mxu0 %v15299_v61 }
 0x774   : > { %12134 = vmatpush1.bf16.msra.mxu1 %v15252_v63 }
 0x775   : > { %12135 = vmatprep.subr.bf16.mxu1 %v15260_v0 }
 0x776   : > { %12048 = vmatpush1.bf16.msra.mxu0 %v15297_v2 }
 0x777   : > { %12049 = vmatprep.subr.bf16.mxu0 %v15305_v1  ;;  %v15342_v1 = vld [vmem:[#allocation12 + $0x2e8] ss:$16 sps:$4 sm:$0xff]  }
 0x778   : > { %12136 = vmatpush1.bf16.msra.mxu1 %v15258_v3 }
 0x779   : > { %12137 = vmatprep.subr.bf16.mxu1 %v15266_v4  ;;  %v15347_v4 = vld [vmem:[#allocation12 + $0x30c] ss:$16 sps:$4 sm:$0xff]  }
 0x77a   : > { %12050 = vmatpush1.bf16.msra.mxu0 %v15303_v10 }
 0x77b   : > { %12051 = vmatprep.subr.bf16.mxu0 %v15311_v15 }
 0x77c   : > { %12138 = vmatpush1.bf16.msra.mxu1 %v15264_v8  ;;  %v15393_v8 = vld [vmem:[#allocation12 + $0x600] ss:$16 sps:$4 sm:$0xff]  }
 0x77d   : > { %12139 = vmatprep.subr.bf16.mxu1 %v15272_v11  ;;  %v15345_v11 = vld [vmem:[#allocation12 + $0x308] ss:$16 sps:$4 sm:$0xff]  }
 0x77e   : > { %12052 = vmatpush1.bf16.msra.mxu0 %v15309_v14  ;;  %v15401_v14 = vld [vmem:[#allocation12 + $0x624] ss:$16 sps:$4 sm:$0xff]  }
 0x77f   : > { %12053 = vmatprep.subr.bf16.mxu0 %v15317_v62  ;;  %v15350_v62 = vld [vmem:[#allocation12 + $0x32c] ss:$16 sps:$4 sm:$0xff]  }
 0x780   : > { %12140 = vmatpush1.bf16.msra.mxu1 %v15270_v16  ;;  %v15399_v16 = vld [vmem:[#allocation12 + $0x620] ss:$16 sps:$4 sm:$0xff]  }
 0x781   : > { %12141 = vmatprep.subr.bf16.mxu1 %v15278_v48  ;;  %v15348_v48 = vld [vmem:[#allocation12 + $0x328] ss:$16 sps:$4 sm:$0xff]  }
 0x782   : > { %12054 = vmatpush1.bf16.msra.mxu0 %v15315_v17  ;;  %v15407_v17 = vld [vmem:[#allocation12 + $0x644] ss:$16 sps:$4 sm:$0xff]  }
 0x783   : > { %12055 = vmatprep.subr.bf16.mxu0 %v15323_v32  ;;  %v15353_v32 = vld [vmem:[#allocation12 + $0x34c] ss:$16 sps:$4 sm:$0xff]  }
 0x784   : > { %12142 = vmatpush1.bf16.msra.mxu1 %v15276_v18  ;;  %v15405_v18 = vld [vmem:[#allocation12 + $0x640] ss:$16 sps:$4 sm:$0xff]  }
 0x785   : > { %12143 = vmatprep.subr.bf16.mxu1 %v15284_v19  ;;  %v15351_v19 = vld [vmem:[#allocation12 + $0x348] ss:$16 sps:$4 sm:$0xff]  }
 0x786   : > { %12056 = vmatpush1.bf16.msra.mxu0 %v15321_v20  ;;  %v15413_v20 = vld [vmem:[#allocation12 + $0x664] ss:$16 sps:$4 sm:$0xff]  }
 0x787   : > { %12057 = vmatprep.subr.bf16.mxu0 %v15329_v37  ;;  %v15356_v37 = vld [vmem:[#allocation12 + $0x36c] ss:$16 sps:$4 sm:$0xff]  }
 0x788   : > { %12144 = vmatpush1.bf16.msra.mxu1 %v15282_v44  ;;  %v15411_v44 = vld [vmem:[#allocation12 + $0x660] ss:$16 sps:$4 sm:$0xff]  }
 0x789   : > { %12145 = vmatprep.subr.bf16.mxu1 %v15290_v21  ;;  %v15354_v21 = vld [vmem:[#allocation12 + $0x368] ss:$16 sps:$4 sm:$0xff]  }
 0x78a   : > { %12058 = vmatpush1.bf16.msra.mxu0 %v15327_v5  ;;  %v15419_v5 = vld [vmem:[#allocation12 + $0x684] ss:$16 sps:$4 sm:$0xff]  }
 0x78b   : > { %12059 = vmatprep.subr.bf16.mxu0 %v15335_v41  ;;  %v15359_v41 = vld [vmem:[#allocation12 + $0x38c] ss:$16 sps:$4 sm:$0xff]  }
 0x78c   : > { %12146 = vmatpush1.bf16.msra.mxu1 %v15288_v22  ;;  %v15417_v22 = vld [vmem:[#allocation12 + $0x680] ss:$16 sps:$4 sm:$0xff]  }
 0x78d   : > { %12147 = vmatprep.subr.bf16.mxu1 %v15296_v23  ;;  %v15357_v23 = vld [vmem:[#allocation12 + $0x388] ss:$16 sps:$4 sm:$0xff]  }
 0x78e   : > { %12060 = vmatpush1.bf16.msra.mxu0 %v15333_v42  ;;  %v15425_v42 = vld [vmem:[#allocation12 + $0x6a4] ss:$16 sps:$4 sm:$0xff]  }
 0x78f   : > { %12061 = vmatprep.subr.bf16.mxu0 %v15341_v29  ;;  %v15362_v29 = vld [vmem:[#allocation12 + $0x3ac] ss:$16 sps:$4 sm:$0xff]  }
 0x790   : > { %12148 = vmatpush1.bf16.msra.mxu1 %v15294_v24  ;;  %v15423_v24 = vld [vmem:[#allocation12 + $0x6a0] ss:$16 sps:$4 sm:$0xff]  }
 0x791   : > { %12160 = vmatprep.subr.bf16.mxu1 %v15302_v43  ;;  %v15360_v43 = vld [vmem:[#allocation12 + $0x3a8] ss:$16 sps:$4 sm:$0xff]  }
 0x792   : > { %12062 = vmatpush1.bf16.msra.mxu0 %v15339_v51  ;;  %v15431_v51 = vld [vmem:[#allocation12 + $0x6c4] ss:$16 sps:$4 sm:$0xff]  }
 0x793   : > { %12150 = vmatmul.mubr.bf16.vlgmr.msra.gmra.mrb[12].mxu1 %v16826_v7  ;;  %12074 = vmatprep.subr.bf16.mxu0 %v15395_v28  ;;  %v16867_v7 = vld [vmem:[#allocation10] sm:$0xff] }
 0x794   : > { %12161 = vmatpush1.bf16.msra.mxu1 %v15300_v27  ;;  %12192 = vmatprep.mubr.bf16.mxu1 %v16844_v26  ;;  %v3846_v26 = vrot.slane %v16867_v7, %v16717_v13  ;;  %v3850_v39 = vrot.slane %v16867_v7, %v16698_v55  ;;  %v15365_v28 = vld [vmem:[#allocation12 + $0x3cc] ss:$16 sps:$4 sm:$0xff]   ;;  %v15429_v27 = vld [vmem:[#allocation12 + $0x6c0] ss:$16 sps:$4 sm:$0xff]  }
 0x795   : > { %12162 = vmatprep.subr.bf16.mxu1 %v15308_v33  ;;  %v15363_v33 = vld [vmem:[#allocation12 + $0x3c8] ss:$16 sps:$4 sm:$0xff]  }
 0x798   : > { %12163 = vmatpush1.bf16.msra.mxu1 %v15306_v36  ;;  %v15437_v36 = vld [vmem:[#allocation12 + $0x6e4] ss:$16 sps:$4 sm:$0xff]  }
 0x799   : > { %12164 = vmatprep.subr.bf16.mxu1 %v15314_v12  ;;  %v15368_v12 = vld [vmem:[#allocation12 + $0x3ec] ss:$16 sps:$4 sm:$0xff]  }
 0x79c   : > { %12165 = vmatpush1.bf16.msra.mxu1 %v15312_v38  ;;  %v15435_v38 = vld [vmem:[#allocation12 + $0x6e0] ss:$16 sps:$4 sm:$0xff]  }
 0x79d   : > { %12166 = vmatprep.subr.bf16.mxu1 %v15320_v40  ;;  %v15366_v40 = vld [vmem:[#allocation12 + $0x3e8] ss:$16 sps:$4 sm:$0xff]  }
 0x7a0   : > { %12167 = vmatpush1.bf16.msra.mxu1 %v15318_v31  ;;  %v15443_v31 = vld [vmem:[#allocation12 + $0x704] ss:$16 sps:$4 sm:$0xff]  }
 0x7a1   : > { %12168 = vmatprep.subr.bf16.mxu1 %v15326_v45  ;;  %v15371_v45 = vld [vmem:[#allocation12 + $0x40c] ss:$16 sps:$4 sm:$0xff]  }
 0x7a4   : > { %12169 = vmatpush1.bf16.msra.mxu1 %v15324_v25  ;;  %v15441_v25 = vld [vmem:[#allocation12 + $0x700] ss:$16 sps:$4 sm:$0xff]  }
 0x7a5   : > { %12170 = vmatprep.subr.bf16.mxu1 %v15332_v59  ;;  %v15369_v59 = vld [vmem:[#allocation12 + $0x408] ss:$16 sps:$4 sm:$0xff]  }
 0x7a7   : > { %v10010_v57 = vpop.f32.mrb[4].mxu0 }
 0x7a8   : > { %v14823_v58 = vadd.f32 %v10010_v57, %v3846_v26  ;;  %v10012_v9 = vpop.f32.mrb[5].mxu0  ;;  %12171 = vmatpush1.bf16.msra.mxu1 %v15330_v53  ;;  %v15449_v53 = vld [vmem:[#allocation12 + $0x724] ss:$16 sps:$4 sm:$0xff]  }
 0x7a9   : > { %v14824_v6 = vadd.f32 %v10012_v9, %v3850_v39  ;;  %v10014_v60 = vpop.f32.mrb[6].mxu0  ;;  %12172 = vmatprep.subr.bf16.mxu1 %v15338_v54  ;;  %v15372_v54 = vld [vmem:[#allocation12 + $0x428] ss:$16 sps:$4 sm:$0xff]   ;;  %v15455_v57 = vld [vmem:[#allocation12 + $0x744] ss:$16 sps:$4 sm:$0xff]  }
 0x7aa   : > { %v14825_v61 = vadd.f32 %v10014_v60, %v3846_v26  ;;  %v10016_v63 = vpop.f32.mrb[7].mxu0  ;;  %v10367_v2 = vmax.f32 %v14823_v58, 0.0  ;;  %v15374_v26 = vld [vmem:[#allocation12 + $0x42c] ss:$16 sps:$4 sm:$0xff]   ;;  %v15453_v9 = vld [vmem:[#allocation12 + $0x740] ss:$16 sps:$4 sm:$0xff]  }
 0x7ab   : > { %v14826_v0 = vadd.f32 %v10016_v63, %v3850_v39  ;;  %v10368_v3 = vmax.f32 %v14824_v6, 0.0  ;;  %v15447_v39 = vld [vmem:[#allocation12 + $0x720] ss:$16 sps:$4 sm:$0xff]   ;;  %v15377_v58 = vld [vmem:[#allocation12 + $0x44c] ss:$16 sps:$4 sm:$0xff]  }
 0x7ac   : > { %v10375_v13 = vmax.f32 %v14825_v61, 0.0  ;;  %12173 = vmatpush1.bf16.msra.mxu1 %v15336_v46  ;;  %v15375_v46 = vld [vmem:[#allocation12 + $0x448] ss:$16 sps:$4 sm:$0xff]   ;;  %v15461_v6 = vld [vmem:[#allocation12 + $0x764] ss:$16 sps:$4 sm:$0xff]  }
 0x7ad   : > { %v10376_v55 = vmax.f32 %v14826_v0, 0.0  ;;  %12174 = vmatprep.subr.bf16.mxu1 %v15344_v52  ;;  %v15380_v60 = vld [vmem:[#allocation12 + $0x46c] ss:$16 sps:$4 sm:$0xff]   ;;  %v15378_v52 = vld [vmem:[#allocation12 + $0x468] ss:$16 sps:$4 sm:$0xff]  }
 0x7ae   : > { %v16873_v10 = vpack.c.bf16 %v10375_v13, %v10367_v2  ;;  %v15467_v61 = vld [vmem:[#allocation12 + $0x784] ss:$16 sps:$4 sm:$0xff]   ;;  %v15383_v63 = vld [vmem:[#allocation12 + $0x48c] ss:$16 sps:$4 sm:$0xff]   ;;  %v15465_v0 = vld [vmem:[#allocation12 + $0x780] ss:$16 sps:$4 sm:$0xff]  }
 0x7af   : > { %v16875_v15 = vpack.c.bf16 %v10376_v55, %v10368_v3  ;;  %v15381_v2 = vld [vmem:[#allocation12 + $0x488] ss:$16 sps:$4 sm:$0xff]   ;;  %v15473_v13 = vld [vmem:[#allocation12 + $0x7a4] ss:$16 sps:$4 sm:$0xff]   ;;  %v15471_v3 = vld [vmem:[#allocation12 + $0x7a0] ss:$16 sps:$4 sm:$0xff]  }
 0x7b0   : > { %12175 = vmatpush1.bf16.msra.mxu1 %v15342_v1  ;;  %v15386_v1 = vld [vmem:[#allocation12 + $0x4ac] ss:$16 sps:$4 sm:$0xff]   ;;  %v15384_v55 = vld [vmem:[#allocation12 + $0x4a8] ss:$16 sps:$4 sm:$0xff]  }
 0x7b1   : > { %12063 = vmatprep.mubr.bf16.mxu0 %v16875_v15  ;;  %12176 = vmatprep.subr.bf16.mxu1 %v15347_v4  ;;  %v15479_v4 = vld [vmem:[#allocation12 + $0x7c4] ss:$16 sps:$4 sm:$0xff]  }
 0x7b2   : > { %12064 = vmatmul.mubr.bf16.vlgmr.msra.gmra.mrb[8].mxu0 %v16873_v10 }
 0x7b3   : > { %12075 = vmatpush1.bf16.msra.mxu0 %v15393_v8  ;;  %v15477_v8 = vld [vmem:[#allocation12 + $0x7c0] ss:$16 sps:$4 sm:$0xff]  }
 0x7b4   : > { %12177 = vmatpush1.bf16.msra.mxu1 %v15345_v11  ;;  %12076 = vmatprep.subr.bf16.mxu0 %v15401_v14  ;;  %v15387_v11 = vld [vmem:[#allocation12 + $0x4c8] ss:$16 sps:$4 sm:$0xff]   ;;  %v15485_v14 = vld [vmem:[#allocation12 + $0x7e4] ss:$16 sps:$4 sm:$0xff]  }
 0x7b5   : > { %12178 = vmatprep.subr.bf16.mxu1 %v15350_v62  ;;  %v15392_v62 = vld [vmem:[#allocation12 + $0x4ec] ss:$16 sps:$4 sm:$0xff]  }
 0x7b7   : > { %12077 = vmatpush1.bf16.msra.mxu0 %v15399_v16  ;;  %v15483_v16 = vld [vmem:[#allocation12 + $0x7e0] ss:$16 sps:$4 sm:$0xff]  }
 0x7b8   : > { %12179 = vmatpush1.bf16.msra.mxu1 %v15348_v48  ;;  %12078 = vmatprep.subr.bf16.mxu0 %v15407_v17  ;;  %v15390_v48 = vld [vmem:[#allocation12 + $0x4e8] ss:$16 sps:$4 sm:$0xff]  }
 0x7b9   : > { %12180 = vmatprep.subr.bf16.mxu1 %v15353_v32  ;;  %v15515_v17 = vld [vmem:[#allocation15 + $0x4] ss:$8 sps:$4 sm:$0xff]   ;;  %v15398_v32 = vld [vmem:[#allocation12 + $0x50c] ss:$16 sps:$4 sm:$0xff]  }
 0x7bb   : > { %12079 = vmatpush1.bf16.msra.mxu0 %v15405_v18  ;;  %v15396_v18 = vld [vmem:[#allocation12 + $0x508] ss:$16 sps:$4 sm:$0xff]  }
 0x7bc   : > { %12181 = vmatpush1.bf16.msra.mxu1 %v15351_v19  ;;  %12080 = vmatprep.subr.bf16.mxu0 %v15413_v20  ;;  %v15404_v19 = vld [vmem:[#allocation12 + $0x52c] ss:$16 sps:$4 sm:$0xff]   ;;  %v15402_v20 = vld [vmem:[#allocation12 + $0x528] ss:$16 sps:$4 sm:$0xff]  }
 0x7bd   : > { %12182 = vmatprep.subr.bf16.mxu1 %v15356_v37  ;;  %v15410_v37 = vld [vmem:[#allocation12 + $0x54c] ss:$16 sps:$4 sm:$0xff]  }
 0x7bf   : > { %12081 = vmatpush1.bf16.msra.mxu0 %v15411_v44  ;;  %v15408_v44 = vld [vmem:[#allocation12 + $0x548] ss:$16 sps:$4 sm:$0xff]  }
 0x7c0   : > { %12183 = vmatpush1.bf16.msra.mxu1 %v15354_v21  ;;  %12082 = vmatprep.subr.bf16.mxu0 %v15419_v5  ;;  %v15416_v21 = vld [vmem:[#allocation12 + $0x56c] ss:$16 sps:$4 sm:$0xff]   ;;  %v15414_v5 = vld [vmem:[#allocation12 + $0x568] ss:$16 sps:$4 sm:$0xff]  }
 0x7c1   : > { %12184 = vmatprep.subr.bf16.mxu1 %v15359_v41  ;;  %v15422_v41 = vld [vmem:[#allocation12 + $0x58c] ss:$16 sps:$4 sm:$0xff]  }
 0x7c3   : > { %12083 = vmatpush1.bf16.msra.mxu0 %v15417_v22  ;;  %v15420_v22 = vld [vmem:[#allocation12 + $0x588] ss:$16 sps:$4 sm:$0xff]  }
 0x7c4   : > { %12185 = vmatpush1.bf16.msra.mxu1 %v15357_v23  ;;  %12084 = vmatprep.subr.bf16.mxu0 %v15425_v42  ;;  %v15428_v23 = vld [vmem:[#allocation12 + $0x5ac] ss:$16 sps:$4 sm:$0xff]   ;;  %v15426_v42 = vld [vmem:[#allocation12 + $0x5a8] ss:$16 sps:$4 sm:$0xff]  }
 0x7c5   : > { %12186 = vmatprep.subr.bf16.mxu1 %v15362_v29  ;;  %v15434_v29 = vld [vmem:[#allocation12 + $0x5cc] ss:$16 sps:$4 sm:$0xff]  }
 0x7c7   : > { %12085 = vmatpush1.bf16.msra.mxu0 %v15423_v24  ;;  %v15432_v24 = vld [vmem:[#allocation12 + $0x5c8] ss:$16 sps:$4 sm:$0xff]  }
 0x7c8   : > { %12187 = vmatpush1.bf16.msra.mxu1 %v15360_v43  ;;  %12086 = vmatprep.subr.bf16.mxu0 %v15431_v51  ;;  %v15440_v43 = vld [vmem:[#allocation12 + $0x5ec] ss:$16 sps:$4 sm:$0xff]   ;;  %v15438_v51 = vld [vmem:[#allocation12 + $0x5e8] ss:$16 sps:$4 sm:$0xff]  }
 0x7c9   : > { %12188 = vmatprep.subr.bf16.mxu1 %v15365_v28  ;;  %v15446_v28 = vld [vmem:[#allocation12 + $0x60c] ss:$16 sps:$4 sm:$0xff]  }
 0x7cb   : > { %12087 = vmatpush1.bf16.msra.mxu0 %v15429_v27  ;;  %v15444_v27 = vld [vmem:[#allocation12 + $0x608] ss:$16 sps:$4 sm:$0xff]  }
 0x7cc   : > { %12189 = vmatpush1.bf16.msra.mxu1 %v15363_v33  ;;  %12088 = vmatprep.subr.bf16.mxu0 %v15437_v36  ;;  %v15452_v33 = vld [vmem:[#allocation12 + $0x62c] ss:$16 sps:$4 sm:$0xff]   ;;  %v15450_v36 = vld [vmem:[#allocation12 + $0x628] ss:$16 sps:$4 sm:$0xff]  }
 0x7cd   : > { %12190 = vmatprep.subr.bf16.mxu1 %v15368_v12  ;;  %v15458_v12 = vld [vmem:[#allocation12 + $0x64c] ss:$16 sps:$4 sm:$0xff]  }
 0x7cf   : > { %12089 = vmatpush1.bf16.msra.mxu0 %v15435_v38  ;;  %v15456_v38 = vld [vmem:[#allocation12 + $0x648] ss:$16 sps:$4 sm:$0xff]  }
 0x7d0   : > { %12191 = vmatpush1.bf16.msra.mxu1 %v15366_v40  ;;  %12090 = vmatprep.subr.bf16.mxu0 %v15443_v31  ;;  %v15464_v40 = vld [vmem:[#allocation12 + $0x66c] ss:$16 sps:$4 sm:$0xff]   ;;  %v15462_v31 = vld [vmem:[#allocation12 + $0x668] ss:$16 sps:$4 sm:$0xff]  }
 0x7d1   : > { %12203 = vmatprep.subr.bf16.mxu1 %v15371_v45  ;;  %v15470_v45 = vld [vmem:[#allocation12 + $0x68c] ss:$16 sps:$4 sm:$0xff]  }
 0x7d3   : > { %12193 = vmatmul.mubr.bf16.vlgmr.msra.gmra.mrb[12].mxu1 %v16842_v56  ;;  %12091 = vmatpush1.bf16.msra.mxu0 %v15441_v25  ;;  %v15459_v56 = vld [vmem:[#allocation12 + $0x760] ss:$16 sps:$4 sm:$0xff]   ;;  %v15468_v25 = vld [vmem:[#allocation12 + $0x688] ss:$16 sps:$4 sm:$0xff]  }
 0x7d4   : > { %12204 = vmatpush1.bf16.msra.mxu1 %v15369_v59  ;;  %12235 = vmatprep.mubr.bf16.mxu1 %v16875_v15  ;;  %v15389_v15 = vld [vmem:[#allocation12 + $0x4cc] ss:$16 sps:$4 sm:$0xff]  }
 0x7d5   : > { %12205 = vmatprep.subr.bf16.mxu1 %v15374_v26  ;;  %12092 = vmatprep.subr.bf16.mxu0 %v15449_v53  ;;  %v15476_v59 = vld [vmem:[#allocation12 + $0x6ac] ss:$16 sps:$4 sm:$0xff]   ;;  %v3854_v26 = vrot.slane %v16867_v7, %v16735_v30  ;;  %v15474_v53 = vld [vmem:[#allocation12 + $0x6a8] ss:$16 sps:$4 sm:$0xff]  }
 0x7d7   : > { %12093 = vmatpush1.bf16.msra.mxu0 %v15447_v39  ;;  %v15482_v39 = vld [vmem:[#allocation12 + $0x6cc] ss:$16 sps:$4 sm:$0xff]  }
 0x7d8   : > { %12206 = vmatpush1.bf16.msra.mxu1 %v15372_v54  ;;  %12094 = vmatprep.subr.bf16.mxu0 %v15455_v57 }
 0x7d9   : > { %12207 = vmatprep.subr.bf16.mxu1 %v15377_v58 }
 0x7db   : > { %12095 = vmatpush1.bf16.msra.mxu0 %v15453_v9 }
 0x7dc   : > { %12208 = vmatpush1.bf16.msra.mxu1 %v15375_v46  ;;  %12096 = vmatprep.subr.bf16.mxu0 %v15461_v6  ;;  %v15480_v6 = vld [vmem:[#allocation12 + $0x6c8] ss:$16 sps:$4 sm:$0xff]  }
 0x7dd   : > { %12209 = vmatprep.subr.bf16.mxu1 %v15380_v60 }
 0x7df   : > { %12097 = vmatpush1.bf16.msra.mxu0 %v15459_v56 }
 0x7e0   : > { %12210 = vmatpush1.bf16.msra.mxu1 %v15378_v52  ;;  %12098 = vmatprep.subr.bf16.mxu0 %v15467_v61  ;;  %v15488_v52 = vld [vmem:[#allocation12 + $0x6ec] ss:$16 sps:$4 sm:$0xff]  }
 0x7e1   : > { %12211 = vmatprep.subr.bf16.mxu1 %v15383_v63 }
 0x7e3   : > { %12099 = vmatpush1.bf16.msra.mxu0 %v15465_v0 }
 0x7e4   : > { %12212 = vmatpush1.bf16.msra.mxu1 %v15381_v2  ;;  %12100 = vmatprep.subr.bf16.mxu0 %v15473_v13 }
 0x7e5   : > { %12213 = vmatprep.subr.bf16.mxu1 %v15386_v1  ;;  %v15491_v1 = vld [vmem:[#allocation12 + $0x70c] ss:$16 sps:$4 sm:$0xff]  }
 0x7e7   : > { %12101 = vmatpush1.bf16.msra.mxu0 %v15471_v3  ;;  %v15513_v3 = vld [vmem:[#allocation15] ss:$8 sps:$4 sm:$0xff]  }
 0x7e8   : > { %12214 = vmatpush1.bf16.msra.mxu1 %v15384_v55  ;;  %12102 = vmatprep.subr.bf16.mxu0 %v15479_v4  ;;  %v15518_v55 = vld [vmem:[#allocation15 + $0x14] ss:$8 sps:$4 sm:$0xff]  }
 0x7e9   : > { %12215 = vmatprep.subr.bf16.mxu1 %v15389_v15  ;;  %v15489_v4 = vld [vmem:[#allocation12 + $0x708] ss:$16 sps:$4 sm:$0xff]   ;;  %v15494_v15 = vld [vmem:[#allocation12 + $0x72c] ss:$16 sps:$4 sm:$0xff]  }
 0x7eb   : > { %12103 = vmatpush1.bf16.msra.mxu0 %v15477_v8  ;;  %v15516_v8 = vld [vmem:[#allocation15 + $0x10] ss:$8 sps:$4 sm:$0xff]  }
 0x7ec   : > { %12216 = vmatpush1.bf16.msra.mxu1 %v15387_v11  ;;  %12104 = vmatprep.subr.bf16.mxu0 %v15485_v14  ;;  %v15521_v11 = vld [vmem:[#allocation15 + $0x24] ss:$8 sps:$4 sm:$0xff]  }
 0x7ed   : > { %12217 = vmatprep.subr.bf16.mxu1 %v15392_v62  ;;  %v15492_v14 = vld [vmem:[#allocation12 + $0x728] ss:$16 sps:$4 sm:$0xff]   ;;  %v15497_v62 = vld [vmem:[#allocation12 + $0x74c] ss:$16 sps:$4 sm:$0xff]  }
 0x7ef   : > { %12105 = vmatpush1.bf16.msra.mxu0 %v15483_v16  ;;  %v15519_v16 = vld [vmem:[#allocation15 + $0x20] ss:$8 sps:$4 sm:$0xff]  }
 0x7f0   : > { %12218 = vmatpush1.bf16.msra.mxu1 %v15390_v48  ;;  %12697 = vmatprep.subr.bf16.mxu0 %v15515_v17  ;;  %v15524_v48 = vld [vmem:[#allocation15 + $0x34] ss:$8 sps:$4 sm:$0xff]  }
 0x7f1   : > { %12219 = vmatprep.subr.bf16.mxu1 %v15398_v32  ;;  %v15495_v17 = vld [vmem:[#allocation12 + $0x748] ss:$16 sps:$4 sm:$0xff]   ;;  %v15500_v32 = vld [vmem:[#allocation12 + $0x76c] ss:$16 sps:$4 sm:$0xff]  }
 0x7f4   : > { %12220 = vmatpush1.bf16.msra.mxu1 %v15396_v18  ;;  %v15522_v18 = vld [vmem:[#allocation15 + $0x30] ss:$8 sps:$4 sm:$0xff]  }
 0x7f5   : > { %12221 = vmatprep.subr.bf16.mxu1 %v15404_v19  ;;  %v15527_v19 = vld [vmem:[#allocation15 + $0x44] ss:$8 sps:$4 sm:$0xff]  }
 0x7f8   : > { %12222 = vmatpush1.bf16.msra.mxu1 %v15402_v20  ;;  %v15498_v20 = vld [vmem:[#allocation12 + $0x768] ss:$16 sps:$4 sm:$0xff]  }
 0x7f9   : > { %12223 = vmatprep.subr.bf16.mxu1 %v15410_v37  ;;  %v15503_v37 = vld [vmem:[#allocation12 + $0x78c] ss:$16 sps:$4 sm:$0xff]  }
 0x7fc   : > { %12224 = vmatpush1.bf16.msra.mxu1 %v15408_v44  ;;  %v15525_v44 = vld [vmem:[#allocation15 + $0x40] ss:$8 sps:$4 sm:$0xff]  }
 0x7fd   : > { %12225 = vmatprep.subr.bf16.mxu1 %v15416_v21  ;;  %v15530_v21 = vld [vmem:[#allocation15 + $0x54] ss:$8 sps:$4 sm:$0xff]  }
 0x800   : > { %12226 = vmatpush1.bf16.msra.mxu1 %v15414_v5  ;;  %v15501_v5 = vld [vmem:[#allocation12 + $0x788] ss:$16 sps:$4 sm:$0xff]  }
 0x801   : > { %12227 = vmatprep.subr.bf16.mxu1 %v15422_v41  ;;  %v15506_v41 = vld [vmem:[#allocation12 + $0x7ac] ss:$16 sps:$4 sm:$0xff]  }
 0x804   : > { %12228 = vmatpush1.bf16.msra.mxu1 %v15420_v22  ;;  %v15528_v22 = vld [vmem:[#allocation15 + $0x50] ss:$8 sps:$4 sm:$0xff]  }
 0x805   : > { %12229 = vmatprep.subr.bf16.mxu1 %v15428_v23  ;;  %v15533_v23 = vld [vmem:[#allocation15 + $0x64] ss:$8 sps:$4 sm:$0xff]  }
 0x808   : > { %12230 = vmatpush1.bf16.msra.mxu1 %v15426_v42  ;;  %v15504_v42 = vld [vmem:[#allocation12 + $0x7a8] ss:$16 sps:$4 sm:$0xff]  }
 0x809   : > { %12231 = vmatprep.subr.bf16.mxu1 %v15434_v29  ;;  %v15509_v29 = vld [vmem:[#allocation12 + $0x7cc] ss:$16 sps:$4 sm:$0xff]  }
 0x80c   : > { %12232 = vmatpush1.bf16.msra.mxu1 %v15432_v24  ;;  %v15531_v24 = vld [vmem:[#allocation15 + $0x60] ss:$8 sps:$4 sm:$0xff]  }
 0x80d   : > { %12233 = vmatprep.subr.bf16.mxu1 %v15440_v43  ;;  %v15536_v43 = vld [vmem:[#allocation15 + $0x74] ss:$8 sps:$4 sm:$0xff]  }
 0x810   : > { %12234 = vmatpush1.bf16.msra.mxu1 %v15438_v51  ;;  %v15507_v51 = vld [vmem:[#allocation12 + $0x7c8] ss:$16 sps:$4 sm:$0xff]  }
 0x811   : > { %12246 = vmatprep.subr.bf16.mxu1 %v15446_v28  ;;  %v15512_v28 = vld [vmem:[#allocation12 + $0x7ec] ss:$16 sps:$4 sm:$0xff]  }
 0x813   : > { %12236 = vmatmul.mubr.bf16.vlgmr.msra.gmra.mrb[12].mxu1 %v16873_v10  ;;  %v3858_v10 = vrot.slane %v16867_v7, %v16720_v50  ;;  %v15486_v50 = vld [vmem:[#allocation12 + $0x6e8] ss:$16 sps:$4 sm:$0xff]  }
 0x814   : > { %12247 = vmatpush1.bf16.msra.mxu1 %v15444_v27  ;;  %v15534_v27 = vld [vmem:[#allocation15 + $0x70] ss:$8 sps:$4 sm:$0xff]  }
 0x815   : > { %12248 = vmatprep.subr.bf16.mxu1 %v15452_v33  ;;  %v15539_v33 = vld [vmem:[#allocation15 + $0x84] ss:$8 sps:$4 sm:$0xff]  }
 0x818   : > { %12249 = vmatpush1.bf16.msra.mxu1 %v15450_v36  ;;  %v15510_v36 = vld [vmem:[#allocation12 + $0x7e8] ss:$16 sps:$4 sm:$0xff]  }
 0x819   : > { %12250 = vmatprep.subr.bf16.mxu1 %v15458_v12  ;;  %v15537_v12 = vld [vmem:[#allocation15 + $0x80] ss:$8 sps:$4 sm:$0xff]  }
 0x81c   : > { %12251 = vmatpush1.bf16.msra.mxu1 %v15456_v38  ;;  %v15542_v38 = vld [vmem:[#allocation15 + $0x94] ss:$8 sps:$4 sm:$0xff]  }
 0x81d   : > { %12252 = vmatprep.subr.bf16.mxu1 %v15464_v40  ;;  %v15540_v40 = vld [vmem:[#allocation15 + $0x90] ss:$8 sps:$4 sm:$0xff]  }
 0x820   : > { %12253 = vmatpush1.bf16.msra.mxu1 %v15462_v31  ;;  %v15545_v31 = vld [vmem:[#allocation15 + $0xa4] ss:$8 sps:$4 sm:$0xff]  }
 0x821   : > { %12254 = vmatprep.subr.bf16.mxu1 %v15470_v45  ;;  %v15543_v45 = vld [vmem:[#allocation15 + $0xa0] ss:$8 sps:$4 sm:$0xff]  }
 0x824   : > { %12255 = vmatpush1.bf16.msra.mxu1 %v15468_v25  ;;  %v15548_v25 = vld [vmem:[#allocation15 + $0xb4] ss:$8 sps:$4 sm:$0xff]  }
 0x825   : > { %12256 = vmatprep.subr.bf16.mxu1 %v15476_v59  ;;  %v15546_v59 = vld [vmem:[#allocation15 + $0xb0] ss:$8 sps:$4 sm:$0xff]  }
 0x826   : > { %v10354_v54 = vpop.f32.mrb[8].mxu1 }
 0x827   : > { %v14827_v57 = vadd.f32 %v10354_v54, %v3854_v26  ;;  %v10356_v58 = vpop.f32.mrb[9].mxu1  ;;  %v15557_v54 = vld [vmem:[#allocation15 + $0xe4] ss:$8 sps:$4 sm:$0xff]  }
 0x828   : > { %v14828_v9 = vadd.f32 %v10356_v58, %v3858_v10  ;;  %v10358_v46 = vpop.f32.mrb[10].mxu1  ;;  %12257 = vmatpush1.bf16.msra.mxu1 %v15474_v53  ;;  %v15554_v53 = vld [vmem:[#allocation15 + $0xd4] ss:$8 sps:$4 sm:$0xff]  }
 0x829   : > { %v14829_v60 = vadd.f32 %v10358_v46, %v3854_v26  ;;  %v10360_v56 = vpop.f32.mrb[11].mxu1  ;;  %12258 = vmatprep.subr.bf16.mxu1 %v15482_v39  ;;  %v10369_v30 = vmax.f32 %v14827_v57, 0.0  ;;  %v15551_v26 = vld [vmem:[#allocation15 + $0xc4] ss:$8 sps:$4 sm:$0xff]   ;;  %v15552_v39 = vld [vmem:[#allocation15 + $0xd0] ss:$8 sps:$4 sm:$0xff]  }
 0x82a   : > { %v14830_v61 = vadd.f32 %v10360_v56, %v3858_v10  ;;  %v10370_v0 = vmax.f32 %v14828_v9, 0.0  ;;  %v15549_v10 = vld [vmem:[#allocation15 + $0xc0] ss:$8 sps:$4 sm:$0xff]   ;;  %v15560_v58 = vld [vmem:[#allocation15 + $0xf4] ss:$8 sps:$4 sm:$0xff]  }
 0x82b   : > { %v10377_v63 = vmax.f32 %v14829_v60, 0.0  ;;  %v15555_v57 = vld [vmem:[#allocation15 + $0xe0] ss:$8 sps:$4 sm:$0xff]   ;;  %v15558_v9 = vld [vmem:[#allocation15 + $0xf0] ss:$8 sps:$4 sm:$0xff]  }
 0x82c   : > { %v10378_v2 = vmax.f32 %v14830_v61, 0.0  ;;  %12259 = vmatpush1.bf16.msra.mxu1 %v15480_v6  ;;  %v15563_v46 = vld [vmem:[#allocation15 + $0x104] ss:$8 sps:$4 sm:$0xff]   ;;  %v15613_v61 = vld [vmem:[#allocation18 + $0x50] sm:$0xff]  }
 0x82d   : > { %v16886_v7 = vpack.c.bf16 %v10377_v63, %v10369_v30  ;;  %12260 = vmatprep.subr.bf16.mxu1 %v15488_v52  ;;  %v15609_v6 = vld [vmem:[#allocation18 + $0x40] sm:$0xff]   ;;  %v15611_v56 = vld [vmem:[#allocation18 + $0x48] sm:$0xff]   ;;  %v15614_v30 = vld [vmem:[#allocation18 + $0x10] sm:$0xff]  }
 0x82e   : > { %v10386_v13 = vpack.c.bf16 %v10378_v2, %v10370_v0  ;;  %v15610_v60 = vld [vmem:[#allocation18] sm:$0xff]   ;;  %v15612_v52 = vld [vmem:[#allocation18 + $0x8] sm:$0xff]   ;;  %v15615_v63 = vld [vmem:[#allocation18 + $0x58] sm:$0xff]  }
 0x82f   : > { %v15616_v0 = vld [vmem:[#allocation18 + $0x18] sm:$0xff]   ;;  %v15617_v2 = vld [vmem:[#allocation18 + $0x60] sm:$0xff]  }
 0x830   : > { %12106 = vmatprep.mubr.bf16.mxu0 %v10386_v13  ;;  %12261 = vmatpush1.bf16.msra.mxu1 %v15486_v50  ;;  %v15618_v50 = vld [vmem:[#allocation18 + $0x20] sm:$0xff]  }
 0x831   : > { %12278 = vmatprep.mubr.bf16.mxu1 %v10386_v13  ;;  %12107 = vmatmul.mubr.bf16.vlgmr.msra.gmra.mrb[8].mxu0 %v16886_v7  ;;  %v10643_v13 = vld [vmem:[#allocation13] sm:$0xf] }
 0x832   : > { %12262 = vmatprep.subr.bf16.mxu1 %v15491_v1  ;;  %12698 = vmatpush1.bf16.msra.mxu0 %v15513_v3  ;;  %v10648_v1 = vrot.slane %v10643_v13, %v16692_v47  ;;  %v10652_v3 = vrot.slane %v10643_v13, %v16674_v34 }
 0x833   : > { %12699 = vmatprep.subr.bf16.mxu0 %v15518_v55 }
 0x834   : > { %12263 = vmatpush1.bf16.msra.mxu1 %v15489_v4 }
 0x835   : > { %12264 = vmatprep.subr.bf16.mxu1 %v15494_v15 }
 0x836   : > { %12700 = vmatpush1.bf16.msra.mxu0 %v15516_v8 }
 0x837   : > { %12701 = vmatprep.subr.bf16.mxu0 %v15521_v11 }
 0x838   : > { %12265 = vmatpush1.bf16.msra.mxu1 %v15492_v14 }
 0x839   : > { %12266 = vmatprep.subr.bf16.mxu1 %v15497_v62 }
 0x83a   : > { %12702 = vmatpush1.bf16.msra.mxu0 %v15519_v16 }
 0x83b   : > { %12703 = vmatprep.subr.bf16.mxu0 %v15524_v48 }
 0x83c   : > { %12267 = vmatpush1.bf16.msra.mxu1 %v15495_v17 }
 0x83d   : > { %12268 = vmatprep.subr.bf16.mxu1 %v15500_v32 }
 0x83e   : > { %12704 = vmatpush1.bf16.msra.mxu0 %v15522_v18 }
 0x83f   : > { %12705 = vmatprep.subr.bf16.mxu0 %v15527_v19 }
 0x840   : > { %12269 = vmatpush1.bf16.msra.mxu1 %v15498_v20 }
 0x841   : > { %12270 = vmatprep.subr.bf16.mxu1 %v15503_v37  ;;  %v15561_v37 = vld [vmem:[#allocation15 + $0x100] ss:$8 sps:$4 sm:$0xff]  }
 0x842   : > { %12706 = vmatpush1.bf16.msra.mxu0 %v15525_v44  ;;  %v15566_v44 = vld [vmem:[#allocation15 + $0x114] ss:$8 sps:$4 sm:$0xff]  }
 0x843   : > { %12707 = vmatprep.subr.bf16.mxu0 %v15530_v21  ;;  %v15564_v21 = vld [vmem:[#allocation15 + $0x110] ss:$8 sps:$4 sm:$0xff]  }
 0x844   : > { %12271 = vmatpush1.bf16.msra.mxu1 %v15501_v5  ;;  %v15569_v5 = vld [vmem:[#allocation15 + $0x124] ss:$8 sps:$4 sm:$0xff]  }
 0x845   : > { %12272 = vmatprep.subr.bf16.mxu1 %v15506_v41  ;;  %v15567_v41 = vld [vmem:[#allocation15 + $0x120] ss:$8 sps:$4 sm:$0xff]  }
 0x846   : > { %12708 = vmatpush1.bf16.msra.mxu0 %v15528_v22  ;;  %v15572_v22 = vld [vmem:[#allocation15 + $0x134] ss:$8 sps:$4 sm:$0xff]  }
 0x847   : > { %12709 = vmatprep.subr.bf16.mxu0 %v15533_v23  ;;  %v15570_v23 = vld [vmem:[#allocation15 + $0x130] ss:$8 sps:$4 sm:$0xff]  }
 0x848   : > { %12273 = vmatpush1.bf16.msra.mxu1 %v15504_v42  ;;  %v15575_v42 = vld [vmem:[#allocation15 + $0x144] ss:$8 sps:$4 sm:$0xff]  }
 0x849   : > { %12274 = vmatprep.subr.bf16.mxu1 %v15509_v29  ;;  %v15573_v29 = vld [vmem:[#allocation15 + $0x140] ss:$8 sps:$4 sm:$0xff]  }
 0x84a   : > { %12710 = vmatpush1.bf16.msra.mxu0 %v15531_v24  ;;  %v15578_v24 = vld [vmem:[#allocation15 + $0x154] ss:$8 sps:$4 sm:$0xff]  }
 0x84b   : > { %12711 = vmatprep.subr.bf16.mxu0 %v15536_v43  ;;  %v15576_v43 = vld [vmem:[#allocation15 + $0x150] ss:$8 sps:$4 sm:$0xff]  }
 0x84c   : > { %12275 = vmatpush1.bf16.msra.mxu1 %v15507_v51  ;;  %v15581_v51 = vld [vmem:[#allocation15 + $0x164] ss:$8 sps:$4 sm:$0xff]  }
 0x84d   : > { %12276 = vmatprep.subr.bf16.mxu1 %v15512_v28  ;;  %v10656_v28 = vrot.slane %v10643_v13, %v16695_v49 }
 0x84e   : > { %12712 = vmatpush1.bf16.msra.mxu0 %v15534_v27  ;;  %v15579_v27 = vld [vmem:[#allocation15 + $0x160] ss:$8 sps:$4 sm:$0xff]  }
 0x84f   : > { %12713 = vmatprep.subr.bf16.mxu0 %v15539_v33  ;;  %v10660_v33 = vrot.slane %v10643_v13, %v16677_v35  ;;  %v15585_v35 = vld [vmem:[#allocation15 + $0x180] ss:$8 sps:$4 sm:$0xff]   ;;  %v15608_v13 = vld [vmem:[#allocation15 + $0x1f4] ss:$8 sps:$4 sm:$0xff]  }
 0x850   : > { %12277 = vmatpush1.bf16.msra.mxu1 %v15510_v36  ;;  %v15584_v36 = vld [vmem:[#allocation15 + $0x174] ss:$8 sps:$4 sm:$0xff]  }
 0x851   : > { %14789 = vmatprep.subr.bf16.mxu1 %v15609_v6  ;;  %v15588_v6 = vld [vmem:[#allocation15 + $0x190] ss:$8 sps:$4 sm:$0xff]  }
 0x852   : > { %12714 = vmatpush1.bf16.msra.mxu0 %v15537_v12 }
 0x853   : > { %12279 = vmatmul.mubr.bf16.vlgmr.msra.gmra.mrb[12].mxu1 %v16886_v7  ;;  %12715 = vmatprep.subr.bf16.mxu0 %v15542_v38  ;;  %v15619_v7 = vld [vmem:[#allocation18 + $0x68] sm:$0xff]  }
 0x854   : > { %14790 = vmatpush3.bf16.msra.mxu1 %v15610_v60  ;;  %v15593_v60 = vld [vmem:[#allocation15 + $0x1a4] ss:$8 sps:$4 sm:$0xff]  }
 0x855   : > { %14791 = vmatprep.subr.bf16.mxu1 %v15611_v56  ;;  %v15591_v56 = vld [vmem:[#allocation15 + $0x1a0] ss:$8 sps:$4 sm:$0xff]  }
 0x856   : > { %12716 = vmatpush1.bf16.msra.mxu0 %v15540_v40 }
 0x857   : > { %12717 = vmatprep.subr.bf16.mxu0 %v15545_v31 }
 0x858   : > { %14792 = vmatpush3.bf16.msra.mxu1 %v15612_v52  ;;  %v15596_v52 = vld [vmem:[#allocation15 + $0x1b4] ss:$8 sps:$4 sm:$0xff]  }
 0x859   : > { %14793 = vmatprep.subr.bf16.mxu1 %v15613_v61  ;;  %v15594_v61 = vld [vmem:[#allocation15 + $0x1b0] ss:$8 sps:$4 sm:$0xff]  }
 0x85a   : > { %12718 = vmatpush1.bf16.msra.mxu0 %v15543_v45 }
 0x85b   : > { %12719 = vmatprep.subr.bf16.mxu0 %v15548_v25  ;;  %v15582_v25 = vld [vmem:[#allocation15 + $0x170] ss:$8 sps:$4 sm:$0xff]  }
 0x85c   : > { %14794 = vmatpush3.bf16.msra.mxu1 %v15614_v30  ;;  %v15599_v30 = vld [vmem:[#allocation15 + $0x1c4] ss:$8 sps:$4 sm:$0xff]  }
 0x85d   : > { %14795 = vmatprep.subr.bf16.mxu1 %v15615_v63  ;;  %v15597_v63 = vld [vmem:[#allocation15 + $0x1c0] ss:$8 sps:$4 sm:$0xff]  }
 0x85e   : > { %12720 = vmatpush1.bf16.msra.mxu0 %v15546_v59 }
 0x85f   : > { %12721 = vmatprep.subr.bf16.mxu0 %v15551_v26 }
 0x860   : > { %14796 = vmatpush3.bf16.msra.mxu1 %v15616_v0  ;;  %v15602_v0 = vld [vmem:[#allocation15 + $0x1d4] ss:$8 sps:$4 sm:$0xff]  }
 0x861   : > { %14797 = vmatprep.subr.bf16.mxu1 %v15617_v2  ;;  %v15600_v2 = vld [vmem:[#allocation15 + $0x1d0] ss:$8 sps:$4 sm:$0xff]  }
 0x862   : > { %12722 = vmatpush1.bf16.msra.mxu0 %v15549_v10  ;;  %v15587_v10 = vld [vmem:[#allocation15 + $0x184] ss:$8 sps:$4 sm:$0xff]  }
 0x863   : > { %12723 = vmatprep.subr.bf16.mxu0 %v15554_v53 }
 0x864   : > { %14798 = vmatpush3.bf16.msra.mxu1 %v15618_v50  ;;  %v15605_v50 = vld [vmem:[#allocation15 + $0x1e4] ss:$8 sps:$4 sm:$0xff]  }
 0x865   : > { %14799 = vmatprep.subr.bf16.mxu1 %v15619_v7  ;;  %v15603_v7 = vld [vmem:[#allocation15 + $0x1e0] ss:$8 sps:$4 sm:$0xff]  }
 0x866   : > { %12724 = vmatpush1.bf16.msra.mxu0 %v15552_v39 }
 0x867   : > { %12725 = vmatprep.subr.bf16.mxu0 %v15557_v54 }
 0x86a   : > { %12726 = vmatpush1.bf16.msra.mxu0 %v15555_v57 }
 0x86b   : > { %12727 = vmatprep.subr.bf16.mxu0 %v15560_v58 }
 0x86e   : > { %12728 = vmatpush1.bf16.msra.mxu0 %v15558_v9  ;;  %v15590_v9 = vld [vmem:[#allocation15 + $0x194] ss:$8 sps:$4 sm:$0xff]  }
 0x86f   : > { %12740 = vmatprep.subr.bf16.mxu0 %v15563_v46 }
 0x904   : > { %v12108_v55 = vpop.f32.mrb[8].mxu0 }
 0x905   : > { %v14831_v4 = vadd.f32 %v12108_v55, %v10648_v1  ;;  %v12110_v15 = vpop.f32.mrb[9].mxu0  ;;  %v15621_v55 = vld [vmem:[#allocation18 + $0x70] sm:$0xff]  }
 0x906   : > { %v14832_v8 = vadd.f32 %v12110_v15, %v10652_v3  ;;  %v12112_v11 = vpop.f32.mrb[10].mxu0  ;;  %v15623_v15 = vld [vmem:[#allocation18 + $0x78] sm:$0xff]  }
 0x907   : > { %v14833_v14 = vadd.f32 %v12112_v11, %v10648_v1  ;;  %v12114_v62 = vpop.f32.mrb[11].mxu0  ;;  %v12289_v48 = vmax.f32 %v14831_v4, 0.0  ;;  %v15606_v1 = vld [vmem:[#allocation15 + $0x1f0] ss:$8 sps:$4 sm:$0xff]   ;;  %v12365_v11 = vld [vmem:[#allocation16] sm:$0x3] }
 0x908   : > { %v14834_v16 = vadd.f32 %v12114_v62, %v10652_v3  ;;  %v12290_v32 = vmax.f32 %v14832_v8, 0.0  ;;  %v15620_v3 = vld [vmem:[#allocation18 + $0x28] sm:$0xff]   ;;  %v15622_v4 = vld [vmem:[#allocation18 + $0x30] sm:$0xff]   ;;  %v15624_v8 = vld [vmem:[#allocation18 + $0x38] sm:$0xff]   ;;  %v12374_v62 = vrot.slane %v12365_v11, %v16674_v34 }
 0x909   : > { %v12293_v17 = vmax.f32 %v14833_v14, 0.0  ;;  %14800 = vmatpush3.bf16.msra.mxu1 %v15620_v3  ;;  %v12370_v14 = vrot.slane %v12365_v11, %v16692_v47  ;;  %v14765_v47 = vld [vmem:[#allocation19] ss:$0 sm:$0xff] }
 0x90a   : > { %v12294_v18 = vmax.f32 %v14834_v16, 0.0  ;;  %14801 = vmatprep.subr.bf16.mxu1 %v15621_v55 }
 0x90b   : > { %v12297_v19 = vpack.c.bf16 %v12293_v17, %v12289_v48 }
 0x90c   : > { %v12298_v20 = vpack.c.bf16 %v12294_v18, %v12290_v32 }
 0x90d   : > { %14802 = vmatpush3.bf16.msra.mxu1 %v15622_v4 }
 0x90e   : > { %12729 = vmatprep.mubr.bf16.mxu0 %v12298_v20  ;;  %14803 = vmatprep.subr.bf16.mxu1 %v15623_v15 }
 0x90f   : > { %12730 = vmatmul.mubr.bf16.vlgmr.msra.gmra.mrb[12].mxu0 %v12297_v19 }
 0x910   : > { %12741 = vmatpush1.bf16.msra.mxu0 %v15561_v37 }
 0x911   : > { %12742 = vmatprep.subr.bf16.mxu0 %v15566_v44  ;;  %14804 = vmatpush3.bf16.msra.mxu1 %v15624_v8 }
 0x914   : > { %12743 = vmatpush1.bf16.msra.mxu0 %v15564_v21 }
 0x915   : > { %12744 = vmatprep.subr.bf16.mxu0 %v15569_v5 }
 0x918   : > { %12745 = vmatpush1.bf16.msra.mxu0 %v15567_v41 }
 0x919   : > { %12746 = vmatprep.subr.bf16.mxu0 %v15572_v22 }
 0x91c   : > { %12747 = vmatpush1.bf16.msra.mxu0 %v15570_v23 }
 0x91d   : > { %12748 = vmatprep.subr.bf16.mxu0 %v15575_v42 }
 0x920   : > { %12749 = vmatpush1.bf16.msra.mxu0 %v15573_v29 }
 0x921   : > { %12750 = vmatprep.subr.bf16.mxu0 %v15578_v24 }
 0x924   : > { %12751 = vmatpush1.bf16.msra.mxu0 %v15576_v43 }
 0x925   : > { %12752 = vmatprep.subr.bf16.mxu0 %v15581_v51 }
 0x926   : > { %v12280_v12 = vpop.f32.mrb[12].mxu1 }
 0x927   : > { %v14835_v38 = vadd.f32 %v12280_v12, %v10656_v28  ;;  %v12282_v40 = vpop.f32.mrb[13].mxu1 }
 0x928   : > { %v14836_v31 = vadd.f32 %v12282_v40, %v10660_v33  ;;  %12753 = vmatpush1.bf16.msra.mxu0 %v15579_v27  ;;  %v12284_v45 = vpop.f32.mrb[14].mxu1 }
 0x929   : > { %v14837_v59 = vadd.f32 %v12284_v45, %v10656_v28  ;;  %v12286_v26 = vpop.f32.mrb[15].mxu1  ;;  %12754 = vmatprep.subr.bf16.mxu0 %v15584_v36  ;;  %v12291_v39 = vmax.f32 %v14835_v38, 0.0 }
 0x92a   : > { %v14838_v53 = vadd.f32 %v12286_v26, %v10660_v33  ;;  %v12292_v54 = vmax.f32 %v14836_v31, 0.0 }
 0x92b   : > { %v12295_v49 = vmax.f32 %v14837_v59, 0.0 }
 0x92c   : > { %v12296_v57 = vmax.f32 %v14838_v53, 0.0  ;;  %12755 = vmatpush1.bf16.msra.mxu0 %v15582_v25 }
 0x92d   : > { %v12299_v58 = vpack.c.bf16 %v12295_v49, %v12291_v39  ;;  %12756 = vmatprep.subr.bf16.mxu0 %v15587_v10 }
 0x92e   : > { %v12300_v46 = vpack.c.bf16 %v12296_v57, %v12292_v54 }
 0x930   : > { %12757 = vmatpush1.bf16.msra.mxu0 %v15585_v35  ;;  %12772 = vmatprep.mubr.bf16.mxu0 %v12300_v46 }
 0x931   : > { %12758 = vmatprep.subr.bf16.mxu0 %v15590_v9 }
 0x934   : > { %12759 = vmatpush1.bf16.msra.mxu0 %v15588_v6 }
 0x935   : > { %12760 = vmatprep.subr.bf16.mxu0 %v15593_v60 }
 0x938   : > { %12761 = vmatpush1.bf16.msra.mxu0 %v15591_v56 }
 0x939   : > { %12762 = vmatprep.subr.bf16.mxu0 %v15596_v52 }
 0x93c   : > { %12763 = vmatpush1.bf16.msra.mxu0 %v15594_v61 }
 0x93d   : > { %12764 = vmatprep.subr.bf16.mxu0 %v15599_v30 }
 0x940   : > { %12765 = vmatpush1.bf16.msra.mxu0 %v15597_v63 }
 0x941   : > { %12766 = vmatprep.subr.bf16.mxu0 %v15602_v0 }
 0x944   : > { %12767 = vmatpush1.bf16.msra.mxu0 %v15600_v2 }
 0x945   : > { %12768 = vmatprep.subr.bf16.mxu0 %v15605_v50 }
 0x948   : > { %12769 = vmatpush1.bf16.msra.mxu0 %v15603_v7 }
 0x949   : > { %12770 = vmatprep.subr.bf16.mxu0 %v15608_v13 }
 0x94c   : > { %12771 = vmatpush1.bf16.msra.mxu0 %v15606_v1 }
 0x94f   : > { %12773 = vmatmul.mubr.bf16.vlgmr.msra.gmra.mrb[12].mxu0 %v12299_v58 }
 0xa22   : > { %v12774_v16 = vpop.f32.mrb[12].mxu0 }
 0xa23   : > { %v14839_v48 = vadd.f32 %v12774_v16, %v12370_v14  ;;  %v12776_v17 = vpop.f32.mrb[13].mxu0 }
 0xa24   : > { %v14840_v32 = vadd.f32 %v12776_v17, %v12374_v62  ;;  %v12778_v18 = vpop.f32.mrb[14].mxu0 }
 0xa25   : > { %v14841_v19 = vadd.f32 %v12778_v18, %v12370_v14  ;;  %v12780_v20 = vpop.f32.mrb[15].mxu0  ;;  %v12783_v44 = vmax.f32 %v14839_v48, 0.0 }
 0xa26   : > { %v14842_v37 = vadd.f32 %v12780_v20, %v12374_v62  ;;  %v12784_v5 = vmax.f32 %v14840_v32, 0.0 }
 0xa27   : > { %v12785_v21 = vmax.f32 %v14841_v19, 0.0 }
 0xa28   : > { %v12786_v41 = vmax.f32 %v14842_v37, 0.0 }
 0xa29   : > { %v12787_v22 = vpack.c.bf16 %v12785_v21, %v12783_v44 }
 0xa2a   : > { %v12788_v23 = vpack.c.bf16 %v12786_v41, %v12784_v5 }
 0xa2c   : > { %12956 = vmatprep.mubr.bf16.mxu1 %v12788_v23 }
 0xa2d   : > { %12957 = vmatmul.mubr.bf16.vlgmr.msra.gmra.mrb[16].mxu1 %v12787_v22 }
 0xb00   : > { %v14805_v42 = vpop.f32.mrb[16].mxu1 }
 0xb01   : > { %v14806_v29 = vpop.f32.mrb[17].mxu1 }
 0xb02   : > { %v14807_v34 = vadd.f32 %v14806_v29, %v14805_v42  ;;  %v14808_v24 = vpop.f32.mrb[18].mxu1 }
 0xb03   : > { %v14809_v43 = vpop.f32.mrb[19].mxu1 }
 0xb04   : > { %v12959_v51 = vadd.f32 %v14807_v34, %v14765_v47  ;;  %v14810_v28 = vadd.f32 %v14809_v43, %v14808_v24 }
 0xb06   : > { %12965 = vst [vmem:[#allocation21] sm:$0xff] %v12959_v51  ;;  %v12962_v27 = vadd.f32 %v14810_v28, %v14765_v47 }
 0xb08   : > { %12966 = vst [vmem:[#allocation21 + $0x8] sm:$0xff] %v12962_v27 }
 0xb09 PF: > { %s16984_s28 = sld [smem:[#allocation29_spill]]  ;;  %s16015_s24 = smov [#allocation21]  }
 0xb0a   : > { %s12973_s16 = sshll.u32 %s16015_s24, 4  ;;  %s12974_s16 = int_to_ptr.vmem [resolvable:$true] %s12973_s16 }
 0xb0b   : > { %s15908_s4 = scalar_lea.vmem %s12974_s16, 256  ;;  %p15915_p2 = scmp.lt.s32.totalorder %s12974_s16, %s12974_s16 }
 0xb0c   : > { %p15909_p9 = scmp.ne.s32.totalorder %s12974_s16, %s15908_s4  ;;  %p15916_p3 = scmp.lt.s32.totalorder %s15908_s4, %s15908_s4 }
 0xb0e   : > { %p15917_p6 = por %p15916_p3, %p15915_p2 }
 0xb0f   : > { %p15067_p4 = scmp.eq.s32.totalorder %s16984_s28, 2 }
 0xb11   : > { %p15910_p0 = pnand %p15909_p9, %p15067_p4 }
 0xb13   : > { %p15911_p10 = pneg %p15910_p0 }
 0xb15   : > { %p15918_p7 = pnand %p15917_p6, %p15911_p10 }
 0xb17   : > { %15921 = shalt.err (!%p15918_p7)
}
 0xb18   : > { %s16985_s13 = sld [smem:[#allocation34_spill]] }
 0xb1e   : > { %s15922_s14 = scalar_lea.hbm %s16985_s13, 256 }
 0xb1f   : > { %p15923_p11 = scmp.ne.s32.totalorder %s16985_s13, %s15922_s14  ;;  %p15928_p12 = scmp.lt.u32.totalorder %s15922_s14, %s16985_s13 }
 0xb21   : > { %p15924_p13 = pnand %p15923_p11, %p15067_p4 }
 0xb23   : > { %p15925_p1 = pneg %p15924_p13 }
 0xb25   : > { %p15930_p5 = pnand %p15928_p12, %p15925_p1 }
 0xb27   : > { %15933 = shalt.err (!%p15930_p5)
}
 0xb28   : > { %s16016_s2 = smov 128   ;;  %s16017_s25 = smov 8  }
 0xb29   : > { %15018 = dma.vmem_to_hbm [thread:$0]  (%p15067_p4), %s12974_s16, 256, %s16985_s13, [#allocation6], %s16016_s2, %s16016_s2, %s16017_s25  }
 0xb2a   : > { %15975 = dma.done.wait (%p15067_p4), [#allocation6], 256  }
 0xb2b   : > { %15977 = vsyncadd (%p15067_p4), [#allocation6], 4294967040 }
 0xb2c PF: > { %s16986_s20 = sld [smem:[#allocation30_spill]]  ;;  %s16987_s11 = sld [smem:[#allocation31_spill]] }
 0xb2d   : > { %s16988_s17 = smov %s15984_s18  ;;  %s16989_s18 = smov %s15988_s19 }
 0xb32   : > { %p27_p8 = scmp.ge.s32.totalorder %s16986_s20, 5   ;;  %s16990_s19 = smov %s16987_s11 }
 0xb34   :  { %29 = sbr.rel (!%p27_p8) target bundleno = 13 (0xd), region = 191 }
 0xb3b   :  { %12989 = vsyncpa [#allocation5], 1 }
 0xb3c   :  { %12991 = vsyncpa [#allocation5 + $0x1], 1 }
 0xb3d   :  { %12992 = vsyncpa [#allocation8], 1 }
 0xb3e   :  { %12993 = vsyncpa [#allocation11], 1 }
 0xb3f   :  { %12994 = vsyncpa [#allocation14], 1 }
 0xb40   :  { %12995 = vsyncpa [#allocation17], 1 }
 0xb41   :  { %12996 = vsyncpa [#allocation20], 1 }
 0xb42   :  { %12997 = vsyncpa [#allocation6], 1 }
 0xb43   :  { %12999 = vsyncpa [#allocation6 + $0x1], 1 }

</bundles_post_ra>
